<compile_context>
chip_gen: v7x
topology: tpu7x:2x2x1
jax: 0.10.0
libtpu: 0.0.40
codegen_flags: <defaults>
</compile_context>

<pallas_src>
import functools
import itertools

import numpy as np
import jax
import jax.numpy as jnp
from jax.experimental import pallas as pl
from jax.experimental.pallas import tpu as pltpu

NUM_KERNELS = 84
KLEN = 9
N_STATS = 4          # PPV, max_stretch (LSPV), MPV, MIPV
ROW_CHUNK = 24       # kernels processed per inner chunk (multiple of 8)
KROWS = 96           # NUM_KERNELS padded to a multiple of ROW_CHUNK

# The 84 MiniRocket kernels = all 3-subsets of the 9 taps (same order as the
# literal table in the reference).
INDICES = np.array(list(itertools.combinations(range(KLEN), 3)), dtype=np.int32)
W_NP = -np.ones((NUM_KERNELS, KLEN), dtype=np.float32)
for _k in range(NUM_KERNELS):
    W_NP[_k, INDICES[_k]] = 2.0


def _round_up(x, m):
    return ((x + m - 1) // m) * m


# ----------------------------------------------------------------------------
# Deterministic parameter setup (stands in for fit(); fit is not part of forward)
# ----------------------------------------------------------------------------
def _fit_dilations(input_length, num_features, max_dilations_per_kernel):
    num_kernels = NUM_KERNELS
    num_features_per_kernel = num_features // num_kernels
    true_max_dilations_per_kernel = min(num_features_per_kernel, max_dilations_per_kernel)
    multiplier = num_features_per_kernel / true_max_dilations_per_kernel
    max_exponent = np.log2((input_length - 1) / (9 - 1))
    dilations, num_features_per_dilation = np.unique(
        np.logspace(0, max_exponent, true_max_dilations_per_kernel, base=2).astype(np.int32),
        return_counts=True)
    num_features_per_dilation = (num_features_per_dilation * multiplier).astype(np.int32)
    remainder = num_features_per_kernel - np.sum(num_features_per_dilation)
    i = 0
    while remainder > 0:
        num_features_per_dilation[i] += 1
        remainder -= 1
        i = (i + 1) % len(num_features_per_dilation)
    return dilations, num_features_per_dilation


def _quantiles(n):
    return np.array([_ * ((np.sqrt(5) + 1) / 2) % 1 for _ in range(1, n + 1)],
                    dtype=np.float32)


def make_rocket_params(input_length, num_features, max_dilations_per_kernel, which):
    dil, nfd = _fit_dilations(input_length, num_features, max_dilations_per_kernel)
    n_bias = NUM_KERNELS * int(np.sum(nfd))
    q = _quantiles(2 * n_bias)[which * n_bias:(which + 1) * n_bias]
    # TODO(synk): fit()-time bias estimation uses np.random.randint + np.quantile on
    # training data; here biases are synthesized deterministically, snapped to the
    # grid k*0.5 + 0.25 so bias comparisons never hit floating-point ties.
    biases = (np.floor((q - 0.5) * 24.0) * 0.5 + 0.25).astype(np.float32)
    return dil.astype(np.int32), nfd.astype(np.int32), biases


def build_bias_matrix(biases, nfd, nfdm):
    nd = len(nfd)
    Bm = np.zeros((nd, NUM_KERNELS, nfdm), np.float32)
    off = 0
    for di in range(nd):
        n = int(nfd[di])
        for k in range(NUM_KERNELS):
            Bm[di, k, :n] = biases[off:off + n]
            off += n
    return Bm


# ----------------------------------------------------------------------------
# Pallas kernels
# ----------------------------------------------------------------------------
def _rocket_pool_kernel(pads_ref, par0_ref, slen_ref, half_ref,
                        xp_ref, w_ref, b_ref, o_ref, taps_ref, *,
                        lt, maxoff, nfd_max, offsets, krows, row_chunk):
    """One (example, combined-dilation) grid step.

    xp_ref  : (1, 1, LPAD) zero-padded series row (time on lanes)
    w_ref   : (KROWS, 16)  kernel weights (-1 / +2, zero padded)
    b_ref   : (1, KROWS, NFDM) biases for this dilation
    o_ref   : (1, 1, KROWS, PADL) lane-dense stats; col = stat*NFDM + f
    taps_ref: (16, LT) VMEM scratch with the 9 dilated taps (rows 9..15 zero)
    """
    d_idx = pl.program_id(1)

    # --- stage the 9 dilated taps (static lane slices of the padded row) -------
    taps_ref[...] = jnp.zeros_like(taps_ref)        # rows KLEN..15 must be 0 for the matmul
    for i in range(len(offsets)):
        offs = offsets[i]

        @pl.when(d_idx == i)
        def _(offs=offs):
            for g in range(KLEN):
                taps_ref[g:g + 1, :] = xp_ref[0, :, pl.ds(maxoff + offs[g], lt)]

    # bf16 hi/lo split once per step -> the MXU matmul keeps ~f32 accuracy
    # (exact for inputs that are multiples of 0.5, as in the demo).
    taps = taps_ref[...]
    taps_hi = taps.astype(jnp.bfloat16).astype(jnp.float32)
    taps_lo = taps - taps_hi

    # --- per-(b, d) scalars / lane constants, hoisted out of all loops ---------
    pad = pads_ref[d_idx]                            # int32 scalar (= 4*dilation)
    padf = pad.astype(jnp.float32)
    par0 = par0_ref[d_idx]                           # dilation-index parity
    slen = slen_ref[d_idx]                           # series length for this half
    slen_f = slen.astype(jnp.float32)

    t_i = jax.lax.broadcasted_iota(jnp.int32, (1, lt), 1)
    t_f = t_i.astype(jnp.float32)
    full_ok = (t_i < slen).astype(jnp.float32)                                   # (1, lt)
    crop_ok = jnp.logical_and(t_i >= pad, t_i < slen - pad).astype(jnp.float32)  # (1, lt)

    shifts = []
    s = 1
    while s < lt:
        shifts.append(s)
        s *= 2
    masks = {sh: t_i >= sh for sh in shifts}         # reused across chunks & biases

    def shift_right(y, sh):
        # shift along time (lanes) by sh, zero fill: XLU roll + select.
        return jnp.where(masks[sh], pltpu.roll(y, shift=sh, axis=1), 0.0)

    # --- row-chunked pooling: every (row_chunk, lt) temp is only ~3 vregs -------
    for r in range(krows // row_chunk):
        r0 = r * row_chunk
        rows = slice(r0, r0 + row_chunk)
        w_r = w_ref[rows, :]                                           # (rc, 16)
        c_r = (jnp.dot(w_r, taps_hi, preferred_element_type=jnp.float32)
               + jnp.dot(w_r, taps_lo, preferred_element_type=jnp.float32))  # (rc, lt)

        kidx = r0 + jax.lax.broadcasted_iota(jnp.int32, (row_chunk, 1), 0)
        par_i = (kidx + par0) & 1                                      # 1 -> pooled over C[pad:-pad]
        parf = par_i.astype(jnp.float32)
        v_r = jnp.where(par_i == 1, crop_ok, full_ok)                  # (rc, lt) validity
        j_r = t_f - padf * parf                                        # effective position index
        lf = slen_f - 2.0 * padf * parf                                # (rc, 1) effective length
        inv_lf = 1.0 / lf
        lfm1 = lf - 1.0

        for f in range(nfd_max):
            bias = b_ref[0, rows, f:f + 1]                             # (rc, 1)

            # positive-side stats first (pos dies before the stretch scan starts)
            pos = jnp.where(c_r > bias, v_r, 0.0)
            cnt = jnp.sum(pos, axis=1, keepdims=True)
            spc = jnp.sum(pos * c_r, axis=1, keepdims=True)
            mix = jnp.sum(pos * j_r, axis=1, keepdims=True)
            inv_cnt = jnp.where(cnt > 0, 1.0 / cnt, 0.0)
            o_ref[0, 0, rows, 0 * nfd_max + f:0 * nfd_max + f + 1] = cnt * inv_lf
            o_ref[0, 0, rows, 2 * nfd_max + f:2 * nfd_max + f + 1] = (spc + bias * cnt) * inv_cnt
            o_ref[0, 0, rows, 3 * nfd_max + f:3 * nfd_max + f + 1] = jnp.where(
                cnt > 0, mix * inv_cnt, -1.0)

            # longest stretch between below-bias positions: exclusive running max
            # of negj along time via an O(L log L) roll + max doubling scan.
            neg = jnp.where(c_r < bias, v_r, 0.0)
            negj = neg * j_r                                           # >= 0 everywhere
            prev = shift_right(negj, 1)                                # exclusive seed
            for sh in shifts:
                prev = jnp.maximum(prev, shift_right(prev, sh))
            ms = jnp.maximum(jnp.max(neg * (j_r - prev), axis=1, keepdims=True),
                             lfm1 - jnp.max(negj, axis=1, keepdims=True))
            o_ref[0, 0, rows, 1 * nfd_max + f:1 * nfd_max + f + 1] = ms


def rocket_transform_fused(x2d, xx, params_base, params_diff):
    """Fused base + diff MultiRocket transform.  Returns (B, 4*(nf+nf1)) features
    in the reference flat layout."""
    dil_b, nfd_b, bias_b = params_base
    dil_d, nfd_d, bias_d = params_diff
    B, L = x2d.shape
    Ld = xx.shape[1]                                 # == L - 1
    nd_b, nd_d = len(dil_b), len(dil_d)
    ndt = nd_b + nd_d
    nfdm = int(max(int(np.max(nfd_b)), int(np.max(nfd_d))))
    LT = _round_up(L, 128)                           # lane-aligned working length
    maxoff = 4 * int(max(int(np.max(dil_b)), int(np.max(dil_d))))
    LPAD = _round_up(2 * maxoff + LT, 128)
    PADL = max(128, _round_up(N_STATS * nfdm, 128))  # lane-dense output block

    # padded series rows: row 2b = base series of example b, row 2b+1 = diff series
    xp = jnp.zeros((2 * B, 1, LPAD), jnp.float32)
    xp = xp.at[0::2, 0, maxoff:maxoff + L].set(x2d)
    xp = xp.at[1::2, 0, maxoff:maxoff + Ld].set(xx)

    # per combined-dilation-index scalar tables (SMEM via scalar prefetch)
    pads = np.concatenate([4 * dil_b, 4 * dil_d]).astype(np.int32)
    par0 = np.concatenate([np.arange(nd_b) % 2, np.arange(nd_d) % 2]).astype(np.int32)
    slen = np.concatenate([np.full(nd_b, L), np.full(nd_d, Ld)]).astype(np.int32)
    half = np.concatenate([np.zeros(nd_b), np.ones(nd_d)]).astype(np.int32)

    # bias tables padded to (ndt, KROWS, nfdm)
    Bm = np.zeros((ndt, KROWS, nfdm), np.float32)
    Bm[:nd_b, :NUM_KERNELS, :] = build_bias_matrix(bias_b, nfd_b, nfdm)
    Bm[nd_b:, :NUM_KERNELS, :] = build_bias_matrix(bias_d, nfd_d, nfdm)

    # kernel weights padded to (KROWS, 16) so C = W @ taps runs on the MXU
    Wp = np.zeros((KROWS, 16), np.float32)
    Wp[:NUM_KERNELS, :KLEN] = W_NP

    # static per-dilation tap offsets; the diff half reproduces the reference's use
    # of the ORIGINAL length when shifting the left taps (intentional +1).
    offsets = []
    for d in dil_b:
        offsets.append(tuple((g - 4) * int(d) for g in range(KLEN)))
    for d in dil_d:
        offsets.append(tuple((g - 4) * int(d) + (1 if g < 4 else 0) for g in range(KLEN)))
    offsets = tuple(offsets)

    kernel = functools.partial(_rocket_pool_kernel, lt=LT, maxoff=maxoff,
                               nfd_max=nfdm, offsets=offsets, krows=KROWS,
                               row_chunk=ROW_CHUNK)
    out = pl.pallas_call(
        kernel,
        out_shape=jax.ShapeDtypeStruct((B, ndt, KROWS, PADL), jnp.float32),
        grid_spec=pltpu.PrefetchScalarGridSpec(
            num_scalar_prefetch=4,                   # pads, par0, slen, half -> SMEM
            grid=(B, ndt),
            in_specs=[
                pl.BlockSpec((1, 1, LPAD),
                             lambda b, d, pads, par0, slen, half: (2 * b + half[d], 0, 0)),
                pl.BlockSpec((KROWS, 16),
                             lambda b, d, pads, par0, slen, half: (0, 0)),
                pl.BlockSpec((1, KROWS, nfdm),
                             lambda b, d, pads, par0, slen, half: (d, 0, 0)),
            ],
            out_specs=pl.BlockSpec((1, 1, KROWS, PADL),
                                   lambda b, d, pads, par0, slen, half: (b, d, 0, 0)),
            scratch_shapes=[pltpu.VMEM((16, LT), jnp.float32)]),
        compiler_params=pltpu.CompilerParams(
            dimension_semantics=("parallel", "parallel")),   # disjoint (b, d) blocks
    )(jnp.asarray(pads), jnp.asarray(par0), jnp.asarray(slen), jnp.asarray(half),
      xp, jnp.asarray(Wp), jnp.asarray(Bm))

    # Reassemble the reference flat layout per half: four stat blocks
    # [PPV | stretch | MPV | MIPV], each ordered (dilation, kernel, feature).
    def assemble(d_offset, nfd):
        blocks = []
        for s in range(N_STATS):
            per_d = [
                out[:, d_offset + di, :NUM_KERNELS, s * nfdm:s * nfdm + int(nfd[di])]
                .reshape(B, -1)
                for di in range(len(nfd))
            ]
            blocks.append(jnp.concatenate(per_d, axis=1))
        return jnp.concatenate(blocks, axis=1)

    feat_base = assemble(0, nfd_b)
    feat_diff = assemble(nd_b, nfd_d)
    return jnp.concatenate([feat_base, feat_diff], axis=1)


def _linear_kernel(x_ref, w_ref, b_ref, o_ref):
    # ~f32 accuracy on the MXU via a manual bf16 hi/lo split (head is tiny and
    # HBM-bound, so the extra passes are free and the y check stays tight).
    x = x_ref[...]
    w = w_ref[...]
    x_hi = x.astype(jnp.bfloat16).astype(jnp.float32)
    x_lo = x - x_hi
    w_hi = w.astype(jnp.bfloat16).astype(jnp.float32)
    w_lo = w - w_hi
    acc = jnp.dot(x_hi, w_hi, preferred_element_type=jnp.float32)
    acc = acc + jnp.dot(x_hi, w_lo, preferred_element_type=jnp.float32)
    acc = acc + jnp.dot(x_lo, w_hi, preferred_element_type=jnp.float32)
    o_ref[...] = acc + b_ref[...]


def linear_head(feat, weight, bias):
    # Whole feature axis in one block: even at full scale (~50k features) the
    # operands are ~2 MB, trivially VMEM-resident on v5e/v6e/v7x.
    B, F = feat.shape
    P = weight.shape[0]
    FP = _round_up(F, 128)
    featp = jnp.zeros((B, FP), jnp.float32).at[:, :F].set(feat)
    wtp = jnp.zeros((FP, P), jnp.float32).at[:F, :].set(weight.T)
    return pl.pallas_call(
        _linear_kernel,
        out_shape=jax.ShapeDtypeStruct((B, P), jnp.float32),
        grid_spec=pltpu.PrefetchScalarGridSpec(
            num_scalar_prefetch=0,
            grid=(1,),
            in_specs=[pl.BlockSpec((B, FP), lambda i: (0, 0)),
                      pl.BlockSpec((FP, P), lambda i: (0, 0)),
                      pl.BlockSpec((1, P), lambda i: (0, 0))],
            out_specs=pl.BlockSpec((B, P), lambda i: (0, 0))),
    )(featp, wtp, bias[None, :])


def multirocket_forward(x, params_base, params_diff, weight, bias):
    x2d = x[:, :, 0].astype(jnp.float32)        # (B, L)
    xx = jnp.diff(x2d, n=1, axis=-1)            # (B, L-1) == torch.diff(x.squeeze(), 1)
    feat = rocket_transform_fused(x2d, xx, params_base, params_diff)
    feat = jnp.nan_to_num(feat)
    y = linear_head(feat, weight, bias)
    return y[:, :, None], feat                  # (B, pred_len, 1), (B, F)


# ----------------------------------------------------------------------------
# Pure-NumPy reference (faithful port of the reference transform, numba removed)
# ----------------------------------------------------------------------------
def _pool_ref(c, bias):
    n = c.shape[0]
    ppv = 0
    last_val = 0
    max_stretch = 0.0
    mean_index = 0
    mean = 0.0
    for j in range(n):
        if c[j] > bias:
            ppv += 1
            mean_index += j
            mean += c[j] + bias
        elif c[j] < bias:
            stretch = j - last_val
            if stretch > max_stretch:
                max_stretch = stretch
            last_val = j
    stretch = n - 1 - last_val
    if stretch > max_stretch:
        max_stretch = stretch
    return (ppv / n, max_stretch,
            mean / ppv if ppv > 0 else 0.0,
            mean_index / ppv if ppv > 0 else -1.0)


def _transform_half_ref(_X, input_length, dilations, nfd, biases, features,
                        example_index, base_offset, num_features_stride, series_len):
    A = -_X
    G = _X + _X + _X
    feature_index_start = 0
    for dilation_index in range(len(dilations)):
        _padding0 = dilation_index % 2
        dilation = int(dilations[dilation_index])
        padding = (KLEN - 1) * dilation // 2
        nftd = int(nfd[dilation_index])
        C_alpha = np.zeros(series_len, dtype=np.float32)
        C_alpha[:] = A
        C_gamma = np.zeros((KLEN, series_len), dtype=np.float32)
        C_gamma[KLEN // 2] = G
        start = dilation
        end = input_length - padding          # NOTE: original length (also for diff half)
        for gamma_index in range(KLEN // 2):
            C_alpha[-end:] = C_alpha[-end:] + A[:end]
            C_gamma[gamma_index, -end:] = G[:end]
            end += dilation
        for gamma_index in range(KLEN // 2 + 1, KLEN):
            C_alpha[:-start] = C_alpha[:-start] + A[start:]
            C_gamma[gamma_index, :-start] = G[start:]
            start += dilation
        for kernel_index in range(NUM_KERNELS):
            feature_index_end = feature_index_start + nftd
            _padding1 = (_padding0 + kernel_index) % 2
            i0, i1, i2 = INDICES[kernel_index]
            C = C_alpha + C_gamma[i0] + C_gamma[i1] + C_gamma[i2]
            c = C if _padding1 == 0 else C[padding:-padding]
            for fc in range(nftd):
                fi = feature_index_start + fc
                ppv, ms, mpv, mipv = _pool_ref(c, biases[fi])
                e = base_offset + fi
                features[example_index, e] = ppv
                e += num_features_stride
                features[example_index, e] = ms
                e += num_features_stride
                features[example_index, e] = mpv
                e += num_features_stride
                features[example_index, e] = mipv
            feature_index_start = feature_index_end


def transform_ref(X, X1, parameters, parameters1, n_features_per_kernel=4):
    num_examples, input_length = X.shape
    dil, nfd, biases = parameters
    dil1, nfd1, biases1 = parameters1
    nf = NUM_KERNELS * int(np.sum(nfd))
    nf1 = NUM_KERNELS * int(np.sum(nfd1))
    features = np.zeros((num_examples, (nf + nf1) * n_features_per_kernel), dtype=np.float32)
    n_per_transform = int(features.shape[1] / 2)
    for e in range(num_examples):
        _transform_half_ref(X[e], input_length, dil, nfd, biases, features, e,
                            base_offset=0, num_features_stride=nf,
                            series_len=input_length)
        _transform_half_ref(X1[e], input_length, dil1, nfd1, biases1, features, e,
                            base_offset=n_per_transform, num_features_stride=nf,
                            series_len=input_length - 1)
    return features


def forward_ref(x_np, params_base, params_diff, w_np, b_np):
    X = x_np[:, :, 0].astype(np.float32)
    XX = np.diff(X, 1).astype(np.float32)
    feats = np.nan_to_num(transform_ref(X, XX, params_base, params_diff, 4))
    y = feats @ w_np.T + b_np
    return y[:, :, None], feats


# ----------------------------------------------------------------------------
if __name__ == "__main__":
    B, L, PRED_LEN = 2, 32, 8
    NUM_FEATURES_ARG = 336          # small stand-in for the real 6250 (-> 49728-dim features)
    MAX_DIL = 32

    key = jax.random.PRNGKey(0)
    kx, kw, kb = jax.random.split(key, 3)
    # inputs quantized to multiples of 0.5 so bias comparisons are fp-reassociation proof
    x = jnp.round(jax.random.normal(kx, (B, L, 1), dtype=jnp.float32) * 4.0) / 2.0

    params_base = make_rocket_params(L, NUM_FEATURES_ARG, MAX_DIL, which=0)
    params_diff = make_rocket_params(L - 1, NUM_FEATURES_ARG, MAX_DIL, which=1)

    nf = NUM_KERNELS * int(np.sum(params_base[1]))
    nf1 = NUM_KERNELS * int(np.sum(params_diff[1]))
    F = (nf + nf1) * N_STATS        # == 2688 here (49728 at full size)

    bound = 1.0 / np.sqrt(F)
    weight = jax.random.uniform(kw, (PRED_LEN, F), minval=-bound, maxval=bound,
                                dtype=jnp.float32)
    bias = jax.random.uniform(kb, (PRED_LEN,), minval=-bound, maxval=bound,
                              dtype=jnp.float32)

    y, feat = multirocket_forward(x, params_base, params_diff, weight, bias)
    y = jax.block_until_ready(y)

    # correctness check against the NumPy port of the reference transform + linear
    y_ref, feat_ref = forward_ref(np.asarray(x), params_base, params_diff,
                                  np.asarray(weight), np.asarray(bias))
    np.testing.assert_allclose(np.asarray(feat), feat_ref, rtol=1e-5, atol=1e-3)
    # head runs with a bf16x3 operand split -> near-f32 accuracy
    np.testing.assert_allclose(np.asarray(y), y_ref, rtol=1e-3, atol=5e-3)

    print("KERNEL_OK")
</pallas_src>

<mosaic_0001>
module attributes {stable_mosaic.version = 11 : i64} {
  func.func @_rocket_pool_kernel(%arg0: i32, %arg1: i32, %arg2: memref<6xi32, #tpu.memory_space<smem>>, %arg3: memref<6xi32, #tpu.memory_space<smem>>, %arg4: memref<6xi32, #tpu.memory_space<smem>>, %arg5: memref<6xi32, #tpu.memory_space<smem>>, %arg6: memref<1x1x256xf32, #tpu.memory_space<vmem>>, %arg7: memref<96x16xf32, #tpu.memory_space<vmem>>, %arg8: memref<1x96x2xf32, #tpu.memory_space<vmem>>, %arg9: memref<1x1x96x128xf32, #tpu.memory_space<vmem>>, %arg10: memref<16x128xf32, #tpu.memory_space<vmem>>) attributes {dimension_semantics = [#tpu.dimension_semantics<parallel>, #tpu.dimension_semantics<parallel>], iteration_bounds = array<i64: 2, 6>, scalar_prefetch = 4 : i64, scratch_operands = 1 : i64, tpu.core_type = #tpu.core_type<tc>, window_params = [{transform_indices = @transform_0, window_bounds = array<i64: 1, 1, 256>}, {pipeline_mode = #tpu.pipeline_mode<synchronous>, transform_indices = @transform_1, window_bounds = array<i64: 96, 16>}, {transform_indices = @transform_2, window_bounds = array<i64: 1, 96, 2>}, {transform_indices = @transform_3, window_bounds = array<i64: 1, 1, 96, 128>}]} {
    %cst = arith.constant 0.000000e+00 : f32
    %0 = vector.broadcast %cst : f32 to vector<16x128xf32>
    %c0 = arith.constant 0 : index
    %c0_0 = arith.constant 0 : index
    %1 = vector.load %arg10[%c0, %c0_0] : memref<16x128xf32, #tpu.memory_space<vmem>>, vector<16x128xf32>
    tpu.vector_store %arg10[%c0, %c0_0], %0 {strides = array<i32>} : memref<16x128xf32, #tpu.memory_space<vmem>>, vector<16x128xf32>,
    %c0_i32 = arith.constant 0 : i32
    %2 = arith.cmpi eq, %arg1, %c0_i32 : i32
    %3 = arith.extui %2 : i1 to i32
    %c0_i32_1 = arith.constant 0 : i32
    %4 = arith.cmpi ne, %3, %c0_i32_1 : i32
    scf.if %4 {
      %c0_415 = arith.constant 0 : index
      %c0_416 = arith.constant 0 : index
      %c8 = arith.constant 8 : index
      %1008 = vector.load %arg6[%c0_415, %c0_416, %c8] : memref<1x1x256xf32, #tpu.memory_space<vmem>>, vector<1x1x128xf32>
      %1009 = vector.shape_cast %1008 : vector<1x1x128xf32> to vector<1x128xf32>
      %c0_417 = arith.constant 0 : index
      %c0_418 = arith.constant 0 : index
      %1010 = vector.load %arg10[%c0_417, %c0_418] : memref<16x128xf32, #tpu.memory_space<vmem>>, vector<1x128xf32>
      tpu.vector_store %arg10[%c0_417, %c0_418], %1009 {strides = array<i32>} : memref<16x128xf32, #tpu.memory_space<vmem>>, vector<1x128xf32>,
      %c0_419 = arith.constant 0 : index
      %c0_420 = arith.constant 0 : index
      %c9 = arith.constant 9 : index
      %1011 = vector.load %arg6[%c0_419, %c0_420, %c9] : memref<1x1x256xf32, #tpu.memory_space<vmem>>, vector<1x1x128xf32>
      %1012 = vector.shape_cast %1011 : vector<1x1x128xf32> to vector<1x128xf32>
      %c1_421 = arith.constant 1 : index
      %c0_422 = arith.constant 0 : index
      %1013 = vector.load %arg10[%c1_421, %c0_422] : memref<16x128xf32, #tpu.memory_space<vmem>>, vector<1x128xf32>
      tpu.vector_store %arg10[%c1_421, %c0_422], %1012 {strides = array<i32>} : memref<16x128xf32, #tpu.memory_space<vmem>>, vector<1x128xf32>,
      %c0_423 = arith.constant 0 : index
      %c0_424 = arith.constant 0 : index
      %c10 = arith.constant 10 : index
      %1014 = vector.load %arg6[%c0_423, %c0_424, %c10] : memref<1x1x256xf32, #tpu.memory_space<vmem>>, vector<1x1x128xf32>
      %1015 = vector.shape_cast %1014 : vector<1x1x128xf32> to vector<1x128xf32>
      %c2_425 = arith.constant 2 : index
      %c0_426 = arith.constant 0 : index
      %1016 = vector.load %arg10[%c2_425, %c0_426] : memref<16x128xf32, #tpu.memory_space<vmem>>, vector<1x128xf32>
      tpu.vector_store %arg10[%c2_425, %c0_426], %1015 {strides = array<i32>} : memref<16x128xf32, #tpu.memory_space<vmem>>, vector<1x128xf32>,
      %c0_427 = arith.constant 0 : index
      %c0_428 = arith.constant 0 : index
      %c11 = arith.constant 11 : index
      %1017 = vector.load %arg6[%c0_427, %c0_428, %c11] : memref<1x1x256xf32, #tpu.memory_space<vmem>>, vector<1x1x128xf32>
      %1018 = vector.shape_cast %1017 : vector<1x1x128xf32> to vector<1x128xf32>
      %c3_429 = arith.constant 3 : index
      %c0_430 = arith.constant 0 : index
      %1019 = vector.load %arg10[%c3_429, %c0_430] : memref<16x128xf32, #tpu.memory_space<vmem>>, vector<1x128xf32>
      tpu.vector_store %arg10[%c3_429, %c0_430], %1018 {strides = array<i32>} : memref<16x128xf32, #tpu.memory_space<vmem>>, vector<1x128xf32>,
      %c0_431 = arith.constant 0 : index
      %c0_432 = arith.constant 0 : index
      %c12 = arith.constant 12 : index
      %1020 = vector.load %arg6[%c0_431, %c0_432, %c12] : memref<1x1x256xf32, #tpu.memory_space<vmem>>, vector<1x1x128xf32>
      %1021 = vector.shape_cast %1020 : vector<1x1x128xf32> to vector<1x128xf32>
      %c4_433 = arith.constant 4 : index
      %c0_434 = arith.constant 0 : index
      %1022 = vector.load %arg10[%c4_433, %c0_434] : memref<16x128xf32, #tpu.memory_space<vmem>>, vector<1x128xf32>
      tpu.vector_store %arg10[%c4_433, %c0_434], %1021 {strides = array<i32>} : memref<16x128xf32, #tpu.memory_space<vmem>>, vector<1x128xf32>,
      %c0_435 = arith.constant 0 : index
      %c0_436 = arith.constant 0 : index
      %c13 = arith.constant 13 : index
      %1023 = vector.load %arg6[%c0_435, %c0_436, %c13] : memref<1x1x256xf32, #tpu.memory_space<vmem>>, vector<1x1x128xf32>
      %1024 = vector.shape_cast %1023 : vector<1x1x128xf32> to vector<1x128xf32>
      %c5_437 = arith.constant 5 : index
      %c0_438 = arith.constant 0 : index
      %1025 = vector.load %arg10[%c5_437, %c0_438] : memref<16x128xf32, #tpu.memory_space<vmem>>, vector<1x128xf32>
      tpu.vector_store %arg10[%c5_437, %c0_438], %1024 {strides = array<i32>} : memref<16x128xf32, #tpu.memory_space<vmem>>, vector<1x128xf32>,
      %c0_439 = arith.constant 0 : index
      %c0_440 = arith.constant 0 : index
      %c14 = arith.constant 14 : index
      %1026 = vector.load %arg6[%c0_439, %c0_440, %c14] : memref<1x1x256xf32, #tpu.memory_space<vmem>>, vector<1x1x128xf32>
      %1027 = vector.shape_cast %1026 : vector<1x1x128xf32> to vector<1x128xf32>
      %c6_441 = arith.constant 6 : index
      %c0_442 = arith.constant 0 : index
      %1028 = vector.load %arg10[%c6_441, %c0_442] : memref<16x128xf32, #tpu.memory_space<vmem>>, vector<1x128xf32>
      tpu.vector_store %arg10[%c6_441, %c0_442], %1027 {strides = array<i32>} : memref<16x128xf32, #tpu.memory_space<vmem>>, vector<1x128xf32>,
      %c0_443 = arith.constant 0 : index
      %c0_444 = arith.constant 0 : index
      %c15 = arith.constant 15 : index
      %1029 = vector.load %arg6[%c0_443, %c0_444, %c15] : memref<1x1x256xf32, #tpu.memory_space<vmem>>, vector<1x1x128xf32>
      %1030 = vector.shape_cast %1029 : vector<1x1x128xf32> to vector<1x128xf32>
      %c7_445 = arith.constant 7 : index
      %c0_446 = arith.constant 0 : index
      %1031 = vector.load %arg10[%c7_445, %c0_446] : memref<16x128xf32, #tpu.memory_space<vmem>>, vector<1x128xf32>
      tpu.vector_store %arg10[%c7_445, %c0_446], %1030 {strides = array<i32>} : memref<16x128xf32, #tpu.memory_space<vmem>>, vector<1x128xf32>,
      %c0_447 = arith.constant 0 : index
      %c0_448 = arith.constant 0 : index
      %c16 = arith.constant 16 : index
      %1032 = vector.load %arg6[%c0_447, %c0_448, %c16] : memref<1x1x256xf32, #tpu.memory_space<vmem>>, vector<1x1x128xf32>
      %1033 = vector.shape_cast %1032 : vector<1x1x128xf32> to vector<1x128xf32>
      %c8_449 = arith.constant 8 : index
      %c0_450 = arith.constant 0 : index
      %1034 = vector.load %arg10[%c8_449, %c0_450] : memref<16x128xf32, #tpu.memory_space<vmem>>, vector<1x128xf32>
      tpu.vector_store %arg10[%c8_449, %c0_450], %1033 {strides = array<i32>} : memref<16x128xf32, #tpu.memory_space<vmem>>, vector<1x128xf32>,
    } else {
    }
    %c1_i32 = arith.constant 1 : i32
    %5 = arith.cmpi eq, %arg1, %c1_i32 : i32
    %6 = arith.extui %5 : i1 to i32
    %c0_i32_2 = arith.constant 0 : i32
    %7 = arith.cmpi ne, %6, %c0_i32_2 : i32
    scf.if %7 {
      %c0_415 = arith.constant 0 : index
      %c0_416 = arith.constant 0 : index
      %c4_417 = arith.constant 4 : index
      %1008 = vector.load %arg6[%c0_415, %c0_416, %c4_417] : memref<1x1x256xf32, #tpu.memory_space<vmem>>, vector<1x1x128xf32>
      %1009 = vector.shape_cast %1008 : vector<1x1x128xf32> to vector<1x128xf32>
      %c0_418 = arith.constant 0 : index
      %c0_419 = arith.constant 0 : index
      %1010 = vector.load %arg10[%c0_418, %c0_419] : memref<16x128xf32, #tpu.memory_space<vmem>>, vector<1x128xf32>
      tpu.vector_store %arg10[%c0_418, %c0_419], %1009 {strides = array<i32>} : memref<16x128xf32, #tpu.memory_space<vmem>>, vector<1x128xf32>,
      %c0_420 = arith.constant 0 : index
      %c0_421 = arith.constant 0 : index
      %c6_422 = arith.constant 6 : index
      %1011 = vector.load %arg6[%c0_420, %c0_421, %c6_422] : memref<1x1x256xf32, #tpu.memory_space<vmem>>, vector<1x1x128xf32>
      %1012 = vector.shape_cast %1011 : vector<1x1x128xf32> to vector<1x128xf32>
      %c1_423 = arith.constant 1 : index
      %c0_424 = arith.constant 0 : index
      %1013 = vector.load %arg10[%c1_423, %c0_424] : memref<16x128xf32, #tpu.memory_space<vmem>>, vector<1x128xf32>
      tpu.vector_store %arg10[%c1_423, %c0_424], %1012 {strides = array<i32>} : memref<16x128xf32, #tpu.memory_space<vmem>>, vector<1x128xf32>,
      %c0_425 = arith.constant 0 : index
      %c0_426 = arith.constant 0 : index
      %c8 = arith.constant 8 : index
      %1014 = vector.load %arg6[%c0_425, %c0_426, %c8] : memref<1x1x256xf32, #tpu.memory_space<vmem>>, vector<1x1x128xf32>
      %1015 = vector.shape_cast %1014 : vector<1x1x128xf32> to vector<1x128xf32>
      %c2_427 = arith.constant 2 : index
      %c0_428 = arith.constant 0 : index
      %1016 = vector.load %arg10[%c2_427, %c0_428] : memref<16x128xf32, #tpu.memory_space<vmem>>, vector<1x128xf32>
      tpu.vector_store %arg10[%c2_427, %c0_428], %1015 {strides = array<i32>} : memref<16x128xf32, #tpu.memory_space<vmem>>, vector<1x128xf32>,
      %c0_429 = arith.constant 0 : index
      %c0_430 = arith.constant 0 : index
      %c10 = arith.constant 10 : index
      %1017 = vector.load %arg6[%c0_429, %c0_430, %c10] : memref<1x1x256xf32, #tpu.memory_space<vmem>>, vector<1x1x128xf32>
      %1018 = vector.shape_cast %1017 : vector<1x1x128xf32> to vector<1x128xf32>
      %c3_431 = arith.constant 3 : index
      %c0_432 = arith.constant 0 : index
      %1019 = vector.load %arg10[%c3_431, %c0_432] : memref<16x128xf32, #tpu.memory_space<vmem>>, vector<1x128xf32>
      tpu.vector_store %arg10[%c3_431, %c0_432], %1018 {strides = array<i32>} : memref<16x128xf32, #tpu.memory_space<vmem>>, vector<1x128xf32>,
      %c0_433 = arith.constant 0 : index
      %c0_434 = arith.constant 0 : index
      %c12 = arith.constant 12 : index
      %1020 = vector.load %arg6[%c0_433, %c0_434, %c12] : memref<1x1x256xf32, #tpu.memory_space<vmem>>, vector<1x1x128xf32>
      %1021 = vector.shape_cast %1020 : vector<1x1x128xf32> to vector<1x128xf32>
      %c4_435 = arith.constant 4 : index
      %c0_436 = arith.constant 0 : index
      %1022 = vector.load %arg10[%c4_435, %c0_436] : memref<16x128xf32, #tpu.memory_space<vmem>>, vector<1x128xf32>
      tpu.vector_store %arg10[%c4_435, %c0_436], %1021 {strides = array<i32>} : memref<16x128xf32, #tpu.memory_space<vmem>>, vector<1x128xf32>,
      %c0_437 = arith.constant 0 : index
      %c0_438 = arith.constant 0 : index
      %c14 = arith.constant 14 : index
      %1023 = vector.load %arg6[%c0_437, %c0_438, %c14] : memref<1x1x256xf32, #tpu.memory_space<vmem>>, vector<1x1x128xf32>
      %1024 = vector.shape_cast %1023 : vector<1x1x128xf32> to vector<1x128xf32>
      %c5_439 = arith.constant 5 : index
      %c0_440 = arith.constant 0 : index
      %1025 = vector.load %arg10[%c5_439, %c0_440] : memref<16x128xf32, #tpu.memory_space<vmem>>, vector<1x128xf32>
      tpu.vector_store %arg10[%c5_439, %c0_440], %1024 {strides = array<i32>} : memref<16x128xf32, #tpu.memory_space<vmem>>, vector<1x128xf32>,
      %c0_441 = arith.constant 0 : index
      %c0_442 = arith.constant 0 : index
      %c16 = arith.constant 16 : index
      %1026 = vector.load %arg6[%c0_441, %c0_442, %c16] : memref<1x1x256xf32, #tpu.memory_space<vmem>>, vector<1x1x128xf32>
      %1027 = vector.shape_cast %1026 : vector<1x1x128xf32> to vector<1x128xf32>
      %c6_443 = arith.constant 6 : index
      %c0_444 = arith.constant 0 : index
      %1028 = vector.load %arg10[%c6_443, %c0_444] : memref<16x128xf32, #tpu.memory_space<vmem>>, vector<1x128xf32>
      tpu.vector_store %arg10[%c6_443, %c0_444], %1027 {strides = array<i32>} : memref<16x128xf32, #tpu.memory_space<vmem>>, vector<1x128xf32>,
      %c0_445 = arith.constant 0 : index
      %c0_446 = arith.constant 0 : index
      %c18 = arith.constant 18 : index
      %1029 = vector.load %arg6[%c0_445, %c0_446, %c18] : memref<1x1x256xf32, #tpu.memory_space<vmem>>, vector<1x1x128xf32>
      %1030 = vector.shape_cast %1029 : vector<1x1x128xf32> to vector<1x128xf32>
      %c7_447 = arith.constant 7 : index
      %c0_448 = arith.constant 0 : index
      %1031 = vector.load %arg10[%c7_447, %c0_448] : memref<16x128xf32, #tpu.memory_space<vmem>>, vector<1x128xf32>
      tpu.vector_store %arg10[%c7_447, %c0_448], %1030 {strides = array<i32>} : memref<16x128xf32, #tpu.memory_space<vmem>>, vector<1x128xf32>,
      %c0_449 = arith.constant 0 : index
      %c0_450 = arith.constant 0 : index
      %c20 = arith.constant 20 : index
      %1032 = vector.load %arg6[%c0_449, %c0_450, %c20] : memref<1x1x256xf32, #tpu.memory_space<vmem>>, vector<1x1x128xf32>
      %1033 = vector.shape_cast %1032 : vector<1x1x128xf32> to vector<1x128xf32>
      %c8_451 = arith.constant 8 : index
      %c0_452 = arith.constant 0 : index
      %1034 = vector.load %arg10[%c8_451, %c0_452] : memref<16x128xf32, #tpu.memory_space<vmem>>, vector<1x128xf32>
      tpu.vector_store %arg10[%c8_451, %c0_452], %1033 {strides = array<i32>} : memref<16x128xf32, #tpu.memory_space<vmem>>, vector<1x128xf32>,
    } else {
    }
    %c2_i32 = arith.constant 2 : i32
    %8 = arith.cmpi eq, %arg1, %c2_i32 : i32
    %9 = arith.extui %8 : i1 to i32
    %c0_i32_3 = arith.constant 0 : i32
    %10 = arith.cmpi ne, %9, %c0_i32_3 : i32
    scf.if %10 {
      %c0_415 = arith.constant 0 : index
      %c0_416 = arith.constant 0 : index
      %c0_417 = arith.constant 0 : index
      %1008 = vector.load %arg6[%c0_415, %c0_416, %c0_417] : memref<1x1x256xf32, #tpu.memory_space<vmem>>, vector<1x1x128xf32>
      %1009 = vector.shape_cast %1008 : vector<1x1x128xf32> to vector<1x128xf32>
      %c0_418 = arith.constant 0 : index
      %c0_419 = arith.constant 0 : index
      %1010 = vector.load %arg10[%c0_418, %c0_419] : memref<16x128xf32, #tpu.memory_space<vmem>>, vector<1x128xf32>
      tpu.vector_store %arg10[%c0_418, %c0_419], %1009 {strides = array<i32>} : memref<16x128xf32, #tpu.memory_space<vmem>>, vector<1x128xf32>,
      %c0_420 = arith.constant 0 : index
      %c0_421 = arith.constant 0 : index
      %c3_422 = arith.constant 3 : index
      %1011 = vector.load %arg6[%c0_420, %c0_421, %c3_422] : memref<1x1x256xf32, #tpu.memory_space<vmem>>, vector<1x1x128xf32>
      %1012 = vector.shape_cast %1011 : vector<1x1x128xf32> to vector<1x128xf32>
      %c1_423 = arith.constant 1 : index
      %c0_424 = arith.constant 0 : index
      %1013 = vector.load %arg10[%c1_423, %c0_424] : memref<16x128xf32, #tpu.memory_space<vmem>>, vector<1x128xf32>
      tpu.vector_store %arg10[%c1_423, %c0_424], %1012 {strides = array<i32>} : memref<16x128xf32, #tpu.memory_space<vmem>>, vector<1x128xf32>,
      %c0_425 = arith.constant 0 : index
      %c0_426 = arith.constant 0 : index
      %c6_427 = arith.constant 6 : index
      %1014 = vector.load %arg6[%c0_425, %c0_426, %c6_427] : memref<1x1x256xf32, #tpu.memory_space<vmem>>, vector<1x1x128xf32>
      %1015 = vector.shape_cast %1014 : vector<1x1x128xf32> to vector<1x128xf32>
      %c2_428 = arith.constant 2 : index
      %c0_429 = arith.constant 0 : index
      %1016 = vector.load %arg10[%c2_428, %c0_429] : memref<16x128xf32, #tpu.memory_space<vmem>>, vector<1x128xf32>
      tpu.vector_store %arg10[%c2_428, %c0_429], %1015 {strides = array<i32>} : memref<16x128xf32, #tpu.memory_space<vmem>>, vector<1x128xf32>,
      %c0_430 = arith.constant 0 : index
      %c0_431 = arith.constant 0 : index
      %c9 = arith.constant 9 : index
      %1017 = vector.load %arg6[%c0_430, %c0_431, %c9] : memref<1x1x256xf32, #tpu.memory_space<vmem>>, vector<1x1x128xf32>
      %1018 = vector.shape_cast %1017 : vector<1x1x128xf32> to vector<1x128xf32>
      %c3_432 = arith.constant 3 : index
      %c0_433 = arith.constant 0 : index
      %1019 = vector.load %arg10[%c3_432, %c0_433] : memref<16x128xf32, #tpu.memory_space<vmem>>, vector<1x128xf32>
      tpu.vector_store %arg10[%c3_432, %c0_433], %1018 {strides = array<i32>} : memref<16x128xf32, #tpu.memory_space<vmem>>, vector<1x128xf32>,
      %c0_434 = arith.constant 0 : index
      %c0_435 = arith.constant 0 : index
      %c12 = arith.constant 12 : index
      %1020 = vector.load %arg6[%c0_434, %c0_435, %c12] : memref<1x1x256xf32, #tpu.memory_space<vmem>>, vector<1x1x128xf32>
      %1021 = vector.shape_cast %1020 : vector<1x1x128xf32> to vector<1x128xf32>
      %c4_436 = arith.constant 4 : index
      %c0_437 = arith.constant 0 : index
      %1022 = vector.load %arg10[%c4_436, %c0_437] : memref<16x128xf32, #tpu.memory_space<vmem>>, vector<1x128xf32>
      tpu.vector_store %arg10[%c4_436, %c0_437], %1021 {strides = array<i32>} : memref<16x128xf32, #tpu.memory_space<vmem>>, vector<1x128xf32>,
      %c0_438 = arith.constant 0 : index
      %c0_439 = arith.constant 0 : index
      %c15 = arith.constant 15 : index
      %1023 = vector.load %arg6[%c0_438, %c0_439, %c15] : memref<1x1x256xf32, #tpu.memory_space<vmem>>, vector<1x1x128xf32>
      %1024 = vector.shape_cast %1023 : vector<1x1x128xf32> to vector<1x128xf32>
      %c5_440 = arith.constant 5 : index
      %c0_441 = arith.constant 0 : index
      %1025 = vector.load %arg10[%c5_440, %c0_441] : memref<16x128xf32, #tpu.memory_space<vmem>>, vector<1x128xf32>
      tpu.vector_store %arg10[%c5_440, %c0_441], %1024 {strides = array<i32>} : memref<16x128xf32, #tpu.memory_space<vmem>>, vector<1x128xf32>,
      %c0_442 = arith.constant 0 : index
      %c0_443 = arith.constant 0 : index
      %c18 = arith.constant 18 : index
      %1026 = vector.load %arg6[%c0_442, %c0_443, %c18] : memref<1x1x256xf32, #tpu.memory_space<vmem>>, vector<1x1x128xf32>
      %1027 = vector.shape_cast %1026 : vector<1x1x128xf32> to vector<1x128xf32>
      %c6_444 = arith.constant 6 : index
      %c0_445 = arith.constant 0 : index
      %1028 = vector.load %arg10[%c6_444, %c0_445] : memref<16x128xf32, #tpu.memory_space<vmem>>, vector<1x128xf32>
      tpu.vector_store %arg10[%c6_444, %c0_445], %1027 {strides = array<i32>} : memref<16x128xf32, #tpu.memory_space<vmem>>, vector<1x128xf32>,
      %c0_446 = arith.constant 0 : index
      %c0_447 = arith.constant 0 : index
      %c21 = arith.constant 21 : index
      %1029 = vector.load %arg6[%c0_446, %c0_447, %c21] : memref<1x1x256xf32, #tpu.memory_space<vmem>>, vector<1x1x128xf32>
      %1030 = vector.shape_cast %1029 : vector<1x1x128xf32> to vector<1x128xf32>
      %c7_448 = arith.constant 7 : index
      %c0_449 = arith.constant 0 : index
      %1031 = vector.load %arg10[%c7_448, %c0_449] : memref<16x128xf32, #tpu.memory_space<vmem>>, vector<1x128xf32>
      tpu.vector_store %arg10[%c7_448, %c0_449], %1030 {strides = array<i32>} : memref<16x128xf32, #tpu.memory_space<vmem>>, vector<1x128xf32>,
      %c0_450 = arith.constant 0 : index
      %c0_451 = arith.constant 0 : index
      %c24_452 = arith.constant 24 : index
      %1032 = vector.load %arg6[%c0_450, %c0_451, %c24_452] : memref<1x1x256xf32, #tpu.memory_space<vmem>>, vector<1x1x128xf32>
      %1033 = vector.shape_cast %1032 : vector<1x1x128xf32> to vector<1x128xf32>
      %c8 = arith.constant 8 : index
      %c0_453 = arith.constant 0 : index
      %1034 = vector.load %arg10[%c8, %c0_453] : memref<16x128xf32, #tpu.memory_space<vmem>>, vector<1x128xf32>
      tpu.vector_store %arg10[%c8, %c0_453], %1033 {strides = array<i32>} : memref<16x128xf32, #tpu.memory_space<vmem>>, vector<1x128xf32>,
    } else {
    }
    %c3_i32 = arith.constant 3 : i32
    %11 = arith.cmpi eq, %arg1, %c3_i32 : i32
    %12 = arith.extui %11 : i1 to i32
    %c0_i32_4 = arith.constant 0 : i32
    %13 = arith.cmpi ne, %12, %c0_i32_4 : i32
    scf.if %13 {
      %c0_415 = arith.constant 0 : index
      %c0_416 = arith.constant 0 : index
      %c9 = arith.constant 9 : index
      %1008 = vector.load %arg6[%c0_415, %c0_416, %c9] : memref<1x1x256xf32, #tpu.memory_space<vmem>>, vector<1x1x128xf32>
      %1009 = vector.shape_cast %1008 : vector<1x1x128xf32> to vector<1x128xf32>
      %c0_417 = arith.constant 0 : index
      %c0_418 = arith.constant 0 : index
      %1010 = vector.load %arg10[%c0_417, %c0_418] : memref<16x128xf32, #tpu.memory_space<vmem>>, vector<1x128xf32>
      tpu.vector_store %arg10[%c0_417, %c0_418], %1009 {strides = array<i32>} : memref<16x128xf32, #tpu.memory_space<vmem>>, vector<1x128xf32>,
      %c0_419 = arith.constant 0 : index
      %c0_420 = arith.constant 0 : index
      %c10 = arith.constant 10 : index
      %1011 = vector.load %arg6[%c0_419, %c0_420, %c10] : memref<1x1x256xf32, #tpu.memory_space<vmem>>, vector<1x1x128xf32>
      %1012 = vector.shape_cast %1011 : vector<1x1x128xf32> to vector<1x128xf32>
      %c1_421 = arith.constant 1 : index
      %c0_422 = arith.constant 0 : index
      %1013 = vector.load %arg10[%c1_421, %c0_422] : memref<16x128xf32, #tpu.memory_space<vmem>>, vector<1x128xf32>
      tpu.vector_store %arg10[%c1_421, %c0_422], %1012 {strides = array<i32>} : memref<16x128xf32, #tpu.memory_space<vmem>>, vector<1x128xf32>,
      %c0_423 = arith.constant 0 : index
      %c0_424 = arith.constant 0 : index
      %c11 = arith.constant 11 : index
      %1014 = vector.load %arg6[%c0_423, %c0_424, %c11] : memref<1x1x256xf32, #tpu.memory_space<vmem>>, vector<1x1x128xf32>
      %1015 = vector.shape_cast %1014 : vector<1x1x128xf32> to vector<1x128xf32>
      %c2_425 = arith.constant 2 : index
      %c0_426 = arith.constant 0 : index
      %1016 = vector.load %arg10[%c2_425, %c0_426] : memref<16x128xf32, #tpu.memory_space<vmem>>, vector<1x128xf32>
      tpu.vector_store %arg10[%c2_425, %c0_426], %1015 {strides = array<i32>} : memref<16x128xf32, #tpu.memory_space<vmem>>, vector<1x128xf32>,
      %c0_427 = arith.constant 0 : index
      %c0_428 = arith.constant 0 : index
      %c12 = arith.constant 12 : index
      %1017 = vector.load %arg6[%c0_427, %c0_428, %c12] : memref<1x1x256xf32, #tpu.memory_space<vmem>>, vector<1x1x128xf32>
      %1018 = vector.shape_cast %1017 : vector<1x1x128xf32> to vector<1x128xf32>
      %c3_429 = arith.constant 3 : index
      %c0_430 = arith.constant 0 : index
      %1019 = vector.load %arg10[%c3_429, %c0_430] : memref<16x128xf32, #tpu.memory_space<vmem>>, vector<1x128xf32>
      tpu.vector_store %arg10[%c3_429, %c0_430], %1018 {strides = array<i32>} : memref<16x128xf32, #tpu.memory_space<vmem>>, vector<1x128xf32>,
      %c0_431 = arith.constant 0 : index
      %c0_432 = arith.constant 0 : index
      %c12_433 = arith.constant 12 : index
      %1020 = vector.load %arg6[%c0_431, %c0_432, %c12_433] : memref<1x1x256xf32, #tpu.memory_space<vmem>>, vector<1x1x128xf32>
      %1021 = vector.shape_cast %1020 : vector<1x1x128xf32> to vector<1x128xf32>
      %c4_434 = arith.constant 4 : index
      %c0_435 = arith.constant 0 : index
      %1022 = vector.load %arg10[%c4_434, %c0_435] : memref<16x128xf32, #tpu.memory_space<vmem>>, vector<1x128xf32>
      tpu.vector_store %arg10[%c4_434, %c0_435], %1021 {strides = array<i32>} : memref<16x128xf32, #tpu.memory_space<vmem>>, vector<1x128xf32>,
      %c0_436 = arith.constant 0 : index
      %c0_437 = arith.constant 0 : index
      %c13 = arith.constant 13 : index
      %1023 = vector.load %arg6[%c0_436, %c0_437, %c13] : memref<1x1x256xf32, #tpu.memory_space<vmem>>, vector<1x1x128xf32>
      %1024 = vector.shape_cast %1023 : vector<1x1x128xf32> to vector<1x128xf32>
      %c5_438 = arith.constant 5 : index
      %c0_439 = arith.constant 0 : index
      %1025 = vector.load %arg10[%c5_438, %c0_439] : memref<16x128xf32, #tpu.memory_space<vmem>>, vector<1x128xf32>
      tpu.vector_store %arg10[%c5_438, %c0_439], %1024 {strides = array<i32>} : memref<16x128xf32, #tpu.memory_space<vmem>>, vector<1x128xf32>,
      %c0_440 = arith.constant 0 : index
      %c0_441 = arith.constant 0 : index
      %c14 = arith.constant 14 : index
      %1026 = vector.load %arg6[%c0_440, %c0_441, %c14] : memref<1x1x256xf32, #tpu.memory_space<vmem>>, vector<1x1x128xf32>
      %1027 = vector.shape_cast %1026 : vector<1x1x128xf32> to vector<1x128xf32>
      %c6_442 = arith.constant 6 : index
      %c0_443 = arith.constant 0 : index
      %1028 = vector.load %arg10[%c6_442, %c0_443] : memref<16x128xf32, #tpu.memory_space<vmem>>, vector<1x128xf32>
      tpu.vector_store %arg10[%c6_442, %c0_443], %1027 {strides = array<i32>} : memref<16x128xf32, #tpu.memory_space<vmem>>, vector<1x128xf32>,
      %c0_444 = arith.constant 0 : index
      %c0_445 = arith.constant 0 : index
      %c15 = arith.constant 15 : index
      %1029 = vector.load %arg6[%c0_444, %c0_445, %c15] : memref<1x1x256xf32, #tpu.memory_space<vmem>>, vector<1x1x128xf32>
      %1030 = vector.shape_cast %1029 : vector<1x1x128xf32> to vector<1x128xf32>
      %c7_446 = arith.constant 7 : index
      %c0_447 = arith.constant 0 : index
      %1031 = vector.load %arg10[%c7_446, %c0_447] : memref<16x128xf32, #tpu.memory_space<vmem>>, vector<1x128xf32>
      tpu.vector_store %arg10[%c7_446, %c0_447], %1030 {strides = array<i32>} : memref<16x128xf32, #tpu.memory_space<vmem>>, vector<1x128xf32>,
      %c0_448 = arith.constant 0 : index
      %c0_449 = arith.constant 0 : index
      %c16 = arith.constant 16 : index
      %1032 = vector.load %arg6[%c0_448, %c0_449, %c16] : memref<1x1x256xf32, #tpu.memory_space<vmem>>, vector<1x1x128xf32>
      %1033 = vector.shape_cast %1032 : vector<1x1x128xf32> to vector<1x128xf32>
      %c8 = arith.constant 8 : index
      %c0_450 = arith.constant 0 : index
      %1034 = vector.load %arg10[%c8, %c0_450] : memref<16x128xf32, #tpu.memory_space<vmem>>, vector<1x128xf32>
      tpu.vector_store %arg10[%c8, %c0_450], %1033 {strides = array<i32>} : memref<16x128xf32, #tpu.memory_space<vmem>>, vector<1x128xf32>,
    } else {
    }
    %c4_i32 = arith.constant 4 : i32
    %14 = arith.cmpi eq, %arg1, %c4_i32 : i32
    %15 = arith.extui %14 : i1 to i32
    %c0_i32_5 = arith.constant 0 : i32
    %16 = arith.cmpi ne, %15, %c0_i32_5 : i32
    scf.if %16 {
      %c0_415 = arith.constant 0 : index
      %c0_416 = arith.constant 0 : index
      %c5_417 = arith.constant 5 : index
      %1008 = vector.load %arg6[%c0_415, %c0_416, %c5_417] : memref<1x1x256xf32, #tpu.memory_space<vmem>>, vector<1x1x128xf32>
      %1009 = vector.shape_cast %1008 : vector<1x1x128xf32> to vector<1x128xf32>
      %c0_418 = arith.constant 0 : index
      %c0_419 = arith.constant 0 : index
      %1010 = vector.load %arg10[%c0_418, %c0_419] : memref<16x128xf32, #tpu.memory_space<vmem>>, vector<1x128xf32>
      tpu.vector_store %arg10[%c0_418, %c0_419], %1009 {strides = array<i32>} : memref<16x128xf32, #tpu.memory_space<vmem>>, vector<1x128xf32>,
      %c0_420 = arith.constant 0 : index
      %c0_421 = arith.constant 0 : index
      %c7_422 = arith.constant 7 : index
      %1011 = vector.load %arg6[%c0_420, %c0_421, %c7_422] : memref<1x1x256xf32, #tpu.memory_space<vmem>>, vector<1x1x128xf32>
      %1012 = vector.shape_cast %1011 : vector<1x1x128xf32> to vector<1x128xf32>
      %c1_423 = arith.constant 1 : index
      %c0_424 = arith.constant 0 : index
      %1013 = vector.load %arg10[%c1_423, %c0_424] : memref<16x128xf32, #tpu.memory_space<vmem>>, vector<1x128xf32>
      tpu.vector_store %arg10[%c1_423, %c0_424], %1012 {strides = array<i32>} : memref<16x128xf32, #tpu.memory_space<vmem>>, vector<1x128xf32>,
      %c0_425 = arith.constant 0 : index
      %c0_426 = arith.constant 0 : index
      %c9 = arith.constant 9 : index
      %1014 = vector.load %arg6[%c0_425, %c0_426, %c9] : memref<1x1x256xf32, #tpu.memory_space<vmem>>, vector<1x1x128xf32>
      %1015 = vector.shape_cast %1014 : vector<1x1x128xf32> to vector<1x128xf32>
      %c2_427 = arith.constant 2 : index
      %c0_428 = arith.constant 0 : index
      %1016 = vector.load %arg10[%c2_427, %c0_428] : memref<16x128xf32, #tpu.memory_space<vmem>>, vector<1x128xf32>
      tpu.vector_store %arg10[%c2_427, %c0_428], %1015 {strides = array<i32>} : memref<16x128xf32, #tpu.memory_space<vmem>>, vector<1x128xf32>,
      %c0_429 = arith.constant 0 : index
      %c0_430 = arith.constant 0 : index
      %c11 = arith.constant 11 : index
      %1017 = vector.load %arg6[%c0_429, %c0_430, %c11] : memref<1x1x256xf32, #tpu.memory_space<vmem>>, vector<1x1x128xf32>
      %1018 = vector.shape_cast %1017 : vector<1x1x128xf32> to vector<1x128xf32>
      %c3_431 = arith.constant 3 : index
      %c0_432 = arith.constant 0 : index
      %1019 = vector.load %arg10[%c3_431, %c0_432] : memref<16x128xf32, #tpu.memory_space<vmem>>, vector<1x128xf32>
      tpu.vector_store %arg10[%c3_431, %c0_432], %1018 {strides = array<i32>} : memref<16x128xf32, #tpu.memory_space<vmem>>, vector<1x128xf32>,
      %c0_433 = arith.constant 0 : index
      %c0_434 = arith.constant 0 : index
      %c12 = arith.constant 12 : index
      %1020 = vector.load %arg6[%c0_433, %c0_434, %c12] : memref<1x1x256xf32, #tpu.memory_space<vmem>>, vector<1x1x128xf32>
      %1021 = vector.shape_cast %1020 : vector<1x1x128xf32> to vector<1x128xf32>
      %c4_435 = arith.constant 4 : index
      %c0_436 = arith.constant 0 : index
      %1022 = vector.load %arg10[%c4_435, %c0_436] : memref<16x128xf32, #tpu.memory_space<vmem>>, vector<1x128xf32>
      tpu.vector_store %arg10[%c4_435, %c0_436], %1021 {strides = array<i32>} : memref<16x128xf32, #tpu.memory_space<vmem>>, vector<1x128xf32>,
      %c0_437 = arith.constant 0 : index
      %c0_438 = arith.constant 0 : index
      %c14 = arith.constant 14 : index
      %1023 = vector.load %arg6[%c0_437, %c0_438, %c14] : memref<1x1x256xf32, #tpu.memory_space<vmem>>, vector<1x1x128xf32>
      %1024 = vector.shape_cast %1023 : vector<1x1x128xf32> to vector<1x128xf32>
      %c5_439 = arith.constant 5 : index
      %c0_440 = arith.constant 0 : index
      %1025 = vector.load %arg10[%c5_439, %c0_440] : memref<16x128xf32, #tpu.memory_space<vmem>>, vector<1x128xf32>
      tpu.vector_store %arg10[%c5_439, %c0_440], %1024 {strides = array<i32>} : memref<16x128xf32, #tpu.memory_space<vmem>>, vector<1x128xf32>,
      %c0_441 = arith.constant 0 : index
      %c0_442 = arith.constant 0 : index
      %c16 = arith.constant 16 : index
      %1026 = vector.load %arg6[%c0_441, %c0_442, %c16] : memref<1x1x256xf32, #tpu.memory_space<vmem>>, vector<1x1x128xf32>
      %1027 = vector.shape_cast %1026 : vector<1x1x128xf32> to vector<1x128xf32>
      %c6_443 = arith.constant 6 : index
      %c0_444 = arith.constant 0 : index
      %1028 = vector.load %arg10[%c6_443, %c0_444] : memref<16x128xf32, #tpu.memory_space<vmem>>, vector<1x128xf32>
      tpu.vector_store %arg10[%c6_443, %c0_444], %1027 {strides = array<i32>} : memref<16x128xf32, #tpu.memory_space<vmem>>, vector<1x128xf32>,
      %c0_445 = arith.constant 0 : index
      %c0_446 = arith.constant 0 : index
      %c18 = arith.constant 18 : index
      %1029 = vector.load %arg6[%c0_445, %c0_446, %c18] : memref<1x1x256xf32, #tpu.memory_space<vmem>>, vector<1x1x128xf32>
      %1030 = vector.shape_cast %1029 : vector<1x1x128xf32> to vector<1x128xf32>
      %c7_447 = arith.constant 7 : index
      %c0_448 = arith.constant 0 : index
      %1031 = vector.load %arg10[%c7_447, %c0_448] : memref<16x128xf32, #tpu.memory_space<vmem>>, vector<1x128xf32>
      tpu.vector_store %arg10[%c7_447, %c0_448], %1030 {strides = array<i32>} : memref<16x128xf32, #tpu.memory_space<vmem>>, vector<1x128xf32>,
      %c0_449 = arith.constant 0 : index
      %c0_450 = arith.constant 0 : index
      %c20 = arith.constant 20 : index
      %1032 = vector.load %arg6[%c0_449, %c0_450, %c20] : memref<1x1x256xf32, #tpu.memory_space<vmem>>, vector<1x1x128xf32>
      %1033 = vector.shape_cast %1032 : vector<1x1x128xf32> to vector<1x128xf32>
      %c8 = arith.constant 8 : index
      %c0_451 = arith.constant 0 : index
      %1034 = vector.load %arg10[%c8, %c0_451] : memref<16x128xf32, #tpu.memory_space<vmem>>, vector<1x128xf32>
      tpu.vector_store %arg10[%c8, %c0_451], %1033 {strides = array<i32>} : memref<16x128xf32, #tpu.memory_space<vmem>>, vector<1x128xf32>,
    } else {
    }
    %c5_i32 = arith.constant 5 : i32
    %17 = arith.cmpi eq, %arg1, %c5_i32 : i32
    %18 = arith.extui %17 : i1 to i32
    %c0_i32_6 = arith.constant 0 : i32
    %19 = arith.cmpi ne, %18, %c0_i32_6 : i32
    scf.if %19 {
      %c0_415 = arith.constant 0 : index
      %c0_416 = arith.constant 0 : index
      %c1_417 = arith.constant 1 : index
      %1008 = vector.load %arg6[%c0_415, %c0_416, %c1_417] : memref<1x1x256xf32, #tpu.memory_space<vmem>>, vector<1x1x128xf32>
      %1009 = vector.shape_cast %1008 : vector<1x1x128xf32> to vector<1x128xf32>
      %c0_418 = arith.constant 0 : index
      %c0_419 = arith.constant 0 : index
      %1010 = vector.load %arg10[%c0_418, %c0_419] : memref<16x128xf32, #tpu.memory_space<vmem>>, vector<1x128xf32>
      tpu.vector_store %arg10[%c0_418, %c0_419], %1009 {strides = array<i32>} : memref<16x128xf32, #tpu.memory_space<vmem>>, vector<1x128xf32>,
      %c0_420 = arith.constant 0 : index
      %c0_421 = arith.constant 0 : index
      %c4_422 = arith.constant 4 : index
      %1011 = vector.load %arg6[%c0_420, %c0_421, %c4_422] : memref<1x1x256xf32, #tpu.memory_space<vmem>>, vector<1x1x128xf32>
      %1012 = vector.shape_cast %1011 : vector<1x1x128xf32> to vector<1x128xf32>
      %c1_423 = arith.constant 1 : index
      %c0_424 = arith.constant 0 : index
      %1013 = vector.load %arg10[%c1_423, %c0_424] : memref<16x128xf32, #tpu.memory_space<vmem>>, vector<1x128xf32>
      tpu.vector_store %arg10[%c1_423, %c0_424], %1012 {strides = array<i32>} : memref<16x128xf32, #tpu.memory_space<vmem>>, vector<1x128xf32>,
      %c0_425 = arith.constant 0 : index
      %c0_426 = arith.constant 0 : index
      %c7_427 = arith.constant 7 : index
      %1014 = vector.load %arg6[%c0_425, %c0_426, %c7_427] : memref<1x1x256xf32, #tpu.memory_space<vmem>>, vector<1x1x128xf32>
      %1015 = vector.shape_cast %1014 : vector<1x1x128xf32> to vector<1x128xf32>
      %c2_428 = arith.constant 2 : index
      %c0_429 = arith.constant 0 : index
      %1016 = vector.load %arg10[%c2_428, %c0_429] : memref<16x128xf32, #tpu.memory_space<vmem>>, vector<1x128xf32>
      tpu.vector_store %arg10[%c2_428, %c0_429], %1015 {strides = array<i32>} : memref<16x128xf32, #tpu.memory_space<vmem>>, vector<1x128xf32>,
      %c0_430 = arith.constant 0 : index
      %c0_431 = arith.constant 0 : index
      %c10 = arith.constant 10 : index
      %1017 = vector.load %arg6[%c0_430, %c0_431, %c10] : memref<1x1x256xf32, #tpu.memory_space<vmem>>, vector<1x1x128xf32>
      %1018 = vector.shape_cast %1017 : vector<1x1x128xf32> to vector<1x128xf32>
      %c3_432 = arith.constant 3 : index
      %c0_433 = arith.constant 0 : index
      %1019 = vector.load %arg10[%c3_432, %c0_433] : memref<16x128xf32, #tpu.memory_space<vmem>>, vector<1x128xf32>
      tpu.vector_store %arg10[%c3_432, %c0_433], %1018 {strides = array<i32>} : memref<16x128xf32, #tpu.memory_space<vmem>>, vector<1x128xf32>,
      %c0_434 = arith.constant 0 : index
      %c0_435 = arith.constant 0 : index
      %c12 = arith.constant 12 : index
      %1020 = vector.load %arg6[%c0_434, %c0_435, %c12] : memref<1x1x256xf32, #tpu.memory_space<vmem>>, vector<1x1x128xf32>
      %1021 = vector.shape_cast %1020 : vector<1x1x128xf32> to vector<1x128xf32>
      %c4_436 = arith.constant 4 : index
      %c0_437 = arith.constant 0 : index
      %1022 = vector.load %arg10[%c4_436, %c0_437] : memref<16x128xf32, #tpu.memory_space<vmem>>, vector<1x128xf32>
      tpu.vector_store %arg10[%c4_436, %c0_437], %1021 {strides = array<i32>} : memref<16x128xf32, #tpu.memory_space<vmem>>, vector<1x128xf32>,
      %c0_438 = arith.constant 0 : index
      %c0_439 = arith.constant 0 : index
      %c15 = arith.constant 15 : index
      %1023 = vector.load %arg6[%c0_438, %c0_439, %c15] : memref<1x1x256xf32, #tpu.memory_space<vmem>>, vector<1x1x128xf32>
      %1024 = vector.shape_cast %1023 : vector<1x1x128xf32> to vector<1x128xf32>
      %c5_440 = arith.constant 5 : index
      %c0_441 = arith.constant 0 : index
      %1025 = vector.load %arg10[%c5_440, %c0_441] : memref<16x128xf32, #tpu.memory_space<vmem>>, vector<1x128xf32>
      tpu.vector_store %arg10[%c5_440, %c0_441], %1024 {strides = array<i32>} : memref<16x128xf32, #tpu.memory_space<vmem>>, vector<1x128xf32>,
      %c0_442 = arith.constant 0 : index
      %c0_443 = arith.constant 0 : index
      %c18 = arith.constant 18 : index
      %1026 = vector.load %arg6[%c0_442, %c0_443, %c18] : memref<1x1x256xf32, #tpu.memory_space<vmem>>, vector<1x1x128xf32>
      %1027 = vector.shape_cast %1026 : vector<1x1x128xf32> to vector<1x128xf32>
      %c6_444 = arith.constant 6 : index
      %c0_445 = arith.constant 0 : index
      %1028 = vector.load %arg10[%c6_444, %c0_445] : memref<16x128xf32, #tpu.memory_space<vmem>>, vector<1x128xf32>
      tpu.vector_store %arg10[%c6_444, %c0_445], %1027 {strides = array<i32>} : memref<16x128xf32, #tpu.memory_space<vmem>>, vector<1x128xf32>,
      %c0_446 = arith.constant 0 : index
      %c0_447 = arith.constant 0 : index
      %c21 = arith.constant 21 : index
      %1029 = vector.load %arg6[%c0_446, %c0_447, %c21] : memref<1x1x256xf32, #tpu.memory_space<vmem>>, vector<1x1x128xf32>
      %1030 = vector.shape_cast %1029 : vector<1x1x128xf32> to vector<1x128xf32>
      %c7_448 = arith.constant 7 : index
      %c0_449 = arith.constant 0 : index
      %1031 = vector.load %arg10[%c7_448, %c0_449] : memref<16x128xf32, #tpu.memory_space<vmem>>, vector<1x128xf32>
      tpu.vector_store %arg10[%c7_448, %c0_449], %1030 {strides = array<i32>} : memref<16x128xf32, #tpu.memory_space<vmem>>, vector<1x128xf32>,
      %c0_450 = arith.constant 0 : index
      %c0_451 = arith.constant 0 : index
      %c24_452 = arith.constant 24 : index
      %1032 = vector.load %arg6[%c0_450, %c0_451, %c24_452] : memref<1x1x256xf32, #tpu.memory_space<vmem>>, vector<1x1x128xf32>
      %1033 = vector.shape_cast %1032 : vector<1x1x128xf32> to vector<1x128xf32>
      %c8 = arith.constant 8 : index
      %c0_453 = arith.constant 0 : index
      %1034 = vector.load %arg10[%c8, %c0_453] : memref<16x128xf32, #tpu.memory_space<vmem>>, vector<1x128xf32>
      tpu.vector_store %arg10[%c8, %c0_453], %1033 {strides = array<i32>} : memref<16x128xf32, #tpu.memory_space<vmem>>, vector<1x128xf32>,
    } else {
    }
    %c0_7 = arith.constant 0 : index
    %c0_8 = arith.constant 0 : index
    %20 = vector.load %arg10[%c0_7, %c0_8] : memref<16x128xf32, #tpu.memory_space<vmem>>, vector<16x128xf32>
    %21 = arith.truncf %20 : vector<16x128xf32> to vector<16x128xbf16>
    %22 = arith.extf %21 : vector<16x128xbf16> to vector<16x128xf32>
    %23 = arith.subf %20, %22 : vector<16x128xf32>
    %24 = arith.index_cast %arg1 : i32 to index
    %25 = memref.load %arg2[%24] : memref<6xi32, #tpu.memory_space<smem>>
    %26 = arith.sitofp %25 : i32 to f32
    %27 = arith.index_cast %arg1 : i32 to index
    %28 = memref.load %arg3[%27] : memref<6xi32, #tpu.memory_space<smem>>
    %29 = arith.index_cast %arg1 : i32 to index
    %30 = memref.load %arg4[%29] : memref<6xi32, #tpu.memory_space<smem>>
    %31 = arith.sitofp %30 : i32 to f32
    %32 = tpu.iota {dimensions = array<i32: 1>} : vector<1x128xi32>
    %33 = arith.sitofp %32 : vector<1x128xi32> to vector<1x128xf32>
    %34 = vector.broadcast %30 : i32 to vector<1x128xi32>
    %35 = arith.cmpi slt, %32, %34 : vector<1x128xi32>
    %36 = arith.extui %35 : vector<1x128xi1> to vector<1x128xi32>
    %37 = arith.sitofp %36 : vector<1x128xi32> to vector<1x128xf32>
    %38 = vector.broadcast %25 : i32 to vector<1x128xi32>
    %39 = arith.cmpi sge, %32, %38 : vector<1x128xi32>
    %40 = arith.subi %30, %25 : i32
    %41 = vector.broadcast %40 : i32 to vector<1x128xi32>
    %42 = arith.cmpi slt, %32, %41 : vector<1x128xi32>
    %43 = arith.andi %39, %42 : vector<1x128xi1>
    %44 = arith.extui %43 : vector<1x128xi1> to vector<1x128xi32>
    %45 = arith.sitofp %44 : vector<1x128xi32> to vector<1x128xf32>
    %c1_i32_9 = arith.constant 1 : i32
    %46 = vector.broadcast %c1_i32_9 : i32 to vector<1x128xi32>
    %47 = arith.cmpi sge, %32, %46 : vector<1x128xi32>
    %c2_i32_10 = arith.constant 2 : i32
    %48 = vector.broadcast %c2_i32_10 : i32 to vector<1x128xi32>
    %49 = arith.cmpi sge, %32, %48 : vector<1x128xi32>
    %c4_i32_11 = arith.constant 4 : i32
    %50 = vector.broadcast %c4_i32_11 : i32 to vector<1x128xi32>
    %51 = arith.cmpi sge, %32, %50 : vector<1x128xi32>
    %c8_i32 = arith.constant 8 : i32
    %52 = vector.broadcast %c8_i32 : i32 to vector<1x128xi32>
    %53 = arith.cmpi sge, %32, %52 : vector<1x128xi32>
    %c16_i32 = arith.constant 16 : i32
    %54 = vector.broadcast %c16_i32 : i32 to vector<1x128xi32>
    %55 = arith.cmpi sge, %32, %54 : vector<1x128xi32>
    %c32_i32 = arith.constant 32 : i32
    %56 = vector.broadcast %c32_i32 : i32 to vector<1x128xi32>
    %57 = arith.cmpi sge, %32, %56 : vector<1x128xi32>
    %c64_i32 = arith.constant 64 : i32
    %58 = vector.broadcast %c64_i32 : i32 to vector<1x128xi32>
    %59 = arith.cmpi sge, %32, %58 : vector<1x128xi32>
    %c0_12 = arith.constant 0 : index
    %c0_13 = arith.constant 0 : index
    %60 = vector.load %arg7[%c0_12, %c0_13] : memref<96x16xf32, #tpu.memory_space<vmem>>, vector<24x16xf32>
    %cst_14 = arith.constant dense<0.000000e+00> : vector<24x128xf32>
    %61 = tpu.matmul %60, %22, %cst_14 {dimension_numbers = #tpu.dot_dimension_numbers<[1], [0], [0], [1], [0, 0, 1, 1], [], []>} : vector<24x16xf32>, vector<16x128xf32>, vector<24x128xf32> -> vector<24x128xf32>
    %cst_15 = arith.constant dense<0.000000e+00> : vector<24x128xf32>
    %62 = tpu.matmul %60, %23, %cst_15 {dimension_numbers = #tpu.dot_dimension_numbers<[1], [0], [0], [1], [0, 0, 1, 1], [], []>} : vector<24x16xf32>, vector<16x128xf32>, vector<24x128xf32> -> vector<24x128xf32>
    %63 = arith.addf %61, %62 : vector<24x128xf32>
    %64 = tpu.iota {dimensions = array<i32: 0>} : vector<24x1xi32>
    %c0_i32_16 = arith.constant 0 : i32
    %65 = vector.broadcast %c0_i32_16 : i32 to vector<24x1xi32>
    %66 = arith.addi %65, %64 : vector<24x1xi32>
    %67 = vector.broadcast %28 : i32 to vector<24x1xi32>
    %68 = arith.addi %66, %67 : vector<24x1xi32>
    %c1_i32_17 = arith.constant 1 : i32
    %69 = vector.broadcast %c1_i32_17 : i32 to vector<24x1xi32>
    %70 = arith.andi %68, %69 : vector<24x1xi32>
    %71 = arith.sitofp %70 : vector<24x1xi32> to vector<24x1xf32>
    %c1_i32_18 = arith.constant 1 : i32
    %72 = vector.broadcast %c1_i32_18 : i32 to vector<24x1xi32>
    %73 = arith.cmpi eq, %70, %72 : vector<24x1xi32>
    %74 = vector.shape_cast %73 : vector<24x1xi1> to vector<24x1xi1>
    %75 = vector.broadcast %74 : vector<24x1xi1> to vector<24x128xi1>
    %76 = vector.shape_cast %45 : vector<1x128xf32> to vector<1x128xf32>
    %77 = vector.broadcast %76 : vector<1x128xf32> to vector<24x128xf32>
    %78 = vector.shape_cast %37 : vector<1x128xf32> to vector<1x128xf32>
    %79 = vector.broadcast %78 : vector<1x128xf32> to vector<24x128xf32>
    %80 = arith.select %75, %77, %79 : vector<24x128xi1>, vector<24x128xf32>
    %81 = vector.broadcast %26 : f32 to vector<24x1xf32>
    %82 = arith.mulf %81, %71 : vector<24x1xf32>
    %83 = vector.broadcast %33 : vector<1x128xf32> to vector<24x128xf32>
    %84 = vector.broadcast %82 : vector<24x1xf32> to vector<24x128xf32>
    %85 = arith.subf %83, %84 : vector<24x128xf32>
    %cst_19 = arith.constant 2.000000e+00 : f32
    %86 = arith.mulf %cst_19, %26 : f32
    %87 = vector.broadcast %86 : f32 to vector<24x1xf32>
    %88 = arith.mulf %87, %71 : vector<24x1xf32>
    %89 = vector.broadcast %31 : f32 to vector<24x1xf32>
    %90 = arith.subf %89, %88 : vector<24x1xf32>
    %cst_20 = arith.constant 1.000000e+00 : f32
    %91 = vector.broadcast %cst_20 : f32 to vector<24x1xf32>
    %92 = arith.divf %91, %90 : vector<24x1xf32>
    %cst_21 = arith.constant 1.000000e+00 : f32
    %93 = vector.broadcast %cst_21 : f32 to vector<24x1xf32>
    %94 = arith.subf %90, %93 : vector<24x1xf32>
    %c0_22 = arith.constant 0 : index
    %c0_23 = arith.constant 0 : index
    %c0_24 = arith.constant 0 : index
    %95 = vector.load %arg8[%c0_22, %c0_23, %c0_24] : memref<1x96x2xf32, #tpu.memory_space<vmem>>, vector<1x24x1xf32>
    %96 = vector.shape_cast %95 : vector<1x24x1xf32> to vector<24x1xf32>
    %97 = vector.broadcast %96 : vector<24x1xf32> to vector<24x128xf32>
    %98 = arith.cmpf ogt, %63, %97 : vector<24x128xf32>
    %cst_25 = arith.constant 0.000000e+00 : f32
    %99 = vector.broadcast %cst_25 : f32 to vector<24x128xf32>
    %100 = arith.select %98, %80, %99 : vector<24x128xi1>, vector<24x128xf32>
    %cst_26 = arith.constant dense<0.000000e+00> : vector<24xf32>
    %101 = vector.multi_reduction <add>, %100, %cst_26 [1] : vector<24x128xf32> to vector<24xf32>
    %102 = vector.shape_cast %101 : vector<24xf32> to vector<24x1xf32>
    %103 = arith.mulf %100, %63 : vector<24x128xf32>
    %cst_27 = arith.constant dense<0.000000e+00> : vector<24xf32>
    %104 = vector.multi_reduction <add>, %103, %cst_27 [1] : vector<24x128xf32> to vector<24xf32>
    %105 = vector.shape_cast %104 : vector<24xf32> to vector<24x1xf32>
    %106 = arith.mulf %100, %85 : vector<24x128xf32>
    %cst_28 = arith.constant dense<0.000000e+00> : vector<24xf32>
    %107 = vector.multi_reduction <add>, %106, %cst_28 [1] : vector<24x128xf32> to vector<24xf32>
    %108 = vector.shape_cast %107 : vector<24xf32> to vector<24x1xf32>
    %cst_29 = arith.constant 0.000000e+00 : f32
    %109 = vector.broadcast %cst_29 : f32 to vector<24x1xf32>
    %110 = arith.cmpf ogt, %102, %109 : vector<24x1xf32>
    %cst_30 = arith.constant 1.000000e+00 : f32
    %111 = vector.broadcast %cst_30 : f32 to vector<24x1xf32>
    %112 = arith.divf %111, %102 : vector<24x1xf32>
    %cst_31 = arith.constant 0.000000e+00 : f32
    %113 = vector.broadcast %cst_31 : f32 to vector<24x1xf32>
    %114 = arith.select %110, %112, %113 : vector<24x1xi1>, vector<24x1xf32>
    %115 = arith.mulf %102, %92 : vector<24x1xf32>
    %c0_32 = arith.constant 0 : index
    %c0_33 = arith.constant 0 : index
    %c0_34 = arith.constant 0 : index
    %c0_35 = arith.constant 0 : index
    %116 = vector.load %arg9[%c0_32, %c0_33, %c0_34, %c0_35] : memref<1x1x96x128xf32, #tpu.memory_space<vmem>>, vector<1x1x24x1xf32>
    %117 = vector.shape_cast %116 : vector<1x1x24x1xf32> to vector<24x1xf32>
    %118 = vector.shape_cast %115 : vector<24x1xf32> to vector<1x1x24x1xf32>
    tpu.vector_store %arg9[%c0_32, %c0_33, %c0_34, %c0_35], %118 {strides = array<i32>} : memref<1x1x96x128xf32, #tpu.memory_space<vmem>>, vector<1x1x24x1xf32>,
    %119 = arith.mulf %96, %102 : vector<24x1xf32>
    %120 = arith.addf %105, %119 : vector<24x1xf32>
    %121 = arith.mulf %120, %114 : vector<24x1xf32>
    %c0_36 = arith.constant 0 : index
    %c0_37 = arith.constant 0 : index
    %c0_38 = arith.constant 0 : index
    %c4 = arith.constant 4 : index
    %122 = vector.load %arg9[%c0_36, %c0_37, %c0_38, %c4] : memref<1x1x96x128xf32, #tpu.memory_space<vmem>>, vector<1x1x24x1xf32>
    %123 = vector.shape_cast %122 : vector<1x1x24x1xf32> to vector<24x1xf32>
    %124 = vector.shape_cast %121 : vector<24x1xf32> to vector<1x1x24x1xf32>
    tpu.vector_store %arg9[%c0_36, %c0_37, %c0_38, %c4], %124 {strides = array<i32>} : memref<1x1x96x128xf32, #tpu.memory_space<vmem>>, vector<1x1x24x1xf32>,
    %cst_39 = arith.constant 0.000000e+00 : f32
    %125 = vector.broadcast %cst_39 : f32 to vector<24x1xf32>
    %126 = arith.cmpf ogt, %102, %125 : vector<24x1xf32>
    %127 = arith.mulf %108, %114 : vector<24x1xf32>
    %cst_40 = arith.constant -1.000000e+00 : f32
    %128 = vector.broadcast %cst_40 : f32 to vector<24x1xf32>
    %129 = arith.select %126, %127, %128 : vector<24x1xi1>, vector<24x1xf32>
    %c0_41 = arith.constant 0 : index
    %c0_42 = arith.constant 0 : index
    %c0_43 = arith.constant 0 : index
    %c6 = arith.constant 6 : index
    %130 = vector.load %arg9[%c0_41, %c0_42, %c0_43, %c6] : memref<1x1x96x128xf32, #tpu.memory_space<vmem>>, vector<1x1x24x1xf32>
    %131 = vector.shape_cast %130 : vector<1x1x24x1xf32> to vector<24x1xf32>
    %132 = vector.shape_cast %129 : vector<24x1xf32> to vector<1x1x24x1xf32>
    tpu.vector_store %arg9[%c0_41, %c0_42, %c0_43, %c6], %132 {strides = array<i32>} : memref<1x1x96x128xf32, #tpu.memory_space<vmem>>, vector<1x1x24x1xf32>,
    %133 = vector.broadcast %96 : vector<24x1xf32> to vector<24x128xf32>
    %134 = arith.cmpf olt, %63, %133 : vector<24x128xf32>
    %cst_44 = arith.constant 0.000000e+00 : f32
    %135 = vector.broadcast %cst_44 : f32 to vector<24x128xf32>
    %136 = arith.select %134, %80, %135 : vector<24x128xi1>, vector<24x128xf32>
    %137 = arith.mulf %136, %85 : vector<24x128xf32>
    %c1_i32_45 = arith.constant 1 : i32
    %138 = tpu.dynamic_rotate %137 by %c1_i32_45 dim 1 : vector<24x128xf32>, i32 -> vector<24x128xf32>
    %cst_46 = arith.constant 0.000000e+00 : f32
    %139 = vector.shape_cast %47 : vector<1x128xi1> to vector<1x128xi1>
    %140 = vector.broadcast %139 : vector<1x128xi1> to vector<24x128xi1>
    %141 = vector.broadcast %cst_46 : f32 to vector<24x128xf32>
    %142 = arith.select %140, %138, %141 : vector<24x128xi1>, vector<24x128xf32>
    %c1_i32_47 = arith.constant 1 : i32
    %143 = tpu.dynamic_rotate %142 by %c1_i32_47 dim 1 : vector<24x128xf32>, i32 -> vector<24x128xf32>
    %cst_48 = arith.constant 0.000000e+00 : f32
    %144 = vector.shape_cast %47 : vector<1x128xi1> to vector<1x128xi1>
    %145 = vector.broadcast %144 : vector<1x128xi1> to vector<24x128xi1>
    %146 = vector.broadcast %cst_48 : f32 to vector<24x128xf32>
    %147 = arith.select %145, %143, %146 : vector<24x128xi1>, vector<24x128xf32>
    %148 = arith.maximumf %142, %147 : vector<24x128xf32>
    %c2_i32_49 = arith.constant 2 : i32
    %149 = tpu.dynamic_rotate %148 by %c2_i32_49 dim 1 : vector<24x128xf32>, i32 -> vector<24x128xf32>
    %cst_50 = arith.constant 0.000000e+00 : f32
    %150 = vector.shape_cast %49 : vector<1x128xi1> to vector<1x128xi1>
    %151 = vector.broadcast %150 : vector<1x128xi1> to vector<24x128xi1>
    %152 = vector.broadcast %cst_50 : f32 to vector<24x128xf32>
    %153 = arith.select %151, %149, %152 : vector<24x128xi1>, vector<24x128xf32>
    %154 = arith.maximumf %148, %153 : vector<24x128xf32>
    %c4_i32_51 = arith.constant 4 : i32
    %155 = tpu.dynamic_rotate %154 by %c4_i32_51 dim 1 : vector<24x128xf32>, i32 -> vector<24x128xf32>
    %cst_52 = arith.constant 0.000000e+00 : f32
    %156 = vector.shape_cast %51 : vector<1x128xi1> to vector<1x128xi1>
    %157 = vector.broadcast %156 : vector<1x128xi1> to vector<24x128xi1>
    %158 = vector.broadcast %cst_52 : f32 to vector<24x128xf32>
    %159 = arith.select %157, %155, %158 : vector<24x128xi1>, vector<24x128xf32>
    %160 = arith.maximumf %154, %159 : vector<24x128xf32>
    %c8_i32_53 = arith.constant 8 : i32
    %161 = tpu.dynamic_rotate %160 by %c8_i32_53 dim 1 : vector<24x128xf32>, i32 -> vector<24x128xf32>
    %cst_54 = arith.constant 0.000000e+00 : f32
    %162 = vector.shape_cast %53 : vector<1x128xi1> to vector<1x128xi1>
    %163 = vector.broadcast %162 : vector<1x128xi1> to vector<24x128xi1>
    %164 = vector.broadcast %cst_54 : f32 to vector<24x128xf32>
    %165 = arith.select %163, %161, %164 : vector<24x128xi1>, vector<24x128xf32>
    %166 = arith.maximumf %160, %165 : vector<24x128xf32>
    %c16_i32_55 = arith.constant 16 : i32
    %167 = tpu.dynamic_rotate %166 by %c16_i32_55 dim 1 : vector<24x128xf32>, i32 -> vector<24x128xf32>
    %cst_56 = arith.constant 0.000000e+00 : f32
    %168 = vector.shape_cast %55 : vector<1x128xi1> to vector<1x128xi1>
    %169 = vector.broadcast %168 : vector<1x128xi1> to vector<24x128xi1>
    %170 = vector.broadcast %cst_56 : f32 to vector<24x128xf32>
    %171 = arith.select %169, %167, %170 : vector<24x128xi1>, vector<24x128xf32>
    %172 = arith.maximumf %166, %171 : vector<24x128xf32>
    %c32_i32_57 = arith.constant 32 : i32
    %173 = tpu.dynamic_rotate %172 by %c32_i32_57 dim 1 : vector<24x128xf32>, i32 -> vector<24x128xf32>
    %cst_58 = arith.constant 0.000000e+00 : f32
    %174 = vector.shape_cast %57 : vector<1x128xi1> to vector<1x128xi1>
    %175 = vector.broadcast %174 : vector<1x128xi1> to vector<24x128xi1>
    %176 = vector.broadcast %cst_58 : f32 to vector<24x128xf32>
    %177 = arith.select %175, %173, %176 : vector<24x128xi1>, vector<24x128xf32>
    %178 = arith.maximumf %172, %177 : vector<24x128xf32>
    %c64_i32_59 = arith.constant 64 : i32
    %179 = tpu.dynamic_rotate %178 by %c64_i32_59 dim 1 : vector<24x128xf32>, i32 -> vector<24x128xf32>
    %cst_60 = arith.constant 0.000000e+00 : f32
    %180 = vector.shape_cast %59 : vector<1x128xi1> to vector<1x128xi1>
    %181 = vector.broadcast %180 : vector<1x128xi1> to vector<24x128xi1>
    %182 = vector.broadcast %cst_60 : f32 to vector<24x128xf32>
    %183 = arith.select %181, %179, %182 : vector<24x128xi1>, vector<24x128xf32>
    %184 = arith.maximumf %178, %183 : vector<24x128xf32>
    %185 = arith.subf %85, %184 : vector<24x128xf32>
    %186 = arith.mulf %136, %185 : vector<24x128xf32>
    %cst_61 = arith.constant dense<0xFF800000> : vector<24xf32>
    %187 = vector.multi_reduction <maximumf>, %186, %cst_61 [1] : vector<24x128xf32> to vector<24xf32>
    %188 = vector.shape_cast %187 : vector<24xf32> to vector<24x1xf32>
    %cst_62 = arith.constant dense<0xFF800000> : vector<24xf32>
    %189 = vector.multi_reduction <maximumf>, %137, %cst_62 [1] : vector<24x128xf32> to vector<24xf32>
    %190 = vector.shape_cast %189 : vector<24xf32> to vector<24x1xf32>
    %191 = arith.subf %94, %190 : vector<24x1xf32>
    %192 = arith.maximumf %188, %191 : vector<24x1xf32>
    %c0_63 = arith.constant 0 : index
    %c0_64 = arith.constant 0 : index
    %c0_65 = arith.constant 0 : index
    %c2 = arith.constant 2 : index
    %193 = vector.load %arg9[%c0_63, %c0_64, %c0_65, %c2] : memref<1x1x96x128xf32, #tpu.memory_space<vmem>>, vector<1x1x24x1xf32>
    %194 = vector.shape_cast %193 : vector<1x1x24x1xf32> to vector<24x1xf32>
    %195 = vector.shape_cast %192 : vector<24x1xf32> to vector<1x1x24x1xf32>
    tpu.vector_store %arg9[%c0_63, %c0_64, %c0_65, %c2], %195 {strides = array<i32>} : memref<1x1x96x128xf32, #tpu.memory_space<vmem>>, vector<1x1x24x1xf32>,
    %c0_66 = arith.constant 0 : index
    %c0_67 = arith.constant 0 : index
    %c1 = arith.constant 1 : index
    %196 = vector.load %arg8[%c0_66, %c0_67, %c1] : memref<1x96x2xf32, #tpu.memory_space<vmem>>, vector<1x24x1xf32>
    %197 = vector.shape_cast %196 : vector<1x24x1xf32> to vector<24x1xf32>
    %198 = vector.broadcast %197 : vector<24x1xf32> to vector<24x128xf32>
    %199 = arith.cmpf ogt, %63, %198 : vector<24x128xf32>
    %cst_68 = arith.constant 0.000000e+00 : f32
    %200 = vector.broadcast %cst_68 : f32 to vector<24x128xf32>
    %201 = arith.select %199, %80, %200 : vector<24x128xi1>, vector<24x128xf32>
    %cst_69 = arith.constant dense<0.000000e+00> : vector<24xf32>
    %202 = vector.multi_reduction <add>, %201, %cst_69 [1] : vector<24x128xf32> to vector<24xf32>
    %203 = vector.shape_cast %202 : vector<24xf32> to vector<24x1xf32>
    %204 = arith.mulf %201, %63 : vector<24x128xf32>
    %cst_70 = arith.constant dense<0.000000e+00> : vector<24xf32>
    %205 = vector.multi_reduction <add>, %204, %cst_70 [1] : vector<24x128xf32> to vector<24xf32>
    %206 = vector.shape_cast %205 : vector<24xf32> to vector<24x1xf32>
    %207 = arith.mulf %201, %85 : vector<24x128xf32>
    %cst_71 = arith.constant dense<0.000000e+00> : vector<24xf32>
    %208 = vector.multi_reduction <add>, %207, %cst_71 [1] : vector<24x128xf32> to vector<24xf32>
    %209 = vector.shape_cast %208 : vector<24xf32> to vector<24x1xf32>
    %cst_72 = arith.constant 0.000000e+00 : f32
    %210 = vector.broadcast %cst_72 : f32 to vector<24x1xf32>
    %211 = arith.cmpf ogt, %203, %210 : vector<24x1xf32>
    %cst_73 = arith.constant 1.000000e+00 : f32
    %212 = vector.broadcast %cst_73 : f32 to vector<24x1xf32>
    %213 = arith.divf %212, %203 : vector<24x1xf32>
    %cst_74 = arith.constant 0.000000e+00 : f32
    %214 = vector.broadcast %cst_74 : f32 to vector<24x1xf32>
    %215 = arith.select %211, %213, %214 : vector<24x1xi1>, vector<24x1xf32>
    %216 = arith.mulf %203, %92 : vector<24x1xf32>
    %c0_75 = arith.constant 0 : index
    %c0_76 = arith.constant 0 : index
    %c0_77 = arith.constant 0 : index
    %c1_78 = arith.constant 1 : index
    %217 = vector.load %arg9[%c0_75, %c0_76, %c0_77, %c1_78] : memref<1x1x96x128xf32, #tpu.memory_space<vmem>>, vector<1x1x24x1xf32>
    %218 = vector.shape_cast %217 : vector<1x1x24x1xf32> to vector<24x1xf32>
    %219 = vector.shape_cast %216 : vector<24x1xf32> to vector<1x1x24x1xf32>
    tpu.vector_store %arg9[%c0_75, %c0_76, %c0_77, %c1_78], %219 {strides = array<i32>} : memref<1x1x96x128xf32, #tpu.memory_space<vmem>>, vector<1x1x24x1xf32>,
    %220 = arith.mulf %197, %203 : vector<24x1xf32>
    %221 = arith.addf %206, %220 : vector<24x1xf32>
    %222 = arith.mulf %221, %215 : vector<24x1xf32>
    %c0_79 = arith.constant 0 : index
    %c0_80 = arith.constant 0 : index
    %c0_81 = arith.constant 0 : index
    %c5 = arith.constant 5 : index
    %223 = vector.load %arg9[%c0_79, %c0_80, %c0_81, %c5] : memref<1x1x96x128xf32, #tpu.memory_space<vmem>>, vector<1x1x24x1xf32>
    %224 = vector.shape_cast %223 : vector<1x1x24x1xf32> to vector<24x1xf32>
    %225 = vector.shape_cast %222 : vector<24x1xf32> to vector<1x1x24x1xf32>
    tpu.vector_store %arg9[%c0_79, %c0_80, %c0_81, %c5], %225 {strides = array<i32>} : memref<1x1x96x128xf32, #tpu.memory_space<vmem>>, vector<1x1x24x1xf32>,
    %cst_82 = arith.constant 0.000000e+00 : f32
    %226 = vector.broadcast %cst_82 : f32 to vector<24x1xf32>
    %227 = arith.cmpf ogt, %203, %226 : vector<24x1xf32>
    %228 = arith.mulf %209, %215 : vector<24x1xf32>
    %cst_83 = arith.constant -1.000000e+00 : f32
    %229 = vector.broadcast %cst_83 : f32 to vector<24x1xf32>
    %230 = arith.select %227, %228, %229 : vector<24x1xi1>, vector<24x1xf32>
    %c0_84 = arith.constant 0 : index
    %c0_85 = arith.constant 0 : index
    %c0_86 = arith.constant 0 : index
    %c7 = arith.constant 7 : index
    %231 = vector.load %arg9[%c0_84, %c0_85, %c0_86, %c7] : memref<1x1x96x128xf32, #tpu.memory_space<vmem>>, vector<1x1x24x1xf32>
    %232 = vector.shape_cast %231 : vector<1x1x24x1xf32> to vector<24x1xf32>
    %233 = vector.shape_cast %230 : vector<24x1xf32> to vector<1x1x24x1xf32>
    tpu.vector_store %arg9[%c0_84, %c0_85, %c0_86, %c7], %233 {strides = array<i32>} : memref<1x1x96x128xf32, #tpu.memory_space<vmem>>, vector<1x1x24x1xf32>,
    %234 = vector.broadcast %197 : vector<24x1xf32> to vector<24x128xf32>
    %235 = arith.cmpf olt, %63, %234 : vector<24x128xf32>
    %cst_87 = arith.constant 0.000000e+00 : f32
    %236 = vector.broadcast %cst_87 : f32 to vector<24x128xf32>
    %237 = arith.select %235, %80, %236 : vector<24x128xi1>, vector<24x128xf32>
    %238 = arith.mulf %237, %85 : vector<24x128xf32>
    %c1_i32_88 = arith.constant 1 : i32
    %239 = tpu.dynamic_rotate %238 by %c1_i32_88 dim 1 : vector<24x128xf32>, i32 -> vector<24x128xf32>
    %cst_89 = arith.constant 0.000000e+00 : f32
    %240 = vector.shape_cast %47 : vector<1x128xi1> to vector<1x128xi1>
    %241 = vector.broadcast %240 : vector<1x128xi1> to vector<24x128xi1>
    %242 = vector.broadcast %cst_89 : f32 to vector<24x128xf32>
    %243 = arith.select %241, %239, %242 : vector<24x128xi1>, vector<24x128xf32>
    %c1_i32_90 = arith.constant 1 : i32
    %244 = tpu.dynamic_rotate %243 by %c1_i32_90 dim 1 : vector<24x128xf32>, i32 -> vector<24x128xf32>
    %cst_91 = arith.constant 0.000000e+00 : f32
    %245 = vector.shape_cast %47 : vector<1x128xi1> to vector<1x128xi1>
    %246 = vector.broadcast %245 : vector<1x128xi1> to vector<24x128xi1>
    %247 = vector.broadcast %cst_91 : f32 to vector<24x128xf32>
    %248 = arith.select %246, %244, %247 : vector<24x128xi1>, vector<24x128xf32>
    %249 = arith.maximumf %243, %248 : vector<24x128xf32>
    %c2_i32_92 = arith.constant 2 : i32
    %250 = tpu.dynamic_rotate %249 by %c2_i32_92 dim 1 : vector<24x128xf32>, i32 -> vector<24x128xf32>
    %cst_93 = arith.constant 0.000000e+00 : f32
    %251 = vector.shape_cast %49 : vector<1x128xi1> to vector<1x128xi1>
    %252 = vector.broadcast %251 : vector<1x128xi1> to vector<24x128xi1>
    %253 = vector.broadcast %cst_93 : f32 to vector<24x128xf32>
    %254 = arith.select %252, %250, %253 : vector<24x128xi1>, vector<24x128xf32>
    %255 = arith.maximumf %249, %254 : vector<24x128xf32>
    %c4_i32_94 = arith.constant 4 : i32
    %256 = tpu.dynamic_rotate %255 by %c4_i32_94 dim 1 : vector<24x128xf32>, i32 -> vector<24x128xf32>
    %cst_95 = arith.constant 0.000000e+00 : f32
    %257 = vector.shape_cast %51 : vector<1x128xi1> to vector<1x128xi1>
    %258 = vector.broadcast %257 : vector<1x128xi1> to vector<24x128xi1>
    %259 = vector.broadcast %cst_95 : f32 to vector<24x128xf32>
    %260 = arith.select %258, %256, %259 : vector<24x128xi1>, vector<24x128xf32>
    %261 = arith.maximumf %255, %260 : vector<24x128xf32>
    %c8_i32_96 = arith.constant 8 : i32
    %262 = tpu.dynamic_rotate %261 by %c8_i32_96 dim 1 : vector<24x128xf32>, i32 -> vector<24x128xf32>
    %cst_97 = arith.constant 0.000000e+00 : f32
    %263 = vector.shape_cast %53 : vector<1x128xi1> to vector<1x128xi1>
    %264 = vector.broadcast %263 : vector<1x128xi1> to vector<24x128xi1>
    %265 = vector.broadcast %cst_97 : f32 to vector<24x128xf32>
    %266 = arith.select %264, %262, %265 : vector<24x128xi1>, vector<24x128xf32>
    %267 = arith.maximumf %261, %266 : vector<24x128xf32>
    %c16_i32_98 = arith.constant 16 : i32
    %268 = tpu.dynamic_rotate %267 by %c16_i32_98 dim 1 : vector<24x128xf32>, i32 -> vector<24x128xf32>
    %cst_99 = arith.constant 0.000000e+00 : f32
    %269 = vector.shape_cast %55 : vector<1x128xi1> to vector<1x128xi1>
    %270 = vector.broadcast %269 : vector<1x128xi1> to vector<24x128xi1>
    %271 = vector.broadcast %cst_99 : f32 to vector<24x128xf32>
    %272 = arith.select %270, %268, %271 : vector<24x128xi1>, vector<24x128xf32>
    %273 = arith.maximumf %267, %272 : vector<24x128xf32>
    %c32_i32_100 = arith.constant 32 : i32
    %274 = tpu.dynamic_rotate %273 by %c32_i32_100 dim 1 : vector<24x128xf32>, i32 -> vector<24x128xf32>
    %cst_101 = arith.constant 0.000000e+00 : f32
    %275 = vector.shape_cast %57 : vector<1x128xi1> to vector<1x128xi1>
    %276 = vector.broadcast %275 : vector<1x128xi1> to vector<24x128xi1>
    %277 = vector.broadcast %cst_101 : f32 to vector<24x128xf32>
    %278 = arith.select %276, %274, %277 : vector<24x128xi1>, vector<24x128xf32>
    %279 = arith.maximumf %273, %278 : vector<24x128xf32>
    %c64_i32_102 = arith.constant 64 : i32
    %280 = tpu.dynamic_rotate %279 by %c64_i32_102 dim 1 : vector<24x128xf32>, i32 -> vector<24x128xf32>
    %cst_103 = arith.constant 0.000000e+00 : f32
    %281 = vector.shape_cast %59 : vector<1x128xi1> to vector<1x128xi1>
    %282 = vector.broadcast %281 : vector<1x128xi1> to vector<24x128xi1>
    %283 = vector.broadcast %cst_103 : f32 to vector<24x128xf32>
    %284 = arith.select %282, %280, %283 : vector<24x128xi1>, vector<24x128xf32>
    %285 = arith.maximumf %279, %284 : vector<24x128xf32>
    %286 = arith.subf %85, %285 : vector<24x128xf32>
    %287 = arith.mulf %237, %286 : vector<24x128xf32>
    %cst_104 = arith.constant dense<0xFF800000> : vector<24xf32>
    %288 = vector.multi_reduction <maximumf>, %287, %cst_104 [1] : vector<24x128xf32> to vector<24xf32>
    %289 = vector.shape_cast %288 : vector<24xf32> to vector<24x1xf32>
    %cst_105 = arith.constant dense<0xFF800000> : vector<24xf32>
    %290 = vector.multi_reduction <maximumf>, %238, %cst_105 [1] : vector<24x128xf32> to vector<24xf32>
    %291 = vector.shape_cast %290 : vector<24xf32> to vector<24x1xf32>
    %292 = arith.subf %94, %291 : vector<24x1xf32>
    %293 = arith.maximumf %289, %292 : vector<24x1xf32>
    %c0_106 = arith.constant 0 : index
    %c0_107 = arith.constant 0 : index
    %c0_108 = arith.constant 0 : index
    %c3 = arith.constant 3 : index
    %294 = vector.load %arg9[%c0_106, %c0_107, %c0_108, %c3] : memref<1x1x96x128xf32, #tpu.memory_space<vmem>>, vector<1x1x24x1xf32>
    %295 = vector.shape_cast %294 : vector<1x1x24x1xf32> to vector<24x1xf32>
    %296 = vector.shape_cast %293 : vector<24x1xf32> to vector<1x1x24x1xf32>
    tpu.vector_store %arg9[%c0_106, %c0_107, %c0_108, %c3], %296 {strides = array<i32>} : memref<1x1x96x128xf32, #tpu.memory_space<vmem>>, vector<1x1x24x1xf32>,
    %c24 = arith.constant 24 : index
    %c0_109 = arith.constant 0 : index
    %297 = vector.load %arg7[%c24, %c0_109] : memref<96x16xf32, #tpu.memory_space<vmem>>, vector<24x16xf32>
    %cst_110 = arith.constant dense<0.000000e+00> : vector<24x128xf32>
    %298 = tpu.matmul %297, %22, %cst_110 {dimension_numbers = #tpu.dot_dimension_numbers<[1], [0], [0], [1], [0, 0, 1, 1], [], []>} : vector<24x16xf32>, vector<16x128xf32>, vector<24x128xf32> -> vector<24x128xf32>
    %cst_111 = arith.constant dense<0.000000e+00> : vector<24x128xf32>
    %299 = tpu.matmul %297, %23, %cst_111 {dimension_numbers = #tpu.dot_dimension_numbers<[1], [0], [0], [1], [0, 0, 1, 1], [], []>} : vector<24x16xf32>, vector<16x128xf32>, vector<24x128xf32> -> vector<24x128xf32>
    %300 = arith.addf %298, %299 : vector<24x128xf32>
    %301 = tpu.iota {dimensions = array<i32: 0>} : vector<24x1xi32>
    %c24_i32 = arith.constant 24 : i32
    %302 = vector.broadcast %c24_i32 : i32 to vector<24x1xi32>
    %303 = arith.addi %302, %301 : vector<24x1xi32>
    %304 = vector.broadcast %28 : i32 to vector<24x1xi32>
    %305 = arith.addi %303, %304 : vector<24x1xi32>
    %c1_i32_112 = arith.constant 1 : i32
    %306 = vector.broadcast %c1_i32_112 : i32 to vector<24x1xi32>
    %307 = arith.andi %305, %306 : vector<24x1xi32>
    %308 = arith.sitofp %307 : vector<24x1xi32> to vector<24x1xf32>
    %c1_i32_113 = arith.constant 1 : i32
    %309 = vector.broadcast %c1_i32_113 : i32 to vector<24x1xi32>
    %310 = arith.cmpi eq, %307, %309 : vector<24x1xi32>
    %311 = vector.shape_cast %310 : vector<24x1xi1> to vector<24x1xi1>
    %312 = vector.broadcast %311 : vector<24x1xi1> to vector<24x128xi1>
    %313 = vector.shape_cast %45 : vector<1x128xf32> to vector<1x128xf32>
    %314 = vector.broadcast %313 : vector<1x128xf32> to vector<24x128xf32>
    %315 = vector.shape_cast %37 : vector<1x128xf32> to vector<1x128xf32>
    %316 = vector.broadcast %315 : vector<1x128xf32> to vector<24x128xf32>
    %317 = arith.select %312, %314, %316 : vector<24x128xi1>, vector<24x128xf32>
    %318 = vector.broadcast %26 : f32 to vector<24x1xf32>
    %319 = arith.mulf %318, %308 : vector<24x1xf32>
    %320 = vector.broadcast %33 : vector<1x128xf32> to vector<24x128xf32>
    %321 = vector.broadcast %319 : vector<24x1xf32> to vector<24x128xf32>
    %322 = arith.subf %320, %321 : vector<24x128xf32>
    %cst_114 = arith.constant 2.000000e+00 : f32
    %323 = arith.mulf %cst_114, %26 : f32
    %324 = vector.broadcast %323 : f32 to vector<24x1xf32>
    %325 = arith.mulf %324, %308 : vector<24x1xf32>
    %326 = vector.broadcast %31 : f32 to vector<24x1xf32>
    %327 = arith.subf %326, %325 : vector<24x1xf32>
    %cst_115 = arith.constant 1.000000e+00 : f32
    %328 = vector.broadcast %cst_115 : f32 to vector<24x1xf32>
    %329 = arith.divf %328, %327 : vector<24x1xf32>
    %cst_116 = arith.constant 1.000000e+00 : f32
    %330 = vector.broadcast %cst_116 : f32 to vector<24x1xf32>
    %331 = arith.subf %327, %330 : vector<24x1xf32>
    %c0_117 = arith.constant 0 : index
    %c24_118 = arith.constant 24 : index
    %c0_119 = arith.constant 0 : index
    %332 = vector.load %arg8[%c0_117, %c24_118, %c0_119] : memref<1x96x2xf32, #tpu.memory_space<vmem>>, vector<1x24x1xf32>
    %333 = vector.shape_cast %332 : vector<1x24x1xf32> to vector<24x1xf32>
    %334 = vector.broadcast %333 : vector<24x1xf32> to vector<24x128xf32>
    %335 = arith.cmpf ogt, %300, %334 : vector<24x128xf32>
    %cst_120 = arith.constant 0.000000e+00 : f32
    %336 = vector.broadcast %cst_120 : f32 to vector<24x128xf32>
    %337 = arith.select %335, %317, %336 : vector<24x128xi1>, vector<24x128xf32>
    %cst_121 = arith.constant dense<0.000000e+00> : vector<24xf32>
    %338 = vector.multi_reduction <add>, %337, %cst_121 [1] : vector<24x128xf32> to vector<24xf32>
    %339 = vector.shape_cast %338 : vector<24xf32> to vector<24x1xf32>
    %340 = arith.mulf %337, %300 : vector<24x128xf32>
    %cst_122 = arith.constant dense<0.000000e+00> : vector<24xf32>
    %341 = vector.multi_reduction <add>, %340, %cst_122 [1] : vector<24x128xf32> to vector<24xf32>
    %342 = vector.shape_cast %341 : vector<24xf32> to vector<24x1xf32>
    %343 = arith.mulf %337, %322 : vector<24x128xf32>
    %cst_123 = arith.constant dense<0.000000e+00> : vector<24xf32>
    %344 = vector.multi_reduction <add>, %343, %cst_123 [1] : vector<24x128xf32> to vector<24xf32>
    %345 = vector.shape_cast %344 : vector<24xf32> to vector<24x1xf32>
    %cst_124 = arith.constant 0.000000e+00 : f32
    %346 = vector.broadcast %cst_124 : f32 to vector<24x1xf32>
    %347 = arith.cmpf ogt, %339, %346 : vector<24x1xf32>
    %cst_125 = arith.constant 1.000000e+00 : f32
    %348 = vector.broadcast %cst_125 : f32 to vector<24x1xf32>
    %349 = arith.divf %348, %339 : vector<24x1xf32>
    %cst_126 = arith.constant 0.000000e+00 : f32
    %350 = vector.broadcast %cst_126 : f32 to vector<24x1xf32>
    %351 = arith.select %347, %349, %350 : vector<24x1xi1>, vector<24x1xf32>
    %352 = arith.mulf %339, %329 : vector<24x1xf32>
    %c0_127 = arith.constant 0 : index
    %c0_128 = arith.constant 0 : index
    %c24_129 = arith.constant 24 : index
    %c0_130 = arith.constant 0 : index
    %353 = vector.load %arg9[%c0_127, %c0_128, %c24_129, %c0_130] : memref<1x1x96x128xf32, #tpu.memory_space<vmem>>, vector<1x1x24x1xf32>
    %354 = vector.shape_cast %353 : vector<1x1x24x1xf32> to vector<24x1xf32>
    %355 = vector.shape_cast %352 : vector<24x1xf32> to vector<1x1x24x1xf32>
    tpu.vector_store %arg9[%c0_127, %c0_128, %c24_129, %c0_130], %355 {strides = array<i32>} : memref<1x1x96x128xf32, #tpu.memory_space<vmem>>, vector<1x1x24x1xf32>,
    %356 = arith.mulf %333, %339 : vector<24x1xf32>
    %357 = arith.addf %342, %356 : vector<24x1xf32>
    %358 = arith.mulf %357, %351 : vector<24x1xf32>
    %c0_131 = arith.constant 0 : index
    %c0_132 = arith.constant 0 : index
    %c24_133 = arith.constant 24 : index
    %c4_134 = arith.constant 4 : index
    %359 = vector.load %arg9[%c0_131, %c0_132, %c24_133, %c4_134] : memref<1x1x96x128xf32, #tpu.memory_space<vmem>>, vector<1x1x24x1xf32>
    %360 = vector.shape_cast %359 : vector<1x1x24x1xf32> to vector<24x1xf32>
    %361 = vector.shape_cast %358 : vector<24x1xf32> to vector<1x1x24x1xf32>
    tpu.vector_store %arg9[%c0_131, %c0_132, %c24_133, %c4_134], %361 {strides = array<i32>} : memref<1x1x96x128xf32, #tpu.memory_space<vmem>>, vector<1x1x24x1xf32>,
    %cst_135 = arith.constant 0.000000e+00 : f32
    %362 = vector.broadcast %cst_135 : f32 to vector<24x1xf32>
    %363 = arith.cmpf ogt, %339, %362 : vector<24x1xf32>
    %364 = arith.mulf %345, %351 : vector<24x1xf32>
    %cst_136 = arith.constant -1.000000e+00 : f32
    %365 = vector.broadcast %cst_136 : f32 to vector<24x1xf32>
    %366 = arith.select %363, %364, %365 : vector<24x1xi1>, vector<24x1xf32>
    %c0_137 = arith.constant 0 : index
    %c0_138 = arith.constant 0 : index
    %c24_139 = arith.constant 24 : index
    %c6_140 = arith.constant 6 : index
    %367 = vector.load %arg9[%c0_137, %c0_138, %c24_139, %c6_140] : memref<1x1x96x128xf32, #tpu.memory_space<vmem>>, vector<1x1x24x1xf32>
    %368 = vector.shape_cast %367 : vector<1x1x24x1xf32> to vector<24x1xf32>
    %369 = vector.shape_cast %366 : vector<24x1xf32> to vector<1x1x24x1xf32>
    tpu.vector_store %arg9[%c0_137, %c0_138, %c24_139, %c6_140], %369 {strides = array<i32>} : memref<1x1x96x128xf32, #tpu.memory_space<vmem>>, vector<1x1x24x1xf32>,
    %370 = vector.broadcast %333 : vector<24x1xf32> to vector<24x128xf32>
    %371 = arith.cmpf olt, %300, %370 : vector<24x128xf32>
    %cst_141 = arith.constant 0.000000e+00 : f32
    %372 = vector.broadcast %cst_141 : f32 to vector<24x128xf32>
    %373 = arith.select %371, %317, %372 : vector<24x128xi1>, vector<24x128xf32>
    %374 = arith.mulf %373, %322 : vector<24x128xf32>
    %c1_i32_142 = arith.constant 1 : i32
    %375 = tpu.dynamic_rotate %374 by %c1_i32_142 dim 1 : vector<24x128xf32>, i32 -> vector<24x128xf32>
    %cst_143 = arith.constant 0.000000e+00 : f32
    %376 = vector.shape_cast %47 : vector<1x128xi1> to vector<1x128xi1>
    %377 = vector.broadcast %376 : vector<1x128xi1> to vector<24x128xi1>
    %378 = vector.broadcast %cst_143 : f32 to vector<24x128xf32>
    %379 = arith.select %377, %375, %378 : vector<24x128xi1>, vector<24x128xf32>
    %c1_i32_144 = arith.constant 1 : i32
    %380 = tpu.dynamic_rotate %379 by %c1_i32_144 dim 1 : vector<24x128xf32>, i32 -> vector<24x128xf32>
    %cst_145 = arith.constant 0.000000e+00 : f32
    %381 = vector.shape_cast %47 : vector<1x128xi1> to vector<1x128xi1>
    %382 = vector.broadcast %381 : vector<1x128xi1> to vector<24x128xi1>
    %383 = vector.broadcast %cst_145 : f32 to vector<24x128xf32>
    %384 = arith.select %382, %380, %383 : vector<24x128xi1>, vector<24x128xf32>
    %385 = arith.maximumf %379, %384 : vector<24x128xf32>
    %c2_i32_146 = arith.constant 2 : i32
    %386 = tpu.dynamic_rotate %385 by %c2_i32_146 dim 1 : vector<24x128xf32>, i32 -> vector<24x128xf32>
    %cst_147 = arith.constant 0.000000e+00 : f32
    %387 = vector.shape_cast %49 : vector<1x128xi1> to vector<1x128xi1>
    %388 = vector.broadcast %387 : vector<1x128xi1> to vector<24x128xi1>
    %389 = vector.broadcast %cst_147 : f32 to vector<24x128xf32>
    %390 = arith.select %388, %386, %389 : vector<24x128xi1>, vector<24x128xf32>
    %391 = arith.maximumf %385, %390 : vector<24x128xf32>
    %c4_i32_148 = arith.constant 4 : i32
    %392 = tpu.dynamic_rotate %391 by %c4_i32_148 dim 1 : vector<24x128xf32>, i32 -> vector<24x128xf32>
    %cst_149 = arith.constant 0.000000e+00 : f32
    %393 = vector.shape_cast %51 : vector<1x128xi1> to vector<1x128xi1>
    %394 = vector.broadcast %393 : vector<1x128xi1> to vector<24x128xi1>
    %395 = vector.broadcast %cst_149 : f32 to vector<24x128xf32>
    %396 = arith.select %394, %392, %395 : vector<24x128xi1>, vector<24x128xf32>
    %397 = arith.maximumf %391, %396 : vector<24x128xf32>
    %c8_i32_150 = arith.constant 8 : i32
    %398 = tpu.dynamic_rotate %397 by %c8_i32_150 dim 1 : vector<24x128xf32>, i32 -> vector<24x128xf32>
    %cst_151 = arith.constant 0.000000e+00 : f32
    %399 = vector.shape_cast %53 : vector<1x128xi1> to vector<1x128xi1>
    %400 = vector.broadcast %399 : vector<1x128xi1> to vector<24x128xi1>
    %401 = vector.broadcast %cst_151 : f32 to vector<24x128xf32>
    %402 = arith.select %400, %398, %401 : vector<24x128xi1>, vector<24x128xf32>
    %403 = arith.maximumf %397, %402 : vector<24x128xf32>
    %c16_i32_152 = arith.constant 16 : i32
    %404 = tpu.dynamic_rotate %403 by %c16_i32_152 dim 1 : vector<24x128xf32>, i32 -> vector<24x128xf32>
    %cst_153 = arith.constant 0.000000e+00 : f32
    %405 = vector.shape_cast %55 : vector<1x128xi1> to vector<1x128xi1>
    %406 = vector.broadcast %405 : vector<1x128xi1> to vector<24x128xi1>
    %407 = vector.broadcast %cst_153 : f32 to vector<24x128xf32>
    %408 = arith.select %406, %404, %407 : vector<24x128xi1>, vector<24x128xf32>
    %409 = arith.maximumf %403, %408 : vector<24x128xf32>
    %c32_i32_154 = arith.constant 32 : i32
    %410 = tpu.dynamic_rotate %409 by %c32_i32_154 dim 1 : vector<24x128xf32>, i32 -> vector<24x128xf32>
    %cst_155 = arith.constant 0.000000e+00 : f32
    %411 = vector.shape_cast %57 : vector<1x128xi1> to vector<1x128xi1>
    %412 = vector.broadcast %411 : vector<1x128xi1> to vector<24x128xi1>
    %413 = vector.broadcast %cst_155 : f32 to vector<24x128xf32>
    %414 = arith.select %412, %410, %413 : vector<24x128xi1>, vector<24x128xf32>
    %415 = arith.maximumf %409, %414 : vector<24x128xf32>
    %c64_i32_156 = arith.constant 64 : i32
    %416 = tpu.dynamic_rotate %415 by %c64_i32_156 dim 1 : vector<24x128xf32>, i32 -> vector<24x128xf32>
    %cst_157 = arith.constant 0.000000e+00 : f32
    %417 = vector.shape_cast %59 : vector<1x128xi1> to vector<1x128xi1>
    %418 = vector.broadcast %417 : vector<1x128xi1> to vector<24x128xi1>
    %419 = vector.broadcast %cst_157 : f32 to vector<24x128xf32>
    %420 = arith.select %418, %416, %419 : vector<24x128xi1>, vector<24x128xf32>
    %421 = arith.maximumf %415, %420 : vector<24x128xf32>
    %422 = arith.subf %322, %421 : vector<24x128xf32>
    %423 = arith.mulf %373, %422 : vector<24x128xf32>
    %cst_158 = arith.constant dense<0xFF800000> : vector<24xf32>
    %424 = vector.multi_reduction <maximumf>, %423, %cst_158 [1] : vector<24x128xf32> to vector<24xf32>
    %425 = vector.shape_cast %424 : vector<24xf32> to vector<24x1xf32>
    %cst_159 = arith.constant dense<0xFF800000> : vector<24xf32>
    %426 = vector.multi_reduction <maximumf>, %374, %cst_159 [1] : vector<24x128xf32> to vector<24xf32>
    %427 = vector.shape_cast %426 : vector<24xf32> to vector<24x1xf32>
    %428 = arith.subf %331, %427 : vector<24x1xf32>
    %429 = arith.maximumf %425, %428 : vector<24x1xf32>
    %c0_160 = arith.constant 0 : index
    %c0_161 = arith.constant 0 : index
    %c24_162 = arith.constant 24 : index
    %c2_163 = arith.constant 2 : index
    %430 = vector.load %arg9[%c0_160, %c0_161, %c24_162, %c2_163] : memref<1x1x96x128xf32, #tpu.memory_space<vmem>>, vector<1x1x24x1xf32>
    %431 = vector.shape_cast %430 : vector<1x1x24x1xf32> to vector<24x1xf32>
    %432 = vector.shape_cast %429 : vector<24x1xf32> to vector<1x1x24x1xf32>
    tpu.vector_store %arg9[%c0_160, %c0_161, %c24_162, %c2_163], %432 {strides = array<i32>} : memref<1x1x96x128xf32, #tpu.memory_space<vmem>>, vector<1x1x24x1xf32>,
    %c0_164 = arith.constant 0 : index
    %c24_165 = arith.constant 24 : index
    %c1_166 = arith.constant 1 : index
    %433 = vector.load %arg8[%c0_164, %c24_165, %c1_166] : memref<1x96x2xf32, #tpu.memory_space<vmem>>, vector<1x24x1xf32>
    %434 = vector.shape_cast %433 : vector<1x24x1xf32> to vector<24x1xf32>
    %435 = vector.broadcast %434 : vector<24x1xf32> to vector<24x128xf32>
    %436 = arith.cmpf ogt, %300, %435 : vector<24x128xf32>
    %cst_167 = arith.constant 0.000000e+00 : f32
    %437 = vector.broadcast %cst_167 : f32 to vector<24x128xf32>
    %438 = arith.select %436, %317, %437 : vector<24x128xi1>, vector<24x128xf32>
    %cst_168 = arith.constant dense<0.000000e+00> : vector<24xf32>
    %439 = vector.multi_reduction <add>, %438, %cst_168 [1] : vector<24x128xf32> to vector<24xf32>
    %440 = vector.shape_cast %439 : vector<24xf32> to vector<24x1xf32>
    %441 = arith.mulf %438, %300 : vector<24x128xf32>
    %cst_169 = arith.constant dense<0.000000e+00> : vector<24xf32>
    %442 = vector.multi_reduction <add>, %441, %cst_169 [1] : vector<24x128xf32> to vector<24xf32>
    %443 = vector.shape_cast %442 : vector<24xf32> to vector<24x1xf32>
    %444 = arith.mulf %438, %322 : vector<24x128xf32>
    %cst_170 = arith.constant dense<0.000000e+00> : vector<24xf32>
    %445 = vector.multi_reduction <add>, %444, %cst_170 [1] : vector<24x128xf32> to vector<24xf32>
    %446 = vector.shape_cast %445 : vector<24xf32> to vector<24x1xf32>
    %cst_171 = arith.constant 0.000000e+00 : f32
    %447 = vector.broadcast %cst_171 : f32 to vector<24x1xf32>
    %448 = arith.cmpf ogt, %440, %447 : vector<24x1xf32>
    %cst_172 = arith.constant 1.000000e+00 : f32
    %449 = vector.broadcast %cst_172 : f32 to vector<24x1xf32>
    %450 = arith.divf %449, %440 : vector<24x1xf32>
    %cst_173 = arith.constant 0.000000e+00 : f32
    %451 = vector.broadcast %cst_173 : f32 to vector<24x1xf32>
    %452 = arith.select %448, %450, %451 : vector<24x1xi1>, vector<24x1xf32>
    %453 = arith.mulf %440, %329 : vector<24x1xf32>
    %c0_174 = arith.constant 0 : index
    %c0_175 = arith.constant 0 : index
    %c24_176 = arith.constant 24 : index
    %c1_177 = arith.constant 1 : index
    %454 = vector.load %arg9[%c0_174, %c0_175, %c24_176, %c1_177] : memref<1x1x96x128xf32, #tpu.memory_space<vmem>>, vector<1x1x24x1xf32>
    %455 = vector.shape_cast %454 : vector<1x1x24x1xf32> to vector<24x1xf32>
    %456 = vector.shape_cast %453 : vector<24x1xf32> to vector<1x1x24x1xf32>
    tpu.vector_store %arg9[%c0_174, %c0_175, %c24_176, %c1_177], %456 {strides = array<i32>} : memref<1x1x96x128xf32, #tpu.memory_space<vmem>>, vector<1x1x24x1xf32>,
    %457 = arith.mulf %434, %440 : vector<24x1xf32>
    %458 = arith.addf %443, %457 : vector<24x1xf32>
    %459 = arith.mulf %458, %452 : vector<24x1xf32>
    %c0_178 = arith.constant 0 : index
    %c0_179 = arith.constant 0 : index
    %c24_180 = arith.constant 24 : index
    %c5_181 = arith.constant 5 : index
    %460 = vector.load %arg9[%c0_178, %c0_179, %c24_180, %c5_181] : memref<1x1x96x128xf32, #tpu.memory_space<vmem>>, vector<1x1x24x1xf32>
    %461 = vector.shape_cast %460 : vector<1x1x24x1xf32> to vector<24x1xf32>
    %462 = vector.shape_cast %459 : vector<24x1xf32> to vector<1x1x24x1xf32>
    tpu.vector_store %arg9[%c0_178, %c0_179, %c24_180, %c5_181], %462 {strides = array<i32>} : memref<1x1x96x128xf32, #tpu.memory_space<vmem>>, vector<1x1x24x1xf32>,
    %cst_182 = arith.constant 0.000000e+00 : f32
    %463 = vector.broadcast %cst_182 : f32 to vector<24x1xf32>
    %464 = arith.cmpf ogt, %440, %463 : vector<24x1xf32>
    %465 = arith.mulf %446, %452 : vector<24x1xf32>
    %cst_183 = arith.constant -1.000000e+00 : f32
    %466 = vector.broadcast %cst_183 : f32 to vector<24x1xf32>
    %467 = arith.select %464, %465, %466 : vector<24x1xi1>, vector<24x1xf32>
    %c0_184 = arith.constant 0 : index
    %c0_185 = arith.constant 0 : index
    %c24_186 = arith.constant 24 : index
    %c7_187 = arith.constant 7 : index
    %468 = vector.load %arg9[%c0_184, %c0_185, %c24_186, %c7_187] : memref<1x1x96x128xf32, #tpu.memory_space<vmem>>, vector<1x1x24x1xf32>
    %469 = vector.shape_cast %468 : vector<1x1x24x1xf32> to vector<24x1xf32>
    %470 = vector.shape_cast %467 : vector<24x1xf32> to vector<1x1x24x1xf32>
    tpu.vector_store %arg9[%c0_184, %c0_185, %c24_186, %c7_187], %470 {strides = array<i32>} : memref<1x1x96x128xf32, #tpu.memory_space<vmem>>, vector<1x1x24x1xf32>,
    %471 = vector.broadcast %434 : vector<24x1xf32> to vector<24x128xf32>
    %472 = arith.cmpf olt, %300, %471 : vector<24x128xf32>
    %cst_188 = arith.constant 0.000000e+00 : f32
    %473 = vector.broadcast %cst_188 : f32 to vector<24x128xf32>
    %474 = arith.select %472, %317, %473 : vector<24x128xi1>, vector<24x128xf32>
    %475 = arith.mulf %474, %322 : vector<24x128xf32>
    %c1_i32_189 = arith.constant 1 : i32
    %476 = tpu.dynamic_rotate %475 by %c1_i32_189 dim 1 : vector<24x128xf32>, i32 -> vector<24x128xf32>
    %cst_190 = arith.constant 0.000000e+00 : f32
    %477 = vector.shape_cast %47 : vector<1x128xi1> to vector<1x128xi1>
    %478 = vector.broadcast %477 : vector<1x128xi1> to vector<24x128xi1>
    %479 = vector.broadcast %cst_190 : f32 to vector<24x128xf32>
    %480 = arith.select %478, %476, %479 : vector<24x128xi1>, vector<24x128xf32>
    %c1_i32_191 = arith.constant 1 : i32
    %481 = tpu.dynamic_rotate %480 by %c1_i32_191 dim 1 : vector<24x128xf32>, i32 -> vector<24x128xf32>
    %cst_192 = arith.constant 0.000000e+00 : f32
    %482 = vector.shape_cast %47 : vector<1x128xi1> to vector<1x128xi1>
    %483 = vector.broadcast %482 : vector<1x128xi1> to vector<24x128xi1>
    %484 = vector.broadcast %cst_192 : f32 to vector<24x128xf32>
    %485 = arith.select %483, %481, %484 : vector<24x128xi1>, vector<24x128xf32>
    %486 = arith.maximumf %480, %485 : vector<24x128xf32>
    %c2_i32_193 = arith.constant 2 : i32
    %487 = tpu.dynamic_rotate %486 by %c2_i32_193 dim 1 : vector<24x128xf32>, i32 -> vector<24x128xf32>
    %cst_194 = arith.constant 0.000000e+00 : f32
    %488 = vector.shape_cast %49 : vector<1x128xi1> to vector<1x128xi1>
    %489 = vector.broadcast %488 : vector<1x128xi1> to vector<24x128xi1>
    %490 = vector.broadcast %cst_194 : f32 to vector<24x128xf32>
    %491 = arith.select %489, %487, %490 : vector<24x128xi1>, vector<24x128xf32>
    %492 = arith.maximumf %486, %491 : vector<24x128xf32>
    %c4_i32_195 = arith.constant 4 : i32
    %493 = tpu.dynamic_rotate %492 by %c4_i32_195 dim 1 : vector<24x128xf32>, i32 -> vector<24x128xf32>
    %cst_196 = arith.constant 0.000000e+00 : f32
    %494 = vector.shape_cast %51 : vector<1x128xi1> to vector<1x128xi1>
    %495 = vector.broadcast %494 : vector<1x128xi1> to vector<24x128xi1>
    %496 = vector.broadcast %cst_196 : f32 to vector<24x128xf32>
    %497 = arith.select %495, %493, %496 : vector<24x128xi1>, vector<24x128xf32>
    %498 = arith.maximumf %492, %497 : vector<24x128xf32>
    %c8_i32_197 = arith.constant 8 : i32
    %499 = tpu.dynamic_rotate %498 by %c8_i32_197 dim 1 : vector<24x128xf32>, i32 -> vector<24x128xf32>
    %cst_198 = arith.constant 0.000000e+00 : f32
    %500 = vector.shape_cast %53 : vector<1x128xi1> to vector<1x128xi1>
    %501 = vector.broadcast %500 : vector<1x128xi1> to vector<24x128xi1>
    %502 = vector.broadcast %cst_198 : f32 to vector<24x128xf32>
    %503 = arith.select %501, %499, %502 : vector<24x128xi1>, vector<24x128xf32>
    %504 = arith.maximumf %498, %503 : vector<24x128xf32>
    %c16_i32_199 = arith.constant 16 : i32
    %505 = tpu.dynamic_rotate %504 by %c16_i32_199 dim 1 : vector<24x128xf32>, i32 -> vector<24x128xf32>
    %cst_200 = arith.constant 0.000000e+00 : f32
    %506 = vector.shape_cast %55 : vector<1x128xi1> to vector<1x128xi1>
    %507 = vector.broadcast %506 : vector<1x128xi1> to vector<24x128xi1>
    %508 = vector.broadcast %cst_200 : f32 to vector<24x128xf32>
    %509 = arith.select %507, %505, %508 : vector<24x128xi1>, vector<24x128xf32>
    %510 = arith.maximumf %504, %509 : vector<24x128xf32>
    %c32_i32_201 = arith.constant 32 : i32
    %511 = tpu.dynamic_rotate %510 by %c32_i32_201 dim 1 : vector<24x128xf32>, i32 -> vector<24x128xf32>
    %cst_202 = arith.constant 0.000000e+00 : f32
    %512 = vector.shape_cast %57 : vector<1x128xi1> to vector<1x128xi1>
    %513 = vector.broadcast %512 : vector<1x128xi1> to vector<24x128xi1>
    %514 = vector.broadcast %cst_202 : f32 to vector<24x128xf32>
    %515 = arith.select %513, %511, %514 : vector<24x128xi1>, vector<24x128xf32>
    %516 = arith.maximumf %510, %515 : vector<24x128xf32>
    %c64_i32_203 = arith.constant 64 : i32
    %517 = tpu.dynamic_rotate %516 by %c64_i32_203 dim 1 : vector<24x128xf32>, i32 -> vector<24x128xf32>
    %cst_204 = arith.constant 0.000000e+00 : f32
    %518 = vector.shape_cast %59 : vector<1x128xi1> to vector<1x128xi1>
    %519 = vector.broadcast %518 : vector<1x128xi1> to vector<24x128xi1>
    %520 = vector.broadcast %cst_204 : f32 to vector<24x128xf32>
    %521 = arith.select %519, %517, %520 : vector<24x128xi1>, vector<24x128xf32>
    %522 = arith.maximumf %516, %521 : vector<24x128xf32>
    %523 = arith.subf %322, %522 : vector<24x128xf32>
    %524 = arith.mulf %474, %523 : vector<24x128xf32>
    %cst_205 = arith.constant dense<0xFF800000> : vector<24xf32>
    %525 = vector.multi_reduction <maximumf>, %524, %cst_205 [1] : vector<24x128xf32> to vector<24xf32>
    %526 = vector.shape_cast %525 : vector<24xf32> to vector<24x1xf32>
    %cst_206 = arith.constant dense<0xFF800000> : vector<24xf32>
    %527 = vector.multi_reduction <maximumf>, %475, %cst_206 [1] : vector<24x128xf32> to vector<24xf32>
    %528 = vector.shape_cast %527 : vector<24xf32> to vector<24x1xf32>
    %529 = arith.subf %331, %528 : vector<24x1xf32>
    %530 = arith.maximumf %526, %529 : vector<24x1xf32>
    %c0_207 = arith.constant 0 : index
    %c0_208 = arith.constant 0 : index
    %c24_209 = arith.constant 24 : index
    %c3_210 = arith.constant 3 : index
    %531 = vector.load %arg9[%c0_207, %c0_208, %c24_209, %c3_210] : memref<1x1x96x128xf32, #tpu.memory_space<vmem>>, vector<1x1x24x1xf32>
    %532 = vector.shape_cast %531 : vector<1x1x24x1xf32> to vector<24x1xf32>
    %533 = vector.shape_cast %530 : vector<24x1xf32> to vector<1x1x24x1xf32>
    tpu.vector_store %arg9[%c0_207, %c0_208, %c24_209, %c3_210], %533 {strides = array<i32>} : memref<1x1x96x128xf32, #tpu.memory_space<vmem>>, vector<1x1x24x1xf32>,
    %c48 = arith.constant 48 : index
    %c0_211 = arith.constant 0 : index
    %534 = vector.load %arg7[%c48, %c0_211] : memref<96x16xf32, #tpu.memory_space<vmem>>, vector<24x16xf32>
    %cst_212 = arith.constant dense<0.000000e+00> : vector<24x128xf32>
    %535 = tpu.matmul %534, %22, %cst_212 {dimension_numbers = #tpu.dot_dimension_numbers<[1], [0], [0], [1], [0, 0, 1, 1], [], []>} : vector<24x16xf32>, vector<16x128xf32>, vector<24x128xf32> -> vector<24x128xf32>
    %cst_213 = arith.constant dense<0.000000e+00> : vector<24x128xf32>
    %536 = tpu.matmul %534, %23, %cst_213 {dimension_numbers = #tpu.dot_dimension_numbers<[1], [0], [0], [1], [0, 0, 1, 1], [], []>} : vector<24x16xf32>, vector<16x128xf32>, vector<24x128xf32> -> vector<24x128xf32>
    %537 = arith.addf %535, %536 : vector<24x128xf32>
    %538 = tpu.iota {dimensions = array<i32: 0>} : vector<24x1xi32>
    %c48_i32 = arith.constant 48 : i32
    %539 = vector.broadcast %c48_i32 : i32 to vector<24x1xi32>
    %540 = arith.addi %539, %538 : vector<24x1xi32>
    %541 = vector.broadcast %28 : i32 to vector<24x1xi32>
    %542 = arith.addi %540, %541 : vector<24x1xi32>
    %c1_i32_214 = arith.constant 1 : i32
    %543 = vector.broadcast %c1_i32_214 : i32 to vector<24x1xi32>
    %544 = arith.andi %542, %543 : vector<24x1xi32>
    %545 = arith.sitofp %544 : vector<24x1xi32> to vector<24x1xf32>
    %c1_i32_215 = arith.constant 1 : i32
    %546 = vector.broadcast %c1_i32_215 : i32 to vector<24x1xi32>
    %547 = arith.cmpi eq, %544, %546 : vector<24x1xi32>
    %548 = vector.shape_cast %547 : vector<24x1xi1> to vector<24x1xi1>
    %549 = vector.broadcast %548 : vector<24x1xi1> to vector<24x128xi1>
    %550 = vector.shape_cast %45 : vector<1x128xf32> to vector<1x128xf32>
    %551 = vector.broadcast %550 : vector<1x128xf32> to vector<24x128xf32>
    %552 = vector.shape_cast %37 : vector<1x128xf32> to vector<1x128xf32>
    %553 = vector.broadcast %552 : vector<1x128xf32> to vector<24x128xf32>
    %554 = arith.select %549, %551, %553 : vector<24x128xi1>, vector<24x128xf32>
    %555 = vector.broadcast %26 : f32 to vector<24x1xf32>
    %556 = arith.mulf %555, %545 : vector<24x1xf32>
    %557 = vector.broadcast %33 : vector<1x128xf32> to vector<24x128xf32>
    %558 = vector.broadcast %556 : vector<24x1xf32> to vector<24x128xf32>
    %559 = arith.subf %557, %558 : vector<24x128xf32>
    %cst_216 = arith.constant 2.000000e+00 : f32
    %560 = arith.mulf %cst_216, %26 : f32
    %561 = vector.broadcast %560 : f32 to vector<24x1xf32>
    %562 = arith.mulf %561, %545 : vector<24x1xf32>
    %563 = vector.broadcast %31 : f32 to vector<24x1xf32>
    %564 = arith.subf %563, %562 : vector<24x1xf32>
    %cst_217 = arith.constant 1.000000e+00 : f32
    %565 = vector.broadcast %cst_217 : f32 to vector<24x1xf32>
    %566 = arith.divf %565, %564 : vector<24x1xf32>
    %cst_218 = arith.constant 1.000000e+00 : f32
    %567 = vector.broadcast %cst_218 : f32 to vector<24x1xf32>
    %568 = arith.subf %564, %567 : vector<24x1xf32>
    %c0_219 = arith.constant 0 : index
    %c48_220 = arith.constant 48 : index
    %c0_221 = arith.constant 0 : index
    %569 = vector.load %arg8[%c0_219, %c48_220, %c0_221] : memref<1x96x2xf32, #tpu.memory_space<vmem>>, vector<1x24x1xf32>
    %570 = vector.shape_cast %569 : vector<1x24x1xf32> to vector<24x1xf32>
    %571 = vector.broadcast %570 : vector<24x1xf32> to vector<24x128xf32>
    %572 = arith.cmpf ogt, %537, %571 : vector<24x128xf32>
    %cst_222 = arith.constant 0.000000e+00 : f32
    %573 = vector.broadcast %cst_222 : f32 to vector<24x128xf32>
    %574 = arith.select %572, %554, %573 : vector<24x128xi1>, vector<24x128xf32>
    %cst_223 = arith.constant dense<0.000000e+00> : vector<24xf32>
    %575 = vector.multi_reduction <add>, %574, %cst_223 [1] : vector<24x128xf32> to vector<24xf32>
    %576 = vector.shape_cast %575 : vector<24xf32> to vector<24x1xf32>
    %577 = arith.mulf %574, %537 : vector<24x128xf32>
    %cst_224 = arith.constant dense<0.000000e+00> : vector<24xf32>
    %578 = vector.multi_reduction <add>, %577, %cst_224 [1] : vector<24x128xf32> to vector<24xf32>
    %579 = vector.shape_cast %578 : vector<24xf32> to vector<24x1xf32>
    %580 = arith.mulf %574, %559 : vector<24x128xf32>
    %cst_225 = arith.constant dense<0.000000e+00> : vector<24xf32>
    %581 = vector.multi_reduction <add>, %580, %cst_225 [1] : vector<24x128xf32> to vector<24xf32>
    %582 = vector.shape_cast %581 : vector<24xf32> to vector<24x1xf32>
    %cst_226 = arith.constant 0.000000e+00 : f32
    %583 = vector.broadcast %cst_226 : f32 to vector<24x1xf32>
    %584 = arith.cmpf ogt, %576, %583 : vector<24x1xf32>
    %cst_227 = arith.constant 1.000000e+00 : f32
    %585 = vector.broadcast %cst_227 : f32 to vector<24x1xf32>
    %586 = arith.divf %585, %576 : vector<24x1xf32>
    %cst_228 = arith.constant 0.000000e+00 : f32
    %587 = vector.broadcast %cst_228 : f32 to vector<24x1xf32>
    %588 = arith.select %584, %586, %587 : vector<24x1xi1>, vector<24x1xf32>
    %589 = arith.mulf %576, %566 : vector<24x1xf32>
    %c0_229 = arith.constant 0 : index
    %c0_230 = arith.constant 0 : index
    %c48_231 = arith.constant 48 : index
    %c0_232 = arith.constant 0 : index
    %590 = vector.load %arg9[%c0_229, %c0_230, %c48_231, %c0_232] : memref<1x1x96x128xf32, #tpu.memory_space<vmem>>, vector<1x1x24x1xf32>
    %591 = vector.shape_cast %590 : vector<1x1x24x1xf32> to vector<24x1xf32>
    %592 = vector.shape_cast %589 : vector<24x1xf32> to vector<1x1x24x1xf32>
    tpu.vector_store %arg9[%c0_229, %c0_230, %c48_231, %c0_232], %592 {strides = array<i32>} : memref<1x1x96x128xf32, #tpu.memory_space<vmem>>, vector<1x1x24x1xf32>,
    %593 = arith.mulf %570, %576 : vector<24x1xf32>
    %594 = arith.addf %579, %593 : vector<24x1xf32>
    %595 = arith.mulf %594, %588 : vector<24x1xf32>
    %c0_233 = arith.constant 0 : index
    %c0_234 = arith.constant 0 : index
    %c48_235 = arith.constant 48 : index
    %c4_236 = arith.constant 4 : index
    %596 = vector.load %arg9[%c0_233, %c0_234, %c48_235, %c4_236] : memref<1x1x96x128xf32, #tpu.memory_space<vmem>>, vector<1x1x24x1xf32>
    %597 = vector.shape_cast %596 : vector<1x1x24x1xf32> to vector<24x1xf32>
    %598 = vector.shape_cast %595 : vector<24x1xf32> to vector<1x1x24x1xf32>
    tpu.vector_store %arg9[%c0_233, %c0_234, %c48_235, %c4_236], %598 {strides = array<i32>} : memref<1x1x96x128xf32, #tpu.memory_space<vmem>>, vector<1x1x24x1xf32>,
    %cst_237 = arith.constant 0.000000e+00 : f32
    %599 = vector.broadcast %cst_237 : f32 to vector<24x1xf32>
    %600 = arith.cmpf ogt, %576, %599 : vector<24x1xf32>
    %601 = arith.mulf %582, %588 : vector<24x1xf32>
    %cst_238 = arith.constant -1.000000e+00 : f32
    %602 = vector.broadcast %cst_238 : f32 to vector<24x1xf32>
    %603 = arith.select %600, %601, %602 : vector<24x1xi1>, vector<24x1xf32>
    %c0_239 = arith.constant 0 : index
    %c0_240 = arith.constant 0 : index
    %c48_241 = arith.constant 48 : index
    %c6_242 = arith.constant 6 : index
    %604 = vector.load %arg9[%c0_239, %c0_240, %c48_241, %c6_242] : memref<1x1x96x128xf32, #tpu.memory_space<vmem>>, vector<1x1x24x1xf32>
    %605 = vector.shape_cast %604 : vector<1x1x24x1xf32> to vector<24x1xf32>
    %606 = vector.shape_cast %603 : vector<24x1xf32> to vector<1x1x24x1xf32>
    tpu.vector_store %arg9[%c0_239, %c0_240, %c48_241, %c6_242], %606 {strides = array<i32>} : memref<1x1x96x128xf32, #tpu.memory_space<vmem>>, vector<1x1x24x1xf32>,
    %607 = vector.broadcast %570 : vector<24x1xf32> to vector<24x128xf32>
    %608 = arith.cmpf olt, %537, %607 : vector<24x128xf32>
    %cst_243 = arith.constant 0.000000e+00 : f32
    %609 = vector.broadcast %cst_243 : f32 to vector<24x128xf32>
    %610 = arith.select %608, %554, %609 : vector<24x128xi1>, vector<24x128xf32>
    %611 = arith.mulf %610, %559 : vector<24x128xf32>
    %c1_i32_244 = arith.constant 1 : i32
    %612 = tpu.dynamic_rotate %611 by %c1_i32_244 dim 1 : vector<24x128xf32>, i32 -> vector<24x128xf32>
    %cst_245 = arith.constant 0.000000e+00 : f32
    %613 = vector.shape_cast %47 : vector<1x128xi1> to vector<1x128xi1>
    %614 = vector.broadcast %613 : vector<1x128xi1> to vector<24x128xi1>
    %615 = vector.broadcast %cst_245 : f32 to vector<24x128xf32>
    %616 = arith.select %614, %612, %615 : vector<24x128xi1>, vector<24x128xf32>
    %c1_i32_246 = arith.constant 1 : i32
    %617 = tpu.dynamic_rotate %616 by %c1_i32_246 dim 1 : vector<24x128xf32>, i32 -> vector<24x128xf32>
    %cst_247 = arith.constant 0.000000e+00 : f32
    %618 = vector.shape_cast %47 : vector<1x128xi1> to vector<1x128xi1>
    %619 = vector.broadcast %618 : vector<1x128xi1> to vector<24x128xi1>
    %620 = vector.broadcast %cst_247 : f32 to vector<24x128xf32>
    %621 = arith.select %619, %617, %620 : vector<24x128xi1>, vector<24x128xf32>
    %622 = arith.maximumf %616, %621 : vector<24x128xf32>
    %c2_i32_248 = arith.constant 2 : i32
    %623 = tpu.dynamic_rotate %622 by %c2_i32_248 dim 1 : vector<24x128xf32>, i32 -> vector<24x128xf32>
    %cst_249 = arith.constant 0.000000e+00 : f32
    %624 = vector.shape_cast %49 : vector<1x128xi1> to vector<1x128xi1>
    %625 = vector.broadcast %624 : vector<1x128xi1> to vector<24x128xi1>
    %626 = vector.broadcast %cst_249 : f32 to vector<24x128xf32>
    %627 = arith.select %625, %623, %626 : vector<24x128xi1>, vector<24x128xf32>
    %628 = arith.maximumf %622, %627 : vector<24x128xf32>
    %c4_i32_250 = arith.constant 4 : i32
    %629 = tpu.dynamic_rotate %628 by %c4_i32_250 dim 1 : vector<24x128xf32>, i32 -> vector<24x128xf32>
    %cst_251 = arith.constant 0.000000e+00 : f32
    %630 = vector.shape_cast %51 : vector<1x128xi1> to vector<1x128xi1>
    %631 = vector.broadcast %630 : vector<1x128xi1> to vector<24x128xi1>
    %632 = vector.broadcast %cst_251 : f32 to vector<24x128xf32>
    %633 = arith.select %631, %629, %632 : vector<24x128xi1>, vector<24x128xf32>
    %634 = arith.maximumf %628, %633 : vector<24x128xf32>
    %c8_i32_252 = arith.constant 8 : i32
    %635 = tpu.dynamic_rotate %634 by %c8_i32_252 dim 1 : vector<24x128xf32>, i32 -> vector<24x128xf32>
    %cst_253 = arith.constant 0.000000e+00 : f32
    %636 = vector.shape_cast %53 : vector<1x128xi1> to vector<1x128xi1>
    %637 = vector.broadcast %636 : vector<1x128xi1> to vector<24x128xi1>
    %638 = vector.broadcast %cst_253 : f32 to vector<24x128xf32>
    %639 = arith.select %637, %635, %638 : vector<24x128xi1>, vector<24x128xf32>
    %640 = arith.maximumf %634, %639 : vector<24x128xf32>
    %c16_i32_254 = arith.constant 16 : i32
    %641 = tpu.dynamic_rotate %640 by %c16_i32_254 dim 1 : vector<24x128xf32>, i32 -> vector<24x128xf32>
    %cst_255 = arith.constant 0.000000e+00 : f32
    %642 = vector.shape_cast %55 : vector<1x128xi1> to vector<1x128xi1>
    %643 = vector.broadcast %642 : vector<1x128xi1> to vector<24x128xi1>
    %644 = vector.broadcast %cst_255 : f32 to vector<24x128xf32>
    %645 = arith.select %643, %641, %644 : vector<24x128xi1>, vector<24x128xf32>
    %646 = arith.maximumf %640, %645 : vector<24x128xf32>
    %c32_i32_256 = arith.constant 32 : i32
    %647 = tpu.dynamic_rotate %646 by %c32_i32_256 dim 1 : vector<24x128xf32>, i32 -> vector<24x128xf32>
    %cst_257 = arith.constant 0.000000e+00 : f32
    %648 = vector.shape_cast %57 : vector<1x128xi1> to vector<1x128xi1>
    %649 = vector.broadcast %648 : vector<1x128xi1> to vector<24x128xi1>
    %650 = vector.broadcast %cst_257 : f32 to vector<24x128xf32>
    %651 = arith.select %649, %647, %650 : vector<24x128xi1>, vector<24x128xf32>
    %652 = arith.maximumf %646, %651 : vector<24x128xf32>
    %c64_i32_258 = arith.constant 64 : i32
    %653 = tpu.dynamic_rotate %652 by %c64_i32_258 dim 1 : vector<24x128xf32>, i32 -> vector<24x128xf32>
    %cst_259 = arith.constant 0.000000e+00 : f32
    %654 = vector.shape_cast %59 : vector<1x128xi1> to vector<1x128xi1>
    %655 = vector.broadcast %654 : vector<1x128xi1> to vector<24x128xi1>
    %656 = vector.broadcast %cst_259 : f32 to vector<24x128xf32>
    %657 = arith.select %655, %653, %656 : vector<24x128xi1>, vector<24x128xf32>
    %658 = arith.maximumf %652, %657 : vector<24x128xf32>
    %659 = arith.subf %559, %658 : vector<24x128xf32>
    %660 = arith.mulf %610, %659 : vector<24x128xf32>
    %cst_260 = arith.constant dense<0xFF800000> : vector<24xf32>
    %661 = vector.multi_reduction <maximumf>, %660, %cst_260 [1] : vector<24x128xf32> to vector<24xf32>
    %662 = vector.shape_cast %661 : vector<24xf32> to vector<24x1xf32>
    %cst_261 = arith.constant dense<0xFF800000> : vector<24xf32>
    %663 = vector.multi_reduction <maximumf>, %611, %cst_261 [1] : vector<24x128xf32> to vector<24xf32>
    %664 = vector.shape_cast %663 : vector<24xf32> to vector<24x1xf32>
    %665 = arith.subf %568, %664 : vector<24x1xf32>
    %666 = arith.maximumf %662, %665 : vector<24x1xf32>
    %c0_262 = arith.constant 0 : index
    %c0_263 = arith.constant 0 : index
    %c48_264 = arith.constant 48 : index
    %c2_265 = arith.constant 2 : index
    %667 = vector.load %arg9[%c0_262, %c0_263, %c48_264, %c2_265] : memref<1x1x96x128xf32, #tpu.memory_space<vmem>>, vector<1x1x24x1xf32>
    %668 = vector.shape_cast %667 : vector<1x1x24x1xf32> to vector<24x1xf32>
    %669 = vector.shape_cast %666 : vector<24x1xf32> to vector<1x1x24x1xf32>
    tpu.vector_store %arg9[%c0_262, %c0_263, %c48_264, %c2_265], %669 {strides = array<i32>} : memref<1x1x96x128xf32, #tpu.memory_space<vmem>>, vector<1x1x24x1xf32>,
    %c0_266 = arith.constant 0 : index
    %c48_267 = arith.constant 48 : index
    %c1_268 = arith.constant 1 : index
    %670 = vector.load %arg8[%c0_266, %c48_267, %c1_268] : memref<1x96x2xf32, #tpu.memory_space<vmem>>, vector<1x24x1xf32>
    %671 = vector.shape_cast %670 : vector<1x24x1xf32> to vector<24x1xf32>
    %672 = vector.broadcast %671 : vector<24x1xf32> to vector<24x128xf32>
    %673 = arith.cmpf ogt, %537, %672 : vector<24x128xf32>
    %cst_269 = arith.constant 0.000000e+00 : f32
    %674 = vector.broadcast %cst_269 : f32 to vector<24x128xf32>
    %675 = arith.select %673, %554, %674 : vector<24x128xi1>, vector<24x128xf32>
    %cst_270 = arith.constant dense<0.000000e+00> : vector<24xf32>
    %676 = vector.multi_reduction <add>, %675, %cst_270 [1] : vector<24x128xf32> to vector<24xf32>
    %677 = vector.shape_cast %676 : vector<24xf32> to vector<24x1xf32>
    %678 = arith.mulf %675, %537 : vector<24x128xf32>
    %cst_271 = arith.constant dense<0.000000e+00> : vector<24xf32>
    %679 = vector.multi_reduction <add>, %678, %cst_271 [1] : vector<24x128xf32> to vector<24xf32>
    %680 = vector.shape_cast %679 : vector<24xf32> to vector<24x1xf32>
    %681 = arith.mulf %675, %559 : vector<24x128xf32>
    %cst_272 = arith.constant dense<0.000000e+00> : vector<24xf32>
    %682 = vector.multi_reduction <add>, %681, %cst_272 [1] : vector<24x128xf32> to vector<24xf32>
    %683 = vector.shape_cast %682 : vector<24xf32> to vector<24x1xf32>
    %cst_273 = arith.constant 0.000000e+00 : f32
    %684 = vector.broadcast %cst_273 : f32 to vector<24x1xf32>
    %685 = arith.cmpf ogt, %677, %684 : vector<24x1xf32>
    %cst_274 = arith.constant 1.000000e+00 : f32
    %686 = vector.broadcast %cst_274 : f32 to vector<24x1xf32>
    %687 = arith.divf %686, %677 : vector<24x1xf32>
    %cst_275 = arith.constant 0.000000e+00 : f32
    %688 = vector.broadcast %cst_275 : f32 to vector<24x1xf32>
    %689 = arith.select %685, %687, %688 : vector<24x1xi1>, vector<24x1xf32>
    %690 = arith.mulf %677, %566 : vector<24x1xf32>
    %c0_276 = arith.constant 0 : index
    %c0_277 = arith.constant 0 : index
    %c48_278 = arith.constant 48 : index
    %c1_279 = arith.constant 1 : index
    %691 = vector.load %arg9[%c0_276, %c0_277, %c48_278, %c1_279] : memref<1x1x96x128xf32, #tpu.memory_space<vmem>>, vector<1x1x24x1xf32>
    %692 = vector.shape_cast %691 : vector<1x1x24x1xf32> to vector<24x1xf32>
    %693 = vector.shape_cast %690 : vector<24x1xf32> to vector<1x1x24x1xf32>
    tpu.vector_store %arg9[%c0_276, %c0_277, %c48_278, %c1_279], %693 {strides = array<i32>} : memref<1x1x96x128xf32, #tpu.memory_space<vmem>>, vector<1x1x24x1xf32>,
    %694 = arith.mulf %671, %677 : vector<24x1xf32>
    %695 = arith.addf %680, %694 : vector<24x1xf32>
    %696 = arith.mulf %695, %689 : vector<24x1xf32>
    %c0_280 = arith.constant 0 : index
    %c0_281 = arith.constant 0 : index
    %c48_282 = arith.constant 48 : index
    %c5_283 = arith.constant 5 : index
    %697 = vector.load %arg9[%c0_280, %c0_281, %c48_282, %c5_283] : memref<1x1x96x128xf32, #tpu.memory_space<vmem>>, vector<1x1x24x1xf32>
    %698 = vector.shape_cast %697 : vector<1x1x24x1xf32> to vector<24x1xf32>
    %699 = vector.shape_cast %696 : vector<24x1xf32> to vector<1x1x24x1xf32>
    tpu.vector_store %arg9[%c0_280, %c0_281, %c48_282, %c5_283], %699 {strides = array<i32>} : memref<1x1x96x128xf32, #tpu.memory_space<vmem>>, vector<1x1x24x1xf32>,
    %cst_284 = arith.constant 0.000000e+00 : f32
    %700 = vector.broadcast %cst_284 : f32 to vector<24x1xf32>
    %701 = arith.cmpf ogt, %677, %700 : vector<24x1xf32>
    %702 = arith.mulf %683, %689 : vector<24x1xf32>
    %cst_285 = arith.constant -1.000000e+00 : f32
    %703 = vector.broadcast %cst_285 : f32 to vector<24x1xf32>
    %704 = arith.select %701, %702, %703 : vector<24x1xi1>, vector<24x1xf32>
    %c0_286 = arith.constant 0 : index
    %c0_287 = arith.constant 0 : index
    %c48_288 = arith.constant 48 : index
    %c7_289 = arith.constant 7 : index
    %705 = vector.load %arg9[%c0_286, %c0_287, %c48_288, %c7_289] : memref<1x1x96x128xf32, #tpu.memory_space<vmem>>, vector<1x1x24x1xf32>
    %706 = vector.shape_cast %705 : vector<1x1x24x1xf32> to vector<24x1xf32>
    %707 = vector.shape_cast %704 : vector<24x1xf32> to vector<1x1x24x1xf32>
    tpu.vector_store %arg9[%c0_286, %c0_287, %c48_288, %c7_289], %707 {strides = array<i32>} : memref<1x1x96x128xf32, #tpu.memory_space<vmem>>, vector<1x1x24x1xf32>,
    %708 = vector.broadcast %671 : vector<24x1xf32> to vector<24x128xf32>
    %709 = arith.cmpf olt, %537, %708 : vector<24x128xf32>
    %cst_290 = arith.constant 0.000000e+00 : f32
    %710 = vector.broadcast %cst_290 : f32 to vector<24x128xf32>
    %711 = arith.select %709, %554, %710 : vector<24x128xi1>, vector<24x128xf32>
    %712 = arith.mulf %711, %559 : vector<24x128xf32>
    %c1_i32_291 = arith.constant 1 : i32
    %713 = tpu.dynamic_rotate %712 by %c1_i32_291 dim 1 : vector<24x128xf32>, i32 -> vector<24x128xf32>
    %cst_292 = arith.constant 0.000000e+00 : f32
    %714 = vector.shape_cast %47 : vector<1x128xi1> to vector<1x128xi1>
    %715 = vector.broadcast %714 : vector<1x128xi1> to vector<24x128xi1>
    %716 = vector.broadcast %cst_292 : f32 to vector<24x128xf32>
    %717 = arith.select %715, %713, %716 : vector<24x128xi1>, vector<24x128xf32>
    %c1_i32_293 = arith.constant 1 : i32
    %718 = tpu.dynamic_rotate %717 by %c1_i32_293 dim 1 : vector<24x128xf32>, i32 -> vector<24x128xf32>
    %cst_294 = arith.constant 0.000000e+00 : f32
    %719 = vector.shape_cast %47 : vector<1x128xi1> to vector<1x128xi1>
    %720 = vector.broadcast %719 : vector<1x128xi1> to vector<24x128xi1>
    %721 = vector.broadcast %cst_294 : f32 to vector<24x128xf32>
    %722 = arith.select %720, %718, %721 : vector<24x128xi1>, vector<24x128xf32>
    %723 = arith.maximumf %717, %722 : vector<24x128xf32>
    %c2_i32_295 = arith.constant 2 : i32
    %724 = tpu.dynamic_rotate %723 by %c2_i32_295 dim 1 : vector<24x128xf32>, i32 -> vector<24x128xf32>
    %cst_296 = arith.constant 0.000000e+00 : f32
    %725 = vector.shape_cast %49 : vector<1x128xi1> to vector<1x128xi1>
    %726 = vector.broadcast %725 : vector<1x128xi1> to vector<24x128xi1>
    %727 = vector.broadcast %cst_296 : f32 to vector<24x128xf32>
    %728 = arith.select %726, %724, %727 : vector<24x128xi1>, vector<24x128xf32>
    %729 = arith.maximumf %723, %728 : vector<24x128xf32>
    %c4_i32_297 = arith.constant 4 : i32
    %730 = tpu.dynamic_rotate %729 by %c4_i32_297 dim 1 : vector<24x128xf32>, i32 -> vector<24x128xf32>
    %cst_298 = arith.constant 0.000000e+00 : f32
    %731 = vector.shape_cast %51 : vector<1x128xi1> to vector<1x128xi1>
    %732 = vector.broadcast %731 : vector<1x128xi1> to vector<24x128xi1>
    %733 = vector.broadcast %cst_298 : f32 to vector<24x128xf32>
    %734 = arith.select %732, %730, %733 : vector<24x128xi1>, vector<24x128xf32>
    %735 = arith.maximumf %729, %734 : vector<24x128xf32>
    %c8_i32_299 = arith.constant 8 : i32
    %736 = tpu.dynamic_rotate %735 by %c8_i32_299 dim 1 : vector<24x128xf32>, i32 -> vector<24x128xf32>
    %cst_300 = arith.constant 0.000000e+00 : f32
    %737 = vector.shape_cast %53 : vector<1x128xi1> to vector<1x128xi1>
    %738 = vector.broadcast %737 : vector<1x128xi1> to vector<24x128xi1>
    %739 = vector.broadcast %cst_300 : f32 to vector<24x128xf32>
    %740 = arith.select %738, %736, %739 : vector<24x128xi1>, vector<24x128xf32>
    %741 = arith.maximumf %735, %740 : vector<24x128xf32>
    %c16_i32_301 = arith.constant 16 : i32
    %742 = tpu.dynamic_rotate %741 by %c16_i32_301 dim 1 : vector<24x128xf32>, i32 -> vector<24x128xf32>
    %cst_302 = arith.constant 0.000000e+00 : f32
    %743 = vector.shape_cast %55 : vector<1x128xi1> to vector<1x128xi1>
    %744 = vector.broadcast %743 : vector<1x128xi1> to vector<24x128xi1>
    %745 = vector.broadcast %cst_302 : f32 to vector<24x128xf32>
    %746 = arith.select %744, %742, %745 : vector<24x128xi1>, vector<24x128xf32>
    %747 = arith.maximumf %741, %746 : vector<24x128xf32>
    %c32_i32_303 = arith.constant 32 : i32
    %748 = tpu.dynamic_rotate %747 by %c32_i32_303 dim 1 : vector<24x128xf32>, i32 -> vector<24x128xf32>
    %cst_304 = arith.constant 0.000000e+00 : f32
    %749 = vector.shape_cast %57 : vector<1x128xi1> to vector<1x128xi1>
    %750 = vector.broadcast %749 : vector<1x128xi1> to vector<24x128xi1>
    %751 = vector.broadcast %cst_304 : f32 to vector<24x128xf32>
    %752 = arith.select %750, %748, %751 : vector<24x128xi1>, vector<24x128xf32>
    %753 = arith.maximumf %747, %752 : vector<24x128xf32>
    %c64_i32_305 = arith.constant 64 : i32
    %754 = tpu.dynamic_rotate %753 by %c64_i32_305 dim 1 : vector<24x128xf32>, i32 -> vector<24x128xf32>
    %cst_306 = arith.constant 0.000000e+00 : f32
    %755 = vector.shape_cast %59 : vector<1x128xi1> to vector<1x128xi1>
    %756 = vector.broadcast %755 : vector<1x128xi1> to vector<24x128xi1>
    %757 = vector.broadcast %cst_306 : f32 to vector<24x128xf32>
    %758 = arith.select %756, %754, %757 : vector<24x128xi1>, vector<24x128xf32>
    %759 = arith.maximumf %753, %758 : vector<24x128xf32>
    %760 = arith.subf %559, %759 : vector<24x128xf32>
    %761 = arith.mulf %711, %760 : vector<24x128xf32>
    %cst_307 = arith.constant dense<0xFF800000> : vector<24xf32>
    %762 = vector.multi_reduction <maximumf>, %761, %cst_307 [1] : vector<24x128xf32> to vector<24xf32>
    %763 = vector.shape_cast %762 : vector<24xf32> to vector<24x1xf32>
    %cst_308 = arith.constant dense<0xFF800000> : vector<24xf32>
    %764 = vector.multi_reduction <maximumf>, %712, %cst_308 [1] : vector<24x128xf32> to vector<24xf32>
    %765 = vector.shape_cast %764 : vector<24xf32> to vector<24x1xf32>
    %766 = arith.subf %568, %765 : vector<24x1xf32>
    %767 = arith.maximumf %763, %766 : vector<24x1xf32>
    %c0_309 = arith.constant 0 : index
    %c0_310 = arith.constant 0 : index
    %c48_311 = arith.constant 48 : index
    %c3_312 = arith.constant 3 : index
    %768 = vector.load %arg9[%c0_309, %c0_310, %c48_311, %c3_312] : memref<1x1x96x128xf32, #tpu.memory_space<vmem>>, vector<1x1x24x1xf32>
    %769 = vector.shape_cast %768 : vector<1x1x24x1xf32> to vector<24x1xf32>
    %770 = vector.shape_cast %767 : vector<24x1xf32> to vector<1x1x24x1xf32>
    tpu.vector_store %arg9[%c0_309, %c0_310, %c48_311, %c3_312], %770 {strides = array<i32>} : memref<1x1x96x128xf32, #tpu.memory_space<vmem>>, vector<1x1x24x1xf32>,
    %c72 = arith.constant 72 : index
    %c0_313 = arith.constant 0 : index
    %771 = vector.load %arg7[%c72, %c0_313] : memref<96x16xf32, #tpu.memory_space<vmem>>, vector<24x16xf32>
    %cst_314 = arith.constant dense<0.000000e+00> : vector<24x128xf32>
    %772 = tpu.matmul %771, %22, %cst_314 {dimension_numbers = #tpu.dot_dimension_numbers<[1], [0], [0], [1], [0, 0, 1, 1], [], []>} : vector<24x16xf32>, vector<16x128xf32>, vector<24x128xf32> -> vector<24x128xf32>
    %cst_315 = arith.constant dense<0.000000e+00> : vector<24x128xf32>
    %773 = tpu.matmul %771, %23, %cst_315 {dimension_numbers = #tpu.dot_dimension_numbers<[1], [0], [0], [1], [0, 0, 1, 1], [], []>} : vector<24x16xf32>, vector<16x128xf32>, vector<24x128xf32> -> vector<24x128xf32>
    %774 = arith.addf %772, %773 : vector<24x128xf32>
    %775 = tpu.iota {dimensions = array<i32: 0>} : vector<24x1xi32>
    %c72_i32 = arith.constant 72 : i32
    %776 = vector.broadcast %c72_i32 : i32 to vector<24x1xi32>
    %777 = arith.addi %776, %775 : vector<24x1xi32>
    %778 = vector.broadcast %28 : i32 to vector<24x1xi32>
    %779 = arith.addi %777, %778 : vector<24x1xi32>
    %c1_i32_316 = arith.constant 1 : i32
    %780 = vector.broadcast %c1_i32_316 : i32 to vector<24x1xi32>
    %781 = arith.andi %779, %780 : vector<24x1xi32>
    %782 = arith.sitofp %781 : vector<24x1xi32> to vector<24x1xf32>
    %c1_i32_317 = arith.constant 1 : i32
    %783 = vector.broadcast %c1_i32_317 : i32 to vector<24x1xi32>
    %784 = arith.cmpi eq, %781, %783 : vector<24x1xi32>
    %785 = vector.shape_cast %784 : vector<24x1xi1> to vector<24x1xi1>
    %786 = vector.broadcast %785 : vector<24x1xi1> to vector<24x128xi1>
    %787 = vector.shape_cast %45 : vector<1x128xf32> to vector<1x128xf32>
    %788 = vector.broadcast %787 : vector<1x128xf32> to vector<24x128xf32>
    %789 = vector.shape_cast %37 : vector<1x128xf32> to vector<1x128xf32>
    %790 = vector.broadcast %789 : vector<1x128xf32> to vector<24x128xf32>
    %791 = arith.select %786, %788, %790 : vector<24x128xi1>, vector<24x128xf32>
    %792 = vector.broadcast %26 : f32 to vector<24x1xf32>
    %793 = arith.mulf %792, %782 : vector<24x1xf32>
    %794 = vector.broadcast %33 : vector<1x128xf32> to vector<24x128xf32>
    %795 = vector.broadcast %793 : vector<24x1xf32> to vector<24x128xf32>
    %796 = arith.subf %794, %795 : vector<24x128xf32>
    %cst_318 = arith.constant 2.000000e+00 : f32
    %797 = arith.mulf %cst_318, %26 : f32
    %798 = vector.broadcast %797 : f32 to vector<24x1xf32>
    %799 = arith.mulf %798, %782 : vector<24x1xf32>
    %800 = vector.broadcast %31 : f32 to vector<24x1xf32>
    %801 = arith.subf %800, %799 : vector<24x1xf32>
    %cst_319 = arith.constant 1.000000e+00 : f32
    %802 = vector.broadcast %cst_319 : f32 to vector<24x1xf32>
    %803 = arith.divf %802, %801 : vector<24x1xf32>
    %cst_320 = arith.constant 1.000000e+00 : f32
    %804 = vector.broadcast %cst_320 : f32 to vector<24x1xf32>
    %805 = arith.subf %801, %804 : vector<24x1xf32>
    %c0_321 = arith.constant 0 : index
    %c72_322 = arith.constant 72 : index
    %c0_323 = arith.constant 0 : index
    %806 = vector.load %arg8[%c0_321, %c72_322, %c0_323] : memref<1x96x2xf32, #tpu.memory_space<vmem>>, vector<1x24x1xf32>
    %807 = vector.shape_cast %806 : vector<1x24x1xf32> to vector<24x1xf32>
    %808 = vector.broadcast %807 : vector<24x1xf32> to vector<24x128xf32>
    %809 = arith.cmpf ogt, %774, %808 : vector<24x128xf32>
    %cst_324 = arith.constant 0.000000e+00 : f32
    %810 = vector.broadcast %cst_324 : f32 to vector<24x128xf32>
    %811 = arith.select %809, %791, %810 : vector<24x128xi1>, vector<24x128xf32>
    %cst_325 = arith.constant dense<0.000000e+00> : vector<24xf32>
    %812 = vector.multi_reduction <add>, %811, %cst_325 [1] : vector<24x128xf32> to vector<24xf32>
    %813 = vector.shape_cast %812 : vector<24xf32> to vector<24x1xf32>
    %814 = arith.mulf %811, %774 : vector<24x128xf32>
    %cst_326 = arith.constant dense<0.000000e+00> : vector<24xf32>
    %815 = vector.multi_reduction <add>, %814, %cst_326 [1] : vector<24x128xf32> to vector<24xf32>
    %816 = vector.shape_cast %815 : vector<24xf32> to vector<24x1xf32>
    %817 = arith.mulf %811, %796 : vector<24x128xf32>
    %cst_327 = arith.constant dense<0.000000e+00> : vector<24xf32>
    %818 = vector.multi_reduction <add>, %817, %cst_327 [1] : vector<24x128xf32> to vector<24xf32>
    %819 = vector.shape_cast %818 : vector<24xf32> to vector<24x1xf32>
    %cst_328 = arith.constant 0.000000e+00 : f32
    %820 = vector.broadcast %cst_328 : f32 to vector<24x1xf32>
    %821 = arith.cmpf ogt, %813, %820 : vector<24x1xf32>
    %cst_329 = arith.constant 1.000000e+00 : f32
    %822 = vector.broadcast %cst_329 : f32 to vector<24x1xf32>
    %823 = arith.divf %822, %813 : vector<24x1xf32>
    %cst_330 = arith.constant 0.000000e+00 : f32
    %824 = vector.broadcast %cst_330 : f32 to vector<24x1xf32>
    %825 = arith.select %821, %823, %824 : vector<24x1xi1>, vector<24x1xf32>
    %826 = arith.mulf %813, %803 : vector<24x1xf32>
    %c0_331 = arith.constant 0 : index
    %c0_332 = arith.constant 0 : index
    %c72_333 = arith.constant 72 : index
    %c0_334 = arith.constant 0 : index
    %827 = vector.load %arg9[%c0_331, %c0_332, %c72_333, %c0_334] : memref<1x1x96x128xf32, #tpu.memory_space<vmem>>, vector<1x1x24x1xf32>
    %828 = vector.shape_cast %827 : vector<1x1x24x1xf32> to vector<24x1xf32>
    %829 = vector.shape_cast %826 : vector<24x1xf32> to vector<1x1x24x1xf32>
    tpu.vector_store %arg9[%c0_331, %c0_332, %c72_333, %c0_334], %829 {strides = array<i32>} : memref<1x1x96x128xf32, #tpu.memory_space<vmem>>, vector<1x1x24x1xf32>,
    %830 = arith.mulf %807, %813 : vector<24x1xf32>
    %831 = arith.addf %816, %830 : vector<24x1xf32>
    %832 = arith.mulf %831, %825 : vector<24x1xf32>
    %c0_335 = arith.constant 0 : index
    %c0_336 = arith.constant 0 : index
    %c72_337 = arith.constant 72 : index
    %c4_338 = arith.constant 4 : index
    %833 = vector.load %arg9[%c0_335, %c0_336, %c72_337, %c4_338] : memref<1x1x96x128xf32, #tpu.memory_space<vmem>>, vector<1x1x24x1xf32>
    %834 = vector.shape_cast %833 : vector<1x1x24x1xf32> to vector<24x1xf32>
    %835 = vector.shape_cast %832 : vector<24x1xf32> to vector<1x1x24x1xf32>
    tpu.vector_store %arg9[%c0_335, %c0_336, %c72_337, %c4_338], %835 {strides = array<i32>} : memref<1x1x96x128xf32, #tpu.memory_space<vmem>>, vector<1x1x24x1xf32>,
    %cst_339 = arith.constant 0.000000e+00 : f32
    %836 = vector.broadcast %cst_339 : f32 to vector<24x1xf32>
    %837 = arith.cmpf ogt, %813, %836 : vector<24x1xf32>
    %838 = arith.mulf %819, %825 : vector<24x1xf32>
    %cst_340 = arith.constant -1.000000e+00 : f32
    %839 = vector.broadcast %cst_340 : f32 to vector<24x1xf32>
    %840 = arith.select %837, %838, %839 : vector<24x1xi1>, vector<24x1xf32>
    %c0_341 = arith.constant 0 : index
    %c0_342 = arith.constant 0 : index
    %c72_343 = arith.constant 72 : index
    %c6_344 = arith.constant 6 : index
    %841 = vector.load %arg9[%c0_341, %c0_342, %c72_343, %c6_344] : memref<1x1x96x128xf32, #tpu.memory_space<vmem>>, vector<1x1x24x1xf32>
    %842 = vector.shape_cast %841 : vector<1x1x24x1xf32> to vector<24x1xf32>
    %843 = vector.shape_cast %840 : vector<24x1xf32> to vector<1x1x24x1xf32>
    tpu.vector_store %arg9[%c0_341, %c0_342, %c72_343, %c6_344], %843 {strides = array<i32>} : memref<1x1x96x128xf32, #tpu.memory_space<vmem>>, vector<1x1x24x1xf32>,
    %844 = vector.broadcast %807 : vector<24x1xf32> to vector<24x128xf32>
    %845 = arith.cmpf olt, %774, %844 : vector<24x128xf32>
    %cst_345 = arith.constant 0.000000e+00 : f32
    %846 = vector.broadcast %cst_345 : f32 to vector<24x128xf32>
    %847 = arith.select %845, %791, %846 : vector<24x128xi1>, vector<24x128xf32>
    %848 = arith.mulf %847, %796 : vector<24x128xf32>
    %c1_i32_346 = arith.constant 1 : i32
    %849 = tpu.dynamic_rotate %848 by %c1_i32_346 dim 1 : vector<24x128xf32>, i32 -> vector<24x128xf32>
    %cst_347 = arith.constant 0.000000e+00 : f32
    %850 = vector.shape_cast %47 : vector<1x128xi1> to vector<1x128xi1>
    %851 = vector.broadcast %850 : vector<1x128xi1> to vector<24x128xi1>
    %852 = vector.broadcast %cst_347 : f32 to vector<24x128xf32>
    %853 = arith.select %851, %849, %852 : vector<24x128xi1>, vector<24x128xf32>
    %c1_i32_348 = arith.constant 1 : i32
    %854 = tpu.dynamic_rotate %853 by %c1_i32_348 dim 1 : vector<24x128xf32>, i32 -> vector<24x128xf32>
    %cst_349 = arith.constant 0.000000e+00 : f32
    %855 = vector.shape_cast %47 : vector<1x128xi1> to vector<1x128xi1>
    %856 = vector.broadcast %855 : vector<1x128xi1> to vector<24x128xi1>
    %857 = vector.broadcast %cst_349 : f32 to vector<24x128xf32>
    %858 = arith.select %856, %854, %857 : vector<24x128xi1>, vector<24x128xf32>
    %859 = arith.maximumf %853, %858 : vector<24x128xf32>
    %c2_i32_350 = arith.constant 2 : i32
    %860 = tpu.dynamic_rotate %859 by %c2_i32_350 dim 1 : vector<24x128xf32>, i32 -> vector<24x128xf32>
    %cst_351 = arith.constant 0.000000e+00 : f32
    %861 = vector.shape_cast %49 : vector<1x128xi1> to vector<1x128xi1>
    %862 = vector.broadcast %861 : vector<1x128xi1> to vector<24x128xi1>
    %863 = vector.broadcast %cst_351 : f32 to vector<24x128xf32>
    %864 = arith.select %862, %860, %863 : vector<24x128xi1>, vector<24x128xf32>
    %865 = arith.maximumf %859, %864 : vector<24x128xf32>
    %c4_i32_352 = arith.constant 4 : i32
    %866 = tpu.dynamic_rotate %865 by %c4_i32_352 dim 1 : vector<24x128xf32>, i32 -> vector<24x128xf32>
    %cst_353 = arith.constant 0.000000e+00 : f32
    %867 = vector.shape_cast %51 : vector<1x128xi1> to vector<1x128xi1>
    %868 = vector.broadcast %867 : vector<1x128xi1> to vector<24x128xi1>
    %869 = vector.broadcast %cst_353 : f32 to vector<24x128xf32>
    %870 = arith.select %868, %866, %869 : vector<24x128xi1>, vector<24x128xf32>
    %871 = arith.maximumf %865, %870 : vector<24x128xf32>
    %c8_i32_354 = arith.constant 8 : i32
    %872 = tpu.dynamic_rotate %871 by %c8_i32_354 dim 1 : vector<24x128xf32>, i32 -> vector<24x128xf32>
    %cst_355 = arith.constant 0.000000e+00 : f32
    %873 = vector.shape_cast %53 : vector<1x128xi1> to vector<1x128xi1>
    %874 = vector.broadcast %873 : vector<1x128xi1> to vector<24x128xi1>
    %875 = vector.broadcast %cst_355 : f32 to vector<24x128xf32>
    %876 = arith.select %874, %872, %875 : vector<24x128xi1>, vector<24x128xf32>
    %877 = arith.maximumf %871, %876 : vector<24x128xf32>
    %c16_i32_356 = arith.constant 16 : i32
    %878 = tpu.dynamic_rotate %877 by %c16_i32_356 dim 1 : vector<24x128xf32>, i32 -> vector<24x128xf32>
    %cst_357 = arith.constant 0.000000e+00 : f32
    %879 = vector.shape_cast %55 : vector<1x128xi1> to vector<1x128xi1>
    %880 = vector.broadcast %879 : vector<1x128xi1> to vector<24x128xi1>
    %881 = vector.broadcast %cst_357 : f32 to vector<24x128xf32>
    %882 = arith.select %880, %878, %881 : vector<24x128xi1>, vector<24x128xf32>
    %883 = arith.maximumf %877, %882 : vector<24x128xf32>
    %c32_i32_358 = arith.constant 32 : i32
    %884 = tpu.dynamic_rotate %883 by %c32_i32_358 dim 1 : vector<24x128xf32>, i32 -> vector<24x128xf32>
    %cst_359 = arith.constant 0.000000e+00 : f32
    %885 = vector.shape_cast %57 : vector<1x128xi1> to vector<1x128xi1>
    %886 = vector.broadcast %885 : vector<1x128xi1> to vector<24x128xi1>
    %887 = vector.broadcast %cst_359 : f32 to vector<24x128xf32>
    %888 = arith.select %886, %884, %887 : vector<24x128xi1>, vector<24x128xf32>
    %889 = arith.maximumf %883, %888 : vector<24x128xf32>
    %c64_i32_360 = arith.constant 64 : i32
    %890 = tpu.dynamic_rotate %889 by %c64_i32_360 dim 1 : vector<24x128xf32>, i32 -> vector<24x128xf32>
    %cst_361 = arith.constant 0.000000e+00 : f32
    %891 = vector.shape_cast %59 : vector<1x128xi1> to vector<1x128xi1>
    %892 = vector.broadcast %891 : vector<1x128xi1> to vector<24x128xi1>
    %893 = vector.broadcast %cst_361 : f32 to vector<24x128xf32>
    %894 = arith.select %892, %890, %893 : vector<24x128xi1>, vector<24x128xf32>
    %895 = arith.maximumf %889, %894 : vector<24x128xf32>
    %896 = arith.subf %796, %895 : vector<24x128xf32>
    %897 = arith.mulf %847, %896 : vector<24x128xf32>
    %cst_362 = arith.constant dense<0xFF800000> : vector<24xf32>
    %898 = vector.multi_reduction <maximumf>, %897, %cst_362 [1] : vector<24x128xf32> to vector<24xf32>
    %899 = vector.shape_cast %898 : vector<24xf32> to vector<24x1xf32>
    %cst_363 = arith.constant dense<0xFF800000> : vector<24xf32>
    %900 = vector.multi_reduction <maximumf>, %848, %cst_363 [1] : vector<24x128xf32> to vector<24xf32>
    %901 = vector.shape_cast %900 : vector<24xf32> to vector<24x1xf32>
    %902 = arith.subf %805, %901 : vector<24x1xf32>
    %903 = arith.maximumf %899, %902 : vector<24x1xf32>
    %c0_364 = arith.constant 0 : index
    %c0_365 = arith.constant 0 : index
    %c72_366 = arith.constant 72 : index
    %c2_367 = arith.constant 2 : index
    %904 = vector.load %arg9[%c0_364, %c0_365, %c72_366, %c2_367] : memref<1x1x96x128xf32, #tpu.memory_space<vmem>>, vector<1x1x24x1xf32>
    %905 = vector.shape_cast %904 : vector<1x1x24x1xf32> to vector<24x1xf32>
    %906 = vector.shape_cast %903 : vector<24x1xf32> to vector<1x1x24x1xf32>
    tpu.vector_store %arg9[%c0_364, %c0_365, %c72_366, %c2_367], %906 {strides = array<i32>} : memref<1x1x96x128xf32, #tpu.memory_space<vmem>>, vector<1x1x24x1xf32>,
    %c0_368 = arith.constant 0 : index
    %c72_369 = arith.constant 72 : index
    %c1_370 = arith.constant 1 : index
    %907 = vector.load %arg8[%c0_368, %c72_369, %c1_370] : memref<1x96x2xf32, #tpu.memory_space<vmem>>, vector<1x24x1xf32>
    %908 = vector.shape_cast %907 : vector<1x24x1xf32> to vector<24x1xf32>
    %909 = vector.broadcast %908 : vector<24x1xf32> to vector<24x128xf32>
    %910 = arith.cmpf ogt, %774, %909 : vector<24x128xf32>
    %cst_371 = arith.constant 0.000000e+00 : f32
    %911 = vector.broadcast %cst_371 : f32 to vector<24x128xf32>
    %912 = arith.select %910, %791, %911 : vector<24x128xi1>, vector<24x128xf32>
    %cst_372 = arith.constant dense<0.000000e+00> : vector<24xf32>
    %913 = vector.multi_reduction <add>, %912, %cst_372 [1] : vector<24x128xf32> to vector<24xf32>
    %914 = vector.shape_cast %913 : vector<24xf32> to vector<24x1xf32>
    %915 = arith.mulf %912, %774 : vector<24x128xf32>
    %cst_373 = arith.constant dense<0.000000e+00> : vector<24xf32>
    %916 = vector.multi_reduction <add>, %915, %cst_373 [1] : vector<24x128xf32> to vector<24xf32>
    %917 = vector.shape_cast %916 : vector<24xf32> to vector<24x1xf32>
    %918 = arith.mulf %912, %796 : vector<24x128xf32>
    %cst_374 = arith.constant dense<0.000000e+00> : vector<24xf32>
    %919 = vector.multi_reduction <add>, %918, %cst_374 [1] : vector<24x128xf32> to vector<24xf32>
    %920 = vector.shape_cast %919 : vector<24xf32> to vector<24x1xf32>
    %cst_375 = arith.constant 0.000000e+00 : f32
    %921 = vector.broadcast %cst_375 : f32 to vector<24x1xf32>
    %922 = arith.cmpf ogt, %914, %921 : vector<24x1xf32>
    %cst_376 = arith.constant 1.000000e+00 : f32
    %923 = vector.broadcast %cst_376 : f32 to vector<24x1xf32>
    %924 = arith.divf %923, %914 : vector<24x1xf32>
    %cst_377 = arith.constant 0.000000e+00 : f32
    %925 = vector.broadcast %cst_377 : f32 to vector<24x1xf32>
    %926 = arith.select %922, %924, %925 : vector<24x1xi1>, vector<24x1xf32>
    %927 = arith.mulf %914, %803 : vector<24x1xf32>
    %c0_378 = arith.constant 0 : index
    %c0_379 = arith.constant 0 : index
    %c72_380 = arith.constant 72 : index
    %c1_381 = arith.constant 1 : index
    %928 = vector.load %arg9[%c0_378, %c0_379, %c72_380, %c1_381] : memref<1x1x96x128xf32, #tpu.memory_space<vmem>>, vector<1x1x24x1xf32>
    %929 = vector.shape_cast %928 : vector<1x1x24x1xf32> to vector<24x1xf32>
    %930 = vector.shape_cast %927 : vector<24x1xf32> to vector<1x1x24x1xf32>
    tpu.vector_store %arg9[%c0_378, %c0_379, %c72_380, %c1_381], %930 {strides = array<i32>} : memref<1x1x96x128xf32, #tpu.memory_space<vmem>>, vector<1x1x24x1xf32>,
    %931 = arith.mulf %908, %914 : vector<24x1xf32>
    %932 = arith.addf %917, %931 : vector<24x1xf32>
    %933 = arith.mulf %932, %926 : vector<24x1xf32>
    %c0_382 = arith.constant 0 : index
    %c0_383 = arith.constant 0 : index
    %c72_384 = arith.constant 72 : index
    %c5_385 = arith.constant 5 : index
    %934 = vector.load %arg9[%c0_382, %c0_383, %c72_384, %c5_385] : memref<1x1x96x128xf32, #tpu.memory_space<vmem>>, vector<1x1x24x1xf32>
    %935 = vector.shape_cast %934 : vector<1x1x24x1xf32> to vector<24x1xf32>
    %936 = vector.shape_cast %933 : vector<24x1xf32> to vector<1x1x24x1xf32>
    tpu.vector_store %arg9[%c0_382, %c0_383, %c72_384, %c5_385], %936 {strides = array<i32>} : memref<1x1x96x128xf32, #tpu.memory_space<vmem>>, vector<1x1x24x1xf32>,
    %cst_386 = arith.constant 0.000000e+00 : f32
    %937 = vector.broadcast %cst_386 : f32 to vector<24x1xf32>
    %938 = arith.cmpf ogt, %914, %937 : vector<24x1xf32>
    %939 = arith.mulf %920, %926 : vector<24x1xf32>
    %cst_387 = arith.constant -1.000000e+00 : f32
    %940 = vector.broadcast %cst_387 : f32 to vector<24x1xf32>
    %941 = arith.select %938, %939, %940 : vector<24x1xi1>, vector<24x1xf32>
    %c0_388 = arith.constant 0 : index
    %c0_389 = arith.constant 0 : index
    %c72_390 = arith.constant 72 : index
    %c7_391 = arith.constant 7 : index
    %942 = vector.load %arg9[%c0_388, %c0_389, %c72_390, %c7_391] : memref<1x1x96x128xf32, #tpu.memory_space<vmem>>, vector<1x1x24x1xf32>
    %943 = vector.shape_cast %942 : vector<1x1x24x1xf32> to vector<24x1xf32>
    %944 = vector.shape_cast %941 : vector<24x1xf32> to vector<1x1x24x1xf32>
    tpu.vector_store %arg9[%c0_388, %c0_389, %c72_390, %c7_391], %944 {strides = array<i32>} : memref<1x1x96x128xf32, #tpu.memory_space<vmem>>, vector<1x1x24x1xf32>,
    %945 = vector.broadcast %908 : vector<24x1xf32> to vector<24x128xf32>
    %946 = arith.cmpf olt, %774, %945 : vector<24x128xf32>
    %cst_392 = arith.constant 0.000000e+00 : f32
    %947 = vector.broadcast %cst_392 : f32 to vector<24x128xf32>
    %948 = arith.select %946, %791, %947 : vector<24x128xi1>, vector<24x128xf32>
    %949 = arith.mulf %948, %796 : vector<24x128xf32>
    %c1_i32_393 = arith.constant 1 : i32
    %950 = tpu.dynamic_rotate %949 by %c1_i32_393 dim 1 : vector<24x128xf32>, i32 -> vector<24x128xf32>
    %cst_394 = arith.constant 0.000000e+00 : f32
    %951 = vector.shape_cast %47 : vector<1x128xi1> to vector<1x128xi1>
    %952 = vector.broadcast %951 : vector<1x128xi1> to vector<24x128xi1>
    %953 = vector.broadcast %cst_394 : f32 to vector<24x128xf32>
    %954 = arith.select %952, %950, %953 : vector<24x128xi1>, vector<24x128xf32>
    %c1_i32_395 = arith.constant 1 : i32
    %955 = tpu.dynamic_rotate %954 by %c1_i32_395 dim 1 : vector<24x128xf32>, i32 -> vector<24x128xf32>
    %cst_396 = arith.constant 0.000000e+00 : f32
    %956 = vector.shape_cast %47 : vector<1x128xi1> to vector<1x128xi1>
    %957 = vector.broadcast %956 : vector<1x128xi1> to vector<24x128xi1>
    %958 = vector.broadcast %cst_396 : f32 to vector<24x128xf32>
    %959 = arith.select %957, %955, %958 : vector<24x128xi1>, vector<24x128xf32>
    %960 = arith.maximumf %954, %959 : vector<24x128xf32>
    %c2_i32_397 = arith.constant 2 : i32
    %961 = tpu.dynamic_rotate %960 by %c2_i32_397 dim 1 : vector<24x128xf32>, i32 -> vector<24x128xf32>
    %cst_398 = arith.constant 0.000000e+00 : f32
    %962 = vector.shape_cast %49 : vector<1x128xi1> to vector<1x128xi1>
    %963 = vector.broadcast %962 : vector<1x128xi1> to vector<24x128xi1>
    %964 = vector.broadcast %cst_398 : f32 to vector<24x128xf32>
    %965 = arith.select %963, %961, %964 : vector<24x128xi1>, vector<24x128xf32>
    %966 = arith.maximumf %960, %965 : vector<24x128xf32>
    %c4_i32_399 = arith.constant 4 : i32
    %967 = tpu.dynamic_rotate %966 by %c4_i32_399 dim 1 : vector<24x128xf32>, i32 -> vector<24x128xf32>
    %cst_400 = arith.constant 0.000000e+00 : f32
    %968 = vector.shape_cast %51 : vector<1x128xi1> to vector<1x128xi1>
    %969 = vector.broadcast %968 : vector<1x128xi1> to vector<24x128xi1>
    %970 = vector.broadcast %cst_400 : f32 to vector<24x128xf32>
    %971 = arith.select %969, %967, %970 : vector<24x128xi1>, vector<24x128xf32>
    %972 = arith.maximumf %966, %971 : vector<24x128xf32>
    %c8_i32_401 = arith.constant 8 : i32
    %973 = tpu.dynamic_rotate %972 by %c8_i32_401 dim 1 : vector<24x128xf32>, i32 -> vector<24x128xf32>
    %cst_402 = arith.constant 0.000000e+00 : f32
    %974 = vector.shape_cast %53 : vector<1x128xi1> to vector<1x128xi1>
    %975 = vector.broadcast %974 : vector<1x128xi1> to vector<24x128xi1>
    %976 = vector.broadcast %cst_402 : f32 to vector<24x128xf32>
    %977 = arith.select %975, %973, %976 : vector<24x128xi1>, vector<24x128xf32>
    %978 = arith.maximumf %972, %977 : vector<24x128xf32>
    %c16_i32_403 = arith.constant 16 : i32
    %979 = tpu.dynamic_rotate %978 by %c16_i32_403 dim 1 : vector<24x128xf32>, i32 -> vector<24x128xf32>
    %cst_404 = arith.constant 0.000000e+00 : f32
    %980 = vector.shape_cast %55 : vector<1x128xi1> to vector<1x128xi1>
    %981 = vector.broadcast %980 : vector<1x128xi1> to vector<24x128xi1>
    %982 = vector.broadcast %cst_404 : f32 to vector<24x128xf32>
    %983 = arith.select %981, %979, %982 : vector<24x128xi1>, vector<24x128xf32>
    %984 = arith.maximumf %978, %983 : vector<24x128xf32>
    %c32_i32_405 = arith.constant 32 : i32
    %985 = tpu.dynamic_rotate %984 by %c32_i32_405 dim 1 : vector<24x128xf32>, i32 -> vector<24x128xf32>
    %cst_406 = arith.constant 0.000000e+00 : f32
    %986 = vector.shape_cast %57 : vector<1x128xi1> to vector<1x128xi1>
    %987 = vector.broadcast %986 : vector<1x128xi1> to vector<24x128xi1>
    %988 = vector.broadcast %cst_406 : f32 to vector<24x128xf32>
    %989 = arith.select %987, %985, %988 : vector<24x128xi1>, vector<24x128xf32>
    %990 = arith.maximumf %984, %989 : vector<24x128xf32>
    %c64_i32_407 = arith.constant 64 : i32
    %991 = tpu.dynamic_rotate %990 by %c64_i32_407 dim 1 : vector<24x128xf32>, i32 -> vector<24x128xf32>
    %cst_408 = arith.constant 0.000000e+00 : f32
    %992 = vector.shape_cast %59 : vector<1x128xi1> to vector<1x128xi1>
    %993 = vector.broadcast %992 : vector<1x128xi1> to vector<24x128xi1>
    %994 = vector.broadcast %cst_408 : f32 to vector<24x128xf32>
    %995 = arith.select %993, %991, %994 : vector<24x128xi1>, vector<24x128xf32>
    %996 = arith.maximumf %990, %995 : vector<24x128xf32>
    %997 = arith.subf %796, %996 : vector<24x128xf32>
    %998 = arith.mulf %948, %997 : vector<24x128xf32>
    %cst_409 = arith.constant dense<0xFF800000> : vector<24xf32>
    %999 = vector.multi_reduction <maximumf>, %998, %cst_409 [1] : vector<24x128xf32> to vector<24xf32>
    %1000 = vector.shape_cast %999 : vector<24xf32> to vector<24x1xf32>
    %cst_410 = arith.constant dense<0xFF800000> : vector<24xf32>
    %1001 = vector.multi_reduction <maximumf>, %949, %cst_410 [1] : vector<24x128xf32> to vector<24xf32>
    %1002 = vector.shape_cast %1001 : vector<24xf32> to vector<24x1xf32>
    %1003 = arith.subf %805, %1002 : vector<24x1xf32>
    %1004 = arith.maximumf %1000, %1003 : vector<24x1xf32>
    %c0_411 = arith.constant 0 : index
    %c0_412 = arith.constant 0 : index
    %c72_413 = arith.constant 72 : index
    %c3_414 = arith.constant 3 : index
    %1005 = vector.load %arg9[%c0_411, %c0_412, %c72_413, %c3_414] : memref<1x1x96x128xf32, #tpu.memory_space<vmem>>, vector<1x1x24x1xf32>
    %1006 = vector.shape_cast %1005 : vector<1x1x24x1xf32> to vector<24x1xf32>
    %1007 = vector.shape_cast %1004 : vector<24x1xf32> to vector<1x1x24x1xf32>
    tpu.vector_store %arg9[%c0_411, %c0_412, %c72_413, %c3_414], %1007 {strides = array<i32>} : memref<1x1x96x128xf32, #tpu.memory_space<vmem>>, vector<1x1x24x1xf32>,
    return
  }
  func.func @transform_0(%arg0: i32, %arg1: i32, %arg2: memref<6xi32, #tpu.memory_space<smem>>, %arg3: memref<6xi32, #tpu.memory_space<smem>>, %arg4: memref<6xi32, #tpu.memory_space<smem>>, %arg5: memref<6xi32, #tpu.memory_space<smem>>) -> (i32, i32, i32) {
    %c2_i32 = arith.constant 2 : i32
    %0 = arith.muli %c2_i32, %arg0 : i32
    %1 = arith.index_cast %arg1 : i32 to index
    %2 = memref.load %arg5[%1] : memref<6xi32, #tpu.memory_space<smem>>
    %3 = arith.addi %0, %2 : i32
    %c0_i32 = arith.constant 0 : i32
    %c0_i32_0 = arith.constant 0 : i32
    %c0_i32_1 = arith.constant 0 : i32
    return %3, %c0_i32, %c0_i32_0 : i32, i32, i32
  }
  func.func @transform_1(%arg0: i32, %arg1: i32, %arg2: memref<6xi32, #tpu.memory_space<smem>>, %arg3: memref<6xi32, #tpu.memory_space<smem>>, %arg4: memref<6xi32, #tpu.memory_space<smem>>, %arg5: memref<6xi32, #tpu.memory_space<smem>>) -> (i32, i32) {
    %c0_i32 = arith.constant 0 : i32
    %c0_i32_0 = arith.constant 0 : i32
    %c0_i32_1 = arith.constant 0 : i32
    return %c0_i32, %c0_i32_0 : i32, i32
  }
  func.func @transform_2(%arg0: i32, %arg1: i32, %arg2: memref<6xi32, #tpu.memory_space<smem>>, %arg3: memref<6xi32, #tpu.memory_space<smem>>, %arg4: memref<6xi32, #tpu.memory_space<smem>>, %arg5: memref<6xi32, #tpu.memory_space<smem>>) -> (i32, i32, i32) {
    %c0_i32 = arith.constant 0 : i32
    %c0_i32_0 = arith.constant 0 : i32
    %c0_i32_1 = arith.constant 0 : i32
    return %arg1, %c0_i32, %c0_i32_0 : i32, i32, i32
  }
  func.func @transform_3(%arg0: i32, %arg1: i32, %arg2: memref<6xi32, #tpu.memory_space<smem>>, %arg3: memref<6xi32, #tpu.memory_space<smem>>, %arg4: memref<6xi32, #tpu.memory_space<smem>>, %arg5: memref<6xi32, #tpu.memory_space<smem>>) -> (i32, i32, i32, i32) {
    %c0_i32 = arith.constant 0 : i32
    %c0_i32_0 = arith.constant 0 : i32
    %c0_i32_1 = arith.constant 0 : i32
    return %arg0, %arg1, %c0_i32, %c0_i32_0 : i32, i32, i32, i32
  }
}

</mosaic_0001>

<bundles_post_ra>
// kernel: tpu_custom_call.1
= control target key start
LH: loop header
LB: loop body
LE: loop exit
PB: predicated region body
PF: predicated region fallthrough
CT: control target
= control target key end

     0   :  { %s8114_s0 = inlined_call_operand.vmem [shape: s32[6], index: 0, kind: input, shape index: {}]   ;;  %s8115_s4 = inlined_call_operand.vmem [shape: f32[4,1,256], index: 4, kind: input, shape index: {}]   ;;  %s8116_s5 = inlined_call_operand.vmem [shape: f32[96,16], index: 5, kind: input, shape index: {}]   ;;  %s8117_s6 = inlined_call_operand.vmem [shape: f32[6,96,2], index: 6, kind: input, shape index: {}]   ;;  %s8118_s7 = inlined_call_operand.hbm [shape: f32[2,6,96,128], index: 7, kind: output, shape index: {}]   ;;  %s8119_s1 = inlined_call_operand.vmem [shape: s32[6], index: 1, kind: input, shape index: {}]   ;;  %s8120_s2 = inlined_call_operand.vmem [shape: s32[6], index: 2, kind: input, shape index: {}]   ;;  %s8121_s3 = inlined_call_operand.vmem [shape: s32[6], index: 3, kind: input, shape index: {}]  }
   0x1   :  { %s12_s26 = sshll.u32 %s8114_s0, 4  ;;  %s16_s29 = sshll.u32 %s8119_s1, 4  ;;  %s13_s26 = int_to_ptr.vmem [resolvable:$true] %s12_s26  ;;  %s17_s29 = int_to_ptr.vmem [resolvable:$true] %s16_s29 }
   0x2   :  { %s4566_s30 = scalar_lea.vmem %s13_s26, 16  ;;  %p4571_p1 = scmp.lt.s32.totalorder %s13_s26, %s13_s26 }
   0x3   :  { %p4567_p0 = scmp.ne.s32.totalorder %s13_s26, %s4566_s30  ;;  %p4572_p2 = scmp.lt.s32.totalorder %s4566_s30, %s4566_s30 }
   0x5   :  { %p4573_p3 = por %p4572_p2, %p4571_p1 }
   0x7   :  { %p4574_p4 = pnand %p4573_p3, %p4567_p0 }
   0x9   :  { %4577 = shalt.err (!%p4574_p4)  }
   0xa   :  { %s4712_s8 = smov [#allocation4]   ;;  %s4578_s9 = scalar_lea.vmem %s17_s29, 16 }
   0xb   :  { %15 = dma.vmem_to_smem %s13_s26, 16, %s4712_s8, [#allocation3] }
   0xc   :  { %p4579_p5 = scmp.ne.s32.totalorder %s17_s29, %s4578_s9  ;;  %p4583_p6 = scmp.lt.s32.totalorder %s17_s29, %s17_s29 }
   0xd   :  { %p4584_p7 = scmp.lt.s32.totalorder %s4578_s9, %s4578_s9 }
   0xf   :  { %p4585_p8 = por %p4584_p7, %p4583_p6 }
  0x11   :  { %p4586_p9 = pnand %p4585_p8, %p4579_p5 }
  0x13   :  { %4589 = shalt.err (!%p4586_p9)  }
  0x14   :  { %s4713_s0 = smov [#allocation5]   ;;  %s20_s11 = sshll.u32 %s8120_s2, 4  ;;  %s21_s11 = int_to_ptr.vmem [resolvable:$true] %s20_s11 }
  0x15   :  { %19 = dma.vmem_to_smem %s17_s29, 16, %s4713_s0, [#allocation3] }
  0x16   :  { %s24_s14 = sshll.u32 %s8121_s3, 4  ;;  %s4590_s15 = scalar_lea.vmem %s21_s11, 16  ;;  %s25_s14 = int_to_ptr.vmem [resolvable:$true] %s24_s14 }
  0x17   :  { %p4591_p10 = scmp.ne.s32.totalorder %s21_s11, %s4590_s15  ;;  %p4595_p11 = scmp.lt.s32.totalorder %s21_s11, %s21_s11 }
  0x18   :  { %p4596_p12 = scmp.lt.s32.totalorder %s4590_s15, %s4590_s15 }
  0x1a   :  { %p4597_p13 = por %p4596_p12, %p4595_p11 }
  0x1c   :  { %p4598_p0 = pnand %p4597_p13, %p4591_p10 }
  0x1e   :  { %4601 = shalt.err (!%p4598_p0)  }
  0x1f   :  { %s4714_s16 = smov [#allocation6]   ;;  %s4602_s17 = scalar_lea.vmem %s25_s14, 16 }
  0x20   :  { %23 = dma.vmem_to_smem %s21_s11, 16, %s4714_s16, [#allocation3] }
  0x21   :  { %p4603_p1 = scmp.ne.s32.totalorder %s25_s14, %s4602_s17  ;;  %p4607_p2 = scmp.lt.s32.totalorder %s25_s14, %s25_s14 }
  0x22   :  { %p4608_p3 = scmp.lt.s32.totalorder %s4602_s17, %s4602_s17 }
  0x24   :  { %p4609_p4 = por %p4608_p3, %p4607_p2 }
  0x26   :  { %p4610_p5 = pnand %p4609_p4, %p4603_p1 }
  0x28   :  { %4613 = shalt.err (!%p4610_p5)  }
  0x29   :  { %s4715_s2 = smov [#allocation7]  }
  0x2a   :  { %27 = dma.vmem_to_smem %s25_s14, 16, %s4715_s2, [#allocation3] }
  0x2b   :  { %4674 = dma.done.wait [#allocation3], 64 }
  0x2c   :  { %4675 = vsyncadd [#allocation3], 4294967232 }
  0x2d   :  { %29 = sfence }
  0x2e   :  { %30 = vsyncpa [#allocation9], 0 }
  0x2f   :  { %32 = vsyncpa [#allocation9 + $0x1], 0  ;;  %s4834_s3 = smov 0   ;;  %s4836_s18 = smov 0  }
  0x30   :  { %s4838_s19 = smov 0   ;;  %s4840_s20 = smov 0  }
  0x31   :  { %s4842_s21 = smov 0   ;;  %s4844_s22 = smov 0  }
  0x32   :  { %s4846_s23 = smov 0   ;;  %s4848_s24 = smov 0  }
  0x33 LB: > { %s4083_s25 = sadd.s32 4294967295, %s4710_s24   ;;  %s4084_s26 = sadd.s32 4294967294, %s4710_s24   ;;  %s4710_s24 = sphi %s4848_s24, %s38_s24   ;;  %s4706_s23 = sphi %s4846_s23, %s8521_s23   ;;  %s4702_s22 = sphi %s4844_s22, %s8520_s22   ;;  %s4698_s21 = sphi %s4842_s21, %s8519_s21   ;;  %s4694_s20 = sphi %s4840_s20, %s8518_s20   ;;  %s4690_s19 = sphi %s4838_s19, %s8517_s19   ;;  %s4686_s18 = sphi %s4836_s18, %s8516_s18   ;;  %s4682_s3 = sphi %s4834_s3, %s8515_s3  }
  0x34   : > { %s47_s27 = sadd.s32 1, %s4702_s22  ;;  %s50_s28 = sadd.s32 1, %s4706_s23 }
  0x35   : > { %p48_p6 = scmp.ge.s32.totalorder %s47_s27, 6  ;;  %p148_p7 = scmp.ne.s32.totalorder %s4690_s19, %s4686_s18 }
  0x36   : > { %p149_p8 = scmp.eq.s32.totalorder %s4083_s25, 11  ;;  %p154_p11 = scmp.ne.s32.totalorder %s4686_s18, %s4682_s3 }
  0x37   : > { %s8523_s27 = smov (%p48_p6, %s47_s27), 0  ;;  %s8525_s28 = smov (!%p48_p6, %s50_s28), %s4706_s23 }
  0x38   : > { %s134_s29 = ssub.s32 %s4702_s22, %s8523_s27  ;;  %p4885_p9 = por %p149_p8, %p148_p7 }
  0x39   : > { %p52_p10 = scmp.ge.s32.totalorder %s8525_s28, 2  ;;  %p155_p12 = scmp.eq.s32.totalorder %s4084_s26, 11 }
  0x3a   : > { %p4089_p13 = scmp.ge.s32.totalorder %s4710_s24, 1  ;;  %p197_p1 = scmp.lt.s32.totalorder %s4710_s24, 13 }
  0x3b   : > { %s8527_s28 = smov (%p52_p10, %s8525_s28), 0  ;;  %p4894_p0 = por %p155_p12, %p154_p11 }
  0x3c   : > { %s133_s9 = ssub.s32 %s4706_s23, %s8527_s28  ;;  %s138_s0 = sadd.s32 1, %s4690_s19 }
  0x3d   : > { %s135_s1 = sor.u32 %s134_s29, %s133_s9  ;;  %p198_p2 = pnand %p4089_p13, %p197_p1 }
  0x3e   : > { %p136_p3 = scmp.eq.s32.totalorder %s135_s1, 0 }
  0x3f   : > { %201 = sbr.rel (%p198_p2) target bundleno = 4117 (0x1015), region = 32 }
  0x40   : > { %s4903_s10 = scalar_select %p136_p3, %s4690_s19, %s138_s0  }
  0x46   : > { %s8122_s11 = sand.u32 1, %s4686_s18   ;;  %s229_s13 = sld [smem:[#allocation7 + %s4694_s20]]  ;;  %v8125_v0 = vmov 0.0  }
  0x47   : > { %s4332_s12 = smul.u32 96, %s8122_s11  ;;  %243 = vst [vmem:[#allocation2] sm:$0xff] %v8125_v0  ;;  %244 = vst [vmem:[#allocation2 + $0x8] sm:$0xff] %v8125_v0  ;;  %p238_p4 = scmp.lt.s32.totalorder %s4694_s20, 5 }
  0x48   : > { %s4090_s14 = sshll.u32 %s4698_s21, 1  ;;  %p4093_p6 = scmp.ne.s32.totalorder %s4694_s20, 0 }
  0x49   : > { %s239_s15 = scalar_select %p238_p4, %s4694_s20, 5 }
  0x4a   : > { %s4924_s11 = scalar_lea.vmem [#allocation8], %s4332_s12  ;;  %v251_v1 = vlaneseq (!%p4093_p6)  ;;  %s4718_s12 = smov (!%p4093_p6), 120   ;;  %vm281_vm0 = vcmask (!%p4093_p6), 973824   ;;  %vm263_vm1 = vcmask (!%p4093_p6), 982016   ;;  %vm299_vm2 = vcmask (!%p4093_p6), 965632  }
  0x4b   : > { %s4333_s16 = smul.u32 96, %s239_s15  ;;  %s4720_s15 = smov (!%p4093_p6), 117   ;;  %vm317_vm3 = vcmask (!%p4093_p6), 957440   ;;  %vm335_vm4 = vcmask (!%p4093_p6), 949248   ;;  %vm353_vm5 = vcmask (!%p4093_p6), 941056   ;;  %vm371_vm6 = vcmask (!%p4093_p6), 932864  }
  0x4c   : > { %s230_s17 = sadd.s32 %s4090_s14, %s229_s13  ;;  %248 = sbr.rel (%p4093_p6) target bundleno = 235 (0xeb), region = 36  ;;  %v252_v2 = vshrl.u32 (!%p4093_p6), %v251_v1, 7  ;;  %vm389_vm7 = vcmask (!%p4093_p6), 924672   ;;  %vm407_vm8 = vcmask (!%p4093_p6), 916480  }
  0x4d   : > { %p231_p5 = scmp.lt.s32.totalorder %s230_s17, 3  ;;  %s4917_s26 = scalar_lea.vmem %s8117_s6, %s4333_s16 }
  0x4e   : > { %v253_v5 = vsub.s32 (!%p4093_p6), 0, %v252_v2  ;;  %v257_v6 = vsub.s32 (!%p4093_p6), 1, %v252_v2  ;;  %s4717_s13 = smov (!%p4093_p6), 119   ;;  %s4719_s14 = smov (!%p4093_p6), 118  }
  0x4f   : > { %s8529_s17 = smov (!%p231_p5, %s230_s17), 3  ;;  %s4721_s16 = smov (!%p4093_p6), 116  }
  0x50   : > { %s4091_s29 = sshll.u32 %s8529_s17, 1  ;;  %s4722_s17 = smov (!%p4093_p6), 115  }
  0x51   : > { %s4922_s1 = scalar_lea.vmem %s8115_s4, %s4091_s29  ;;  %s4723_s2 = smov (!%p4093_p6), 114  }
  0x52   : > { %v267_v3 = vld [vmem:[%s4922_s1] sm:$0x3] (!%p4093_p6)  ;;  %s4724_s25 = smov (!%p4093_p6), 113   ;;  %s4725_s29 = smov (!%p4093_p6), 112  }
  0x53   : > { %v249_v4 = vld [vmem:[%s4922_s1] sm:$0x3]  ;;  %v272_v7 = vrot.slane %v267_v3, %v253_v5  ;;  %v276_v9 = vrot.slane %v267_v3, %v257_v6 }
  0x54   : > { %v254_v8 = vrot.slane %v249_v4, %v253_v5  ;;  %v258_v10 = vrot.slane %v249_v4, %v257_v6  ;;  %v285_v11 = vld [vmem:[%s4922_s1] sm:$0x3] }
  0x55   : > { %277 = vrot.lane.b32.xlu1 %v272_v7, %s4717_s13  ;;  %v294_v12 = vrot.slane %v285_v11, %v257_v6  ;;  %v290_v13 = vrot.slane %v285_v11, %v253_v5  ;;  %v303_v14 = vld [vmem:[%s4922_s1] sm:$0x3] }
  0x56   : > { %259 = vrot.lane.b32.xlu0 %v254_v8, %s4718_s12  ;;  %v312_v15 = vrot.slane %v303_v14, %v257_v6  ;;  %v308_v16 = vrot.slane %v303_v14, %v253_v5  ;;  %v321_v17 = vld [vmem:[%s4922_s1] sm:$0x3] }
  0x57   : > { %v330_v18 = vrot.slane %v321_v17, %v257_v6  ;;  %v326_v19 = vrot.slane %v321_v17, %v253_v5  ;;  %v339_v20 = vld [vmem:[%s4922_s1] sm:$0x3] }
  0x58   : > { %v348_v21 = vrot.slane %v339_v20, %v257_v6  ;;  %v344_v22 = vrot.slane %v339_v20, %v253_v5  ;;  %v357_v23 = vld [vmem:[%s4922_s1] sm:$0x3] }
  0x59   : > { %279 = vrot.lane.b32.xlu1 %v276_v9, %s4717_s13  ;;  %v366_v24 = vrot.slane %v357_v23, %v257_v6  ;;  %v362_v25 = vrot.slane %v357_v23, %v253_v5  ;;  %v375_v26 = vld [vmem:[%s4922_s1] sm:$0x3] }
  0x5a   : > { %261 = vrot.lane.b32.xlu0 %v258_v10, %s4718_s12  ;;  %v384_v27 = vrot.slane %v375_v26, %v257_v6  ;;  %v380_v28 = vrot.slane %v375_v26, %v253_v5  ;;  %v393_v29 = vld [vmem:[%s4922_s1] sm:$0x3] }
  0x5b   : > { %v402_v30 = vrot.slane %v393_v29, %v257_v6  ;;  %v398_v31 = vrot.slane %v393_v29, %v253_v5 }
  0x5d   : > { %297 = vrot.lane.b32.xlu1 %v294_v12, %s4719_s14 }
  0x5e   : > { %295 = vrot.lane.b32.xlu0 %v290_v13, %s4719_s14 }
  0x61   : > { %315 = vrot.lane.b32.xlu1 %v312_v15, %s4720_s15 }
  0x62   : > { %313 = vrot.lane.b32.xlu0 %v308_v16, %s4720_s15 }
  0x65   : > { %333 = vrot.lane.b32.xlu1 %v330_v18, %s4721_s16 }
  0x66   : > { %331 = vrot.lane.b32.xlu0 %v326_v19, %s4721_s16 }
  0x69   : > { %351 = vrot.lane.b32.xlu1 %v348_v21, %s4722_s17 }
  0x6a   : > { %349 = vrot.lane.b32.xlu0 %v344_v22, %s4722_s17 }
  0x6d   : > { %369 = vrot.lane.b32.xlu1 %v366_v24, %s4723_s2 }
  0x6e   : > { %367 = vrot.lane.b32.xlu0 %v362_v25, %s4723_s2 }
  0x71   : > { %387 = vrot.lane.b32.xlu1 %v384_v27, %s4724_s25 }
  0x72   : > { %385 = vrot.lane.b32.xlu0 %v380_v28, %s4724_s25 }
  0x75   : > { %405 = vrot.lane.b32.xlu1 %v402_v30, %s4725_s29 }
  0x76   : > { %403 = vrot.lane.b32.xlu0 %v398_v31, %s4725_s29 }
  0xc7   : > { %v278_v32 = vpop.permute.xlu1 %277 }
  0xc8   : > { %v260_v33 = vpop.permute.xlu0 %259 }
  0xcb   : > { %v280_v34 = vpop.permute.xlu1 %279 }
  0xcc   : > { %v262_v35 = vpop.permute.xlu0 %261  ;;  %v282_v36 = vsel %vm281_vm0, %v278_v32, %v280_v34 }
  0xcd   : > { %v264_v37 = vsel %vm263_vm1, %v260_v33, %v262_v35  ;;  %284 = vst [vmem:[#allocation2 + $0x1] sm:$0x1] %v282_v36 }
  0xce   : > { %266 = vst [vmem:[#allocation2] sm:$0x1] %v264_v37 }
  0xcf   : > { %v298_v38 = vpop.permute.xlu1 %297 }
  0xd0   : > { %v296_v39 = vpop.permute.xlu0 %295 }
  0xd1   : > { %v300_v40 = vsel %vm299_vm2, %v296_v39, %v298_v38 }
  0xd2   : > { %302 = vst [vmem:[#allocation2 + $0x2] sm:$0x1] %v300_v40 }
  0xd3   : > { %v316_v41 = vpop.permute.xlu1 %315 }
  0xd4   : > { %v314_v42 = vpop.permute.xlu0 %313 }
  0xd5   : > { %v318_v43 = vsel %vm317_vm3, %v314_v42, %v316_v41 }
  0xd6   : > { %320 = vst [vmem:[#allocation2 + $0x3] sm:$0x1] %v318_v43 }
  0xd7   : > { %v334_v44 = vpop.permute.xlu1 %333 }
  0xd8   : > { %v332_v45 = vpop.permute.xlu0 %331 }
  0xd9   : > { %v336_v46 = vsel %vm335_vm4, %v332_v45, %v334_v44 }
  0xda   : > { %338 = vst [vmem:[#allocation2 + $0x4] sm:$0x1] %v336_v46 }
  0xdb   : > { %v352_v47 = vpop.permute.xlu1 %351 }
  0xdc   : > { %v350_v48 = vpop.permute.xlu0 %349 }
  0xdd   : > { %v354_v49 = vsel %vm353_vm5, %v350_v48, %v352_v47 }
  0xde   : > { %356 = vst [vmem:[#allocation2 + $0x5] sm:$0x1] %v354_v49 }
  0xdf   : > { %v370_v50 = vpop.permute.xlu1 %369 }
  0xe0   : > { %v368_v51 = vpop.permute.xlu0 %367 }
  0xe1   : > { %v372_v52 = vsel %vm371_vm6, %v368_v51, %v370_v50 }
  0xe2   : > { %374 = vst [vmem:[#allocation2 + $0x6] sm:$0x1] %v372_v52 }
  0xe3   : > { %v388_v53 = vpop.permute.xlu1 %387 }
  0xe4   : > { %v386_v54 = vpop.permute.xlu0 %385 }
  0xe5   : > { %v390_v55 = vsel %vm389_vm7, %v386_v54, %v388_v53 }
  0xe6   : > { %392 = vst [vmem:[#allocation2 + $0x7] sm:$0x1] %v390_v55 }
  0xe7   : > { %v406_v56 = vpop.permute.xlu1 %405 }
  0xe8   : > { %v404_v57 = vpop.permute.xlu0 %403 }
  0xe9   : > { %v408_v58 = vsel %vm407_vm8, %v404_v57, %v406_v56 }
  0xea   : > { %410 = vst [vmem:[#allocation2 + $0x8] sm:$0x1] %v408_v58 }
  0xeb PF: > { %p4094_p7 = scmp.ne.s32.totalorder %s4694_s20, 1 }
  0xec   : > { %v417_v59 = vlaneseq (!%p4094_p7)  ;;  %v433_v61 = vld [vmem:[%s4922_s1] sm:$0x3] (!%p4094_p7)  ;;  %s4726_s9 = smov (!%p4094_p7), 122   ;;  %s4727_s0 = smov (!%p4094_p7), 124   ;;  %vm447_vm9 = vcmask (!%p4094_p7), 998400   ;;  %vm429_vm10 = vcmask (!%p4094_p7), 1014784  }
  0xed   : > { %414 = sbr.rel (%p4094_p7) target bundleno = 393 (0x189), region = 40  ;;  %v415_v62 = vld [vmem:[%s4922_s1] sm:$0x3] (!%p4094_p7)  ;;  %s4728_s13 = smov (!%p4094_p7), 120   ;;  %vm465_vm11 = vcmask (!%p4094_p7), 982016   ;;  %vm483_vm12 = vcmask (!%p4094_p7), 965632  }
  0xee   : > { %v418_v60 = vshrl.u32 (!%p4094_p7), %v417_v59, 7  ;;  %v451_v6 = vld [vmem:[%s4922_s1] sm:$0x3] (!%p4094_p7)  ;;  %s4729_s12 = smov (!%p4094_p7), 118   ;;  %s4730_s14 = smov (!%p4094_p7), 116   ;;  %vm501_vm13 = vcmask (!%p4094_p7), 949248  }
  0xef   : > { %v469_v9 = vld [vmem:[%s4922_s1] sm:$0x3] (!%p4094_p7)  ;;  %s4731_s15 = smov (!%p4094_p7), 114   ;;  %s4732_s16 = smov (!%p4094_p7), 112   ;;  %vm519_vm14 = vcmask (!%p4094_p7), 932864   ;;  %vm537_vm15 = vcmask (!%p4094_p7), 916480  }
  0xf0   : > { %v419_v63 = vsub.s32 (!%p4094_p7), 0, %v418_v60  ;;  %v423_v1 = vsub.s32 (!%p4094_p7), 1, %v418_v60  ;;  %v487_v12 = vld [vmem:[%s4922_s1] sm:$0x3] (!%p4094_p7)  ;;  %s4733_s17 = smov (!%p4094_p7), 110   ;;  %s4734_s2 = smov (!%p4094_p7), 108  }
  0xf1   : > { %v505_v15 = vld [vmem:[%s4922_s1] sm:$0x3] (!%p4094_p7)  ;;  %vm555_vm0 = vcmask (!%p4094_p7), 900096   ;;  %vm573_vm1 = vcmask (!%p4094_p7), 883712  }
  0xf2   : > { %v438_v2 = vrot.slane (!%p4094_p7), %v433_v61, %v419_v63  ;;  %v420_v3 = vrot.slane (!%p4094_p7), %v415_v62, %v419_v63  ;;  %v442_v4 = vrot.slane (!%p4094_p7), %v433_v61, %v423_v1  ;;  %v424_v5 = vrot.slane (!%p4094_p7), %v415_v62, %v423_v1  ;;  %v523_v18 = vld [vmem:[%s4922_s1] sm:$0x3] (!%p4094_p7) }
  0xf3   : > { %v460_v7 = vrot.slane (!%p4094_p7), %v451_v6, %v423_v1  ;;  %v456_v8 = vrot.slane (!%p4094_p7), %v451_v6, %v419_v63  ;;  %v478_v10 = vrot.slane (!%p4094_p7), %v469_v9, %v423_v1  ;;  %v474_v11 = vrot.slane (!%p4094_p7), %v469_v9, %v419_v63  ;;  %v541_v21 = vld [vmem:[%s4922_s1] sm:$0x3] (!%p4094_p7) }
  0xf4   : > { %443 = vrot.lane.b32.xlu1 %v438_v2, %s4726_s9  ;;  %425 = vrot.lane.b32.xlu0 %v420_v3, %s4727_s0  ;;  %v496_v13 = vrot.slane %v487_v12, %v423_v1  ;;  %v492_v14 = vrot.slane %v487_v12, %v419_v63  ;;  %v514_v16 = vrot.slane %v505_v15, %v423_v1  ;;  %v559_v24 = vld [vmem:[%s4922_s1] sm:$0x3] }
  0xf5   : > { %v510_v17 = vrot.slane %v505_v15, %v419_v63  ;;  %v532_v19 = vrot.slane %v523_v18, %v423_v1  ;;  %v528_v20 = vrot.slane %v523_v18, %v419_v63  ;;  %v550_v22 = vrot.slane %v541_v21, %v423_v1 }
  0xf6   : > { %v546_v23 = vrot.slane %v541_v21, %v419_v63  ;;  %v568_v25 = vrot.slane %v559_v24, %v423_v1  ;;  %v564_v26 = vrot.slane %v559_v24, %v419_v63 }
  0xf8   : > { %445 = vrot.lane.b32.xlu1 %v442_v4, %s4726_s9  ;;  %427 = vrot.lane.b32.xlu0 %v424_v5, %s4727_s0 }
  0xfc   : > { %463 = vrot.lane.b32.xlu1 %v460_v7, %s4728_s13  ;;  %461 = vrot.lane.b32.xlu0 %v456_v8, %s4728_s13 }
 0x100   : > { %481 = vrot.lane.b32.xlu1 %v478_v10, %s4729_s12  ;;  %479 = vrot.lane.b32.xlu0 %v474_v11, %s4729_s12 }
 0x104   : > { %499 = vrot.lane.b32.xlu1 %v496_v13, %s4730_s14  ;;  %497 = vrot.lane.b32.xlu0 %v492_v14, %s4730_s14 }
 0x108   : > { %517 = vrot.lane.b32.xlu1 %v514_v16, %s4731_s15  ;;  %515 = vrot.lane.b32.xlu0 %v510_v17, %s4731_s15 }
 0x10c   : > { %535 = vrot.lane.b32.xlu1 %v532_v19, %s4732_s16  ;;  %533 = vrot.lane.b32.xlu0 %v528_v20, %s4732_s16 }
 0x110   : > { %553 = vrot.lane.b32.xlu1 %v550_v22, %s4733_s17  ;;  %551 = vrot.lane.b32.xlu0 %v546_v23, %s4733_s17 }
 0x114   : > { %571 = vrot.lane.b32.xlu1 %v568_v25, %s4734_s2  ;;  %569 = vrot.lane.b32.xlu0 %v564_v26, %s4734_s2 }
 0x166   : > { %v444_v27 = vpop.permute.xlu1 %443  ;;  %v426_v28 = vpop.permute.xlu0 %425 }
 0x16a   : > { %v446_v29 = vpop.permute.xlu1 %445  ;;  %v428_v30 = vpop.permute.xlu0 %427 }
 0x16b   : > { %v448_v31 = vsel %vm447_vm9, %v444_v27, %v446_v29  ;;  %v430_v32 = vsel %vm429_vm10, %v426_v28, %v428_v30 }
 0x16c   : > { %450 = vst [vmem:[#allocation2 + $0x1] sm:$0x1] %v448_v31  ;;  %432 = vst [vmem:[#allocation2] sm:$0x1] %v430_v32 }
 0x16e   : > { %v464_v33 = vpop.permute.xlu1 %463  ;;  %v462_v34 = vpop.permute.xlu0 %461 }
 0x16f   : > { %v466_v35 = vsel %vm465_vm11, %v462_v34, %v464_v33 }
 0x170   : > { %468 = vst [vmem:[#allocation2 + $0x2] sm:$0x1] %v466_v35 }
 0x172   : > { %v482_v36 = vpop.permute.xlu1 %481  ;;  %v480_v37 = vpop.permute.xlu0 %479 }
 0x173   : > { %v484_v38 = vsel %vm483_vm12, %v480_v37, %v482_v36 }
 0x174   : > { %486 = vst [vmem:[#allocation2 + $0x3] sm:$0x1] %v484_v38 }
 0x176   : > { %v500_v39 = vpop.permute.xlu1 %499  ;;  %v498_v40 = vpop.permute.xlu0 %497 }
 0x177   : > { %v502_v41 = vsel %vm501_vm13, %v498_v40, %v500_v39 }
 0x178   : > { %504 = vst [vmem:[#allocation2 + $0x4] sm:$0x1] %v502_v41 }
 0x17a   : > { %v518_v42 = vpop.permute.xlu1 %517  ;;  %v516_v43 = vpop.permute.xlu0 %515 }
 0x17b   : > { %v520_v44 = vsel %vm519_vm14, %v516_v43, %v518_v42 }
 0x17c   : > { %522 = vst [vmem:[#allocation2 + $0x5] sm:$0x1] %v520_v44 }
 0x17e   : > { %v536_v45 = vpop.permute.xlu1 %535  ;;  %v534_v46 = vpop.permute.xlu0 %533 }
 0x17f   : > { %v538_v47 = vsel %vm537_vm15, %v534_v46, %v536_v45 }
 0x180   : > { %540 = vst [vmem:[#allocation2 + $0x6] sm:$0x1] %v538_v47 }
 0x182   : > { %v554_v48 = vpop.permute.xlu1 %553  ;;  %v552_v49 = vpop.permute.xlu0 %551 }
 0x183   : > { %v556_v50 = vsel %vm555_vm0, %v552_v49, %v554_v48 }
 0x184   : > { %558 = vst [vmem:[#allocation2 + $0x7] sm:$0x1] %v556_v50 }
 0x186   : > { %v572_v51 = vpop.permute.xlu1 %571  ;;  %v570_v52 = vpop.permute.xlu0 %569 }
 0x187   : > { %v574_v53 = vsel %vm573_vm1, %v570_v52, %v572_v51 }
 0x188   : > { %576 = vst [vmem:[#allocation2 + $0x8] sm:$0x1] %v574_v53 }
 0x189 PF: > { %p4095_p8 = scmp.ne.s32.totalorder %s4694_s20, 2 }
 0x18a   : > { %v585_v54 = vlaneseq (!%p4095_p8)  ;;  %v601_v56 = vld [vmem:[%s4922_s1] sm:$0x3] (!%p4095_p8)  ;;  %s4735_s25 = smov (!%p4095_p8), 122   ;;  %s4736_s29 = smov (!%p4095_p8), 125   ;;  %vm615_vm2 = vcmask (!%p4095_p8), 998400   ;;  %vm597_vm3 = vcmask (!%p4095_p8), 1022976  }
 0x18b   : > { %580 = sbr.rel (%p4095_p8) target bundleno = 547 (0x223), region = 44  ;;  %v583_v57 = vld [vmem:[%s4922_s1] sm:$0x3] (!%p4095_p8)  ;;  %s4737_s9 = smov (!%p4095_p8), 119   ;;  %vm633_vm4 = vcmask (!%p4095_p8), 973824   ;;  %vm651_vm5 = vcmask (!%p4095_p8), 949248  }
 0x18c   : > { %v586_v55 = vshrl.u32 (!%p4095_p8), %v585_v54, 7  ;;  %v619_v1 = vld [vmem:[%s4922_s1] sm:$0x3] (!%p4095_p8)  ;;  %s4738_s0 = smov (!%p4095_p8), 116   ;;  %s4739_s13 = smov (!%p4095_p8), 113   ;;  %vm669_vm6 = vcmask (!%p4095_p8), 924672  }
 0x18d   : > { %v637_v4 = vld [vmem:[%s4922_s1] sm:$0x3] (!%p4095_p8)  ;;  %s4740_s12 = smov (!%p4095_p8), 110   ;;  %s4741_s14 = smov (!%p4095_p8), 107   ;;  %vm687_vm7 = vcmask (!%p4095_p8), 900096   ;;  %vm705_vm8 = vcmask (!%p4095_p8), 875520  }
 0x18e   : > { %v587_v58 = vsub.s32 (!%p4095_p8), 0, %v586_v55  ;;  %v591_v59 = vsub.s32 (!%p4095_p8), 1, %v586_v55  ;;  %v655_v7 = vld [vmem:[%s4922_s1] sm:$0x3] (!%p4095_p8)  ;;  %s4742_s15 = smov (!%p4095_p8), 104   ;;  %vm723_vm9 = vcmask (!%p4095_p8), 850944  }
 0x18f   : > { %v673_v10 = vld [vmem:[%s4922_s1] sm:$0x3] (!%p4095_p8) }
 0x190   : > { %v606_v60 = vrot.slane (!%p4095_p8), %v601_v56, %v587_v58  ;;  %v588_v61 = vrot.slane (!%p4095_p8), %v583_v57, %v587_v58  ;;  %v610_v62 = vrot.slane (!%p4095_p8), %v601_v56, %v591_v59  ;;  %v592_v63 = vrot.slane (!%p4095_p8), %v583_v57, %v591_v59  ;;  %v581_v11 = vld [vmem:[%s4922_s1] sm:$0x1] (!%p4095_p8) }
 0x191   : > { %v628_v2 = vrot.slane (!%p4095_p8), %v619_v1, %v591_v59  ;;  %v624_v3 = vrot.slane (!%p4095_p8), %v619_v1, %v587_v58  ;;  %v646_v5 = vrot.slane (!%p4095_p8), %v637_v4, %v591_v59  ;;  %v642_v6 = vrot.slane (!%p4095_p8), %v637_v4, %v587_v58  ;;  %582 = vst [vmem:[#allocation2] sm:$0x1] (!%p4095_p8), %v581_v11  ;;  %v691_v14 = vld [vmem:[%s4922_s1] sm:$0x3] (!%p4095_p8) }
 0x192   : > { %611 = vrot.lane.b32.xlu1 %v606_v60, %s4735_s25  ;;  %593 = vrot.lane.b32.xlu0 %v588_v61, %s4736_s29  ;;  %v664_v8 = vrot.slane %v655_v7, %v591_v59  ;;  %v660_v9 = vrot.slane %v655_v7, %v587_v58  ;;  %v682_v12 = vrot.slane %v673_v10, %v591_v59  ;;  %v709_v17 = vld [vmem:[%s4922_s1] sm:$0x3] }
 0x193   : > { %v678_v13 = vrot.slane %v673_v10, %v587_v58  ;;  %v700_v15 = vrot.slane %v691_v14, %v591_v59  ;;  %v696_v16 = vrot.slane %v691_v14, %v587_v58  ;;  %v718_v18 = vrot.slane %v709_v17, %v591_v59 }
 0x194   : > { %v714_v19 = vrot.slane %v709_v17, %v587_v58 }
 0x196   : > { %613 = vrot.lane.b32.xlu1 %v610_v62, %s4735_s25  ;;  %595 = vrot.lane.b32.xlu0 %v592_v63, %s4736_s29 }
 0x19a   : > { %631 = vrot.lane.b32.xlu1 %v628_v2, %s4737_s9  ;;  %629 = vrot.lane.b32.xlu0 %v624_v3, %s4737_s9 }
 0x19e   : > { %649 = vrot.lane.b32.xlu1 %v646_v5, %s4738_s0  ;;  %647 = vrot.lane.b32.xlu0 %v642_v6, %s4738_s0 }
 0x1a2   : > { %667 = vrot.lane.b32.xlu1 %v664_v8, %s4739_s13  ;;  %665 = vrot.lane.b32.xlu0 %v660_v9, %s4739_s13 }
 0x1a6   : > { %685 = vrot.lane.b32.xlu1 %v682_v12, %s4740_s12  ;;  %683 = vrot.lane.b32.xlu0 %v678_v13, %s4740_s12 }
 0x1aa   : > { %703 = vrot.lane.b32.xlu1 %v700_v15, %s4741_s14  ;;  %701 = vrot.lane.b32.xlu0 %v696_v16, %s4741_s14 }
 0x1ae   : > { %721 = vrot.lane.b32.xlu1 %v718_v18, %s4742_s15  ;;  %719 = vrot.lane.b32.xlu0 %v714_v19, %s4742_s15 }
 0x204   : > { %v612_v20 = vpop.permute.xlu1 %611  ;;  %v594_v21 = vpop.permute.xlu0 %593 }
 0x208   : > { %v614_v22 = vpop.permute.xlu1 %613  ;;  %v596_v23 = vpop.permute.xlu0 %595 }
 0x209   : > { %v616_v24 = vsel %vm615_vm2, %v612_v20, %v614_v22  ;;  %v598_v25 = vsel %vm597_vm3, %v594_v21, %v596_v23 }
 0x20a   : > { %618 = vst [vmem:[#allocation2 + $0x2] sm:$0x1] %v616_v24  ;;  %600 = vst [vmem:[#allocation2 + $0x1] sm:$0x1] %v598_v25 }
 0x20c   : > { %v632_v26 = vpop.permute.xlu1 %631  ;;  %v630_v27 = vpop.permute.xlu0 %629 }
 0x20d   : > { %v634_v28 = vsel %vm633_vm4, %v630_v27, %v632_v26 }
 0x20e   : > { %636 = vst [vmem:[#allocation2 + $0x3] sm:$0x1] %v634_v28 }
 0x210   : > { %v650_v29 = vpop.permute.xlu1 %649  ;;  %v648_v30 = vpop.permute.xlu0 %647 }
 0x211   : > { %v652_v31 = vsel %vm651_vm5, %v648_v30, %v650_v29 }
 0x212   : > { %654 = vst [vmem:[#allocation2 + $0x4] sm:$0x1] %v652_v31 }
 0x214   : > { %v668_v32 = vpop.permute.xlu1 %667  ;;  %v666_v33 = vpop.permute.xlu0 %665 }
 0x215   : > { %v670_v34 = vsel %vm669_vm6, %v666_v33, %v668_v32 }
 0x216   : > { %672 = vst [vmem:[#allocation2 + $0x5] sm:$0x1] %v670_v34 }
 0x218   : > { %v686_v35 = vpop.permute.xlu1 %685  ;;  %v684_v36 = vpop.permute.xlu0 %683 }
 0x219   : > { %v688_v37 = vsel %vm687_vm7, %v684_v36, %v686_v35 }
 0x21a   : > { %690 = vst [vmem:[#allocation2 + $0x6] sm:$0x1] %v688_v37 }
 0x21c   : > { %v704_v38 = vpop.permute.xlu1 %703  ;;  %v702_v39 = vpop.permute.xlu0 %701 }
 0x21d   : > { %v706_v40 = vsel %vm705_vm8, %v702_v39, %v704_v38 }
 0x21e   : > { %708 = vst [vmem:[#allocation2 + $0x7] sm:$0x1] %v706_v40 }
 0x220   : > { %v722_v41 = vpop.permute.xlu1 %721  ;;  %v720_v42 = vpop.permute.xlu0 %719 }
 0x221   : > { %v724_v43 = vsel %vm723_vm9, %v720_v42, %v722_v41 }
 0x222   : > { %726 = vst [vmem:[#allocation2 + $0x8] sm:$0x1] %v724_v43 }
 0x223 PF: > { %p4096_p10 = scmp.ne.s32.totalorder %s4694_s20, 3 }
 0x224   : > { %v733_v44 = vlaneseq (!%p4096_p10)  ;;  %v749_v46 = vld [vmem:[%s4922_s1] sm:$0x3] (!%p4096_p10)  ;;  %s4743_s16 = smov (!%p4096_p10), 118   ;;  %s4744_s17 = smov (!%p4096_p10), 119   ;;  %vm763_vm10 = vcmask (!%p4096_p10), 965632   ;;  %vm745_vm11 = vcmask (!%p4096_p10), 973824  }
 0x225   : > { %730 = sbr.rel (%p4096_p10) target bundleno = 705 (0x2c1), region = 48  ;;  %v731_v47 = vld [vmem:[%s4922_s1] sm:$0x3] (!%p4096_p10)  ;;  %s4745_s2 = smov (!%p4096_p10), 117   ;;  %vm781_vm12 = vcmask (!%p4096_p10), 957440   ;;  %vm799_vm13 = vcmask (!%p4096_p10), 949248  }
 0x226   : > { %v734_v45 = vshrl.u32 (!%p4096_p10), %v733_v44, 7  ;;  %v767_v54 = vld [vmem:[%s4922_s1] sm:$0x3] (!%p4096_p10)  ;;  %s4746_s25 = smov (!%p4096_p10), 116   ;;  %s4747_s29 = smov (!%p4096_p10), 115   ;;  %vm834_vm14 = vcmask (!%p4096_p10), 941056  }
 0x227   : > { %v785_v57 = vld [vmem:[%s4922_s1] sm:$0x3] (!%p4096_p10)  ;;  %s4748_s9 = smov (!%p4096_p10), 114   ;;  %s4749_s0 = smov (!%p4096_p10), 113   ;;  %vm852_vm15 = vcmask (!%p4096_p10), 932864   ;;  %vm870_vm0 = vcmask (!%p4096_p10), 924672  }
 0x228   : > { %v735_v48 = vsub.s32 (!%p4096_p10), 0, %v734_v45  ;;  %v739_v49 = vsub.s32 (!%p4096_p10), 1, %v734_v45  ;;  %v803_v60 = vld [vmem:[%s4922_s1] sm:$0x3] (!%p4096_p10)  ;;  %s4750_s13 = smov (!%p4096_p10), 112   ;;  %vm888_vm1 = vcmask (!%p4096_p10), 916480  }
 0x229   : > { %v820_v63 = vld [vmem:[%s4922_s1] sm:$0x3] (!%p4096_p10) }
 0x22a   : > { %v754_v50 = vrot.slane (!%p4096_p10), %v749_v46, %v735_v48  ;;  %v736_v51 = vrot.slane (!%p4096_p10), %v731_v47, %v735_v48  ;;  %v758_v52 = vrot.slane (!%p4096_p10), %v749_v46, %v739_v49  ;;  %v740_v53 = vrot.slane (!%p4096_p10), %v731_v47, %v739_v49  ;;  %v838_v3 = vld [vmem:[%s4922_s1] sm:$0x3] (!%p4096_p10) }
 0x22b   : > { %v776_v55 = vrot.slane (!%p4096_p10), %v767_v54, %v739_v49  ;;  %v772_v56 = vrot.slane (!%p4096_p10), %v767_v54, %v735_v48  ;;  %v794_v58 = vrot.slane (!%p4096_p10), %v785_v57, %v739_v49  ;;  %v790_v59 = vrot.slane (!%p4096_p10), %v785_v57, %v735_v48  ;;  %v856_v6 = vld [vmem:[%s4922_s1] sm:$0x3] (!%p4096_p10) }
 0x22c   : > { %759 = vrot.lane.b32.xlu1 %v754_v50, %s4743_s16  ;;  %741 = vrot.lane.b32.xlu0 %v736_v51, %s4744_s17  ;;  %v812_v61 = vrot.slane %v803_v60, %v739_v49  ;;  %v808_v62 = vrot.slane %v803_v60, %v735_v48  ;;  %v829_v1 = vrot.slane %v820_v63, %v739_v49  ;;  %v874_v9 = vld [vmem:[%s4922_s1] sm:$0x3] }
 0x22d   : > { %v825_v2 = vrot.slane %v820_v63, %v735_v48  ;;  %v847_v4 = vrot.slane %v838_v3, %v739_v49  ;;  %v843_v5 = vrot.slane %v838_v3, %v735_v48  ;;  %v865_v7 = vrot.slane %v856_v6, %v739_v49 }
 0x22e   : > { %v861_v8 = vrot.slane %v856_v6, %v735_v48  ;;  %v883_v10 = vrot.slane %v874_v9, %v739_v49  ;;  %v879_v11 = vrot.slane %v874_v9, %v735_v48 }
 0x230   : > { %761 = vrot.lane.b32.xlu1 %v758_v52, %s4743_s16  ;;  %743 = vrot.lane.b32.xlu0 %v740_v53, %s4744_s17 }
 0x234   : > { %779 = vrot.lane.b32.xlu1 %v776_v55, %s4745_s2  ;;  %777 = vrot.lane.b32.xlu0 %v772_v56, %s4745_s2 }
 0x238   : > { %797 = vrot.lane.b32.xlu1 %v794_v58, %s4746_s25  ;;  %795 = vrot.lane.b32.xlu0 %v790_v59, %s4746_s25 }
 0x23c   : > { %815 = vrot.lane.b32.xlu1 %v812_v61, %s4746_s25  ;;  %813 = vrot.lane.b32.xlu0 %v808_v62, %s4746_s25 }
 0x240   : > { %832 = vrot.lane.b32.xlu1 %v829_v1, %s4747_s29  ;;  %830 = vrot.lane.b32.xlu0 %v825_v2, %s4747_s29 }
 0x244   : > { %850 = vrot.lane.b32.xlu1 %v847_v4, %s4748_s9  ;;  %848 = vrot.lane.b32.xlu0 %v843_v5, %s4748_s9 }
 0x248   : > { %868 = vrot.lane.b32.xlu1 %v865_v7, %s4749_s0  ;;  %866 = vrot.lane.b32.xlu0 %v861_v8, %s4749_s0 }
 0x24c   : > { %886 = vrot.lane.b32.xlu1 %v883_v10, %s4750_s13  ;;  %884 = vrot.lane.b32.xlu0 %v879_v11, %s4750_s13 }
 0x29e   : > { %v760_v12 = vpop.permute.xlu1 %759  ;;  %v742_v13 = vpop.permute.xlu0 %741 }
 0x2a2   : > { %v762_v14 = vpop.permute.xlu1 %761  ;;  %v744_v15 = vpop.permute.xlu0 %743 }
 0x2a3   : > { %v764_v16 = vsel %vm763_vm10, %v760_v12, %v762_v14  ;;  %v746_v17 = vsel %vm745_vm11, %v742_v13, %v744_v15 }
 0x2a4   : > { %766 = vst [vmem:[#allocation2 + $0x1] sm:$0x1] %v764_v16  ;;  %748 = vst [vmem:[#allocation2] sm:$0x1] %v746_v17 }
 0x2a6   : > { %v780_v18 = vpop.permute.xlu1 %779  ;;  %v778_v19 = vpop.permute.xlu0 %777 }
 0x2a7   : > { %v782_v20 = vsel %vm781_vm12, %v778_v19, %v780_v18 }
 0x2a8   : > { %784 = vst [vmem:[#allocation2 + $0x2] sm:$0x1] %v782_v20 }
 0x2aa   : > { %v798_v21 = vpop.permute.xlu1 %797  ;;  %v796_v22 = vpop.permute.xlu0 %795 }
 0x2ab   : > { %v800_v23 = vsel %vm799_vm13, %v796_v22, %v798_v21 }
 0x2ac   : > { %802 = vst [vmem:[#allocation2 + $0x3] sm:$0x1] %v800_v23 }
 0x2ae   : > { %v816_v24 = vpop.permute.xlu1 %815  ;;  %v814_v25 = vpop.permute.xlu0 %813 }
 0x2af   : > { %v817_v26 = vsel %vm799_vm13, %v814_v25, %v816_v24 }
 0x2b0   : > { %819 = vst [vmem:[#allocation2 + $0x4] sm:$0x1] %v817_v26 }
 0x2b2   : > { %v833_v27 = vpop.permute.xlu1 %832  ;;  %v831_v28 = vpop.permute.xlu0 %830 }
 0x2b3   : > { %v835_v29 = vsel %vm834_vm14, %v831_v28, %v833_v27 }
 0x2b4   : > { %837 = vst [vmem:[#allocation2 + $0x5] sm:$0x1] %v835_v29 }
 0x2b6   : > { %v851_v30 = vpop.permute.xlu1 %850  ;;  %v849_v31 = vpop.permute.xlu0 %848 }
 0x2b7   : > { %v853_v32 = vsel %vm852_vm15, %v849_v31, %v851_v30 }
 0x2b8   : > { %855 = vst [vmem:[#allocation2 + $0x6] sm:$0x1] %v853_v32 }
 0x2ba   : > { %v869_v33 = vpop.permute.xlu1 %868  ;;  %v867_v34 = vpop.permute.xlu0 %866 }
 0x2bb   : > { %v871_v35 = vsel %vm870_vm0, %v867_v34, %v869_v33 }
 0x2bc   : > { %873 = vst [vmem:[#allocation2 + $0x7] sm:$0x1] %v871_v35 }
 0x2be   : > { %v887_v36 = vpop.permute.xlu1 %886  ;;  %v885_v37 = vpop.permute.xlu0 %884 }
 0x2bf   : > { %v889_v38 = vsel %vm888_vm1, %v885_v37, %v887_v36 }
 0x2c0   : > { %891 = vst [vmem:[#allocation2 + $0x8] sm:$0x1] %v889_v38 }
 0x2c1 PF: > { %p4097_p11 = scmp.ne.s32.totalorder %s4694_s20, 4 }
 0x2c2   : > { %v898_v39 = vlaneseq (!%p4097_p11)  ;;  %v914_v41 = vld [vmem:[%s4922_s1] sm:$0x3] (!%p4097_p11)  ;;  %s4751_s12 = smov (!%p4097_p11), 121   ;;  %s4752_s14 = smov (!%p4097_p11), 123   ;;  %vm928_vm2 = vcmask (!%p4097_p11), 990208   ;;  %vm910_vm3 = vcmask (!%p4097_p11), 1006592  }
 0x2c3   : > { %895 = sbr.rel (%p4097_p11) target bundleno = 863 (0x35f), region = 52  ;;  %v896_v42 = vld [vmem:[%s4922_s1] sm:$0x3] (!%p4097_p11)  ;;  %s4753_s15 = smov (!%p4097_p11), 119   ;;  %vm946_vm4 = vcmask (!%p4097_p11), 973824   ;;  %vm964_vm5 = vcmask (!%p4097_p11), 957440  }
 0x2c4   : > { %v899_v40 = vshrl.u32 (!%p4097_p11), %v898_v39, 7  ;;  %v932_v49 = vld [vmem:[%s4922_s1] sm:$0x3] (!%p4097_p11)  ;;  %s4754_s16 = smov (!%p4097_p11), 117   ;;  %s4755_s17 = smov (!%p4097_p11), 116   ;;  %vm982_vm6 = vcmask (!%p4097_p11), 949248  }
 0x2c5   : > { %v950_v52 = vld [vmem:[%s4922_s1] sm:$0x3] (!%p4097_p11)  ;;  %s4756_s2 = smov (!%p4097_p11), 114   ;;  %s4757_s25 = smov (!%p4097_p11), 112   ;;  %vm1000_vm7 = vcmask (!%p4097_p11), 932864   ;;  %vm1018_vm8 = vcmask (!%p4097_p11), 916480  }
 0x2c6   : > { %v900_v43 = vsub.s32 (!%p4097_p11), 0, %v899_v40  ;;  %v904_v44 = vsub.s32 (!%p4097_p11), 1, %v899_v40  ;;  %v968_v55 = vld [vmem:[%s4922_s1] sm:$0x3] (!%p4097_p11)  ;;  %s4758_s29 = smov (!%p4097_p11), 110   ;;  %s4759_s9 = smov (!%p4097_p11), 108  }
 0x2c7   : > { %v986_v58 = vld [vmem:[%s4922_s1] sm:$0x3] (!%p4097_p11)  ;;  %vm1036_vm9 = vcmask (!%p4097_p11), 900096   ;;  %vm1054_vm10 = vcmask (!%p4097_p11), 883712  }
 0x2c8   : > { %v919_v45 = vrot.slane (!%p4097_p11), %v914_v41, %v900_v43  ;;  %v901_v46 = vrot.slane (!%p4097_p11), %v896_v42, %v900_v43  ;;  %v923_v47 = vrot.slane (!%p4097_p11), %v914_v41, %v904_v44  ;;  %v905_v48 = vrot.slane (!%p4097_p11), %v896_v42, %v904_v44  ;;  %v1004_v61 = vld [vmem:[%s4922_s1] sm:$0x3] (!%p4097_p11) }
 0x2c9   : > { %v941_v50 = vrot.slane (!%p4097_p11), %v932_v49, %v904_v44  ;;  %v937_v51 = vrot.slane (!%p4097_p11), %v932_v49, %v900_v43  ;;  %v959_v53 = vrot.slane (!%p4097_p11), %v950_v52, %v904_v44  ;;  %v955_v54 = vrot.slane (!%p4097_p11), %v950_v52, %v900_v43  ;;  %v1022_v1 = vld [vmem:[%s4922_s1] sm:$0x3] (!%p4097_p11) }
 0x2ca   : > { %924 = vrot.lane.b32.xlu1 %v919_v45, %s4751_s12  ;;  %906 = vrot.lane.b32.xlu0 %v901_v46, %s4752_s14  ;;  %v977_v56 = vrot.slane %v968_v55, %v904_v44  ;;  %v973_v57 = vrot.slane %v968_v55, %v900_v43  ;;  %v995_v59 = vrot.slane %v986_v58, %v904_v44  ;;  %v1040_v4 = vld [vmem:[%s4922_s1] sm:$0x3] }
 0x2cb   : > { %v991_v60 = vrot.slane %v986_v58, %v900_v43  ;;  %v1013_v62 = vrot.slane %v1004_v61, %v904_v44  ;;  %v1009_v63 = vrot.slane %v1004_v61, %v900_v43  ;;  %v1031_v2 = vrot.slane %v1022_v1, %v904_v44 }
 0x2cc   : > { %v1027_v3 = vrot.slane %v1022_v1, %v900_v43  ;;  %v1049_v5 = vrot.slane %v1040_v4, %v904_v44  ;;  %v1045_v6 = vrot.slane %v1040_v4, %v900_v43 }
 0x2ce   : > { %926 = vrot.lane.b32.xlu1 %v923_v47, %s4751_s12  ;;  %908 = vrot.lane.b32.xlu0 %v905_v48, %s4752_s14 }
 0x2d2   : > { %944 = vrot.lane.b32.xlu1 %v941_v50, %s4753_s15  ;;  %942 = vrot.lane.b32.xlu0 %v937_v51, %s4753_s15 }
 0x2d6   : > { %962 = vrot.lane.b32.xlu1 %v959_v53, %s4754_s16  ;;  %960 = vrot.lane.b32.xlu0 %v955_v54, %s4754_s16 }
 0x2da   : > { %980 = vrot.lane.b32.xlu1 %v977_v56, %s4755_s17  ;;  %978 = vrot.lane.b32.xlu0 %v973_v57, %s4755_s17 }
 0x2de   : > { %998 = vrot.lane.b32.xlu1 %v995_v59, %s4756_s2  ;;  %996 = vrot.lane.b32.xlu0 %v991_v60, %s4756_s2 }
 0x2e2   : > { %1016 = vrot.lane.b32.xlu1 %v1013_v62, %s4757_s25  ;;  %1014 = vrot.lane.b32.xlu0 %v1009_v63, %s4757_s25 }
 0x2e6   : > { %1034 = vrot.lane.b32.xlu1 %v1031_v2, %s4758_s29  ;;  %1032 = vrot.lane.b32.xlu0 %v1027_v3, %s4758_s29 }
 0x2ea   : > { %1052 = vrot.lane.b32.xlu1 %v1049_v5, %s4759_s9  ;;  %1050 = vrot.lane.b32.xlu0 %v1045_v6, %s4759_s9 }
 0x33c   : > { %v925_v7 = vpop.permute.xlu1 %924  ;;  %v907_v8 = vpop.permute.xlu0 %906 }
 0x340   : > { %v927_v9 = vpop.permute.xlu1 %926  ;;  %v909_v10 = vpop.permute.xlu0 %908 }
 0x341   : > { %v929_v11 = vsel %vm928_vm2, %v925_v7, %v927_v9  ;;  %v911_v12 = vsel %vm910_vm3, %v907_v8, %v909_v10 }
 0x342   : > { %931 = vst [vmem:[#allocation2 + $0x1] sm:$0x1] %v929_v11  ;;  %913 = vst [vmem:[#allocation2] sm:$0x1] %v911_v12 }
 0x344   : > { %v945_v13 = vpop.permute.xlu1 %944  ;;  %v943_v14 = vpop.permute.xlu0 %942 }
 0x345   : > { %v947_v15 = vsel %vm946_vm4, %v943_v14, %v945_v13 }
 0x346   : > { %949 = vst [vmem:[#allocation2 + $0x2] sm:$0x1] %v947_v15 }
 0x348   : > { %v963_v16 = vpop.permute.xlu1 %962  ;;  %v961_v17 = vpop.permute.xlu0 %960 }
 0x349   : > { %v965_v18 = vsel %vm964_vm5, %v961_v17, %v963_v16 }
 0x34a   : > { %967 = vst [vmem:[#allocation2 + $0x3] sm:$0x1] %v965_v18 }
 0x34c   : > { %v981_v19 = vpop.permute.xlu1 %980  ;;  %v979_v20 = vpop.permute.xlu0 %978 }
 0x34d   : > { %v983_v21 = vsel %vm982_vm6, %v979_v20, %v981_v19 }
 0x34e   : > { %985 = vst [vmem:[#allocation2 + $0x4] sm:$0x1] %v983_v21 }
 0x350   : > { %v999_v22 = vpop.permute.xlu1 %998  ;;  %v997_v23 = vpop.permute.xlu0 %996 }
 0x351   : > { %v1001_v24 = vsel %vm1000_vm7, %v997_v23, %v999_v22 }
 0x352   : > { %1003 = vst [vmem:[#allocation2 + $0x5] sm:$0x1] %v1001_v24 }
 0x354   : > { %v1017_v25 = vpop.permute.xlu1 %1016  ;;  %v1015_v26 = vpop.permute.xlu0 %1014 }
 0x355   : > { %v1019_v27 = vsel %vm1018_vm8, %v1015_v26, %v1017_v25 }
 0x356   : > { %1021 = vst [vmem:[#allocation2 + $0x6] sm:$0x1] %v1019_v27 }
 0x358   : > { %v1035_v28 = vpop.permute.xlu1 %1034  ;;  %v1033_v29 = vpop.permute.xlu0 %1032 }
 0x359   : > { %v1037_v30 = vsel %vm1036_vm9, %v1033_v29, %v1035_v28 }
 0x35a   : > { %1039 = vst [vmem:[#allocation2 + $0x7] sm:$0x1] %v1037_v30 }
 0x35c   : > { %v1053_v31 = vpop.permute.xlu1 %1052  ;;  %v1051_v32 = vpop.permute.xlu0 %1050 }
 0x35d   : > { %v1055_v33 = vsel %vm1054_vm10, %v1051_v32, %v1053_v31 }
 0x35e   : > { %1057 = vst [vmem:[#allocation2 + $0x8] sm:$0x1] %v1055_v33 }
 0x35f PF: > { %p4098_p12 = scmp.ne.s32.totalorder %s4694_s20, 5 }
 0x360   : > { %v1064_v34 = vlaneseq (!%p4098_p12)  ;;  %v1080_v36 = vld [vmem:[%s4922_s1] sm:$0x3] (!%p4098_p12)  ;;  %s4760_s0 = smov (!%p4098_p12), 124   ;;  %s4761_s13 = smov (!%p4098_p12), 127   ;;  %vm1094_vm11 = vcmask (!%p4098_p12), 1014784   ;;  %vm1076_vm12 = vcmask (!%p4098_p12), 1039360  }
 0x361   : > { %1061 = sbr.rel (%p4098_p12) target bundleno = 1021 (0x3fd), region = 56  ;;  %v1062_v37 = vld [vmem:[%s4922_s1] sm:$0x3] (!%p4098_p12)  ;;  %s4762_s12 = smov (!%p4098_p12), 121   ;;  %vm1112_vm13 = vcmask (!%p4098_p12), 990208   ;;  %vm1130_vm14 = vcmask (!%p4098_p12), 965632  }
 0x362   : > { %v1065_v35 = vshrl.u32 (!%p4098_p12), %v1064_v34, 7  ;;  %v1098_v44 = vld [vmem:[%s4922_s1] sm:$0x3] (!%p4098_p12)  ;;  %s4763_s14 = smov (!%p4098_p12), 118   ;;  %s4764_s15 = smov (!%p4098_p12), 116   ;;  %vm1148_vm15 = vcmask (!%p4098_p12), 949248  }
 0x363   : > { %v1116_v47 = vld [vmem:[%s4922_s1] sm:$0x3] (!%p4098_p12)  ;;  %s4765_s16 = smov (!%p4098_p12), 113   ;;  %s4766_s17 = smov (!%p4098_p12), 110   ;;  %vm1166_vm0 = vcmask (!%p4098_p12), 924672   ;;  %vm1184_vm1 = vcmask (!%p4098_p12), 900096  }
 0x364   : > { %v1066_v38 = vsub.s32 (!%p4098_p12), 0, %v1065_v35  ;;  %v1070_v39 = vsub.s32 (!%p4098_p12), 1, %v1065_v35  ;;  %v1134_v50 = vld [vmem:[%s4922_s1] sm:$0x3] (!%p4098_p12)  ;;  %s4767_s2 = smov (!%p4098_p12), 107   ;;  %s4768_s25 = smov (!%p4098_p12), 104  }
 0x365   : > { %v1152_v53 = vld [vmem:[%s4922_s1] sm:$0x3] (!%p4098_p12)  ;;  %vm1202_vm2 = vcmask (!%p4098_p12), 875520   ;;  %vm1220_vm3 = vcmask (!%p4098_p12), 850944  }
 0x366   : > { %v1085_v40 = vrot.slane (!%p4098_p12), %v1080_v36, %v1066_v38  ;;  %v1067_v41 = vrot.slane (!%p4098_p12), %v1062_v37, %v1066_v38  ;;  %v1089_v42 = vrot.slane (!%p4098_p12), %v1080_v36, %v1070_v39  ;;  %v1071_v43 = vrot.slane (!%p4098_p12), %v1062_v37, %v1070_v39  ;;  %v1170_v56 = vld [vmem:[%s4922_s1] sm:$0x3] (!%p4098_p12) }
 0x367   : > { %v1107_v45 = vrot.slane (!%p4098_p12), %v1098_v44, %v1070_v39  ;;  %v1103_v46 = vrot.slane (!%p4098_p12), %v1098_v44, %v1066_v38  ;;  %v1125_v48 = vrot.slane (!%p4098_p12), %v1116_v47, %v1070_v39  ;;  %v1121_v49 = vrot.slane (!%p4098_p12), %v1116_v47, %v1066_v38  ;;  %v1188_v59 = vld [vmem:[%s4922_s1] sm:$0x3] (!%p4098_p12) }
 0x368   : > { %1090 = vrot.lane.b32.xlu1 %v1085_v40, %s4760_s0  ;;  %1072 = vrot.lane.b32.xlu0 %v1067_v41, %s4761_s13  ;;  %v1143_v51 = vrot.slane %v1134_v50, %v1070_v39  ;;  %v1139_v52 = vrot.slane %v1134_v50, %v1066_v38  ;;  %v1161_v54 = vrot.slane %v1152_v53, %v1070_v39  ;;  %v1206_v62 = vld [vmem:[%s4922_s1] sm:$0x3] }
 0x369   : > { %v1157_v55 = vrot.slane %v1152_v53, %v1066_v38  ;;  %v1179_v57 = vrot.slane %v1170_v56, %v1070_v39  ;;  %v1175_v58 = vrot.slane %v1170_v56, %v1066_v38  ;;  %v1197_v60 = vrot.slane %v1188_v59, %v1070_v39 }
 0x36a   : > { %v1193_v61 = vrot.slane %v1188_v59, %v1066_v38  ;;  %v1215_v63 = vrot.slane %v1206_v62, %v1070_v39  ;;  %v1211_v1 = vrot.slane %v1206_v62, %v1066_v38 }
 0x36c   : > { %1092 = vrot.lane.b32.xlu1 %v1089_v42, %s4760_s0  ;;  %1074 = vrot.lane.b32.xlu0 %v1071_v43, %s4761_s13 }
 0x370   : > { %1110 = vrot.lane.b32.xlu1 %v1107_v45, %s4762_s12  ;;  %1108 = vrot.lane.b32.xlu0 %v1103_v46, %s4762_s12 }
 0x374   : > { %1128 = vrot.lane.b32.xlu1 %v1125_v48, %s4763_s14  ;;  %1126 = vrot.lane.b32.xlu0 %v1121_v49, %s4763_s14 }
 0x378   : > { %1146 = vrot.lane.b32.xlu1 %v1143_v51, %s4764_s15  ;;  %1144 = vrot.lane.b32.xlu0 %v1139_v52, %s4764_s15 }
 0x37c   : > { %1164 = vrot.lane.b32.xlu1 %v1161_v54, %s4765_s16  ;;  %1162 = vrot.lane.b32.xlu0 %v1157_v55, %s4765_s16 }
 0x380   : > { %1182 = vrot.lane.b32.xlu1 %v1179_v57, %s4766_s17  ;;  %1180 = vrot.lane.b32.xlu0 %v1175_v58, %s4766_s17 }
 0x384   : > { %1200 = vrot.lane.b32.xlu1 %v1197_v60, %s4767_s2  ;;  %1198 = vrot.lane.b32.xlu0 %v1193_v61, %s4767_s2 }
 0x388   : > { %1218 = vrot.lane.b32.xlu1 %v1215_v63, %s4768_s25  ;;  %1216 = vrot.lane.b32.xlu0 %v1211_v1, %s4768_s25 }
 0x3da   : > { %v1091_v2 = vpop.permute.xlu1 %1090  ;;  %v1073_v3 = vpop.permute.xlu0 %1072 }
 0x3de   : > { %v1093_v4 = vpop.permute.xlu1 %1092  ;;  %v1075_v5 = vpop.permute.xlu0 %1074 }
 0x3df   : > { %v1095_v6 = vsel %vm1094_vm11, %v1091_v2, %v1093_v4  ;;  %v1077_v7 = vsel %vm1076_vm12, %v1073_v3, %v1075_v5 }
 0x3e0   : > { %1097 = vst [vmem:[#allocation2 + $0x1] sm:$0x1] %v1095_v6  ;;  %1079 = vst [vmem:[#allocation2] sm:$0x1] %v1077_v7 }
 0x3e2   : > { %v1111_v8 = vpop.permute.xlu1 %1110  ;;  %v1109_v9 = vpop.permute.xlu0 %1108 }
 0x3e3   : > { %v1113_v10 = vsel %vm1112_vm13, %v1109_v9, %v1111_v8 }
 0x3e4   : > { %1115 = vst [vmem:[#allocation2 + $0x2] sm:$0x1] %v1113_v10 }
 0x3e6   : > { %v1129_v11 = vpop.permute.xlu1 %1128  ;;  %v1127_v12 = vpop.permute.xlu0 %1126 }
 0x3e7   : > { %v1131_v13 = vsel %vm1130_vm14, %v1127_v12, %v1129_v11 }
 0x3e8   : > { %1133 = vst [vmem:[#allocation2 + $0x3] sm:$0x1] %v1131_v13 }
 0x3ea   : > { %v1147_v14 = vpop.permute.xlu1 %1146  ;;  %v1145_v15 = vpop.permute.xlu0 %1144 }
 0x3eb   : > { %v1149_v16 = vsel %vm1148_vm15, %v1145_v15, %v1147_v14 }
 0x3ec   : > { %1151 = vst [vmem:[#allocation2 + $0x4] sm:$0x1] %v1149_v16 }
 0x3ee   : > { %v1165_v17 = vpop.permute.xlu1 %1164  ;;  %v1163_v18 = vpop.permute.xlu0 %1162 }
 0x3ef   : > { %v1167_v19 = vsel %vm1166_vm0, %v1163_v18, %v1165_v17 }
 0x3f0   : > { %1169 = vst [vmem:[#allocation2 + $0x5] sm:$0x1] %v1167_v19 }
 0x3f2   : > { %v1183_v20 = vpop.permute.xlu1 %1182  ;;  %v1181_v21 = vpop.permute.xlu0 %1180 }
 0x3f3   : > { %v1185_v22 = vsel %vm1184_vm1, %v1181_v21, %v1183_v20 }
 0x3f4   : > { %1187 = vst [vmem:[#allocation2 + $0x6] sm:$0x1] %v1185_v22 }
 0x3f6   : > { %v1201_v23 = vpop.permute.xlu1 %1200  ;;  %v1199_v24 = vpop.permute.xlu0 %1198 }
 0x3f7   : > { %v1203_v25 = vsel %vm1202_vm2, %v1199_v24, %v1201_v23 }
 0x3f8   : > { %1205 = vst [vmem:[#allocation2 + $0x7] sm:$0x1] %v1203_v25 }
 0x3fa   : > { %v1219_v26 = vpop.permute.xlu1 %1218  ;;  %v1217_v27 = vpop.permute.xlu0 %1216 }
 0x3fb   : > { %v1221_v28 = vsel %vm1220_vm3, %v1217_v27, %v1219_v26 }
 0x3fc   : > { %1223 = vst [vmem:[#allocation2 + $0x8] sm:$0x1] %v1221_v28 }
 0x3fd PF: > { %v4769_v31 = vmov 0.0|0.0   ;;  %vm4770_vm4 = vmmov 0   ;;  %v4995_v33 = vld [vmem:[%s4917_s26] sm:$0xff]  ;;  %v8127_v36 = vmov 0   ;;  %v5002_v37 = vld [vmem:[%s4917_s26 + $0x10] sm:$0xff]  ;;  %v5007_v40 = vld [vmem:[%s4917_s26 + $0x8] sm:$0xff]  ;;  %v1236_v52 = vlaneseq }
 0x3fe   : > { %4284 = vmatprep.subr.bf16.mxu0 %v4769_v31  ;;  %4290 = vmatprep.subr.bf16.mxu1 %v4769_v31  ;;  %v8123_v42 = vmov 1   ;;  %v1258_v43 = vld [vmem:[%s8116_s5] sm:$0xff]  ;;  %vm1261_vm5 = vcmask 130048   ;;  %v1960_v44 = vld [vmem:[%s8116_s5 + $0x18] sm:$0xff]  ;;  %v1259_v46 = vld [vmem:[%s8116_s5 + $0x8] sm:$0xff]  ;;  %s1233_s1 = sld [smem:[#allocation5 + %s4694_s20]] }
 0x3ff   : > { %v1224_v29 = vld [vmem:[#allocation2] sm:$0xff]  ;;  %4184 = vmatprep.mubr.msk.f32.mxu0 %vm4770_vm4, %v8125_v0  ;;  %4210 = vmatprep.mubr.msk.f32.mxu1 %vm4770_vm4, %v8125_v0  ;;  %v1260_v48 = vld [vmem:[%s8116_s5 + $0x10] sm:$0xff]  ;;  %v1962_v49 = vld [vmem:[%s8116_s5 + $0x28] sm:$0xff]  ;;  %s5093_s29 = sld [smem:[#allocation4 + %s4694_s20]]  ;;  %v5102_v55 = vshrl.u32 %v1236_v52, 7  ;;  %v5112_v59 = vand.u32 127, %v1236_v52 }
 0x400   : > { %4476 = vset.pattern.permute.xlu0 %v8127_v36  ;;  %4477 = vset.pattern.permute.xlu1 %v8127_v36  ;;  %v5023_v45 = vld [vmem:[%s4917_s26 + $0x20] sm:$0xff]  ;;  %v5056_v50 = vld [vmem:[%s4917_s26 + $0x18] sm:$0xff]  ;;  %v5067_v51 = vld [vmem:[%s4917_s26 + $0x28] sm:$0xff]  ;;  %s5096_s9 = sld [smem:[#allocation6 + %s4694_s20]]  ;;  %s4773_s12 = smov 1  }
 0x401   : > { %1487 = vperm.xlu0 %4476, %v4995_v33   ;;  %1497 = vperm.xlu1 %4477, %v5002_v37   ;;  %v1961_v47 = vld [vmem:[%s8116_s5 + $0x20] sm:$0xff]  ;;  %v2132_v60 = vadd.s32 24, %v5102_v55  ;;  %v5135_v9 = vcvt.s32.f32 %v5112_v59  ;;  %s4774_s16 = smov 4   ;;  %s4775_s25 = smov 2  }
 0x402   : > { %s8514_s17 = sand.u32 1, %s4686_s18  }
 0x403   : > { %v1225_v30 = vld [vmem:[#allocation2 + $0x8] sm:$0xff]  ;;  %8258 = vst [vmem:[#allocation13_spill] sm:$0xff] %v5135_v9  ;;  %s8061_s2 = scalar_lea.sflag [#allocation9], %s8514_s17 }
 0x404   : > { %v4988_v32 = vpack.c.bf16 %v1225_v30, %v1224_v29  ;;  %v5100_v54 = vstv %s1233_s1  ;;  %s4777_s1 = smov 16  }
 0x405   : > { %1492 = vperm.xlu0 %4476, %v5007_v40   ;;  %4478 = vset.pattern.permute.xlu1 %v8123_v42  ;;  %v1436_v57 = vadd.s32 %v5100_v54, %v5102_v55  ;;  %v1243_v61 = vstv %s5093_s29  ;;  %s1232_s13 = scvt.s32.f32 %s5093_s29  ;;  %v2135_v3 = vadd.s32 %v2132_v60, %v5100_v54 }
 0x406   : > { %v1227_v34 = vunpack.c.l.bf16 %v4988_v32  ;;  %v1228_v35 = vunpack.c.h.bf16 %v4988_v32  ;;  %1738 = vperm.xlu1 %4478, %v5007_v40   ;;  %s1245_s0 = ssub.s32 %s5096_s9, %s5093_s29  ;;  %v1239_v2 = vstv %s5096_s9  ;;  %vm1244_vm6 = vcmp.ge.s32.totalorder %v5112_v59, %v1243_v61  ;;  %s1235_s15 = scvt.s32.f32 %s5096_s9 }
 0x407   : > { %v1246_v62 = vstv %s1245_s0  ;;  %v1439_v63 = vand.u32 1, %v1436_v57  ;;  %v5129_v6 = vstv %s1232_s13  ;;  %vm1240_vm8 = vcmp.lt.s32.totalorder %v5112_v59, %v1239_v2  ;;  %s1464_s14 = smul.f32 2.0, %s1232_s13  ;;  %s4778_s29 = smov 32  }
 0x408   : > { %v1229_v38 = vsub.f32 %v1224_v29, %v1227_v34  ;;  %v1230_v39 = vsub.f32 %v1225_v30, %v1228_v35  ;;  %vm1247_vm7 = vcmp.lt.s32.totalorder %v5112_v59, %v1246_v62  ;;  %8257 = vst [vmem:[#allocation12_spill] sm:$0xff] %v5129_v6  ;;  %v2138_v7 = vand.u32 1, %v2135_v3  ;;  %s4779_s9 = smov 64  }
 0x409   : > { %2187 = vperm.xlu0 %4476, %v5023_v45   ;;  %v5123_v4 = vcvt.s32.f32 %v1439_v63  ;;  %vm1248_vm9 = vmand %vm1244_vm6, %vm1247_vm7  ;;  %v5140_v11 = vsel %vm1240_vm8, 1.0, %v8125_v0  ;;  %vm1445_vm10 = vcmp.eq.s32.totalorder %v1439_v63, 1 }
 0x40a   : > { %v4285_v41 = vpack.c.bf16 %v1230_v39, %v1229_v38  ;;  %1743 = vperm.xlu1 %4478, %v5002_v37   ;;  %8259 = vst [vmem:[#allocation14_spill] sm:$0xff] %v5140_v11  ;;  %v5143_v12 = vsel %vm1248_vm9, 1.0, %v8125_v0  ;;  %vm2144_vm11 = vcmp.eq.s32.totalorder %v2138_v7, 1 }
 0x40b   : > { %v1458_v10 = vmul.f32 %v5129_v6, %v5123_v4  ;;  %8260 = vst [vmem:[#allocation15_spill] sm:$0xff] %v5143_v12  ;;  %v1454_v15 = vsel %vm1445_vm10, %v5143_v12, %v5140_v11  ;;  %v5152_v17 = vsel %vm2144_vm11, %v5143_v12, %v5140_v11  ;;  %vm1545_vm11 = vcmask 7168  }
 0x40c   : > { %4286 = vmatpush3.bf16.msra.mxu0 %v4285_v41  ;;  %4292 = vmatpush3.bf16.msra.mxu1 %v4285_v41 }
 0x40d   : > { %4287 = vmatprep.subr.bf16.mxu0 %v4769_v31  ;;  %4293 = vmatprep.subr.bf16.mxu1 %v4769_v31  ;;  %v5148_v16 = vsub.f32 %v5135_v9, %v1458_v10 }
 0x40e   : > { %4479 = vset.pattern.permute.xlu1 %v8127_v36  ;;  %4480 = vset.pattern.permute.xlu0 %v8123_v42 }
 0x40f   : > { %4185 = vmatmul.mubr.msk.f32.vlgmr.msra.gmra.mrb[0].mxu0 %vm1261_vm5, %v1258_v43  ;;  %4211 = vmatmul.mubr.msk.f32.vlgmr.msra.gmra.mrb[0].mxu1 %vm1261_vm5, %v1960_v44  ;;  %8261 = vst [vmem:[#allocation16_spill] sm:$0xff] %v5148_v16 }
 0x410   : > { %4289 = vmatpush3.bf16.msra.mxu0 %v4988_v32  ;;  %4187 = vmatprep.mubr.msk.f32.mxu0 %vm4770_vm4, %v8125_v0 }
 0x411   : > { %4213 = vmatprep.mubr.msk.f32.mxu1 %vm4770_vm4, %v8125_v0  ;;  %4295 = vmatpush3.bf16.msra.mxu1 %v4988_v32 }
 0x412   : > { %4296 = vmatprep.subr.bf16.mxu0 %v4769_v31  ;;  %4302 = vmatprep.subr.bf16.mxu1 %v4769_v31 }
 0x413   : > { %4188 = vmatmul.mubr.msk.f32.gmra.mrb[2].mxu0 %vm1261_vm5, %v1259_v46  ;;  %4214 = vmatmul.mubr.msk.f32.gmra.mrb[2].mxu1 %vm1261_vm5, %v1961_v47 }
 0x414   : > { %4190 = vmatprep.mubr.msk.f32.mxu0 %vm4770_vm4, %v8125_v0  ;;  %4216 = vmatprep.mubr.msk.f32.mxu1 %vm4770_vm4, %v8125_v0 }
 0x415   : > { %2182 = vperm.xlu1 %4479, %v5056_v50   ;;  %1733 = vperm.xlu0 %4480, %v4995_v33  }
 0x417   : > { %4191 = vmatmul.mubr.msk.f32.gmra.mrb[4].mxu0 %vm1261_vm5, %v1260_v48  ;;  %4217 = vmatmul.mubr.msk.f32.gmra.mrb[4].mxu1 %vm1261_vm5, %v1962_v49 }
 0x418   : > { %4197 = vmatprep.mubr.msk.f32.mxu0 %vm4770_vm4, %v8125_v0  ;;  %4223 = vmatprep.mubr.msk.f32.mxu1 %vm4770_vm4, %v8125_v0 }
 0x419   : > { %2192 = vperm.xlu1 %4479, %v5067_v51  }
 0x41b   : > { %4198 = vmatmul.mubr.msk.f32.vlgmr.msra.gmra.mrb[0].mxu0 %vm1261_vm5, %v1258_v43  ;;  %4224 = vmatmul.mubr.msk.f32.vlgmr.msra.gmra.mrb[0].mxu1 %vm1261_vm5, %v1960_v44 }
 0x41c   : > { %4200 = vmatprep.mubr.msk.f32.mxu0 %vm4770_vm4, %v8125_v0  ;;  %4226 = vmatprep.mubr.msk.f32.mxu1 %vm4770_vm4, %v8125_v0 }
 0x41d   : > { %4298 = vmatpush3.bf16.msra.mxu0 %v4285_v41  ;;  %4304 = vmatpush3.bf16.msra.mxu1 %v4285_v41 }
 0x41e   : > { %4299 = vmatprep.subr.bf16.mxu0 %v4769_v31  ;;  %4481 = vset.pattern.permute.xlu1 %v8123_v42 }
 0x41f   : > { %4201 = vmatmul.mubr.msk.f32.gmra.mrb[2].mxu0 %vm1261_vm5, %v1259_v46  ;;  %4227 = vmatmul.mubr.msk.f32.gmra.mrb[2].mxu1 %vm1261_vm5, %v1961_v47  ;;  %v5181_v47 = vadd.s32 8, %v5102_v55 }
 0x420   : > { %4203 = vmatprep.mubr.msk.f32.mxu0 %vm4770_vm4, %v8125_v0  ;;  %4229 = vmatprep.mubr.msk.f32.mxu1 %vm4770_vm4, %v8125_v0 }
 0x421   : > { %4305 = vmatprep.subr.bf16.mxu1 %v4769_v31 }
 0x423   : > { %4204 = vmatmul.mubr.msk.f32.gmra.mrb[4].mxu0 %vm1261_vm5, %v1260_v48  ;;  %4230 = vmatmul.mubr.msk.f32.gmra.mrb[4].mxu1 %vm1261_vm5, %v1962_v49  ;;  %v2141_v48 = vcvt.s32.f32 %v2138_v7  ;;  %v1437_v49 = vadd.s32 %v5100_v54, %v5181_v47 }
 0x424   : > { %4236 = vmatprep.mubr.msk.f32.mxu0 %vm4770_vm4, %v8125_v0  ;;  %4262 = vmatprep.mubr.msk.f32.mxu1 %vm4770_vm4, %v8125_v0 }
 0x425   : > { %v2156_v52 = vmul.f32 %v2141_v48, %v5129_v6  ;;  %v1440_v57 = vand.u32 1, %v1437_v49 }
 0x427   : > { %v5188_v60 = vsub.f32 %v5135_v9, %v2156_v52  ;;  %v5191_v62 = vcvt.s32.f32 %v1440_v57  ;;  %vm1446_vm2 = vcmp.eq.s32.totalorder %v1440_v57, 1 }
 0x428   : > { %v1455_v7 = vsel %vm1446_vm2, %v5143_v12, %v5140_v11 }
 0x429   : > { %8264 = vst [vmem:[#allocation19_spill] sm:$0xff] %v5188_v60  ;;  %v1459_v3 = vmul.f32 %v5129_v6, %v5191_v62 }
 0x480   : > { %v5098_v53 = vpop.permute.xlu1 %1497  ;;  %v5104_v56 = vpop.permute.xlu0 %1487 }
 0x484   : > { %v5117_v1 = vpop.permute.xlu0 %1492 }
 0x485   : > { %v5110_v58 = vpop.permute.xlu1 %1738 }
 0x488   : > { %v5132_v8 = vpop.permute.xlu0 %2187 }
 0x489   : > { %v5125_v5 = vpop.permute.xlu1 %1743 }
 0x494   : > { %v2183_v13 = vpop.permute.xlu1 %2182  ;;  %v1734_v14 = vpop.permute.xlu0 %1733 }
 0x498   : > { %v5251_v49 = vpop.permute.xlu1 %2192 }
 0x4ee   : > { %v1417_v18 = vpop.f32.mrb[0].mxu0  ;;  %v5154_v19 = vpop.f32.mrb[0].mxu1 }
 0x4ef   : > { %v4199_v20 = vpop.f32.mrb[1].mxu0  ;;  %v4225_v21 = vpop.f32.mrb[1].mxu1  ;;  %vm1500_vm12 = vcmp.gt.f32.partialorder %v1417_v18, %v5104_v56  ;;  %vm2195_vm13 = vcmp.gt.f32.partialorder %v5154_v19, %v2183_v13  ;;  %vm1746_vm14 = vcmp.gt.f32.partialorder %v1417_v18, %v1734_v14  ;;  %vm1830_vm15 = vcmp.lt.f32.partialorder %v1417_v18, %v1734_v14 }
 0x4f0   : > { %v1503_v22 = vsel %vm1500_vm12, %v1454_v15, 0.0  ;;  %v2198_v23 = vsel %vm2195_vm13, %v5152_v17, 0.0  ;;  %v1749_v30 = vsel %vm1746_vm14, %v1454_v15, 0.0  ;;  %v5169_v41 = vsel %vm1830_vm15, %v1454_v15, 0.0 }
 0x4f1   : > { %1506 = vadd.xlane.f32.xlu1 %v1503_v22  ;;  %v1521_v24 = vmul.f32 %v1503_v22, %v5148_v16  ;;  %v2207_v29 = vmul.f32 %v2198_v23, %v5154_v19  ;;  %v1512_v39 = vmul.f32 %v1503_v22, %v1417_v18  ;;  %8262 = vst [vmem:[#allocation17_spill] sm:$0xff] %v5169_v41  ;;  %v2133_v22 = vadd.s32 24, %v5181_v47 }
 0x4f2   : > { %v5160_v25 = vpop.f32.mrb[2].mxu0  ;;  %v5162_v26 = vpop.f32.mrb[2].mxu1  ;;  %vm1584_vm0 = vcmp.lt.f32.partialorder %v1417_v18, %v5104_v56  ;;  %v1836_v43 = vmul.f32 %v5169_v41, %v5148_v16  ;;  %v1758_v56 = vmul.f32 %v1749_v30, %v1417_v18  ;;  %vm2276_vm1 = vcmp.lt.f32.partialorder %v5154_v19, %v2183_v13 }
 0x4f3   : > { %v4228_v27 = vpop.f32.mrb[3].mxu1  ;;  %1524 = vadd.xlane.f32.xlu0 %v1521_v24  ;;  %v4202_v28 = vpop.f32.mrb[3].mxu0  ;;  %v5175_v44 = vsel %vm1584_vm0, %v1454_v15, 0.0  ;;  %v1767_v61 = vmul.f32 %v1749_v30, %v5148_v16  ;;  %v5194_v63 = vsel %vm2276_vm1, %v5152_v17, 0.0  ;;  %vm1501_vm3 = vcmp.gt.f32.partialorder %v5160_v25, %v5117_v1 }
 0x4f4   : > { %8263 = vst [vmem:[#allocation18_spill] sm:$0xff] %v5175_v44  ;;  %v1590_v46 = vmul.f32 %v5175_v44, %v5148_v16  ;;  %8265 = vst [vmem:[#allocation20_spill] sm:$0xff] %v5194_v63  ;;  %v2282_v2 = vmul.f32 %v5194_v63, %v5188_v60  ;;  %v2216_v10 = vmul.f32 %v2198_v23, %v5188_v60  ;;  %v1504_v14 = vsel %vm1501_vm3, %v1455_v7, 0.0 }
 0x4f5   : > { %1752 = vadd.xlane.f32.xlu1 %v1749_v30  ;;  %v5207_v13 = vsub.f32 %v5135_v9, %v1459_v3  ;;  %vm1747_vm6 = vcmp.gt.f32.partialorder %v5160_v25, %v5110_v58  ;;  %vm1831_vm7 = vcmp.lt.f32.partialorder %v5160_v25, %v5110_v58  ;;  %v2136_v24 = vadd.s32 %v2133_v22, %v5100_v54 }
 0x4f6   : > { %v5165_v31 = vpop.f32.mrb[4].mxu0  ;;  %v5167_v34 = vpop.f32.mrb[4].mxu1  ;;  %v5212_v18 = vsel %vm1747_vm6, %v1455_v7, 0.0  ;;  %v5218_v21 = vsel %vm1831_vm7, %v1455_v7, 0.0  ;;  %vm2196_vm9 = vcmp.gt.f32.partialorder %v5162_v26, %v5132_v8  ;;  %v5235_v28 = vstv %s1464_s14 }
 0x4f7   : > { %v4205_v35 = vpop.f32.mrb[5].mxu0  ;;  %v4231_v38 = vpop.f32.mrb[5].mxu1  ;;  %8266 = vst [vmem:[#allocation21_spill] sm:$0xff] %v5207_v13  ;;  %v1522_v15 = vmul.f32 %v1504_v14, %v5207_v13  ;;  %v1759_v20 = vmul.f32 %v5212_v18, %v5160_v25  ;;  %8267 = vst [vmem:[#allocation22_spill] sm:$0xff] %v5218_v21  ;;  %v2139_v27 = vand.u32 1, %v2136_v24  ;;  %v1466_v30 = vmul.f32 %v5235_v28, %v5123_v4 }
 0x4f8   : > { %8268 = vst [vmem:[#allocation23_spill] sm:$0xff] %v5235_v28  ;;  %v1513_v35 = vmul.f32 %v1504_v14, %v5160_v25  ;;  %v5241_v38 = vstv %s1235_s15  ;;  %vm1585_vm10 = vcmp.lt.f32.partialorder %v5160_v25, %v5117_v1  ;;  %vm2277_vm13 = vcmp.lt.f32.partialorder %v5162_v26, %v5132_v8 }
 0x4f9   : > { %2201 = vadd.xlane.f32.xlu1 %v2198_v23  ;;  %v1837_v23 = vmul.f32 %v5218_v21, %v5207_v13  ;;  %vm2145_vm8 = vcmp.eq.s32.totalorder %v2139_v27, 1  ;;  %8269 = vst [vmem:[#allocation24_spill] sm:$0xff] %v5241_v38  ;;  %vm1502_vm15 = vcmp.gt.f32.partialorder %v5165_v31, %v5098_v53  ;;  %vm1748_vm0 = vcmp.gt.f32.partialorder %v5165_v31, %v5125_v5 }
 0x4fa   : > { %v5230_v58 = vsel %vm2145_vm8, %v5143_v12, %v5140_v11  ;;  %vm2197_vm2 = vcmp.gt.f32.partialorder %v5167_v34, %v5251_v49  ;;  %vm1832_vm3 = vcmp.lt.f32.partialorder %v5165_v31, %v5125_v5  ;;  %vm1586_vm7 = vcmp.lt.f32.partialorder %v5165_v31, %v5098_v53 }
 0x4fd   : > { %1515 = vadd.xlane.f32.xlu1 %v1512_v39  ;;  %v5244_v39 = vsub.f32 %v5241_v38, %v1466_v30 }
 0x4ff   : > { %8270 = vst [vmem:[#allocation25_spill] sm:$0xff] %v5244_v39  ;;  %4486 = vrcp.f32 %v5244_v39 }
 0x509   : > { %1839 = vrot.lane.b32.xlu0 %v1836_v43, %s4773_s12  ;;  %v5256_v4 = vpop.eup %4486 }
 0x50a   : > { %8272 = vst [vmem:[#allocation27_spill] sm:$0xff] %v5256_v4 }
 0x50e   : > { %1593 = vrot.lane.b32.xlu1 %v1590_v46, %s4773_s12 }
 0x528   : > { %1944 = vmax.xlane.f32.xlu0 %v1836_v43  ;;  %v2162_v43 = vmul.f32 %v2141_v48, %v5235_v28 }
 0x532   : > { %1712 = vmax.xlane.f32.xlu1 %v1590_v46  ;;  %v5249_v46 = vsub.f32 %v5241_v38, %v2162_v43 }
 0x534   : > { %8271 = vst [vmem:[#allocation26_spill] sm:$0xff] %v5249_v46  ;;  %4488 = vrcp.f32 %v5249_v46 }
 0x536   : > { %1761 = vadd.xlane.f32.xlu1 %v1758_v56  ;;  %v5260_v56 = vsel %vm1585_vm10, %v1455_v7, 0.0 }
 0x537   : > { %8273 = vst [vmem:[#allocation28_spill] sm:$0xff] %v5260_v56 }
 0x53a   : > { %1770 = vadd.xlane.f32.xlu1 %v1767_v61  ;;  %v1591_v61 = vmul.f32 %v5260_v56, %v5207_v13 }
 0x53e   : > { %2285 = vrot.lane.b32.xlu0 %v2282_v2, %s4773_s12  ;;  %2210 = vadd.xlane.f32.xlu1 %v2207_v29  ;;  %v2199_v29 = vsel %vm2196_vm9, %v5230_v58, 0.0  ;;  %v5273_v25 = vpop.eup %4488  ;;  %vm2278_vm9 = vcmp.lt.f32.partialorder %v5167_v34, %v5251_v49 }
 0x53f   : > { %v2208_v57 = vmul.f32 %v2199_v29, %v5162_v26  ;;  %8275 = vst [vmem:[#allocation30_spill] sm:$0xff] %v5273_v25 }
 0x542   : > { %2219 = vadd.xlane.f32.xlu1 %v2216_v10 }
 0x546   : > { %1526 = vadd.xlane.f32.xlu1 %v1522_v15 }
 0x54a   : > { %1763 = vadd.xlane.f32.xlu1 %v1759_v20 }
 0x55b   : > { %1841 = vrot.lane.b32.xlu1 %v1837_v23, %s4773_s12 }
 0x55d   : > { %2390 = vmax.xlane.f32.xlu0 %v2282_v2  ;;  %v5275_v2 = vcvt.s32.f32 %v2139_v27  ;;  %v5297_v27 = vsel %vm2277_vm13, %v5230_v58, 0.0  ;;  %vm1251_vm13 = vcmp.ge.s32.totalorder %v5112_v59, 1 }
 0x55e   : > { %8277 = vst [vmem:[#allocation32_spill] sm:$0xff] %v5297_v27 }
 0x561   : > { %1508 = vadd.xlane.f32.xlu0 %v1504_v14  ;;  %v2157_v14 = vmul.f32 %v5275_v2, %v5129_v6 }
 0x563   : > { %v5294_v24 = vsub.f32 %v5135_v9, %v2157_v14 }
 0x565   : > { %1754 = vadd.xlane.f32.xlu0 %v5212_v18  ;;  %8276 = vst [vmem:[#allocation31_spill] sm:$0xff] %v5294_v24  ;;  %v2283_v30 = vmul.f32 %v5297_v27, %v5294_v24 }
 0x569   : > { %2203 = vadd.xlane.f32.xlu0 %v2199_v29 }
 0x56d   : > { %1517 = vadd.xlane.f32.xlu0 %v1513_v35  ;;  %v5303_v35 = vadd.s32 16, %v5102_v55 }
 0x56f   : > { %8278 = vst [vmem:[#allocation33_spill] sm:$0xff] %v5303_v35  ;;  %v1438_v43 = vadd.s32 %v5100_v54, %v5303_v35 }
 0x571   : > { %v1441_v8 = vand.u32 1, %v1438_v43 }
 0x573   : > { %vm1447_vm14 = vcmp.eq.s32.totalorder %v1441_v8, 1 }
 0x574   : > { %v1456_v14 = vsel %vm1447_vm14, %v5143_v12, %v5140_v11 }
 0x575   : > { %v5352_v42 = vsel %vm1832_vm3, %v1456_v14, 0.0 }
 0x576   : > { %8281 = vst [vmem:[#allocation36_spill] sm:$0xff] %v5352_v42 }
 0x57e   : > { %v5258_v52 = vpop.xlane.xlu1 %1506 }
 0x57f   : > { %4490 = vrcp.f32 %v5258_v52  ;;  %1946 = vmax.xlane.f32.xlu1 %v1837_v23  ;;  %v1542_v48 = vmul.f32 %v5256_v4, %v5258_v52  ;;  %vm1530_vm12 = vcmp.gt.f32.partialorder %v5258_v52, 0.0 }
 0x580   : > { %v1525_v20 = vpop.xlane.xlu0 %1524 }
 0x581   : > { %1546 = vst.msk [vmem:[%s4924_s11] sm:$0xff] %vm1545_vm11, %v1542_v48  ;;  %v1768_v48 = vmul.f32 %v5212_v18, %v5207_v13  ;;  %v1505_v18 = vsel %vm1502_vm15, %v1456_v14, 0.0 }
 0x582   : > { %v5270_v1 = vpop.xlane.xlu1 %1752 }
 0x583   : > { %8274 = vst [vmem:[#allocation29_spill] sm:$0xff] %v5270_v1  ;;  %2212 = vadd.xlane.f32.xlu1 %v2208_v57  ;;  %1595 = vrot.lane.b32.xlu0 %v1591_v61, %s4773_s12  ;;  %v5309_v57 = vcvt.s32.f32 %v1441_v8  ;;  %4492 = vrcp.f32 %v5270_v1  ;;  %vm1776_vm6 = vcmp.gt.f32.partialorder %v5270_v1, 0.0 }
 0x584   : > { %v5380_v53 = vpop.permute.xlu0 %1839 }
 0x586   : > { %v5277_v3 = vpop.xlane.xlu1 %2201 }
 0x587   : > { %v2237_v7 = vmul.f32 %v5273_v25, %v5277_v3  ;;  %4494 = vrcp.f32 %v5277_v3  ;;  %vm2225_vm8 = vcmp.gt.f32.partialorder %v5277_v3, 0.0 }
 0x589   : > { %v4491_v10 = vpop.eup %4490  ;;  %2240 = vst.msk [vmem:[%s4924_s11 + $0x18] sm:$0xff] %vm1545_vm11, %v2237_v7  ;;  %v2217_v7 = vmul.f32 %v2199_v29, %v5294_v24 }
 0x58a   : > { %v5286_v15 = vsel %vm1530_vm12, %v4491_v10, 0.0  ;;  %v1460_v10 = vmul.f32 %v5129_v6, %v5309_v57  ;;  %v5324_v43 = vpop.xlane.xlu1 %1515 }
 0x58b   : > { %v1574_v22 = vmul.f32 %v5286_v15, %v1525_v20  ;;  %v2134_v20 = vadd.s32 24, %v5303_v35 }
 0x58d   : > { %v5291_v23 = vsel %vm1530_vm12, %v1574_v22, -1.0  ;;  %v2137_v29 = vadd.s32 %v2134_v20, %v5100_v54  ;;  %v4493_v0 = vpop.eup %4492 }
 0x58e   : > { %v5357_v25 = vsel %vm1776_vm6, %v4493_v0, 0.0 }
 0x58f   : > { %v2140_v8 = vand.u32 1, %v2137_v29 }
 0x591   : > { %vm2146_vm1 = vcmp.eq.s32.totalorder %v2140_v8, 1 }
 0x594   : > { %2287 = vrot.lane.b32.xlu1 %v2283_v30, %s4773_s12 }
 0x5a2   : > { %1714 = vmax.xlane.f32.xlu0 %v1591_v61  ;;  %v5319_v61 = vsub.f32 %v5135_v9, %v1460_v10  ;;  %v5336_v10 = vsel %vm2146_vm1, %v5143_v12, %v5140_v11  ;;  %v2243_v12 = vmul.f32 %v5277_v3, %v5056_v50 }
 0x5a3   : > { %v5343_v20 = vsel %vm2197_vm2, %v5336_v10, 0.0 }
 0x5a4   : > { %8279 = vst [vmem:[#allocation34_spill] sm:$0xff] %v5319_v61  ;;  %v1523_v22 = vmul.f32 %v1505_v18, %v5319_v61  ;;  %v1838_v36 = vmul.f32 %v5352_v42, %v5319_v61  ;;  %v5371_v42 = vsel %vm1586_vm7, %v1456_v14, 0.0  ;;  %vm1570_vm7 = vcmask 39968  }
 0x5a5   : > { %8283 = vst [vmem:[#allocation38_spill] sm:$0xff] %v5371_v42 }
 0x5a6   : > { %1772 = vadd.xlane.f32.xlu0 %v1768_v48  ;;  %v5329_v48 = vpop.permute.xlu1 %1593 }
 0x5aa   : > { %2221 = vadd.xlane.f32.xlu0 %v2217_v7  ;;  %v5331_v7 = vsel %vm1748_vm0, %v1456_v14, 0.0 }
 0x5ae   : > { %1510 = vadd.xlane.f32.xlu0 %v1505_v18 }
 0x5b2   : > { %1528 = vadd.xlane.f32.xlu0 %v1523_v22  ;;  %v1514_v22 = vmul.f32 %v1505_v18, %v5165_v31 }
 0x5b5   : > { %v5385_v56 = vpop.xlane.xlu0 %1944 }
 0x5b6   : > { %8285 = vst [vmem:[#allocation40_spill] sm:$0xff] %v5385_v56  ;;  %v5402_v56 = vcvt.s32.f32 %v2140_v8 }
 0x5b8   : > { %2392 = vmax.xlane.f32.xlu1 %v2283_v30 }
 0x5b9   : > { %v5390_v14 = vpop.permute.xlu0 %2285 }
 0x5bc   : > { %1756 = vadd.xlane.f32.xlu1 %v5331_v7 }
 0x5bf   : > { %v5340_v30 = vpop.xlane.xlu1 %1712 }
 0x5c0   : > { %8280 = vst [vmem:[#allocation35_spill] sm:$0xff] %v5340_v30  ;;  %2205 = vadd.xlane.f32.xlu1 %v5343_v20  ;;  %v4495_v30 = vpop.eup %4494 }
 0x5c3   : > { %v5350_v29 = vpop.xlane.xlu1 %1761 }
 0x5c4   : > { %1519 = vadd.xlane.f32.xlu1 %v1514_v22  ;;  %v5368_v22 = vsel %vm2225_vm8, %v4495_v30, 0.0 }
 0x5c7   : > { %v1771_v46 = vpop.xlane.xlu1 %1770 }
 0x5c8   : > { %v1820_v5 = vmul.f32 %v5357_v25, %v1771_v46  ;;  %1843 = vrot.lane.b32.xlu0 %v1838_v36, %s4773_s12 }
 0x5ca   : > { %v5361_v4 = vsel %vm1776_vm6, %v1820_v5, -1.0  ;;  %v1592_v5 = vmul.f32 %v5371_v42, %v5319_v61 }
 0x5cb   : > { %8282 = vst [vmem:[#allocation37_spill] sm:$0xff] %v5361_v4  ;;  %v5363_v18 = vpop.xlane.xlu1 %2210  ;;  %v1467_v4 = vmul.f32 %v5235_v28, %v5191_v62 }
 0x5cd   : > { %v5383_v30 = vsub.f32 %v5241_v38, %v1467_v4 }
 0x5cf   : > { %v2220_v39 = vpop.xlane.xlu1 %2219  ;;  %8284 = vst [vmem:[#allocation39_spill] sm:$0xff] %v5383_v30  ;;  %4496 = vrcp.f32 %v5383_v30 }
 0x5d0   : > { %v2267_v0 = vmul.f32 %v5368_v22, %v2220_v39  ;;  %v2163_v39 = vmul.f32 %v5275_v2, %v5235_v28 }
 0x5d2   : > { %v5373_v46 = vsel %vm2225_vm8, %v2267_v0, -1.0  ;;  %v5393_v0 = vsub.f32 %v5241_v38, %v2163_v39  ;;  %vm1580_vm8 = vcmask 56368  }
 0x5d3   : > { %v1527_v63 = vpop.xlane.xlu1 %1526 }
 0x5d4   : > { %8286 = vst [vmem:[#allocation41_spill] sm:$0xff] %v5393_v0  ;;  %4498 = vrcp.f32 %v5393_v0 }
 0x5d5   : > { %1597 = vrot.lane.b32.xlu1 %v1592_v5, %s4773_s12 }
 0x5d9   : > { %v5398_v42 = vpop.eup %4496 }
 0x5da   : > { %8288 = vst [vmem:[#allocation43_spill] sm:$0xff] %v5398_v42 }
 0x5de   : > { %v5413_v30 = vpop.eup %4498 }
 0x5df   : > { %8290 = vst [vmem:[#allocation45_spill] sm:$0xff] %v5413_v30 }
 0x5e7   : > { %1948 = vmax.xlane.f32.xlu0 %v1838_v36  ;;  %v2158_v36 = vmul.f32 %v5402_v56, %v5129_v6 }
 0x5e9   : > { %v5420_v8 = vsub.f32 %v5135_v9, %v2158_v36 }
 0x5ea   : > { %v5395_v62 = vpop.xlane.xlu0 %2390 }
 0x5eb   : > { %8287 = vst [vmem:[#allocation42_spill] sm:$0xff] %v5395_v62  ;;  %8291 = vst [vmem:[#allocation46_spill] sm:$0xff] %v5420_v8 }
 0x5ee   : > { %v5400_v4 = vpop.xlane.xlu0 %1508 }
 0x5ef   : > { %4500 = vrcp.f32 %v5400_v4  ;;  %v1543_v2 = vmul.f32 %v5398_v42, %v5400_v4  ;;  %vm1531_vm10 = vcmp.gt.f32.partialorder %v5400_v4, 0.0 }
 0x5f1   : > { %1547 = vst.msk [vmem:[%s4924_s11 + $0x8] sm:$0xff] %vm1545_vm11, %v1543_v2  ;;  %v5425_v2 = vsel %vm2278_vm9, %v5336_v10, 0.0 }
 0x5f2   : > { %v5409_v39 = vpop.xlane.xlu0 %1754  ;;  %8292 = vst [vmem:[#allocation47_spill] sm:$0xff] %v5425_v2  ;;  %v2284_v36 = vmul.f32 %v5425_v2, %v5420_v8 }
 0x5f3   : > { %8289 = vst [vmem:[#allocation44_spill] sm:$0xff] %v5409_v39  ;;  %4502 = vrcp.f32 %v5409_v39  ;;  %vm1777_vm12 = vcmp.gt.f32.partialorder %v5409_v39, 0.0 }
 0x5f6   : > { %v5417_v62 = vpop.xlane.xlu0 %2203 }
 0x5f7   : > { %v2238_v42 = vmul.f32 %v5413_v30, %v5417_v62  ;;  %v1760_v30 = vmul.f32 %v5331_v7, %v5165_v31  ;;  %v8293_v31 = vmov 0   ;;  %4504 = vrcp.f32 %v5417_v62 }
 0x5f8   : > { %vm2226_vm14 = vcmp.gt.f32.partialorder %v5417_v62, 0.0 }
 0x5f9   : > { %v4501_v0 = vpop.eup %4500  ;;  %1716 = vmax.xlane.f32.xlu1 %v1592_v5  ;;  %2241 = vst.msk [vmem:[%s4924_s11 + $0x20] sm:$0xff] %vm1545_vm11, %v2238_v42  ;;  %v1769_v5 = vmul.f32 %v5331_v7, %v5319_v61  ;;  %v2209_v42 = vmul.f32 %v5343_v20, %v5167_v34  ;;  %v1468_v7 = vmul.f32 %v5235_v28, %v5309_v57 }
 0x5fa   : > { %v5430_v41 = vsel %vm1531_vm10, %v4501_v0, 0.0  ;;  %v5451_v0 = vpop.xlane.xlu0 %1517 }
 0x5fb   : > { %v1575_v49 = vmul.f32 %v5430_v41, %v1527_v63  ;;  %v2218_v63 = vmul.f32 %v5343_v20, %v5420_v8 }
 0x5fd   : > { %2289 = vrot.lane.b32.xlu0 %v2284_v36, %s4773_s12  ;;  %1765 = vadd.xlane.f32.xlu1 %v1760_v30  ;;  %v5438_v27 = vsel %vm1531_vm10, %v1575_v49, -1.0  ;;  %v5449_v30 = vpop.xlane.xlu1 %1763 }
 0x5fe   : > { %v5457_v20 = vpop.permute.xlu0 %1595 }
 0x5ff   : > { %v5619_v11 = vsel %vm1251_vm13, %v5457_v20, 0.0 }
 0x601   : > { %1774 = vadd.xlane.f32.xlu1 %v1769_v5  ;;  %v1842_v49 = vpop.permute.xlu1 %1841 }
 0x605   : > { %2214 = vadd.xlane.f32.xlu1 %v2209_v42 }
 0x609   : > { %2223 = vadd.xlane.f32.xlu1 %v2218_v63  ;;  %v4503_v63 = vpop.eup %4502 }
 0x60a   : > { %v5469_v57 = vsel %vm1777_vm12, %v4503_v63, 0.0  ;;  %v4505_v61 = vpop.eup %4504 }
 0x60b   : > { %v5485_v63 = vsel %vm2226_vm14, %v4505_v61, 0.0 }
 0x60c   : > { %v5462_v5 = vpop.xlane.xlu1 %1946 }
 0x60d   : > { %8295 = vst [vmem:[#allocation49_spill] sm:$0xff] %v5462_v5  ;;  %v5478_v5 = vsel %vm1251_vm13, %v5329_v48, 0.0  ;;  %v5493_v48 = vsel %vm1251_vm13, %v1842_v49, 0.0 }
 0x60e   : > { %8299 = vst [vmem:[#allocation53_spill] sm:$0xff] %v5493_v48 }
 0x610   : > { %v5472_v21 = vpop.xlane.xlu1 %2212 }
 0x61a   : > { %2410 = vperm.xlu1 %4481, %v5056_v50  }
 0x61c   : > { %2394 = vmax.xlane.f32.xlu0 %v2284_v36  ;;  %v5460_v36 = vsub.f32 %v5241_v38, %v1468_v7 }
 0x61e   : > { %2420 = vperm.xlu1 %4481, %v5067_v51   ;;  %8294 = vst [vmem:[#allocation48_spill] sm:$0xff] %v5460_v36  ;;  %4506 = vrcp.f32 %v5460_v36 }
 0x622   : > { %4482 = vset.pattern.permute.xlu1 %v8293_v31 }
 0x628   : > { %v5489_v13 = vpop.eup %4506 }
 0x629   : > { %8298 = vst [vmem:[#allocation52_spill] sm:$0xff] %v5489_v13 }
 0x62f   : > { %v5464_v42 = vpop.xlane.xlu0 %1714 }
 0x630   : > { %8296 = vst [vmem:[#allocation50_spill] sm:$0xff] %v5464_v42 }
 0x632   : > { %2415 = vperm.xlu0 %4480, %v5023_v45  }
 0x633   : > { %v1773_v2 = vpop.xlane.xlu0 %1772 }
 0x634   : > { %v1821_v7 = vmul.f32 %v5469_v57, %v1773_v2 }
 0x636   : > { %v5480_v36 = vsel %vm1777_vm12, %v1821_v7, -1.0  ;;  %1604 = vrot.lane.b32.xlu0 %v5478_v5, %s4773_s12  ;;  %v2164_v7 = vmul.f32 %v5402_v56, %v5235_v28 }
 0x637   : > { %8297 = vst [vmem:[#allocation51_spill] sm:$0xff] %v5480_v36  ;;  %v2222_v42 = vpop.xlane.xlu0 %2221  ;;  %4483 = vset.pattern.permute.xlu0 %v8293_v31  ;;  %v2288_v36 = vpop.permute.xlu1 %2287 }
 0x638   : > { %v2268_v2 = vmul.f32 %v5485_v63, %v2222_v42  ;;  %v5508_v49 = vsel %vm1251_vm13, %v2288_v36, 0.0  ;;  %v5511_v56 = vsub.f32 %v5241_v38, %v2164_v7 }
 0x639   : > { %8300 = vst [vmem:[#allocation54_spill] sm:$0xff] %v5508_v49 }
 0x63a   : > { %v5497_v44 = vsel %vm2226_vm14, %v2268_v2, -1.0  ;;  %1850 = vrot.lane.b32.xlu0 %v5493_v48, %s4773_s12  ;;  %8301 = vst [vmem:[#allocation55_spill] sm:$0xff] %v5511_v56 }
 0x63b   : > { %v5501_v61 = vpop.xlane.xlu0 %1510 }
 0x63c   : > { %4508 = vrcp.f32 %v5501_v61  ;;  %v1544_v31 = vmul.f32 %v5489_v13, %v5501_v61  ;;  %vm1532_vm15 = vcmp.gt.f32.partialorder %v5501_v61, 0.0 }
 0x63d   : > { %4510 = vrcp.f32 %v5511_v56 }
 0x63e   : > { %2296 = vrot.lane.b32.xlu0 %v5508_v49, %s4773_s12  ;;  %1548 = vst.msk [vmem:[%s4924_s11 + $0x10] sm:$0xff] %vm1545_vm11, %v1544_v31  ;;  %v1549_v49 = vmul.f32 %v5258_v52, %v4995_v33 }
 0x63f   : > { %v1529_v36 = vpop.xlane.xlu0 %1528 }
 0x640   : > { %v1552_v20 = vadd.f32 %v1549_v49, %v5324_v43 }
 0x642   : > { %v1555_v48 = vmul.f32 %v1552_v20, %v5286_v15  ;;  %v2244_v20 = vmul.f32 %v5417_v62, %v5023_v45 }
 0x645   : > { %v5518_v42 = vpop.xlane.xlu1 %2392 }
 0x646   : > { %8302 = vst [vmem:[#allocation56_spill] sm:$0xff] %v5518_v42  ;;  %v4509_v2 = vpop.eup %4508 }
 0x647   : > { %v5521_v13 = vsel %vm1532_vm15, %v4509_v2, 0.0  ;;  %v5528_v38 = vpop.eup %4510  ;;  %v1795_v2 = vmul.f32 %v5270_v1, %v4995_v33  ;;  %v1550_v1 = vmul.f32 %v5400_v4, %v5007_v40 }
 0x648   : > { %v1576_v16 = vmul.f32 %v5521_v13, %v1529_v36  ;;  %8304 = vst [vmem:[#allocation58_spill] sm:$0xff] %v5528_v38 }
 0x649   : > { %v5524_v28 = vpop.xlane.xlu1 %1756  ;;  %v1798_v36 = vadd.f32 %v1795_v2, %v5350_v29 }
 0x64a   : > { %8303 = vst [vmem:[#allocation57_spill] sm:$0xff] %v5524_v28  ;;  %v5526_v7 = vsel %vm1532_vm15, %v1576_v16, -1.0  ;;  %4512 = vrcp.f32 %v5524_v28  ;;  %vm1778_vm0 = vcmp.gt.f32.partialorder %v5524_v28, 0.0 }
 0x64d   : > { %v5530_v9 = vpop.xlane.xlu1 %2205 }
 0x64e   : > { %v2239_v31 = vmul.f32 %v5528_v38, %v5530_v9  ;;  %v2246_v38 = vadd.f32 %v2243_v12, %v5363_v18  ;;  %4514 = vrcp.f32 %v5530_v9  ;;  %vm2227_vm1 = vcmp.gt.f32.partialorder %v5530_v9, 0.0 }
 0x64f   : > { %v2245_v62 = vmul.f32 %v5530_v9, %v5067_v51  ;;  %v3306_v51 = vld [vmem:[%s8116_s5 + $0x48] sm:$0xff]  ;;  %v8311_v9 = vmov 0.0  }
 0x650   : > { %2242 = vst.msk [vmem:[%s4924_s11 + $0x28] sm:$0xff] %vm1545_vm11, %v2239_v31  ;;  %v1801_v31 = vmul.f32 %v1798_v36, %v5357_v25  ;;  %v2249_v29 = vmul.f32 %v2246_v38, %v5368_v22  ;;  %4263 = vmatmul.mubr.msk.f32.vlgmr.msra.gmra.mrb[6].mxu1 %vm1261_vm5, %v3306_v51 }
 0x651   : > { %v5536_v56 = vpop.xlane.xlu1 %1519  ;;  %4265 = vmatprep.mubr.msk.f32.mxu1 %vm4770_vm4, %v8311_v9  ;;  %4307 = vmatpush3.bf16.msra.mxu1 %v4988_v32 }
 0x654   : > { %v4513_v18 = vpop.eup %4512 }
 0x655   : > { %v1598_v42 = vpop.permute.xlu1 %1597  ;;  %v5566_v38 = vsel %vm1778_vm0, %v4513_v18, 0.0 }
 0x656   : > { %v5543_v16 = vsel %vm1251_vm13, %v1598_v42, 0.0  ;;  %v1553_v42 = vadd.f32 %v1550_v1, %v5451_v0 }
 0x657   : > { %8305 = vst [vmem:[#allocation59_spill] sm:$0xff] %v5543_v16  ;;  %1608 = vrot.lane.b32.xlu0 %v5543_v16, %s4773_s12 }
 0x658   : > { %v1556_v3 = vmul.f32 %v1553_v42, %v5430_v41  ;;  %v4515_v0 = vpop.eup %4514 }
 0x659   : > { %v5574_v2 = vsel %vm2227_vm1, %v4515_v0, 0.0 }
 0x65b   : > { %1807 = vrot.lane.b32.xlu0 %v1801_v31, %s4774_s16 }
 0x65f   : > { %2255 = vrot.lane.b32.xlu0 %v2249_v29, %s4774_s16 }
 0x663   : > { %1563 = vrot.lane.b32.xlu0 %v1556_v3, %s4774_s16 }
 0x686   : > { %v5560_v25 = vpop.xlane.xlu1 %1716 }
 0x687   : > { %8306 = vst [vmem:[#allocation60_spill] sm:$0xff] %v5560_v25 }
 0x68a   : > { %v5563_v12 = vpop.xlane.xlu1 %1765 }
 0x68e   : > { %v1775_v1 = vpop.xlane.xlu1 %1774 }
 0x68f   : > { %v1822_v22 = vmul.f32 %v5566_v38, %v1775_v1  ;;  %v1844_v1 = vpop.permute.xlu0 %1843 }
 0x690   : > { %v5628_v6 = vsel %vm1251_vm13, %v1844_v1, 0.0 }
 0x691   : > { %v5569_v4 = vsel %vm1778_vm0, %v1822_v22, -1.0 }
 0x692   : > { %8307 = vst [vmem:[#allocation61_spill] sm:$0xff] %v5569_v4  ;;  %v5571_v41 = vpop.xlane.xlu1 %2214 }
 0x693   : > { %v5585_v22 = vpop.xlane.xlu0 %1948 }
 0x694   : > { %8308 = vst [vmem:[#allocation62_spill] sm:$0xff] %v5585_v22  ;;  %v5605_v22 = vsel %vm1251_vm13, %v5390_v14, 0.0 }
 0x696   : > { %v2224_v36 = vpop.xlane.xlu1 %2223 }
 0x697   : > { %v2269_v31 = vmul.f32 %v5574_v2, %v2224_v36  ;;  %v2290_v0 = vpop.permute.xlu0 %2289  ;;  %v5594_v36 = vsel %vm1251_vm13, %v5380_v53, 0.0 }
 0x699   : > { %v5577_v29 = vsel %vm2227_vm1, %v2269_v31, -1.0 }
 0x69a   : > { %v5579_v42 = vpop.permute.xlu1 %2410 }
 0x69b   : > { %vm2423_vm2 = vcmp.gt.f32.partialorder %v5154_v19, %v5579_v42  ;;  %vm2504_vm12 = vcmp.lt.f32.partialorder %v5154_v19, %v5579_v42 }
 0x69c   : > { %v2426_v3 = vsel %vm2423_vm2, %v5152_v17, 0.0 }
 0x69d   : > { %2429 = vadd.xlane.f32.xlu1 %v2426_v3  ;;  %v2435_v18 = vmul.f32 %v2426_v3, %v5154_v19 }
 0x69e   : > { %v5587_v4 = vpop.permute.xlu1 %2420 }
 0x69f   : > { %vm2425_vm3 = vcmp.gt.f32.partialorder %v5167_v34, %v5587_v4  ;;  %vm2506_vm14 = vcmp.lt.f32.partialorder %v5167_v34, %v5587_v4 }
 0x6a9   : > { %v5589_v25 = vpop.xlane.xlu0 %2394 }
 0x6aa   : > { %8309 = vst [vmem:[#allocation63_spill] sm:$0xff] %v5589_v25  ;;  %v2428_v25 = vsel %vm2425_vm3, %v5336_v10, 0.0 }
 0x6ab   : > { %v2446_v14 = vmul.f32 %v2428_v25, %v5420_v8 }
 0x6ae   : > { %1848 = vrot.lane.b32.xlu1 %v5594_v36, %s4773_s12 }
 0x6b1   : > { %v5600_v31 = vpop.permute.xlu0 %2415 }
 0x6b2   : > { %2294 = vrot.lane.b32.xlu1 %v5605_v22, %s4773_s12  ;;  %vm2424_vm6 = vcmp.gt.f32.partialorder %v5162_v26, %v5600_v31 }
 0x6b3   : > { %v5612_v53 = vsel %vm2424_vm6, %v5230_v58, 0.0 }
 0x6b4   : > { %2431 = vadd.xlane.f32.xlu0 %v5612_v53  ;;  %v2436_v15 = vmul.f32 %v5612_v53, %v5162_v26 }
 0x6b5   : > { %v5624_v16 = vpop.permute.xlu0 %1604 }
 0x6b6   : > { %1606 = vrot.lane.b32.xlu1 %v5619_v11, %s4773_s12 }
 0x6b8   : > { %2451 = vadd.xlane.f32.xlu0 %v2446_v14  ;;  %v5637_v14 = vsel %vm1251_vm13, %v2290_v0, 0.0  ;;  %v2444_v0 = vmul.f32 %v2426_v3, %v5188_v60 }
 0x6b9   : > { %v5641_v1 = vpop.permute.xlu0 %1850 }
 0x6ba   : > { %1852 = vrot.lane.b32.xlu1 %v5628_v6, %s4773_s12 }
 0x6bd   : > { %v5645_v33 = vpop.permute.xlu0 %2296 }
 0x6be   : > { %2298 = vrot.lane.b32.xlu1 %v5637_v14, %s4773_s12 }
 0x6c2   : > { %1561 = vrot.lane.b32.xlu1 %v1555_v48, %s4774_s16  ;;  %v2437_v48 = vmul.f32 %v2428_v25, %v5167_v34 }
 0x6c9   : > { %v5647_v52 = vpop.permute.xlu0 %1608 }
 0x6cd   : > { %v5649_v35 = vpop.permute.xlu0 %1807 }
 0x6ce   : > { %8310 = vst [vmem:[#allocation64_spill] sm:$0xff] %v5649_v35 }
 0x6d1   : > { %v2256_v43 = vpop.permute.xlu0 %2255 }
 0x6d2   : > { %2264 = vst.msk [vmem:[%s4924_s11 + $0x18] sm:$0xff] %vm1570_vm7, %v2256_v43 }
 0x6d3   : > { %2273 = vst.msk [vmem:[%s4924_s11 + $0x18] sm:$0xff] %vm1580_vm8, %v5373_v46  ;;  %v1796_v46 = vmul.f32 %v5409_v39, %v5007_v40  ;;  %v1797_v40 = vmul.f32 %v5524_v28, %v5002_v37  ;;  %v8338_v28 = vld [vmem:[#allocation15_spill] sm:$0xff]  ;;  %v8339_v39 = vld [vmem:[#allocation13_spill] sm:$0xff] }
 0x6d5   : > { %v1564_v49 = vpop.permute.xlu0 %1563 }
 0x6d6   : > { %1572 = vst.msk [vmem:[%s4924_s11 + $0x8] sm:$0xff] %vm1570_vm7, %v1564_v49  ;;  %v1551_v49 = vmul.f32 %v5501_v61, %v5002_v37  ;;  %v2633_v37 = vld [vmem:[%s8116_s5 + $0x30] sm:$0xff] }
 0x6d7   : > { %1582 = vst.msk [vmem:[%s4924_s11 + $0x8] sm:$0xff] %vm1580_vm8, %v5438_v27  ;;  %v1799_v27 = vadd.f32 %v1796_v46, %v5449_v30  ;;  %4237 = vmatmul.mubr.msk.f32.vlgmr.msra.gmra.mrb[6].mxu0 %vm1261_vm5, %v2633_v37  ;;  %v3307_v61 = vld [vmem:[%s8116_s5 + $0x50] sm:$0xff] }
 0x6d8   : > { %v1554_v3 = vadd.f32 %v1551_v49, %v5536_v56  ;;  %4239 = vmatprep.mubr.msk.f32.mxu0 %vm4770_vm4, %v8311_v9  ;;  %4301 = vmatpush3.bf16.msra.mxu0 %v4988_v32  ;;  %v2635_v56 = vld [vmem:[%s8116_s5 + $0x40] sm:$0xff] }
 0x6d9   : > { %v1802_v43 = vmul.f32 %v1799_v27, %v5469_v57  ;;  %v2248_v57 = vadd.f32 %v2245_v62, %v5571_v41  ;;  %4266 = vmatmul.mubr.msk.f32.gmra.mrb[8].mxu1 %vm1261_vm5, %v3307_v61 }
 0x6da   : > { %v1557_v45 = vmul.f32 %v1554_v3, %v5521_v13  ;;  %v2634_v13 = vld [vmem:[%s8116_s5 + $0x38] sm:$0xff]  ;;  %4268 = vmatprep.mubr.msk.f32.mxu1 %vm4770_vm4, %v8311_v9 }
 0x6db   : > { %4240 = vmatmul.mubr.msk.f32.gmra.mrb[8].mxu0 %vm1261_vm5, %v2634_v13 }
 0x6dc   : > { %4242 = vmatprep.mubr.msk.f32.mxu0 %vm4770_vm4, %v8311_v9 }
 0x6df   : > { %4243 = vmatmul.mubr.msk.f32.gmra.mrb[10].mxu0 %vm1261_vm5, %v2635_v56 }
 0x6e0   : > { %4249 = vmatprep.mubr.msk.f32.mxu0 %vm4770_vm4, %v8311_v9 }
 0x6e3   : > { %4250 = vmatmul.mubr.msk.f32.vlgmr.msra.gmra.mrb[6].mxu0 %vm1261_vm5, %v2633_v37 }
 0x6e4   : > { %4252 = vmatprep.mubr.msk.f32.mxu0 %vm4770_vm4, %v8311_v9 }
 0x6e6   : > { %2433 = vadd.xlane.f32.xlu1 %v2428_v25 }
 0x6e7   : > { %4253 = vmatmul.mubr.msk.f32.gmra.mrb[8].mxu0 %vm1261_vm5, %v2634_v13 }
 0x6e8   : > { %4255 = vmatprep.mubr.msk.f32.mxu0 %vm4770_vm4, %v8311_v9 }
 0x6ea   : > { %2438 = vadd.xlane.f32.xlu1 %v2435_v18  ;;  %v2247_v18 = vadd.f32 %v2244_v20, %v5472_v21  ;;  %v1800_v21 = vadd.f32 %v1797_v40, %v5563_v12  ;;  %v3308_v12 = vld [vmem:[%s8116_s5 + $0x58] sm:$0xff]  ;;  %v4558_v40 = vld [vmem:[%s4917_s26 + $0x20] sm:$0xff] }
 0x6eb   : > { %4269 = vmatmul.mubr.msk.f32.gmra.mrb[10].mxu1 %vm1261_vm5, %v3308_v12  ;;  %4256 = vmatmul.mubr.msk.f32.gmra.mrb[10].mxu0 %vm1261_vm5, %v2635_v56 }
 0x6ec   : > { %v2250_v25 = vmul.f32 %v2247_v18, %v5485_v63  ;;  %v1803_v30 = vmul.f32 %v1800_v21, %v5566_v38  ;;  %v2251_v63 = vmul.f32 %v2248_v57, %v5574_v2  ;;  %4275 = vmatprep.mubr.msk.f32.mxu1 %vm4770_vm4, %v8311_v9 }
 0x6ee   : > { %2440 = vadd.xlane.f32.xlu1 %v2436_v15  ;;  %v2445_v15 = vmul.f32 %v5612_v53, %v5294_v24 }
 0x6ef   : > { %4276 = vmatmul.mubr.msk.f32.vlgmr.msra.gmra.mrb[6].mxu1 %vm1261_vm5, %v3306_v51 }
 0x6f0   : > { %4278 = vmatprep.mubr.msk.f32.mxu1 %vm4770_vm4, %v8311_v9 }
 0x6f2   : > { %2442 = vadd.xlane.f32.xlu1 %v2437_v48 }
 0x6f3   : > { %4279 = vmatmul.mubr.msk.f32.gmra.mrb[8].mxu1 %vm1261_vm5, %v3307_v61 }
 0x6f4   : > { %4281 = vmatprep.mubr.msk.f32.mxu1 %vm4770_vm4, %v8311_v9 }
 0x6f6   : > { %2447 = vadd.xlane.f32.xlu1 %v2444_v0 }
 0x6f7   : > { %4282 = vmatmul.mubr.msk.f32.gmra.mrb[10].mxu1 %vm1261_vm5, %v3308_v12  ;;  %vm2505_vm5 = vcmp.lt.f32.partialorder %v5162_v26, %v5600_v31 }
 0x6f8   : > { %v5791_v51 = vsel %vm2505_vm5, %v5230_v58, 0.0  ;;  %v5803_v58 = vsel %vm2504_vm12, %v5152_v17, 0.0  ;;  %v5817_v17 = vsel %vm2506_vm14, %v5336_v10, 0.0 }
 0x6f9   : > { %8317 = vst [vmem:[#allocation70_spill] sm:$0xff] %v5791_v51  ;;  %8319 = vst [vmem:[#allocation72_spill] sm:$0xff] %v5803_v58  ;;  %v5814_v19 = vmul.f32 %v5803_v58, %v5188_v60  ;;  %v5825_v34 = vmul.f32 %v5817_v17, %v5420_v8 }
 0x6fa   : > { %8321 = vst [vmem:[#allocation74_spill] sm:$0xff] %v5817_v17 }
 0x707   : > { %1809 = vrot.lane.b32.xlu1 %v1802_v43, %s4774_s16 }
 0x70b   : > { %2257 = vrot.lane.b32.xlu1 %v2250_v25, %s4774_s16 }
 0x70f   : > { %1565 = vrot.lane.b32.xlu1 %v1557_v45, %s4774_s16 }
 0x713   : > { %1811 = vrot.lane.b32.xlu1 %v1803_v30, %s4774_s16 }
 0x717   : > { %2259 = vrot.lane.b32.xlu1 %v2251_v63, %s4774_s16  ;;  %v4559_v63 = vld [vmem:[%s4917_s26 + $0x28] sm:$0xff] }
 0x72a   : > { %v5734_v32 = vpop.xlane.xlu1 %2429 }
 0x72b   : > { %8312 = vst [vmem:[#allocation65_spill] sm:$0xff] %v5734_v32  ;;  %4516 = vrcp.f32 %v5734_v32  ;;  %v2471_v18 = vmul.f32 %v5734_v32, %v5056_v50  ;;  %vm2453_vm4 = vcmp.gt.f32.partialorder %v5734_v32, 0.0 }
 0x72e   : > { %v5742_v38 = vpop.permute.xlu1 %1848 }
 0x732   : > { %v5746_v41 = vpop.permute.xlu1 %2294 }
 0x735   : > { %v4517_v53 = vpop.eup %4516 }
 0x736   : > { %v5748_v2 = vpop.permute.xlu1 %1606 }
 0x73a   : > { %v5752_v48 = vpop.permute.xlu1 %1852 }
 0x73b   : > { %2449 = vadd.xlane.f32.xlu1 %v2445_v15  ;;  %v5800_v15 = vmul.f32 %v5791_v51, %v5294_v24 }
 0x73e   : > { %v5754_v0 = vpop.permute.xlu1 %2298 }
 0x741   : > { %v5762_v20 = vpop.xlane.xlu0 %2431 }
 0x742   : > { %v1562_v46 = vpop.permute.xlu1 %1561  ;;  %8313 = vst [vmem:[#allocation66_spill] sm:$0xff] %v5762_v20  ;;  %4518 = vrcp.f32 %v5762_v20  ;;  %v2472_v45 = vmul.f32 %v4558_v40, %v5762_v20  ;;  %vm2454_vm9 = vcmp.gt.f32.partialorder %v5762_v20, 0.0  ;;  %v5858_v40 = vld [vmem:[%s4917_s26 + $0x30] sm:$0xff] }
 0x743   : > { %1571 = vst.msk [vmem:[%s4924_s11] sm:$0xff] %vm1570_vm7, %v1562_v46 }
 0x744   : > { %1581 = vst.msk [vmem:[%s4924_s11] sm:$0xff] %vm1580_vm8, %v5291_v23  ;;  %v5773_v23 = vsel %vm2453_vm4, %v4517_v53, 0.0 }
 0x745   : > { %8315 = vst [vmem:[#allocation68_spill] sm:$0xff] %v5773_v23  ;;  %v2452_v26 = vpop.xlane.xlu0 %2451 }
 0x74c   : > { %v4519_v25 = vpop.eup %4518 }
 0x74d   : > { %v5784_v62 = vsel %vm2454_vm9, %v4519_v25, 0.0 }
 0x74e   : > { %8316 = vst [vmem:[#allocation69_spill] sm:$0xff] %v5784_v62 }
 0x773   : > { %v5765_v27 = vpop.xlane.xlu1 %2433 }
 0x774   : > { %8314 = vst [vmem:[#allocation67_spill] sm:$0xff] %v5765_v27  ;;  %4520 = vrcp.f32 %v5765_v27  ;;  %vm2455_vm10 = vcmp.gt.f32.partialorder %v5765_v27, 0.0  ;;  %v2473_v37 = vmul.f32 %v4559_v63, %v5765_v27  ;;  %v5878_v63 = vld [vmem:[%s4917_s26 + $0x38] sm:$0xff]  ;;  %v3479_v27 = vadd.s32 72, %v5181_v47 }
 0x777   : > { %v2439_v43 = vpop.xlane.xlu1 %2438 }
 0x778   : > { %v2474_v49 = vadd.f32 %v2471_v18, %v2439_v43 }
 0x77a   : > { %v2477_v3 = vmul.f32 %v2474_v49, %v5773_v23 }
 0x77b   : > { %v2441_v21 = vpop.xlane.xlu1 %2440 }
 0x77c   : > { %v2475_v50 = vadd.f32 %v2472_v45, %v2441_v21  ;;  %2483 = vrot.lane.b32.xlu1 %v2477_v3, %s4774_s16  ;;  %v5865_v21 = vld [vmem:[%s4917_s26 + $0x40] sm:$0xff] }
 0x77e   : > { %v4521_v30 = vpop.eup %4520  ;;  %v2478_v57 = vmul.f32 %v2475_v50, %v5784_v62 }
 0x77f   : > { %v2464_v31 = vsel %vm2455_vm10, %v4521_v30, 0.0  ;;  %v2443_v9 = vpop.xlane.xlu1 %2442 }
 0x780   : > { %v2497_v13 = vmul.f32 %v2464_v31, %v2452_v26  ;;  %v2476_v61 = vadd.f32 %v2473_v37, %v2443_v9  ;;  %2485 = vrot.lane.b32.xlu0 %v2478_v57, %s4774_s16  ;;  %v5875_v57 = vld [vmem:[%s4917_s26 + $0x48] sm:$0xff]  ;;  %v5883_v37 = vld [vmem:[%s4917_s26 + $0x58] sm:$0xff]  ;;  %v5886_v26 = vld [vmem:[%s4917_s26 + $0x50] sm:$0xff]  ;;  %v1854_v9 = vsel %vm1251_vm13, %v5742_v38, 0.0  ;;  %v1611_v38 = vsel %vm1251_vm13, %v5748_v2, 0.0 }
 0x782   : > { %v5796_v56 = vsel %vm2455_vm10, %v2497_v13, -1.0  ;;  %v2479_v12 = vmul.f32 %v2476_v61, %v2464_v31  ;;  %v1610_v31 = vsel %vm1251_vm13, %v5624_v16, 0.0  ;;  %v5900_v61 = vmax.f32 %v5594_v36, %v1854_v9 }
 0x783   : > { %8318 = vst [vmem:[#allocation71_spill] sm:$0xff] %v5796_v56  ;;  %v5805_v46 = vpop.xlane.xlu1 %2447  ;;  %v5897_v13 = vmax.f32 %v5478_v5, %v1610_v31  ;;  %v8328_v16 = vmov 1  }
 0x784   : > { %8320 = vst [vmem:[#allocation73_spill] sm:$0xff] %v5805_v46  ;;  %2515 = vrot.lane.b32.xlu0 %v5800_v15, %s4773_s12  ;;  %2487 = vrot.lane.b32.xlu1 %v2479_v12, %s4774_s16  ;;  %v2300_v12 = vsel %vm1251_vm13, %v5746_v41, 0.0 }
 0x785   : > { %v5912_v5 = vmax.f32 %v5605_v22, %v2300_v12 }
 0x787   : > { %v5819_v42 = vpop.permute.xlu1 %1809 }
 0x788   : > { %8322 = vst [vmem:[#allocation75_spill] sm:$0xff] %v5819_v42  ;;  %2513 = vrot.lane.b32.xlu1 %v5814_v19, %s4773_s12 }
 0x78b   : > { %v2258_v4 = vpop.permute.xlu1 %2257 }
 0x78c   : > { %2265 = vst.msk [vmem:[%s4924_s11 + $0x20] sm:$0xff] %vm1570_vm7, %v2258_v4  ;;  %2517 = vrot.lane.b32.xlu1 %v5825_v34, %s4773_s12 }
 0x78d   : > { %2274 = vst.msk [vmem:[%s4924_s11 + $0x20] sm:$0xff] %vm1580_vm8, %v5497_v44 }
 0x78f   : > { %v1566_v10 = vpop.permute.xlu1 %1565 }
 0x790   : > { %1573 = vst.msk [vmem:[%s4924_s11 + $0x10] sm:$0xff] %vm1570_vm7, %v1566_v10  ;;  %v5924_v10 = vmax.f32 %v5619_v11, %v1611_v38 }
 0x791   : > { %1583 = vst.msk [vmem:[%s4924_s11 + $0x10] sm:$0xff] %vm1580_vm8, %v5526_v7 }
 0x793   : > { %v5839_v53 = vpop.permute.xlu1 %1811 }
 0x794   : > { %8323 = vst [vmem:[#allocation76_spill] sm:$0xff] %v5839_v53 }
 0x797   : > { %v2260_v18 = vpop.permute.xlu1 %2259 }
 0x798   : > { %2266 = vst.msk [vmem:[%s4924_s11 + $0x28] sm:$0xff] %vm1570_vm7, %v2260_v18 }
 0x799   : > { %2275 = vst.msk [vmem:[%s4924_s11 + $0x28] sm:$0xff] %vm1580_vm8, %v5577_v29 }
 0x7b6   : > { %v5914_v36 = vpop.f32.mrb[6].mxu0 }
 0x7b7   : > { %v4251_v41 = vpop.f32.mrb[7].mxu0 }
 0x7ba   : > { %v5921_v4 = vpop.f32.mrb[8].mxu0 }
 0x7bb   : > { %v4254_v18 = vpop.f32.mrb[9].mxu0 }
 0x7bc   : > { %v1856_v18 = vsel %vm1251_vm13, %v5752_v48, 0.0  ;;  %v1855_v48 = vsel %vm1251_vm13, %v5641_v1, 0.0 }
 0x7bd   : > { %v5951_v56 = vmax.f32 %v5628_v6, %v1856_v18  ;;  %v8332_v6 = vld [vmem:[#allocation33_spill] sm:$0xff] }
 0x7be   : > { %v5928_v22 = vpop.f32.mrb[10].mxu0  ;;  %v8333_v18 = vld [vmem:[#allocation53_spill] sm:$0xff]  ;;  %v3480_v32 = vadd.s32 72, %v8332_v6 }
 0x7c8   : > { %v5846_v43 = vpop.xlane.xlu1 %2449 }
 0x7c9   : > { %8324 = vst [vmem:[#allocation77_spill] sm:$0xff] %v5846_v43 }
 0x7ee   : > { %v5848_v49 = vpop.permute.xlu1 %2483 }
 0x7ef   : > { %8325 = vst [vmem:[#allocation78_spill] sm:$0xff] %v5848_v49 }
 0x7f2   : > { %v5850_v44 = vpop.permute.xlu0 %2485 }
 0x7f3   : > { %8326 = vst [vmem:[#allocation79_spill] sm:$0xff] %v5850_v44 }
 0x7f6   : > { %v2516_v25 = vpop.permute.xlu0 %2515  ;;  %v5852_v3 = vpop.permute.xlu1 %2487 }
 0x7f7   : > { %8327 = vst [vmem:[#allocation80_spill] sm:$0xff] %v5852_v3  ;;  %v2520_v7 = vsel %vm1251_vm13, %v2516_v25, 0.0  ;;  %v5930_v25 = vpop.f32.mrb[6].mxu1 }
 0x7f8   : > { %2524 = vrot.lane.b32.xlu1 %v2520_v7, %s4773_s12  ;;  %8329 = vst [vmem:[#allocation81_spill] sm:$0xff] %v5930_v25 }
 0x7fa   : > { %v2514_v29 = vpop.permute.xlu1 %2513 }
 0x7fb   : > { %v2519_v45 = vsel %vm1251_vm13, %v2514_v29, 0.0  ;;  %v4277_v29 = vpop.f32.mrb[7].mxu1 }
 0x7fc   : > { %2855 = vperm.xlu1 %4482, %v5858_v40   ;;  %2522 = vrot.lane.b32.xlu0 %v2519_v45, %s4773_s12  ;;  %v5932_v2 = vpop.f32.mrb[8].mxu1 }
 0x7fd   : > { %8330 = vst [vmem:[#allocation82_spill] sm:$0xff] %v5932_v2  ;;  %v4280_v31 = vpop.f32.mrb[9].mxu1 }
 0x7fe   : > { %v2518_v50 = vpop.permute.xlu1 %2517  ;;  %v5934_v9 = vpop.f32.mrb[10].mxu1 }
 0x7ff   : > { %v5869_v30 = vsel %vm1251_vm13, %v2518_v50, 0.0  ;;  %v4257_v50 = vpop.f32.mrb[11].mxu0  ;;  %8331 = vst [vmem:[#allocation83_spill] sm:$0xff] %v5934_v9  ;;  %v4283_v12 = vpop.f32.mrb[11].mxu1 }
 0x800   : > { %2865 = vperm.xlu1 %4482, %v5865_v21   ;;  %2526 = vrot.lane.b32.xlu0 %v5869_v30, %s4773_s12  ;;  %v2806_v50 = vadd.s32 48, %v5181_v47 }
 0x804   : > { %3528 = vperm.xlu1 %4482, %v5875_v57   ;;  %2860 = vperm.xlu0 %4483, %v5878_v63  }
 0x808   : > { %3538 = vperm.xlu1 %4482, %v5883_v37   ;;  %3533 = vperm.xlu0 %4483, %v5886_v26  }
 0x80c   : > { %1616 = vrot.lane.b32.xlu1 %v5897_v13, %s4775_s25  ;;  %1860 = vrot.lane.b32.xlu0 %v5900_v61, %s4775_s25 }
 0x80d   : > { %4484 = vset.pattern.permute.xlu0 %v8328_v16  ;;  %4485 = vset.pattern.permute.xlu1 %v8328_v16  ;;  %v2805_v16 = vadd.s32 48, %v5102_v55 }
 0x80f   : > { %v2808_v29 = vadd.s32 %v2805_v16, %v5100_v54  ;;  %v2302_v16 = vsel %vm1251_vm13, %v5754_v0, 0.0  ;;  %v2301_v0 = vsel %vm1251_vm13, %v5645_v33, 0.0  ;;  %v1612_v33 = vsel %vm1251_vm13, %v5647_v52, 0.0  ;;  %v8336_v52 = vld [vmem:[#allocation59_spill] sm:$0xff] }
 0x810   : > { %2306 = vrot.lane.b32.xlu0 %v5912_v5, %s4775_s25  ;;  %v5971_v1 = vmax.f32 %v5637_v14, %v2302_v16  ;;  %v8335_v16 = vld [vmem:[#allocation12_spill] sm:$0xff] }
 0x814   : > { %1618 = vrot.lane.b32.xlu0 %v5924_v10, %s4775_s25 }
 0x86a   : > { %v2525_v11 = vpop.permute.xlu1 %2524 }
 0x86b   : > { %v2529_v38 = vsel %vm1251_vm13, %v2525_v11, 0.0  ;;  %v2811_v11 = vand.u32 1, %v2808_v29 }
 0x86c   : > { %v5939_v41 = vmax.f32 %v2520_v7, %v2529_v38  ;;  %v2809_v38 = vadd.s32 %v2806_v50, %v5100_v54 }
 0x86d   : > { %v5976_v29 = vcvt.s32.f32 %v2811_v11  ;;  %vm2817_vm15 = vcmp.eq.s32.totalorder %v2811_v11, 1  ;;  %v6002_v11 = vmax.f32 %v8336_v52, %v1612_v33 }
 0x86e   : > { %v2523_v31 = vpop.permute.xlu0 %2522  ;;  %2536 = vrot.lane.b32.xlu0 %v5939_v41, %s4775_s25  ;;  %v2812_v50 = vand.u32 1, %v2809_v38 }
 0x86f   : > { %v2528_v12 = vsel %vm1251_vm13, %v2523_v31, 0.0  ;;  %v5968_v31 = vmax.f32 %v8333_v18, %v1855_v48  ;;  %v3478_v48 = vadd.s32 72, %v5102_v55  ;;  %v8334_v18 = vld [vmem:[#allocation54_spill] sm:$0xff]  ;;  %v2829_v38 = vmul.f32 %v5976_v29, %v8335_v16 }
 0x870   : > { %v5953_v7 = vmax.f32 %v2519_v45, %v2528_v12  ;;  %v2807_v45 = vadd.s32 48, %v8332_v6  ;;  %v5985_v14 = vmax.f32 %v8334_v18, %v2301_v0  ;;  %v5992_v3 = vcvt.s32.f32 %v2812_v50  ;;  %v8337_v18 = vld [vmem:[#allocation14_spill] sm:$0xff] }
 0x871   : > { %v6006_v42 = vsel %vm2817_vm15, %v8338_v28, %v8337_v18  ;;  %v6013_v49 = vsub.f32 %v8339_v39, %v2829_v38  ;;  %vm2818_vm1 = vcmp.eq.s32.totalorder %v2812_v50, 1 }
 0x872   : > { %2534 = vrot.lane.b32.xlu1 %v5953_v7, %s4775_s25  ;;  %1864 = vrot.lane.b32.xlu0 %v5951_v56, %s4775_s25  ;;  %v2810_v12 = vadd.s32 %v2807_v45, %v5100_v54  ;;  %v2527_v53 = vpop.permute.xlu0 %2526  ;;  %v3481_v45 = vadd.s32 %v3478_v48, %v5100_v54  ;;  %v3482_v48 = vadd.s32 %v3479_v27, %v5100_v54 }
 0x873   : > { %v2530_v47 = vsel %vm1251_vm13, %v2527_v53, 0.0  ;;  %8340 = vst [vmem:[#allocation33_spill] sm:$0xff] %v6013_v49  ;;  %v6034_v27 = vsel %vm2818_vm1, %v8338_v28, %v8337_v18 }
 0x874   : > { %v2813_v55 = vand.u32 1, %v2810_v12  ;;  %v2830_v12 = vmul.f32 %v5992_v3, %v8335_v16  ;;  %v3484_v52 = vand.u32 1, %v3481_v45  ;;  %v6028_v38 = vmax.f32 %v5869_v30, %v2530_v47 }
 0x875   : > { %v3485_v50 = vand.u32 1, %v3482_v48  ;;  %v3483_v47 = vadd.s32 %v3480_v32, %v5100_v54 }
 0x876   : > { %1862 = vrot.lane.b32.xlu1 %v5968_v31, %s4775_s25  ;;  %2310 = vrot.lane.b32.xlu0 %v5971_v1, %s4775_s25  ;;  %v6021_v33 = vcvt.s32.f32 %v2813_v55  ;;  %vm2819_vm2 = vcmp.eq.s32.totalorder %v2813_v55, 1  ;;  %v6048_v45 = vcvt.s32.f32 %v3484_v52  ;;  %vm3490_vm5 = vcmp.eq.s32.totalorder %v3484_v52, 1 }
 0x877   : > { %v6057_v55 = vsel %vm2819_vm2, %v8338_v28, %v8337_v18  ;;  %v6064_v48 = vcvt.s32.f32 %v3485_v50  ;;  %v3486_v44 = vand.u32 1, %v3483_v47  ;;  %v6085_v62 = vsel %vm3490_vm5, %v8338_v28, %v8337_v18 }
 0x878   : > { %v2831_v6 = vmul.f32 %v6021_v33, %v8335_v16  ;;  %8342 = vst [vmem:[#allocation54_spill] sm:$0xff] %v6048_v45  ;;  %v3502_v46 = vmul.f32 %v6048_v45, %v8335_v16  ;;  %8348 = vst [vmem:[#allocation84_spill] sm:$0xff] %v6085_v62  ;;  %vm3491_vm12 = vcmp.eq.s32.totalorder %v3485_v50, 1 }
 0x879   : > { %8344 = vst [vmem:[#allocation59_spill] sm:$0xff] %v6064_v48  ;;  %v3503_v45 = vmul.f32 %v6064_v48, %v8335_v16  ;;  %v6101_v43 = vcvt.s32.f32 %v3486_v44  ;;  %vm3492_vm15 = vcmp.eq.s32.totalorder %v3486_v44, 1 }
 0x87a   : > { %2308 = vrot.lane.b32.xlu1 %v5985_v14, %s4775_s25  ;;  %3083 = vperm.xlu0 %4484, %v5858_v40   ;;  %v6074_v32 = vsub.f32 %v8339_v39, %v2831_v6  ;;  %v6097_v47 = vsub.f32 %v8339_v39, %v3502_v46  ;;  %v6133_v44 = vsel %vm3492_vm15, %v8338_v28, %v8337_v18 }
 0x87b   : > { %v5999_v0 = vpop.permute.xlu1 %2855  ;;  %8350 = vst [vmem:[#allocation86_spill] sm:$0xff] %v6101_v43  ;;  %v6122_v48 = vsub.f32 %v8339_v39, %v3503_v45  ;;  %8358 = vst [vmem:[#allocation94_spill] sm:$0xff] %v6133_v44 }
 0x87c   : > { %vm2949_vm0 = vcmp.lt.f32.partialorder %v5914_v36, %v5999_v0  ;;  %8345 = vst [vmem:[#allocation14_spill] sm:$0xff] %v6074_v32  ;;  %8349 = vst [vmem:[#allocation85_spill] sm:$0xff] %v6097_v47 }
 0x87d   : > { %v6025_v53 = vsel %vm2949_vm0, %v6006_v42, 0.0  ;;  %8355 = vst [vmem:[#allocation91_spill] sm:$0xff] %v6122_v48 }
 0x87e   : > { %1620 = vrot.lane.b32.xlu1 %v6002_v11, %s4775_s25  ;;  %3756 = vperm.xlu0 %4484, %v5875_v57   ;;  %8341 = vst [vmem:[#allocation53_spill] sm:$0xff] %v6025_v53  ;;  %v6037_v57 = vsub.f32 %v8339_v39, %v2830_v12  ;;  %v6044_v30 = vmul.f32 %v6025_v53, %v6013_v49 }
 0x87f   : > { %v6030_v23 = vpop.permute.xlu1 %2865 }
 0x880   : > { %vm2951_vm6 = vcmp.lt.f32.partialorder %v5928_v22, %v6030_v23  ;;  %vm2870_vm15 = vcmp.gt.f32.partialorder %v5928_v22, %v6030_v23 }
 0x881   : > { %v6081_v52 = vsel %vm2951_vm6, %v6057_v55, 0.0 }
 0x882   : > { %2538 = vrot.lane.b32.xlu1 %v6028_v38, %s4775_s25  ;;  %3766 = vperm.xlu0 %4484, %v5883_v37   ;;  %8347 = vst [vmem:[#allocation13_spill] sm:$0xff] %v6081_v52  ;;  %v6094_v6 = vmul.f32 %v6081_v52, %v6074_v32 }
 0x883   : > { %v6051_v12 = vpop.permute.xlu0 %2860  ;;  %v6078_v20 = vpop.permute.xlu1 %3528 }
 0x884   : > { %vm2950_vm3 = vcmp.lt.f32.partialorder %v5921_v4, %v6051_v12  ;;  %8346 = vst [vmem:[#allocation15_spill] sm:$0xff] %v6078_v20  ;;  %vm3622_vm10 = vcmp.lt.f32.partialorder %v5930_v25, %v6078_v20  ;;  %v6110_v20 = vsel %vm3491_vm12, %v8338_v28, %v8337_v18  ;;  %vm1252_vm12 = vcmp.ge.s32.totalorder %v5112_v59, 2 }
 0x885   : > { %v6062_v37 = vsel %vm2950_vm3, %v6034_v27, 0.0  ;;  %v6106_v50 = vsel %vm3622_vm10, %v6085_v62, 0.0  ;;  %8353 = vst [vmem:[#allocation89_spill] sm:$0xff] %v6110_v20 }
 0x886   : > { %8343 = vst [vmem:[#allocation12_spill] sm:$0xff] %v6062_v37  ;;  %3088 = vperm.xlu1 %4485, %v5878_v63   ;;  %2958 = vrot.lane.b32.xlu0 %v6044_v30, %s4773_s12  ;;  %v6071_v54 = vmul.f32 %v6062_v37, %v6037_v57  ;;  %8352 = vst [vmem:[#allocation88_spill] sm:$0xff] %v6106_v50  ;;  %v6119_v46 = vmul.f32 %v6106_v50, %v6097_v47 }
 0x887   : > { %v6103_v35 = vpop.permute.xlu0 %3533  ;;  %v3504_v37 = vmul.f32 %v6101_v43, %v8335_v16  ;;  %v6126_v52 = vpop.permute.xlu1 %3538 }
 0x888   : > { %8351 = vst [vmem:[#allocation87_spill] sm:$0xff] %v6103_v35  ;;  %vm3623_vm14 = vcmp.lt.f32.partialorder %v5932_v2, %v6103_v35  ;;  %8354 = vst [vmem:[#allocation90_spill] sm:$0xff] %v6119_v46  ;;  %vm3624_vm0 = vcmp.lt.f32.partialorder %v5934_v9, %v6126_v52 }
 0x889   : > { %8356 = vst [vmem:[#allocation92_spill] sm:$0xff] %v6126_v52  ;;  %v6129_v35 = vsel %vm3623_vm14, %v6110_v20, 0.0  ;;  %v6144_v16 = vsub.f32 %v8339_v39, %v3504_v37  ;;  %v6147_v45 = vsel %vm3624_vm0, %v6133_v44, 0.0  ;;  %vm2868_vm14 = vcmp.gt.f32.partialorder %v5914_v36, %v5999_v0 }
 0x88a   : > { %3093 = vperm.xlu1 %4485, %v5865_v21   ;;  %2960 = vrot.lane.b32.xlu0 %v6071_v54, %s4773_s12  ;;  %8357 = vst [vmem:[#allocation93_spill] sm:$0xff] %v6129_v35  ;;  %8361 = vst [vmem:[#allocation97_spill] sm:$0xff] %v6147_v45  ;;  %vm2869_vm0 = vcmp.gt.f32.partialorder %v5921_v4, %v6051_v12 }
 0x88b   : > { %8360 = vst [vmem:[#allocation96_spill] sm:$0xff] %v6144_v16  ;;  %v6153_v28 = vmul.f32 %v6147_v45, %v6144_v16  ;;  %v1861_v18 = vpop.permute.xlu0 %1860  ;;  %v6426_v0 = vsel %vm2869_vm0, %v6034_v27, 0.0 }
 0x88c   : > { %v2881_v23 = vmul.f32 %v6426_v0, %v5921_v4 }
 0x88d   : > { %8362 = vst [vmem:[#allocation98_spill] sm:$0xff] %v6153_v28 }
 0x88e   : > { %3761 = vperm.xlu1 %4485, %v5886_v26   ;;  %2962 = vrot.lane.b32.xlu0 %v6094_v6, %s4773_s12  ;;  %v6141_v26 = vmul.f32 %v6129_v35, %v6122_v48  ;;  %v6157_v35 = vpop.permute.xlu1 %1616 }
 0x88f   : > { %v2307_v50 = vpop.permute.xlu0 %2306 }
 0x890   : > { %8359 = vst [vmem:[#allocation95_spill] sm:$0xff] %v6141_v26 }
 0x892   : > { %3631 = vrot.lane.b32.xlu0 %v6119_v46, %s4773_s12 }
 0x893   : > { %v1619_v46 = vpop.permute.xlu0 %1618 }
 0x896   : > { %3633 = vrot.lane.b32.xlu0 %v6141_v26, %s4773_s12 }
 0x89a   : > { %3635 = vrot.lane.b32.xlu0 %v6153_v28, %s4773_s12 }
 0x8e0   : > { %v2537_v39 = vpop.permute.xlu0 %2536 }
 0x8e4   : > { %v6159_v37 = vpop.permute.xlu1 %2534  ;;  %v1865_v43 = vpop.permute.xlu0 %1864 }
 0x8e8   : > { %v6161_v52 = vpop.permute.xlu1 %1862  ;;  %v2311_v53 = vpop.permute.xlu0 %2310 }
 0x8ec   : > { %v6163_v26 = vpop.permute.xlu1 %2308 }
 0x8f0   : > { %v6169_v45 = vpop.permute.xlu1 %1620 }
 0x8f4   : > { %v6191_v60 = vpop.permute.xlu1 %2538 }
 0x8f9   : > { %v6165_v17 = vpop.permute.xlu0 %3083 }
 0x8fa   : > { %8363 = vst [vmem:[#allocation99_spill] sm:$0xff] %v6165_v17  ;;  %vm3177_vm1 = vcmp.lt.f32.partialorder %v5914_v36, %v6165_v17 }
 0x8fb   : > { %v6172_v28 = vsel %vm3177_vm1, %v6006_v42, 0.0  ;;  %vm1253_vm1 = vcmp.ge.s32.totalorder %v5112_v59, 4 }
 0x8fc   : > { %8364 = vst [vmem:[#allocation100_spill] sm:$0xff] %v6172_v28  ;;  %v6176_v8 = vmul.f32 %v6172_v28, %v6013_v49 }
 0x8fd   : > { %v6178_v51 = vpop.permute.xlu0 %3756 }
 0x8fe   : > { %8365 = vst [vmem:[#allocation101_spill] sm:$0xff] %v6176_v8  ;;  %8366 = vst [vmem:[#allocation102_spill] sm:$0xff] %v6178_v51  ;;  %vm3850_vm2 = vcmp.lt.f32.partialorder %v5930_v25, %v6178_v51  ;;  %3186 = vrot.lane.b32.xlu0 %v6176_v8, %s4773_s12 }
 0x8ff   : > { %v6185_v24 = vsel %vm3850_vm2, %v6085_v62, 0.0 }
 0x900   : > { %8367 = vst [vmem:[#allocation103_spill] sm:$0xff] %v6185_v24  ;;  %v6189_v58 = vmul.f32 %v6185_v24, %v6097_v47 }
 0x901   : > { %v6193_v17 = vpop.permute.xlu0 %3766 }
 0x902   : > { %8368 = vst [vmem:[#allocation104_spill] sm:$0xff] %v6189_v58  ;;  %8369 = vst [vmem:[#allocation105_spill] sm:$0xff] %v6193_v17  ;;  %3859 = vrot.lane.b32.xlu1 %v6189_v58, %s4773_s12  ;;  %vm3852_vm5 = vcmp.lt.f32.partialorder %v5934_v9, %v6193_v17  ;;  %v1866_v9 = vsel %vm1252_vm12, %v1861_v18, 0.0  ;;  %v2312_v18 = vsel %vm1252_vm12, %v2307_v50, 0.0 }
 0x905   : > { %v6197_v28 = vpop.permute.xlu1 %3088  ;;  %v2959_v25 = vpop.permute.xlu0 %2958 }
 0x906   : > { %8370 = vst [vmem:[#allocation106_spill] sm:$0xff] %v6197_v28  ;;  %vm3178_vm3 = vcmp.lt.f32.partialorder %v5921_v4, %v6197_v28 }
 0x907   : > { %v6202_v8 = vsel %vm3178_vm3, %v6034_v27, 0.0 }
 0x908   : > { %8371 = vst [vmem:[#allocation107_spill] sm:$0xff] %v6202_v8  ;;  %v6206_v24 = vmul.f32 %v6202_v8, %v6037_v57 }
 0x909   : > { %v6208_v47 = vpop.permute.xlu1 %3093  ;;  %v2961_v62 = vpop.permute.xlu0 %2960 }
 0x90a   : > { %8372 = vst [vmem:[#allocation108_spill] sm:$0xff] %v6206_v24  ;;  %8373 = vst [vmem:[#allocation109_spill] sm:$0xff] %v6208_v47  ;;  %vm3179_vm6 = vcmp.lt.f32.partialorder %v5928_v22, %v6208_v47  ;;  %v6214_v58 = vsel %vm1251_vm13, %v2961_v62, 0.0  ;;  %3188 = vrot.lane.b32.xlu0 %v6206_v24, %s4773_s12 }
 0x90b   : > { %v6219_v51 = vsel %vm3179_vm6, %v6057_v55, 0.0  ;;  %2969 = vrot.lane.b32.xlu1 %v6214_v58, %s4773_s12  ;;  %vm1254_vm6 = vcmp.ge.s32.totalorder %v5112_v59, 8 }
 0x90c   : > { %8374 = vst [vmem:[#allocation110_spill] sm:$0xff] %v6219_v51  ;;  %v6225_v8 = vmul.f32 %v6219_v51, %v6074_v32 }
 0x90d   : > { %v6227_v28 = vpop.permute.xlu1 %3761  ;;  %v2963_v47 = vpop.permute.xlu0 %2962 }
 0x90e   : > { %8375 = vst [vmem:[#allocation111_spill] sm:$0xff] %v6225_v8  ;;  %8376 = vst [vmem:[#allocation112_spill] sm:$0xff] %v6227_v28  ;;  %vm3851_vm10 = vcmp.lt.f32.partialorder %v5932_v2, %v6227_v28  ;;  %v6235_v62 = vsel %vm1251_vm13, %v2963_v47, 0.0  ;;  %3190 = vrot.lane.b32.xlu0 %v6225_v8, %s4773_s12  ;;  %v6250_v28 = vsel %vm3852_vm5, %v6133_v44, 0.0 }
 0x90f   : > { %v6241_v51 = vsel %vm3851_vm10, %v6110_v20, 0.0  ;;  %2971 = vrot.lane.b32.xlu1 %v6235_v62, %s4773_s12  ;;  %8379 = vst [vmem:[#allocation115_spill] sm:$0xff] %v6250_v28 }
 0x910   : > { %8377 = vst [vmem:[#allocation113_spill] sm:$0xff] %v6241_v51  ;;  %v6247_v24 = vmul.f32 %v6241_v51, %v6122_v48  ;;  %v6264_v51 = vmul.f32 %v6250_v28, %v6144_v16  ;;  %v6267_v48 = vmax.f32 %v5900_v61, %v1866_v9  ;;  %v2541_v9 = vsel %vm1252_vm12, %v2537_v39, 0.0 }
 0x911   : > { %v3632_v47 = vpop.permute.xlu0 %3631  ;;  %v6290_v50 = vmax.f32 %v5939_v41, %v2541_v9 }
 0x912   : > { %8378 = vst [vmem:[#allocation114_spill] sm:$0xff] %v6247_v24  ;;  %v6256_v8 = vsel %vm1251_vm13, %v3632_v47, 0.0  ;;  %3861 = vrot.lane.b32.xlu0 %v6247_v24, %s4773_s12  ;;  %8380 = vst [vmem:[#allocation116_spill] sm:$0xff] %v6264_v51  ;;  %v6276_v47 = vmax.f32 %v5912_v5, %v2312_v18  ;;  %v1625_v24 = vsel %vm1252_vm12, %v1619_v46, 0.0  ;;  %v1868_v5 = vsel %vm1252_vm12, %v1865_v43, 0.0 }
 0x913   : > { %3640 = vrot.lane.b32.xlu1 %v6256_v8, %s4773_s12  ;;  %v6283_v61 = vmax.f32 %v5924_v10, %v1625_v24  ;;  %v6297_v18 = vmax.f32 %v5951_v56, %v1868_v5  ;;  %v2314_v24 = vsel %vm1252_vm12, %v2311_v53, 0.0  ;;  %v6319_v56 = vsel %vm1251_vm13, %v2959_v25, 0.0 }
 0x914   : > { %v6304_v10 = vmax.f32 %v5971_v1, %v2314_v24  ;;  %v1624_v1 = vsel %vm1252_vm12, %v6157_v35, 0.0  ;;  %v1867_v35 = vsel %vm1252_vm12, %v6161_v52, 0.0  ;;  %v2542_v52 = vsel %vm1252_vm12, %v6191_v60, 0.0 }
 0x915   : > { %v3634_v46 = vpop.permute.xlu0 %3633  ;;  %v6327_v53 = vmax.f32 %v5897_v13, %v1624_v1  ;;  %v2313_v13 = vsel %vm1252_vm12, %v6163_v26, 0.0 }
 0x916   : > { %3863 = vrot.lane.b32.xlu0 %v6264_v51, %s4773_s12  ;;  %v6351_v25 = vmax.f32 %v5985_v14, %v2313_v13  ;;  %v6367_v14 = vmax.f32 %v6028_v38, %v2542_v52  ;;  %v6373_v26 = vsel %vm1251_vm13, %v3634_v46, 0.0  ;;  %v2871_v52 = vsel %vm2868_vm14, %v6006_v42, 0.0 }
 0x917   : > { %1872 = vrot.lane.b32.xlu1 %v6267_v48, %s4774_s16  ;;  %vm1255_vm14 = vcmp.ge.s32.totalorder %v5112_v59, 16 }
 0x919   : > { %v3636_v41 = vpop.permute.xlu0 %3635 }
 0x91a   : > { %v6310_v43 = vsel %vm1251_vm13, %v3636_v41, 0.0 }
 0x91b   : > { %2318 = vrot.lane.b32.xlu1 %v6276_v47, %s4774_s16 }
 0x91f   : > { %1632 = vrot.lane.b32.xlu1 %v6283_v61, %s4774_s16 }
 0x923   : > { %2548 = vrot.lane.b32.xlu1 %v6290_v50, %s4774_s16 }
 0x927   : > { %1876 = vrot.lane.b32.xlu1 %v6297_v18, %s4774_s16 }
 0x92b   : > { %2322 = vrot.lane.b32.xlu1 %v6304_v10, %s4774_s16 }
 0x92f   : > { %3644 = vrot.lane.b32.xlu1 %v6310_v43, %s4773_s12 }
 0x935   : > { %2618 = vmax.xlane.f32.xlu0 %v5814_v19 }
 0x939   : > { %2620 = vmax.xlane.f32.xlu0 %v5800_v15  ;;  %v2540_v15 = vsel %vm1252_vm12, %v6159_v37, 0.0 }
 0x93a   : > { %v6335_v19 = vmax.f32 %v5953_v7, %v2540_v15  ;;  %v1626_v7 = vsel %vm1252_vm12, %v6169_v45, 0.0 }
 0x93d   : > { %2622 = vmax.xlane.f32.xlu0 %v5825_v34  ;;  %v6343_v34 = vmax.f32 %v5968_v31, %v1867_v35  ;;  %v6359_v31 = vmax.f32 %v6002_v11, %v1626_v7 }
 0x953   : > { %2967 = vrot.lane.b32.xlu0 %v6319_v56, %s4773_s12 }
 0x957   : > { %1630 = vrot.lane.b32.xlu0 %v6327_v53, %s4774_s16 }
 0x95b   : > { %2546 = vrot.lane.b32.xlu0 %v6335_v19, %s4774_s16 }
 0x95f   : > { %1874 = vrot.lane.b32.xlu0 %v6343_v34, %s4774_s16 }
 0x963   : > { %2320 = vrot.lane.b32.xlu0 %v6351_v25, %s4774_s16 }
 0x967   : > { %1634 = vrot.lane.b32.xlu0 %v6359_v31, %s4774_s16 }
 0x96b   : > { %2550 = vrot.lane.b32.xlu0 %v6367_v14, %s4774_s16 }
 0x96f   : > { %3642 = vrot.lane.b32.xlu0 %v6373_v26, %s4773_s12 }
 0x970   : > { %v3187_v11 = vpop.permute.xlu0 %3186 }
 0x971   : > { %v6379_v60 = vsel %vm1251_vm13, %v3187_v11, 0.0  ;;  %v6419_v11 = vsel %vm2870_vm15, %v6057_v55, 0.0  ;;  %vm1256_vm15 = vcmp.ge.s32.totalorder %v5112_v59, 32 }
 0x973   : > { %3195 = vrot.lane.b32.xlu0 %v6379_v60, %s4773_s12 }
 0x974   : > { %v3860_v39 = vpop.permute.xlu1 %3859 }
 0x975   : > { %v6391_v9 = vsel %vm1251_vm13, %v3860_v39, 0.0  ;;  %v2880_v39 = vmul.f32 %v2871_v52, %v5914_v36 }
 0x97c   : > { %v3189_v38 = vpop.permute.xlu0 %3188 }
 0x97d   : > { %v6385_v45 = vsel %vm1251_vm13, %v3189_v38, 0.0  ;;  %v2970_v15 = vpop.permute.xlu1 %2969 }
 0x97e   : > { %3197 = vrot.lane.b32.xlu1 %v6385_v45, %s4773_s12  ;;  %v2974_v16 = vsel %vm1251_vm13, %v2970_v15, 0.0 }
 0x97f   : > { %v6445_v20 = vmax.f32 %v6214_v58, %v2974_v16 }
 0x980   : > { %v3191_v37 = vpop.permute.xlu0 %3190 }
 0x981   : > { %v6395_v5 = vsel %vm1251_vm13, %v3191_v37, 0.0  ;;  %v2972_v35 = vpop.permute.xlu1 %2971 }
 0x982   : > { %3868 = vrot.lane.b32.xlu1 %v6391_v9, %s4773_s12  ;;  %3199 = vrot.lane.b32.xlu0 %v6395_v5, %s4773_s12 }
 0x984   : > { %v3862_v46 = vpop.permute.xlu0 %3861 }
 0x985   : > { %v6403_v24 = vsel %vm1251_vm13, %v3862_v46, 0.0  ;;  %v3641_v13 = vpop.permute.xlu1 %3640  ;;  %v2882_v46 = vmul.f32 %v6419_v11, %v5928_v22 }
 0x986   : > { %3870 = vrot.lane.b32.xlu0 %v6403_v24, %s4773_s12 }
 0x988   : > { %v3864_v41 = vpop.permute.xlu0 %3863 }
 0x989   : > { %v6409_v1 = vsel %vm1251_vm13, %v3864_v41, 0.0  ;;  %v1873_v7 = vpop.permute.xlu1 %1872  ;;  %v2889_v41 = vmul.f32 %v2871_v52, %v6013_v49 }
 0x98a   : > { %3872 = vrot.lane.b32.xlu1 %v6409_v1, %s4773_s12  ;;  %s4776_s12 = smov 8  }
 0x98d   : > { %v2319_v38 = vpop.permute.xlu1 %2318 }
 0x991   : > { %v1633_v37 = vpop.permute.xlu1 %1632 }
 0x995   : > { %v2549_v12 = vpop.permute.xlu1 %2548 }
 0x999   : > { %v6434_v28 = vpop.permute.xlu1 %1876 }
 0x99d   : > { %v6436_v51 = vpop.permute.xlu1 %2322 }
 0x9a1   : > { %v3645_v17 = vpop.permute.xlu1 %3644 }
 0x9a5   : > { %2874 = vadd.xlane.f32.xlu0 %v2871_v52  ;;  %v3648_v52 = vsel %vm1251_vm13, %v3645_v17, 0.0  ;;  %v2975_v17 = vsel %vm1251_vm13, %v2972_v35, 0.0 }
 0x9a9   : > { %2878 = vadd.xlane.f32.xlu0 %v6419_v11 }
 0x9ad   : > { %2883 = vadd.xlane.f32.xlu0 %v2880_v39 }
 0x9ae   : > { %2876 = vadd.xlane.f32.xlu1 %v6426_v0 }
 0x9b1   : > { %2885 = vadd.xlane.f32.xlu0 %v2881_v23 }
 0x9b2   : > { %2887 = vadd.xlane.f32.xlu1 %v2882_v46  ;;  %v6454_v46 = vmax.f32 %v6310_v43, %v3648_v52  ;;  %v6468_v43 = vmax.f32 %v6235_v62, %v2975_v17  ;;  %v3646_v52 = vsel %vm1251_vm13, %v3641_v13, 0.0 }
 0x9b5   : > { %2892 = vadd.xlane.f32.xlu0 %v2889_v41 }
 0x9c2   : > { %v6438_v39 = vpop.xlane.xlu0 %2618 }
 0x9c3   : > { %8381 = vst [vmem:[#allocation117_spill] sm:$0xff] %v6438_v39 }
 0x9c6   : > { %v6442_v44 = vpop.xlane.xlu0 %2620 }
 0x9c7   : > { %8382 = vst [vmem:[#allocation118_spill] sm:$0xff] %v6442_v44 }
 0x9ca   : > { %v6449_v23 = vpop.xlane.xlu0 %2622 }
 0x9cb   : > { %8383 = vst [vmem:[#allocation119_spill] sm:$0xff] %v6449_v23  ;;  %2981 = vrot.lane.b32.xlu0 %v6445_v20, %s4775_s25 }
 0x9ce   : > { %v2968_v41 = vpop.permute.xlu0 %2967 }
 0x9cf   : > { %v2973_v15 = vsel %vm1251_vm13, %v2968_v41, 0.0  ;;  %3656 = vrot.lane.b32.xlu0 %v6454_v46, %s4775_s25 }
 0x9d0   : > { %v6461_v58 = vmax.f32 %v6319_v56, %v2973_v15  ;;  %v6475_v56 = vmax.f32 %v6256_v8, %v3646_v52 }
 0x9d2   : > { %v1631_v16 = vpop.permute.xlu0 %1630  ;;  %2979 = vrot.lane.b32.xlu1 %v6461_v58, %s4775_s25 }
 0x9d6   : > { %v2547_v41 = vpop.permute.xlu0 %2546  ;;  %2983 = vrot.lane.b32.xlu1 %v6468_v43, %s4775_s25 }
 0x9da   : > { %v1875_v15 = vpop.permute.xlu0 %1874  ;;  %3652 = vrot.lane.b32.xlu1 %v6475_v56, %s4775_s25 }
 0x9de   : > { %v2321_v35 = vpop.permute.xlu0 %2320 }
 0x9e2   : > { %v1635_v2 = vpop.permute.xlu0 %1634 }
 0x9e6   : > { %v6479_v23 = vpop.permute.xlu0 %2550 }
 0x9ea   : > { %v3643_v62 = vpop.permute.xlu0 %3642 }
 0x9eb   : > { %v3647_v17 = vsel %vm1251_vm13, %v3643_v62, 0.0 }
 0x9ec   : > { %v6484_v13 = vmax.f32 %v6373_v26, %v3647_v17  ;;  %v1878_v26 = vsel %vm1253_vm1, %v1873_v7, 0.0 }
 0x9ee   : > { %v3196_v44 = vpop.permute.xlu0 %3195  ;;  %3654 = vrot.lane.b32.xlu1 %v6484_v13, %s4775_s25 }
 0x9ef   : > { %v3201_v8 = vsel %vm1251_vm13, %v3196_v44, 0.0 }
 0x9f0   : > { %v6492_v52 = vmax.f32 %v6379_v60, %v3201_v8  ;;  %v3198_v39 = vpop.permute.xlu1 %3197  ;;  %v6508_v60 = vmax.f32 %v6267_v48, %v1878_v26 }
 0x9f1   : > { %v3202_v49 = vsel %vm1251_vm13, %v3198_v39, 0.0 }
 0x9f2   : > { %v6497_v62 = vmax.f32 %v6385_v45, %v3202_v49  ;;  %3207 = vrot.lane.b32.xlu1 %v6492_v52, %s4775_s25  ;;  %v2324_v49 = vsel %vm1253_vm1, %v2319_v38, 0.0  ;;  %v1638_v45 = vsel %vm1253_vm1, %v1631_v16, 0.0  ;;  %v2552_v38 = vsel %vm1253_vm1, %v2547_v41, 0.0 }
 0x9f3   : > { %v6522_v7 = vmax.f32 %v6276_v47, %v2324_v49  ;;  %v6525_v48 = vmax.f32 %v6327_v53, %v1638_v45  ;;  %v6539_v47 = vmax.f32 %v6335_v19, %v2552_v38  ;;  %v2553_v53 = vsel %vm1253_vm1, %v2549_v12, 0.0 }
 0x9f4   : > { %v3200_v17 = vpop.permute.xlu0 %3199  ;;  %3209 = vrot.lane.b32.xlu0 %v6497_v62, %s4775_s25  ;;  %v6550_v41 = vmax.f32 %v6290_v50, %v2553_v53  ;;  %v1880_v19 = vsel %vm1253_vm1, %v6434_v28, 0.0  ;;  %v2325_v12 = vsel %vm1253_vm1, %v2321_v35, 0.0  ;;  %v1640_v28 = vsel %vm1253_vm1, %v1635_v2, 0.0  ;;  %v3869_v35 = vpop.permute.xlu1 %3868 }
 0x9f5   : > { %v3203_v44 = vsel %vm1251_vm13, %v3200_v17, 0.0  ;;  %v6568_v50 = vmax.f32 %v6351_v25, %v2325_v12  ;;  %v6583_v25 = vmax.f32 %v6359_v31, %v1640_v28 }
 0x9f6   : > { %v6511_v39 = vmax.f32 %v6395_v5, %v3203_v44  ;;  %v1639_v5 = vsel %vm1253_vm1, %v1633_v37, 0.0  ;;  %v1879_v37 = vsel %vm1253_vm1, %v1875_v15, 0.0  ;;  %v6565_v15 = vmax.f32 %v6297_v18, %v1880_v19 }
 0x9f7   : > { %v6536_v16 = vmax.f32 %v6283_v61, %v1639_v5  ;;  %v6553_v61 = vmax.f32 %v6343_v34, %v1879_v37  ;;  %v2326_v34 = vsel %vm1253_vm1, %v6436_v51, 0.0  ;;  %v3874_v51 = vsel %vm1251_vm13, %v3869_v35, 0.0 }
 0x9f8   : > { %1884 = vrot.lane.b32.xlu0 %v6508_v60, %s4776_s12  ;;  %3211 = vrot.lane.b32.xlu1 %v6511_v39, %s4775_s25  ;;  %v3871_v8 = vpop.permute.xlu0 %3870  ;;  %v6580_v18 = vmax.f32 %v6304_v10, %v2326_v34  ;;  %v6594_v17 = vmax.f32 %v6391_v9, %v3874_v51  ;;  %v8384_v9 = vld [vmem:[#allocation23_spill] sm:$0xff]  ;;  %v2890_v19 = vmul.f32 %v6426_v0, %v6037_v57 }
 0x9f9   : > { %v3875_v2 = vsel %vm1251_vm13, %v3871_v8, 0.0  ;;  %v2835_v49 = vmul.f32 %v5976_v29, %v8384_v9  ;;  %v2837_v5 = vmul.f32 %v6021_v33, %v8384_v9  ;;  %v2891_v33 = vmul.f32 %v6419_v11, %v6074_v32 }
 0x9fa   : > { %v6597_v10 = vmax.f32 %v6403_v24, %v3875_v2  ;;  %v8385_v24 = vld [vmem:[#allocation24_spill] sm:$0xff] }
 0x9fb   : > { %v6613_v45 = vsub.f32 %v8385_v24, %v2835_v49  ;;  %v6619_v38 = vsub.f32 %v8385_v24, %v2837_v5 }
 0x9fc   : > { %2330 = vrot.lane.b32.xlu0 %v6522_v7, %s4776_s12  ;;  %1644 = vrot.lane.b32.xlu1 %v6525_v48, %s4776_s12  ;;  %v3873_v26 = vpop.permute.xlu1 %3872 }
 0x9fd   : > { %v3876_v31 = vsel %vm1251_vm13, %v3873_v26, 0.0  ;;  %8386 = vst [vmem:[#allocation120_spill] sm:$0xff] %v6613_v45  ;;  %4522 = vrcp.f32 %v6613_v45  ;;  %8387 = vst [vmem:[#allocation121_spill] sm:$0xff] %v6619_v38 }
 0x9fe   : > { %v6606_v44 = vmax.f32 %v6409_v1, %v3876_v31  ;;  %v2836_v1 = vmul.f32 %v5992_v3, %v8384_v9  ;;  %4524 = vrcp.f32 %v6619_v38  ;;  %v2554_v31 = vsel %vm1253_vm1, %v6479_v23, 0.0 }
 0xa00   : > { %1646 = vrot.lane.b32.xlu0 %v6536_v16, %s4776_s12  ;;  %2558 = vrot.lane.b32.xlu1 %v6539_v47, %s4776_s12  ;;  %v6625_v29 = vsub.f32 %v8385_v24, %v2836_v1  ;;  %v6661_v1 = vmax.f32 %v6367_v14, %v2554_v31 }
 0xa02   : > { %8388 = vst [vmem:[#allocation122_spill] sm:$0xff] %v6625_v29  ;;  %4526 = vrcp.f32 %v6625_v29 }
 0xa04   : > { %2560 = vrot.lane.b32.xlu0 %v6550_v41, %s4776_s12  ;;  %1886 = vrot.lane.b32.xlu1 %v6553_v61, %s4776_s12 }
 0xa07   : > { %v6628_v53 = vpop.eup %4522 }
 0xa08   : > { %1888 = vrot.lane.b32.xlu0 %v6565_v15, %s4776_s12  ;;  %2332 = vrot.lane.b32.xlu1 %v6568_v50, %s4776_s12  ;;  %8389 = vst [vmem:[#allocation123_spill] sm:$0xff] %v6628_v53  ;;  %v6635_v12 = vpop.eup %4524 }
 0xa09   : > { %8390 = vst [vmem:[#allocation124_spill] sm:$0xff] %v6635_v12 }
 0xa0c   : > { %2334 = vrot.lane.b32.xlu0 %v6580_v18, %s4776_s12  ;;  %1648 = vrot.lane.b32.xlu1 %v6583_v25, %s4776_s12  ;;  %v6643_v11 = vpop.eup %4526 }
 0xa0d   : > { %8391 = vst [vmem:[#allocation125_spill] sm:$0xff] %v6643_v11 }
 0xa10   : > { %3880 = vrot.lane.b32.xlu0 %v6594_v17, %s4775_s25  ;;  %3882 = vrot.lane.b32.xlu1 %v6597_v10, %s4775_s25 }
 0xa14   : > { %3884 = vrot.lane.b32.xlu0 %v6606_v44, %s4775_s25 }
 0xa32   : > { %v2875_v37 = vpop.xlane.xlu0 %2874 }
 0xa33   : > { %2896 = vadd.xlane.f32.xlu0 %v2891_v33  ;;  %v2910_v3 = vmul.f32 %v6628_v53, %v2875_v37  ;;  %4528 = vrcp.f32 %v2875_v37  ;;  %vm2898_vm13 = vcmp.gt.f32.partialorder %v2875_v37, 0.0  ;;  %v2916_v33 = vmul.f32 %v2875_v37, %v5858_v40 }
 0xa34   : > { %2894 = vadd.xlane.f32.xlu1 %v2890_v19 }
 0xa35   : > { %2913 = vst.msk [vmem:[%s4924_s11 + $0x30] sm:$0xff] %vm1545_vm11, %v2910_v3 }
 0xa36   : > { %v6639_v34 = vpop.xlane.xlu0 %2878 }
 0xa37   : > { %v2912_v28 = vmul.f32 %v6635_v12, %v6639_v34  ;;  %vm2900_vm3 = vcmp.gt.f32.partialorder %v6639_v34, 0.0 }
 0xa39   : > { %2915 = vst.msk [vmem:[%s4924_s11 + $0x40] sm:$0xff] %vm1545_vm11, %v2912_v28 }
 0xa3a   : > { %v2884_v35 = vpop.xlane.xlu0 %2883 }
 0xa3b   : > { %v6647_v0 = vpop.xlane.xlu1 %2876  ;;  %v2919_v28 = vadd.f32 %v2916_v33, %v2884_v35 }
 0xa3c   : > { %v2911_v8 = vmul.f32 %v6643_v11, %v6647_v0  ;;  %4530 = vrcp.f32 %v6647_v0  ;;  %vm2899_vm2 = vcmp.gt.f32.partialorder %v6647_v0, 0.0 }
 0xa3d   : > { %v4529_v2 = vpop.eup %4528  ;;  %4532 = vrcp.f32 %v6639_v34 }
 0xa3e   : > { %v6651_v51 = vpop.xlane.xlu0 %2885  ;;  %2914 = vst.msk [vmem:[%s4924_s11 + $0x38] sm:$0xff] %vm1545_vm11, %v2911_v8  ;;  %v2907_v49 = vsel %vm2898_vm13, %v4529_v2, 0.0 }
 0xa3f   : > { %v6655_v26 = vpop.xlane.xlu1 %2887  ;;  %v2922_v9 = vmul.f32 %v2919_v28, %v2907_v49 }
 0xa42   : > { %v2893_v5 = vpop.xlane.xlu0 %2892 }
 0xa43   : > { %v2940_v19 = vmul.f32 %v2907_v49, %v2893_v5 }
 0xa44   : > { %v2980_v3 = vpop.permute.xlu1 %2979 }
 0xa45   : > { %v6664_v24 = vsel %vm2898_vm13, %v2940_v19, -1.0  ;;  %v2985_v8 = vsel %vm1252_vm12, %v2980_v3, 0.0  ;;  %2562 = vrot.lane.b32.xlu1 %v6661_v1, %s4776_s12  ;;  %vm1257_vm13 = vcmp.ge.s32.totalorder %v5112_v59, 64 }
 0xa46   : > { %v6671_v23 = vmax.f32 %v6461_v58, %v2985_v8  ;;  %v2982_v2 = vpop.permute.xlu0 %2981 }
 0xa47   : > { %v2986_v14 = vsel %vm1252_vm12, %v2982_v2, 0.0 }
 0xa48   : > { %v2984_v40 = vpop.permute.xlu1 %2983  ;;  %v6684_v58 = vmax.f32 %v6445_v20, %v2986_v14 }
 0xa49   : > { %v2987_v37 = vsel %vm1252_vm12, %v2984_v40, 0.0  ;;  %2928 = vrot.lane.b32.xlu0 %v2922_v9, %s4774_s16  ;;  %2991 = vrot.lane.b32.xlu1 %v6671_v23, %s4774_s16 }
 0xa4a   : > { %v6681_v35 = vmax.f32 %v6468_v43, %v2987_v37  ;;  %v3657_v49 = vpop.permute.xlu0 %3656 }
 0xa4b   : > { %v3660_v43 = vsel %vm1252_vm12, %v3657_v49, 0.0 }
 0xa4c   : > { %v3653_v31 = vpop.permute.xlu1 %3652  ;;  %v6700_v20 = vmax.f32 %v6454_v46, %v3660_v43 }
 0xa4d   : > { %v3658_v5 = vsel %vm1252_vm12, %v3653_v31, 0.0  ;;  %2993 = vrot.lane.b32.xlu1 %v6684_v58, %s4774_s16  ;;  %2995 = vrot.lane.b32.xlu0 %v6681_v35, %s4774_s16 }
 0xa4e   : > { %v6693_v9 = vmax.f32 %v6475_v56, %v3658_v5 }
 0xa51   : > { %3664 = vrot.lane.b32.xlu1 %v6693_v9, %s4774_s16 }
 0xa55   : > { %3668 = vrot.lane.b32.xlu1 %v6700_v20, %s4774_s16 }
 0xa60   : > { %v3655_v33 = vpop.permute.xlu1 %3654 }
 0xa61   : > { %v3659_v19 = vsel %vm1252_vm12, %v3655_v33, 0.0 }
 0xa62   : > { %v6707_v3 = vmax.f32 %v6484_v13, %v3659_v19 }
 0xa64   : > { %3666 = vrot.lane.b32.xlu0 %v6707_v3, %s4774_s16  ;;  %v3208_v56 = vpop.permute.xlu1 %3207 }
 0xa65   : > { %v3213_v28 = vsel %vm1252_vm12, %v3208_v56, 0.0 }
 0xa66   : > { %v6714_v46 = vmax.f32 %v6492_v52, %v3213_v28  ;;  %v3210_v8 = vpop.permute.xlu0 %3209 }
 0xa67   : > { %v3214_v2 = vsel %vm1252_vm12, %v3210_v8, 0.0  ;;  %v4531_v8 = vpop.eup %4530 }
 0xa68   : > { %v6719_v14 = vmax.f32 %v6497_v62, %v3214_v2  ;;  %3219 = vrot.lane.b32.xlu0 %v6714_v46, %s4774_s16  ;;  %v2917_v2 = vmul.f32 %v6647_v0, %v5878_v63  ;;  %v6767_v38 = vsel %vm2899_vm2, %v4531_v8, 0.0  ;;  %v4533_v63 = vpop.eup %4532 }
 0xa6a   : > { %v6723_v13 = vpop.permute.xlu0 %1884  ;;  %3221 = vrot.lane.b32.xlu1 %v6719_v14, %s4774_s16  ;;  %v3212_v40 = vpop.permute.xlu1 %3211  ;;  %v2920_v45 = vadd.f32 %v2917_v2, %v6651_v51 }
 0xa6b   : > { %v3215_v52 = vsel %vm1252_vm12, %v3212_v40, 0.0 }
 0xa6c   : > { %v6730_v37 = vmax.f32 %v6511_v39, %v3215_v52 }
 0xa6e   : > { %v6732_v31 = vpop.permute.xlu0 %2330  ;;  %3223 = vrot.lane.b32.xlu0 %v6730_v37, %s4774_s16  ;;  %v1645_v62 = vpop.permute.xlu1 %1644 }
 0xa72   : > { %v6736_v49 = vpop.permute.xlu0 %1646  ;;  %v2559_v5 = vpop.permute.xlu1 %2558 }
 0xa76   : > { %v6738_v43 = vpop.permute.xlu0 %2560  ;;  %v6740_v33 = vpop.permute.xlu1 %1886 }
 0xa7a   : > { %v6743_v19 = vpop.permute.xlu0 %1888  ;;  %v6745_v56 = vpop.permute.xlu1 %2332 }
 0xa7e   : > { %v6748_v39 = vpop.permute.xlu0 %2334  ;;  %v6750_v28 = vpop.permute.xlu1 %1648 }
 0xa82   : > { %v3881_v40 = vpop.permute.xlu0 %3880  ;;  %v3883_v52 = vpop.permute.xlu1 %3882 }
 0xa83   : > { %v3886_v11 = vsel %vm1252_vm12, %v3881_v40, 0.0  ;;  %v3887_v29 = vsel %vm1252_vm12, %v3883_v52, 0.0  ;;  %v2918_v40 = vmul.f32 %v6639_v34, %v5865_v21  ;;  %v2565_v34 = vsel %vm1254_vm6, %v6738_v43, 0.0 }
 0xa84   : > { %v6760_v12 = vmax.f32 %v6594_v17, %v3886_v11  ;;  %v6763_v53 = vmax.f32 %v6597_v10, %v3887_v29  ;;  %v2923_v10 = vmul.f32 %v2920_v45, %v6767_v38  ;;  %v6786_v11 = vsel %vm2900_vm3, %v4533_v63, 0.0 }
 0xa85   : > { %v2921_v29 = vadd.f32 %v2918_v40, %v6655_v26  ;;  %v2338_v43 = vsel %vm1254_vm6, %v6748_v39, 0.0 }
 0xa86   : > { %v3885_v32 = vpop.permute.xlu0 %3884  ;;  %3892 = vrot.lane.b32.xlu1 %v6760_v12, %s4774_s16  ;;  %3894 = vrot.lane.b32.xlu0 %v6763_v53, %s4774_s16 }
 0xa87   : > { %v3888_v17 = vsel %vm1252_vm12, %v3885_v32, 0.0  ;;  %v2924_v32 = vmul.f32 %v2921_v29, %v6786_v11 }
 0xa88   : > { %v6782_v21 = vmax.f32 %v6606_v44, %v3888_v17 }
 0xa8a   : > { %3896 = vrot.lane.b32.xlu1 %v6782_v21, %s4774_s16  ;;  %2930 = vrot.lane.b32.xlu0 %v2923_v10, %s4774_s16 }
 0xa8e   : > { %2932 = vrot.lane.b32.xlu1 %v2924_v32, %s4774_s16 }
 0xac0   : > { %v6793_v45 = vpop.xlane.xlu0 %2896 }
 0xac1   : > { %v6795_v51 = vpop.xlane.xlu1 %2894 }
 0xac4   : > { %v2929_v26 = vpop.permute.xlu0 %2928 }
 0xac5   : > { %2937 = vst.msk [vmem:[%s4924_s11 + $0x30] sm:$0xff] %vm1570_vm7, %v2929_v26  ;;  %v2563_v44 = vpop.permute.xlu1 %2562 }
 0xac6   : > { %2946 = vst.msk [vmem:[%s4924_s11 + $0x30] sm:$0xff] %vm1580_vm8, %v6664_v24 }
 0xac8   : > { %v2996_v8 = vpop.permute.xlu0 %2995 }
 0xac9   : > { %v2992_v2 = vpop.permute.xlu1 %2991  ;;  %v2999_v40 = vsel %vm1253_vm1, %v2996_v8, 0.0 }
 0xaca   : > { %v2997_v52 = vsel %vm1253_vm1, %v2992_v2, 0.0  ;;  %v6815_v24 = vmax.f32 %v6681_v35, %v2999_v40 }
 0xacb   : > { %v6805_v63 = vmax.f32 %v6671_v23, %v2997_v52  ;;  %v1652_v23 = vsel %vm1254_vm6, %v1645_v62, 0.0 }
 0xacc   : > { %v6829_v8 = vmax.f32 %v6525_v48, %v1652_v23 }
 0xacd   : > { %3003 = vrot.lane.b32.xlu0 %v6805_v63, %s4776_s12  ;;  %v2994_v17 = vpop.permute.xlu1 %2993 }
 0xace   : > { %v2998_v10 = vsel %vm1253_vm1, %v2994_v17, 0.0 }
 0xacf   : > { %v6818_v29 = vmax.f32 %v6684_v58, %v2998_v10  ;;  %v2564_v58 = vsel %vm1254_vm6, %v2559_v5, 0.0 }
 0xad0   : > { %v6841_v52 = vmax.f32 %v6539_v47, %v2564_v58  ;;  %v2566_v58 = vsel %vm1254_vm6, %v2563_v44, 0.0 }
 0xad1   : > { %3007 = vrot.lane.b32.xlu0 %v6815_v24, %s4776_s12  ;;  %3005 = vrot.lane.b32.xlu1 %v6818_v29, %s4776_s12  ;;  %v3665_v32 = vpop.permute.xlu1 %3664 }
 0xad2   : > { %v3670_v26 = vsel %vm1253_vm1, %v3665_v32, 0.0 }
 0xad3   : > { %v6832_v35 = vmax.f32 %v6693_v9, %v3670_v26  ;;  %v1891_v9 = vsel %vm1254_vm6, %v6740_v33, 0.0  ;;  %v2337_v33 = vsel %vm1254_vm6, %v6745_v56, 0.0  ;;  %v1654_v56 = vsel %vm1254_vm6, %v6750_v28, 0.0 }
 0xad4   : > { %v6858_v47 = vmax.f32 %v6553_v61, %v1891_v9  ;;  %v6873_v61 = vmax.f32 %v6568_v50, %v2337_v33  ;;  %v6888_v50 = vmax.f32 %v6583_v25, %v1654_v56 }
 0xad5   : > { %1658 = vrot.lane.b32.xlu0 %v6829_v8, %s4777_s1  ;;  %3676 = vrot.lane.b32.xlu1 %v6832_v35, %s4776_s12  ;;  %v3669_v62 = vpop.permute.xlu1 %3668 }
 0xad6   : > { %v3667_v2 = vpop.permute.xlu0 %3666  ;;  %v3672_v40 = vsel %vm1253_vm1, %v3669_v62, 0.0  ;;  %v6902_v62 = vmax.f32 %v6661_v1, %v2566_v58 }
 0xad7   : > { %v3671_v48 = vsel %vm1253_vm1, %v3667_v2, 0.0  ;;  %v2941_v2 = vmul.f32 %v6767_v38, %v6795_v51  ;;  %v2942_v38 = vmul.f32 %v6786_v11, %v6793_v45 }
 0xad8   : > { %v6849_v5 = vmax.f32 %v6707_v3, %v3671_v48  ;;  %v6864_v3 = vmax.f32 %v6700_v20, %v3672_v40 }
 0xad9   : > { %2570 = vrot.lane.b32.xlu0 %v6841_v52, %s4777_s1  ;;  %v2944_v51 = vsel %vm2899_vm2, %v2941_v2, -1.0  ;;  %v2945_v11 = vsel %vm2900_vm3, %v2942_v38, -1.0  ;;  %vm1724_vm2 = vcmask 23568   ;;  %vm1791_vm3 = vcmask 15368  }
 0xada   : > { %v3220_v17 = vpop.permute.xlu0 %3219  ;;  %3678 = vrot.lane.b32.xlu1 %v6849_v5, %s4776_s12 }
 0xadb   : > { %v3225_v10 = vsel %vm1253_vm1, %v3220_v17, 0.0 }
 0xadc   : > { %v3222_v23 = vpop.permute.xlu1 %3221  ;;  %v6879_v20 = vmax.f32 %v6714_v46, %v3225_v10 }
 0xadd   : > { %1898 = vrot.lane.b32.xlu0 %v6858_v47, %s4777_s1  ;;  %v3226_v32 = vsel %vm1253_vm1, %v3222_v23, 0.0 }
 0xade   : > { %3680 = vrot.lane.b32.xlu1 %v6864_v3, %s4776_s12  ;;  %v6893_v28 = vmax.f32 %v6719_v14, %v3226_v32 }
 0xae0   : > { %v3224_v26 = vpop.permute.xlu0 %3223 }
 0xae1   : > { %2344 = vrot.lane.b32.xlu0 %v6873_v61, %s4777_s1  ;;  %v3227_v46 = vsel %vm1253_vm1, %v3224_v26, 0.0 }
 0xae2   : > { %3231 = vrot.lane.b32.xlu1 %v6879_v20, %s4776_s12  ;;  %v6905_v25 = vmax.f32 %v6730_v37, %v3227_v46  ;;  %v1890_v37 = vsel %vm1254_vm6, %v6723_v13, 0.0  ;;  %v2336_v13 = vsel %vm1254_vm6, %v6732_v31, 0.0 }
 0xae3   : > { %v6944_v0 = vmax.f32 %v6522_v7, %v2336_v13  ;;  %v6962_v7 = vmax.f32 %v6550_v41, %v2565_v34  ;;  %v6978_v41 = vmax.f32 %v6580_v18, %v2338_v43 }
 0xae5   : > { %1662 = vrot.lane.b32.xlu0 %v6888_v50, %s4777_s1 }
 0xae6   : > { %3233 = vrot.lane.b32.xlu1 %v6893_v28, %s4776_s12 }
 0xae9   : > { %2574 = vrot.lane.b32.xlu0 %v6902_v62, %s4777_s1 }
 0xaea   : > { %3235 = vrot.lane.b32.xlu1 %v6905_v25, %s4776_s12 }
 0xaf8   : > { %v3895_v14 = vpop.permute.xlu0 %3894  ;;  %v3893_v44 = vpop.permute.xlu1 %3892 }
 0xaf9   : > { %v3898_v1 = vsel %vm1253_vm1, %v3893_v44, 0.0  ;;  %v3899_v56 = vsel %vm1253_vm1, %v3895_v14, 0.0 }
 0xafa   : > { %v6916_v48 = vmax.f32 %v6760_v12, %v3898_v1  ;;  %v6930_v12 = vmax.f32 %v6508_v60, %v1890_v37  ;;  %v1653_v60 = vsel %vm1254_vm6, %v6736_v49, 0.0  ;;  %v1892_v49 = vsel %vm1254_vm6, %v6743_v19, 0.0 }
 0xafb   : > { %v6954_v31 = vmax.f32 %v6536_v16, %v1653_v60  ;;  %v6970_v16 = vmax.f32 %v6565_v15, %v1892_v49  ;;  %v3902_v32 = vmax.f32 %v6763_v53, %v3899_v56 }
 0xafc   : > { %v2931_v9 = vpop.permute.xlu0 %2930  ;;  %3904 = vrot.lane.b32.xlu1 %v6916_v48, %s4776_s12  ;;  %v3897_v40 = vpop.permute.xlu1 %3896 }
 0xafd   : > { %2938 = vst.msk [vmem:[%s4924_s11 + $0x38] sm:$0xff] %vm1570_vm7, %v2931_v9  ;;  %v3900_v33 = vsel %vm1253_vm1, %v3897_v40, 0.0 }
 0xafe   : > { %2947 = vst.msk [vmem:[%s4924_s11 + $0x38] sm:$0xff] %vm1580_vm8, %v2944_v51  ;;  %v3903_v10 = vmax.f32 %v6782_v21, %v3900_v33 }
 0xb00   : > { %1896 = vrot.lane.b32.xlu1 %v6930_v12, %s4777_s1  ;;  %v2933_v17 = vpop.permute.xlu1 %2932 }
 0xb01   : > { %2939 = vst.msk [vmem:[%s4924_s11 + $0x40] sm:$0xff] %vm1570_vm7, %v2933_v17 }
 0xb02   : > { %2948 = vst.msk [vmem:[%s4924_s11 + $0x40] sm:$0xff] %vm1580_vm8, %v2945_v11 }
 0xb04   : > { %2342 = vrot.lane.b32.xlu1 %v6944_v0, %s4777_s1 }
 0xb08   : > { %1660 = vrot.lane.b32.xlu1 %v6954_v31, %s4777_s1 }
 0xb0c   : > { %2572 = vrot.lane.b32.xlu1 %v6962_v7, %s4777_s1 }
 0xb10   : > { %1900 = vrot.lane.b32.xlu1 %v6970_v16, %s4777_s1 }
 0xb14   : > { %2346 = vrot.lane.b32.xlu1 %v6978_v41, %s4777_s1 }
 0xb3f   : > { %v3004_v19 = vpop.permute.xlu0 %3003 }
 0xb40   : > { %v3009_v45 = vsel %vm1254_vm6, %v3004_v19, 0.0 }
 0xb41   : > { %v6985_v15 = vmax.f32 %v6805_v63, %v3009_v45 }
 0xb43   : > { %3015 = vrot.lane.b32.xlu1 %v6985_v15, %s4777_s1  ;;  %v3006_v39 = vpop.permute.xlu1 %3005  ;;  %v3008_v9 = vpop.permute.xlu0 %3007 }
 0xb44   : > { %v3010_v18 = vsel %vm1254_vm6, %v3006_v39, 0.0 }
 0xb45   : > { %v6995_v23 = vmax.f32 %v6818_v29, %v3010_v18 }
 0xb47   : > { %3908 = vrot.lane.b32.xlu1 %v3903_v10, %s4776_s12  ;;  %3017 = vrot.lane.b32.xlu0 %v6995_v23, %s4777_s1  ;;  %v3677_v63 = vpop.permute.xlu1 %3676 }
 0xb48   : > { %v3682_v26 = vsel %vm1254_vm6, %v3677_v63, 0.0 }
 0xb49   : > { %v7007_v29 = vmax.f32 %v6832_v35, %v3682_v26 }
 0xb4b   : > { %3906 = vrot.lane.b32.xlu0 %v3902_v32, %s4776_s12 }
 0xb4c   : > { %v3679_v21 = vpop.permute.xlu1 %3678 }
 0xb4f   : > { %3688 = vrot.lane.b32.xlu0 %v7007_v29, %s4777_s1 }
 0xb50   : > { %v3681_v58 = vpop.permute.xlu1 %3680 }
 0xb54   : > { %v3232_v46 = vpop.permute.xlu1 %3231 }
 0xb55   : > { %v3237_v14 = vsel %vm1254_vm6, %v3232_v46, 0.0 }
 0xb56   : > { %v7014_v44 = vmax.f32 %v6879_v20, %v3237_v14  ;;  %v8392_v20 = vld [vmem:[#allocation99_spill] sm:$0xff]  ;;  %v8393_v14 = vld [vmem:[#allocation106_spill] sm:$0xff] }
 0xb57   : > { %vm3096_vm5 = vcmp.gt.f32.partialorder %v5914_v36, %v8392_v20  ;;  %vm3097_vm10 = vcmp.gt.f32.partialorder %v5921_v4, %v8393_v14 }
 0xb58   : > { %3243 = vrot.lane.b32.xlu0 %v7014_v44, %s4777_s1  ;;  %v3234_v53 = vpop.permute.xlu1 %3233  ;;  %v7031_v37 = vsel %vm3096_vm5, %v6006_v42, 0.0  ;;  %v3684_v42 = vsel %vm1254_vm6, %v3681_v58, 0.0  ;;  %vm1826_vm5 = vcmask 64568  }
 0xb59   : > { %v7051_v38 = vmax.f32 %v6864_v3, %v3684_v42  ;;  %v1659_v3 = vpop.permute.xlu0 %1658 }
 0xb5c   : > { %v3236_v2 = vpop.permute.xlu1 %3235 }
 0xb5d   : > { %v3239_v35 = vsel %vm1254_vm6, %v3236_v2, 0.0  ;;  %v2571_v60 = vpop.permute.xlu0 %2570 }
 0xb5e   : > { %v7021_v1 = vmax.f32 %v6905_v25, %v3239_v35  ;;  %v3683_v25 = vsel %vm1254_vm6, %v3679_v21, 0.0  ;;  %v3108_v35 = vmul.f32 %v7031_v37, %v5914_v36 }
 0xb5f   : > { %v7037_v40 = vmax.f32 %v6849_v5, %v3683_v25  ;;  %v3238_v5 = vsel %vm1254_vm6, %v3234_v53, 0.0  ;;  %v8394_v53 = vld [vmem:[#allocation109_spill] sm:$0xff]  ;;  %v2576_v25 = vsel %vm1255_vm14, %v2571_v60, 0.0 }
 0xb60   : > { %3247 = vrot.lane.b32.xlu0 %v7021_v1, %s4777_s1  ;;  %v7058_v51 = vmax.f32 %v6893_v28, %v3238_v5  ;;  %vm3098_vm12 = vcmp.gt.f32.partialorder %v5928_v22, %v8394_v53 }
 0xb61   : > { %v1899_v49 = vpop.permute.xlu0 %1898  ;;  %v3101_v2 = vsel %vm3098_vm12, %v6057_v55, 0.0  ;;  %vm1956_vm12 = vcmask 31768  }
 0xb62   : > { %v1903_v36 = vsel %vm1255_vm14, %v1899_v49, 0.0  ;;  %v8396_v49 = vld [vmem:[#allocation33_spill] sm:$0xff] }
 0xb65   : > { %v2345_v43 = vpop.permute.xlu0 %2344 }
 0xb69   : > { %v1663_v45 = vpop.permute.xlu0 %1662 }
 0xb6b   : > { %3063 = vmax.xlane.f32.xlu1 %v6044_v30  ;;  %v3011_v30 = vsel %vm1254_vm6, %v3008_v9, 0.0 }
 0xb6d   : > { %v7069_v39 = vpop.permute.xlu0 %2574 }
 0xb6f   : > { %3065 = vmax.xlane.f32.xlu1 %v6071_v54  ;;  %v7044_v54 = vmax.f32 %v6815_v24, %v3011_v30  ;;  %v2349_v30 = vsel %vm1255_vm14, %v2345_v43, 0.0 }
 0xb70   : > { %v7129_v42 = vmax.f32 %v6873_v61, %v2349_v30 }
 0xb73   : > { %3067 = vmax.xlane.f32.xlu1 %v6094_v6  ;;  %v3905_v6 = vpop.permute.xlu1 %3904 }
 0xb74   : > { %v3910_v24 = vsel %vm1254_vm6, %v3905_v6, 0.0 }
 0xb75   : > { %v7065_v17 = vmax.f32 %v6916_v48, %v3910_v24 }
 0xb77   : > { %3102 = vadd.xlane.f32.xlu1 %v7031_v37  ;;  %v1897_v13 = vpop.permute.xlu1 %1896 }
 0xb78   : > { %v1902_v55 = vsel %vm1255_vm14, %v1897_v13, 0.0 }
 0xb79   : > { %v7118_v9 = vmax.f32 %v6930_v12, %v1902_v55  ;;  %v1668_v12 = vsel %vm1255_vm14, %v1663_v45, 0.0 }
 0xb7a   : > { %v7143_v5 = vmax.f32 %v6888_v50, %v1668_v12 }
 0xb7b   : > { %v2343_v11 = vpop.permute.xlu1 %2342 }
 0xb7f   : > { %v1661_v34 = vpop.permute.xlu1 %1660 }
 0xb80   : > { %v1667_v6 = vsel %vm1255_vm14, %v1661_v34, 0.0 }
 0xb81   : > { %v7146_v61 = vmax.f32 %v6954_v31, %v1667_v6 }
 0xb83   : > { %v2573_v28 = vpop.permute.xlu1 %2572 }
 0xb87   : > { %v1901_v19 = vpop.permute.xlu1 %1900 }
 0xb88   : > { %3690 = vrot.lane.b32.xlu1 %v7037_v40, %s4777_s1  ;;  %v1904_v13 = vsel %vm1255_vm14, %v1901_v19, 0.0 }
 0xb89   : > { %v7162_v50 = vmax.f32 %v6970_v16, %v1904_v13 }
 0xb8b   : > { %v2347_v33 = vpop.permute.xlu1 %2346 }
 0xb8c   : > { %3019 = vrot.lane.b32.xlu1 %v7044_v54, %s4777_s1  ;;  %v2350_v31 = vsel %vm1255_vm14, %v2347_v33, 0.0 }
 0xb90   : > { %3692 = vrot.lane.b32.xlu1 %v7051_v38, %s4777_s1 }
 0xb94   : > { %3245 = vrot.lane.b32.xlu1 %v7058_v51, %s4777_s1 }
 0xb98   : > { %3916 = vrot.lane.b32.xlu1 %v7065_v17, %s4777_s1 }
 0xbb5   : > { %v7071_v18 = vpop.permute.xlu1 %3015 }
 0xbb9   : > { %v7073_v56 = vpop.permute.xlu0 %3017  ;;  %v3909_v48 = vpop.permute.xlu1 %3908 }
 0xbba   : > { %v3912_v63 = vsel %vm1254_vm6, %v3909_v48, 0.0 }
 0xbbb   : > { %v7077_v26 = vmax.f32 %v3903_v10, %v3912_v63  ;;  %v3100_v10 = vsel %vm3097_vm10, %v6034_v27, 0.0  ;;  %v7106_v27 = vmax.f32 %v6841_v52, %v2576_v25  ;;  %v2348_v52 = vsel %vm1255_vm14, %v2343_v11, 0.0  ;;  %v4560_v25 = vld [vmem:[%s4917_s26 + $0x30] sm:$0xff] }
 0xbbc   : > { %v3118_v11 = vmul.f32 %v3100_v10, %v6037_v57  ;;  %v3109_v16 = vmul.f32 %v3100_v10, %v5921_v4 }
 0xbbd   : > { %v3907_v21 = vpop.permute.xlu0 %3906  ;;  %3920 = vrot.lane.b32.xlu1 %v7077_v26, %s4777_s1 }
 0xbbe   : > { %v3911_v58 = vsel %vm1254_vm6, %v3907_v21, 0.0  ;;  %vm1816_vm6 = vcmask 48168  }
 0xbbf   : > { %v7083_v46 = vmax.f32 %v3902_v32, %v3911_v58  ;;  %v1666_v32 = vsel %vm1255_vm14, %v1659_v3, 0.0  ;;  %v7169_v3 = vmax.f32 %v6978_v41, %v2350_v31  ;;  %v3117_v41 = vmul.f32 %v7031_v37, %v8396_v49 }
 0xbc0   : > { %v7099_v20 = vmax.f32 %v6829_v8, %v1666_v32  ;;  %v7115_v8 = vmax.f32 %v6858_v47, %v1903_v36  ;;  %v7132_v47 = vmax.f32 %v6944_v0, %v2348_v52  ;;  %v2577_v0 = vsel %vm1255_vm14, %v2573_v28, 0.0  ;;  %v8397_v28 = vld [vmem:[#allocation14_spill] sm:$0xff] }
 0xbc1   : > { %3918 = vrot.lane.b32.xlu0 %v7083_v46, %s4777_s1  ;;  %v7155_v24 = vmax.f32 %v6962_v7, %v2577_v0  ;;  %v3110_v7 = vmul.f32 %v3101_v2, %v5928_v22  ;;  %v3119_v43 = vmul.f32 %v3101_v2, %v8397_v28  ;;  %v2578_v22 = vsel %vm1255_vm14, %v7069_v39, 0.0  ;;  %s4780_s1 = smov [#allocation8]  }
 0xbc2   : > { %v7189_v45 = vmax.f32 %v6902_v62, %v2578_v22  ;;  %v3021_v37 = vsel %vm1255_vm14, %v7071_v18, 0.0  ;;  %v7214_v18 = vpop.permute.xlu0 %3688  ;;  %v3022_v31 = vsel %vm1255_vm14, %v7073_v56, 0.0 }
 0xbc3   : > { %v7201_v63 = vmax.f32 %v6985_v15, %v3021_v37 }
 0xbca   : > { %v7218_v15 = vpop.permute.xlu0 %3243 }
 0xbd2   : > { %v7220_v14 = vpop.permute.xlu0 %3247 }
 0xbe0   : > { %3104 = vadd.xlane.f32.xlu0 %v3100_v10 }
 0xbe1   : > { %3106 = vadd.xlane.f32.xlu1 %v3101_v2 }
 0xbe4   : > { %3111 = vadd.xlane.f32.xlu0 %v3108_v35 }
 0xbf2   : > { %1672 = vrot.lane.b32.xlu1 %v7099_v20, %s4778_s29 }
 0xbf6   : > { %2582 = vrot.lane.b32.xlu1 %v7106_v27, %s4778_s29 }
 0xbf8   : > { %v7175_v60 = vpop.xlane.xlu1 %3063 }
 0xbfa   : > { %1908 = vrot.lane.b32.xlu0 %v7118_v9, %s4778_s29  ;;  %1910 = vrot.lane.b32.xlu1 %v7115_v8, %s4778_s29 }
 0xbfc   : > { %v7178_v34 = vpop.xlane.xlu1 %3065 }
 0xbfd   : > { %8395 = vst [vmem:[#allocation99_spill] sm:$0xff] %v7178_v34 }
 0xbfe   : > { %2354 = vrot.lane.b32.xlu0 %v7132_v47, %s4778_s29  ;;  %2356 = vrot.lane.b32.xlu1 %v7129_v42, %s4778_s29 }
 0xc00   : > { %v7183_v19 = vpop.xlane.xlu1 %3067 }
 0xc02   : > { %1674 = vrot.lane.b32.xlu0 %v7146_v61, %s4778_s29  ;;  %1676 = vrot.lane.b32.xlu1 %v7143_v5, %s4778_s29 }
 0xc04   : > { %v7191_v4 = vpop.xlane.xlu1 %3102 }
 0xc05   : > { %4534 = vrcp.f32 %v7191_v4  ;;  %v3144_v36 = vmul.f32 %v4560_v25, %v7191_v4  ;;  %vm3126_vm0 = vcmp.gt.f32.partialorder %v7191_v4, 0.0 }
 0xc06   : > { %2584 = vrot.lane.b32.xlu0 %v7155_v24, %s4778_s29 }
 0xc08   : > { %v7195_v33 = vpop.permute.xlu1 %3690 }
 0xc0a   : > { %1912 = vrot.lane.b32.xlu0 %v7162_v50, %s4778_s29 }
 0xc0c   : > { %v3020_v48 = vpop.permute.xlu1 %3019 }
 0xc0d   : > { %v3023_v39 = vsel %vm1255_vm14, %v3020_v48, 0.0 }
 0xc0e   : > { %2358 = vrot.lane.b32.xlu0 %v7169_v3, %s4778_s29  ;;  %v7208_v62 = vmax.f32 %v7044_v54, %v3023_v39 }
 0xc0f   : > { %v4535_v32 = vpop.eup %4534 }
 0xc10   : > { %v7212_v21 = vpop.permute.xlu1 %3692  ;;  %v7239_v12 = vsel %vm3126_vm0, %v4535_v32, 0.0 }
 0xc14   : > { %v7216_v58 = vpop.permute.xlu1 %3245 }
 0xc18   : > { %v7223_v53 = vpop.permute.xlu1 %3916 }
 0xc26   : > { %3115 = vadd.xlane.f32.xlu1 %v3110_v7 }
 0xc2a   : > { %3122 = vadd.xlane.f32.xlu1 %v3118_v11 }
 0xc2d   : > { %3113 = vadd.xlane.f32.xlu0 %v3109_v16 }
 0xc2f   : > { %v7227_v54 = vpop.permute.xlu1 %3920 }
 0xc31   : > { %3120 = vadd.xlane.f32.xlu0 %v3117_v41  ;;  %v7256_v41 = vmax.f32 %v6995_v23, %v3022_v31 }
 0xc33   : > { %v7225_v10 = vpop.permute.xlu0 %3918 }
 0xc35   : > { %3124 = vadd.xlane.f32.xlu0 %v3119_v43 }
 0xc3b   : > { %2586 = vrot.lane.b32.xlu1 %v7189_v45, %s4778_s29 }
 0xc4b   : > { %3027 = vrot.lane.b32.xlu0 %v7201_v63, %s4778_s29 }
 0xc4f   : > { %3031 = vrot.lane.b32.xlu0 %v7208_v62, %s4778_s29 }
 0xc6d   : > { %v7229_v2 = vpop.xlane.xlu0 %3104 }
 0xc6e   : > { %v7231_v35 = vpop.xlane.xlu1 %3106  ;;  %4536 = vrcp.f32 %v7229_v2  ;;  %vm3127_vm1 = vcmp.gt.f32.partialorder %v7229_v2, 0.0 }
 0xc6f   : > { %4538 = vrcp.f32 %v7231_v35  ;;  %vm3128_vm10 = vcmp.gt.f32.partialorder %v7231_v35, 0.0 }
 0xc71   : > { %v3112_v55 = vpop.xlane.xlu0 %3111 }
 0xc72   : > { %v3147_v30 = vadd.f32 %v3144_v36, %v3112_v55  ;;  %v1673_v52 = vpop.permute.xlu1 %1672 }
 0xc73   : > { %v1680_v6 = vsel %vm1256_vm15, %v1673_v52, 0.0 }
 0xc74   : > { %v3150_v0 = vmul.f32 %v3147_v30, %v7239_v12  ;;  %v7245_v13 = vmax.f32 %v7099_v20, %v1680_v6 }
 0xc75   : > { %v1909_v7 = vpop.permute.xlu0 %1908 }
 0xc76   : > { %3156 = vrot.lane.b32.xlu1 %v3150_v0, %s4774_s16  ;;  %1686 = vrot.lane.b32.xlu0 %v7245_v13, %s4779_s9  ;;  %v2583_v11 = vpop.permute.xlu1 %2582  ;;  %v1914_v56 = vsel %vm1256_vm15, %v1909_v7, 0.0 }
 0xc77   : > { %v2588_v16 = vsel %vm1256_vm15, %v2583_v11, 0.0  ;;  %v7270_v23 = vmax.f32 %v7118_v9, %v1914_v56 }
 0xc78   : > { %v7259_v20 = vmax.f32 %v7106_v27, %v2588_v16  ;;  %v4537_v56 = vpop.eup %4536 }
 0xc79   : > { %v2355_v43 = vpop.permute.xlu0 %2354 }
 0xc7a   : > { %3029 = vrot.lane.b32.xlu1 %v7256_v41, %s4778_s29  ;;  %2594 = vrot.lane.b32.xlu0 %v7259_v20, %s4779_s9  ;;  %v1911_v22 = vpop.permute.xlu1 %1910  ;;  %v2360_v48 = vsel %vm1256_vm15, %v2355_v43, 0.0 }
 0xc7b   : > { %v1915_v37 = vsel %vm1256_vm15, %v1911_v22, 0.0  ;;  %v7284_v9 = vmax.f32 %v7132_v47, %v2360_v48 }
 0xc7c   : > { %v7273_v27 = vmax.f32 %v7115_v8, %v1915_v37 }
 0xc7d   : > { %v1675_v39 = vpop.permute.xlu0 %1674 }
 0xc7e   : > { %1920 = vrot.lane.b32.xlu1 %v7270_v23, %s4779_s9  ;;  %1922 = vrot.lane.b32.xlu0 %v7273_v27, %s4779_s9  ;;  %v2357_v32 = vpop.permute.xlu1 %2356  ;;  %v1681_v36 = vsel %vm1256_vm15, %v1675_v39, 0.0 }
 0xc7f   : > { %v2361_v25 = vsel %vm1256_vm15, %v2357_v32, 0.0  ;;  %v7298_v47 = vmax.f32 %v7146_v61, %v1681_v36 }
 0xc80   : > { %v7287_v8 = vmax.f32 %v7129_v42, %v2361_v25 }
 0xc81   : > { %v2585_v55 = vpop.permute.xlu0 %2584 }
 0xc82   : > { %2366 = vrot.lane.b32.xlu1 %v7284_v9, %s4779_s9  ;;  %2368 = vrot.lane.b32.xlu0 %v7287_v8, %s4779_s9  ;;  %v1677_v30 = vpop.permute.xlu1 %1676  ;;  %v2589_v6 = vsel %vm1256_vm15, %v2585_v55, 0.0 }
 0xc83   : > { %v1682_v52 = vsel %vm1256_vm15, %v1677_v30, 0.0  ;;  %v7310_v31 = vmax.f32 %v7155_v24, %v2589_v6 }
 0xc84   : > { %v7301_v42 = vmax.f32 %v7143_v5, %v1682_v52 }
 0xc85   : > { %v1913_v0 = vpop.permute.xlu0 %1912 }
 0xc86   : > { %1688 = vrot.lane.b32.xlu1 %v7298_v47, %s4779_s9  ;;  %1690 = vrot.lane.b32.xlu0 %v7301_v42, %s4779_s9  ;;  %v1916_v61 = vsel %vm1256_vm15, %v1913_v0, 0.0 }
 0xc87   : > { %v7317_v5 = vmax.f32 %v7162_v50, %v1916_v61  ;;  %v7334_v50 = vsel %vm3127_vm1, %v4537_v56, 0.0 }
 0xc89   : > { %v2359_v7 = vpop.permute.xlu0 %2358 }
 0xc8a   : > { %2596 = vrot.lane.b32.xlu1 %v7310_v31, %s4779_s9  ;;  %v2362_v11 = vsel %vm1256_vm15, %v2359_v7, 0.0 }
 0xc8b   : > { %v7324_v16 = vmax.f32 %v7169_v3, %v2362_v11  ;;  %v8401_v11 = vld [vmem:[#allocation16_spill] sm:$0xff] }
 0xc8e   : > { %1924 = vrot.lane.b32.xlu1 %v7317_v5, %s4779_s9 }
 0xc92   : > { %2370 = vrot.lane.b32.xlu1 %v7324_v16, %s4779_s9 }
 0xcb3   : > { %v7329_v24 = vpop.xlane.xlu1 %3115 }
 0xcb7   : > { %v3123_v43 = vpop.xlane.xlu1 %3122 }
 0xcb8   : > { %v7337_v22 = vmul.f32 %v7334_v50, %v3123_v43 }
 0xcba   : > { %8398 = vst [vmem:[#allocation106_spill] sm:$0xff] %v7337_v22  ;;  %v7339_v3 = vpop.xlane.xlu0 %3113  ;;  %v8406_v22 = vld [vmem:[#allocation31_spill] sm:$0xff] }
 0xcbb   : > { %v2587_v37 = vpop.permute.xlu1 %2586 }
 0xcbc   : > { %v2590_v48 = vsel %vm1256_vm15, %v2587_v37, 0.0 }
 0xcbd   : > { %v7344_v39 = vmax.f32 %v7189_v45, %v2590_v48 }
 0xcbe   : > { %v7346_v32 = vpop.xlane.xlu0 %3120 }
 0xcbf   : > { %2598 = vrot.lane.b32.xlu0 %v7344_v39, %s4779_s9 }
 0xcc2   : > { %v7350_v25 = vpop.xlane.xlu0 %3124 }
 0xcc3   : > { %8399 = vst [vmem:[#allocation109_spill] sm:$0xff] %v7350_v25 }
 0xcc6   : > { %v3028_v36 = vpop.permute.xlu0 %3027 }
 0xcc7   : > { %v3033_v55 = vsel %vm1256_vm15, %v3028_v36, 0.0 }
 0xcc8   : > { %v7355_v30 = vmax.f32 %v7201_v63, %v3033_v55 }
 0xcca   : > { %3039 = vrot.lane.b32.xlu1 %v7355_v30, %s4779_s9  ;;  %v3032_v52 = vpop.permute.xlu0 %3031 }
 0xccb   : > { %v3035_v45 = vsel %vm1256_vm15, %v3032_v52, 0.0  ;;  %v8402_v52 = vld [vmem:[#allocation19_spill] sm:$0xff] }
 0xccc   : > { %v7362_v6 = vmax.f32 %v7208_v62, %v3035_v45 }
 0xcce   : > { %3043 = vrot.lane.b32.xlu1 %v7362_v6, %s4779_s9 }
 0xce8   : > { %v1687_v0 = vpop.permute.xlu0 %1686  ;;  %v7367_v61 = vpop.permute.xlu1 %3156 }
 0xce9   : > { %8400 = vst [vmem:[#allocation33_spill] sm:$0xff] %v7367_v61  ;;  %v1694_v63 = vsel %vm1257_vm13, %v1687_v0, 0.0 }
 0xcea   : > { %v1697_v7 = vmax.f32 %v7245_v13, %v1694_v63  ;;  %v8403_v13 = vld [vmem:[#allocation18_spill] sm:$0xff] }
 0xcec   : > { %v1700_v56 = vsub.f32 %v8401_v11, %v1697_v7  ;;  %v2595_v43 = vpop.permute.xlu0 %2594  ;;  %v3030_v37 = vpop.permute.xlu1 %3029 }
 0xced   : > { %v2600_v62 = vsel %vm1257_vm13, %v2595_v43, 0.0  ;;  %v3034_v48 = vsel %vm1256_vm15, %v3030_v37, 0.0  ;;  %v8404_v37 = vld [vmem:[#allocation21_spill] sm:$0xff] }
 0xcee   : > { %v2603_v36 = vmax.f32 %v7259_v20, %v2600_v62  ;;  %v7379_v55 = vmax.f32 %v7256_v41, %v3034_v48  ;;  %v1703_v63 = vmul.f32 %v1700_v56, %v8403_v13  ;;  %v8405_v62 = vld [vmem:[#allocation72_spill] sm:$0xff]  ;;  %v8407_v56 = vld [vmem:[#allocation22_spill] sm:$0xff] }
 0xcf0   : > { %v2606_v45 = vsub.f32 %v8402_v52, %v2603_v36  ;;  %v1923_v0 = vpop.permute.xlu0 %1922  ;;  %3041 = vrot.lane.b32.xlu0 %v7379_v55, %s4779_s9  ;;  %v1921_v61 = vpop.permute.xlu1 %1920 }
 0xcf1   : > { %v1927_v7 = vsel %vm1257_vm13, %v1923_v0, 0.0  ;;  %v8408_v0 = vld [vmem:[#allocation32_spill] sm:$0xff] }
 0xcf2   : > { %v1930_v43 = vmax.f32 %v7273_v27, %v1927_v7  ;;  %1706 = vmax.xlane.f32.xlu1 %v1703_v63  ;;  %v2609_v41 = vmul.f32 %v2606_v45, %v8405_v62  ;;  %v1926_v7 = vsel %vm1257_vm13, %v1921_v61, 0.0 }
 0xcf3   : > { %v1929_v45 = vmax.f32 %v7270_v23, %v1926_v7  ;;  %v8411_v7 = vld [vmem:[#allocation28_spill] sm:$0xff] }
 0xcf4   : > { %v1933_v25 = vsub.f32 %v8404_v37, %v1930_v43  ;;  %v2369_v20 = vpop.permute.xlu0 %2368  ;;  %v2367_v63 = vpop.permute.xlu1 %2366 }
 0xcf5   : > { %v2373_v48 = vsel %vm1257_vm13, %v2369_v20, 0.0  ;;  %v1932_v20 = vsub.f32 %v8401_v11, %v1929_v45 }
 0xcf6   : > { %v2376_v36 = vmax.f32 %v7287_v8, %v2373_v48  ;;  %2612 = vmax.xlane.f32.xlu1 %v2609_v41  ;;  %v1936_v13 = vmul.f32 %v1933_v25, %v8407_v56  ;;  %v2372_v8 = vsel %vm1257_vm13, %v2367_v63, 0.0 }
 0xcf7   : > { %v2375_v62 = vmax.f32 %v7284_v9, %v2372_v8 }
 0xcf8   : > { %v2379_v34 = vsub.f32 %v8406_v22, %v2376_v36  ;;  %v1689_v43 = vpop.permute.xlu1 %1688  ;;  %v8409_v36 = vld [vmem:[#allocation17_spill] sm:$0xff]  ;;  %v1691_v56 = vpop.permute.xlu0 %1690 }
 0xcf9   : > { %v1695_v25 = vsel %vm1257_vm13, %v1689_v43, 0.0  ;;  %v1935_v61 = vmul.f32 %v1932_v20, %v8409_v36  ;;  %v1696_v63 = vsel %vm1257_vm13, %v1691_v56, 0.0  ;;  %v8415_v36 = vld [vmem:[#allocation46_spill] sm:$0xff] }
 0xcfa   : > { %1940 = vmax.xlane.f32.xlu1 %v1936_v13  ;;  %v2382_v27 = vmul.f32 %v2379_v34, %v8408_v0  ;;  %v2378_v34 = vsub.f32 %v8402_v52, %v2375_v62  ;;  %v1698_v48 = vmax.f32 %v7298_v47, %v1695_v25  ;;  %v8410_v0 = vld [vmem:[#allocation20_spill] sm:$0xff]  ;;  %v1699_v47 = vmax.f32 %v7301_v42, %v1696_v63  ;;  %v8413_v62 = vld [vmem:[#allocation70_spill] sm:$0xff] }
 0xcfc   : > { %v2597_v41 = vpop.permute.xlu1 %2596  ;;  %v1701_v13 = vsub.f32 %v8404_v37, %v1698_v48  ;;  %v8412_v37 = vld [vmem:[#allocation34_spill] sm:$0xff] }
 0xcfd   : > { %v2601_v23 = vsel %vm1257_vm13, %v2597_v41, 0.0 }
 0xcfe   : > { %2386 = vmax.xlane.f32.xlu1 %v2382_v27  ;;  %v2604_v11 = vmax.f32 %v7310_v31, %v2601_v23  ;;  %v2381_v27 = vmul.f32 %v2378_v34, %v8410_v0  ;;  %v1704_v45 = vmul.f32 %v1701_v13, %v8411_v7  ;;  %v1702_v31 = vsub.f32 %v8412_v37, %v1699_v47  ;;  %v8414_v34 = vld [vmem:[#allocation38_spill] sm:$0xff]  ;;  %v8416_v23 = vld [vmem:[#allocation36_spill] sm:$0xff]  ;;  %v8417_v13 = vld [vmem:[#allocation47_spill] sm:$0xff] }
 0xd00   : > { %v1925_v9 = vpop.permute.xlu1 %1924  ;;  %v2607_v52 = vsub.f32 %v8406_v22, %v2604_v11  ;;  %v1705_v48 = vmul.f32 %v1702_v31, %v8414_v34 }
 0xd01   : > { %v1928_v43 = vsel %vm1257_vm13, %v1925_v9, 0.0 }
 0xd02   : > { %v1931_v20 = vmax.f32 %v7317_v5, %v1928_v43  ;;  %v2610_v25 = vmul.f32 %v2607_v52, %v8413_v62  ;;  %v8420_v62 = vld [vmem:[#allocation13_spill] sm:$0xff] }
 0xd04   : > { %v2371_v8 = vpop.permute.xlu1 %2370  ;;  %v1934_v42 = vsub.f32 %v8412_v37, %v1931_v20 }
 0xd05   : > { %v2374_v41 = vsel %vm1257_vm13, %v2371_v8, 0.0 }
 0xd06   : > { %v2377_v22 = vmax.f32 %v7324_v16, %v2374_v41  ;;  %v1937_v56 = vmul.f32 %v1934_v42, %v8416_v23  ;;  %v8418_v16 = vld [vmem:[#allocation74_spill] sm:$0xff]  ;;  %v8421_v23 = vld [vmem:[#allocation12_spill] sm:$0xff] }
 0xd0f   : > { %1938 = vmax.xlane.f32.xlu0 %v1935_v61  ;;  %v2380_v61 = vsub.f32 %v8415_v36, %v2377_v22  ;;  %v3251_v22 = vsel %vm1255_vm14, %v7220_v14, 0.0 }
 0xd11   : > { %v2383_v5 = vmul.f32 %v2380_v61, %v8417_v13 }
 0xd13   : > { %2384 = vmax.xlane.f32.xlu0 %v2381_v27 }
 0xd17   : > { %1708 = vmax.xlane.f32.xlu0 %v1704_v45 }
 0xd1b   : > { %2614 = vmax.xlane.f32.xlu0 %v2610_v25 }
 0xd1f   : > { %1710 = vmax.xlane.f32.xlu0 %v1705_v48  ;;  %v4561_v48 = vld [vmem:[%s4917_s26 + $0x38] sm:$0xff] }
 0xd23   : > { %1942 = vmax.xlane.f32.xlu0 %v1937_v56 }
 0xd27   : > { %2388 = vmax.xlane.f32.xlu0 %v2383_v5 }
 0xd31   : > { %v2599_v11 = vpop.permute.xlu0 %2598 }
 0xd32   : > { %v2602_v9 = vsel %vm1257_vm13, %v2599_v11, 0.0  ;;  %v8423_v11 = vld [vmem:[#allocation35_spill] sm:$0xff] }
 0xd33   : > { %v2605_v0 = vmax.f32 %v7344_v39, %v2602_v9  ;;  %v8419_v39 = vld [vmem:[#allocation53_spill] sm:$0xff] }
 0xd35   : > { %v2608_v27 = vsub.f32 %v8415_v36, %v2605_v0  ;;  %v3145_v36 = vmul.f32 %v4561_v48, %v7229_v2  ;;  %v8424_v0 = vld [vmem:[#allocation29_spill] sm:$0xff]  ;;  %v8434_v48 = vld [vmem:[#allocation79_spill] sm:$0xff] }
 0xd37   : > { %v2611_v63 = vmul.f32 %v2608_v27, %v8418_v16  ;;  %v8425_v27 = vld [vmem:[#allocation27_spill] sm:$0xff] }
 0xd38   : > { %v1788_v16 = vmul.f32 %v8425_v27, %v8424_v0  ;;  %v8442_v27 = vld [vmem:[#allocation30_spill] sm:$0xff] }
 0xd39   : > { %2616 = vmax.xlane.f32.xlu1 %v2611_v63 }
 0xd3c   : > { %v3040_v47 = vpop.permute.xlu1 %3039 }
 0xd3d   : > { %v3045_v52 = vsel %vm1257_vm13, %v3040_v47, 0.0  ;;  %v8426_v47 = vld [vmem:[#allocation64_spill] sm:$0xff] }
 0xd3e   : > { %v3048_v7 = vmax.f32 %v7355_v30, %v3045_v52  ;;  %v3694_v30 = vsel %vm1255_vm14, %v7214_v18, 0.0  ;;  %v7468_v18 = vmax.f32 %v7021_v1, %v3251_v22  ;;  %v3148_v1 = vadd.f32 %v3145_v36, %v7339_v3  ;;  %v8422_v3 = vld [vmem:[#allocation25_spill] sm:$0xff]  ;;  %v8435_v36 = vld [vmem:[#allocation40_spill] sm:$0xff] }
 0xd3f   : > { %v7450_v41 = vmax.f32 %v7007_v29, %v3694_v30  ;;  %v4107_v5 = vadd.f32 -1.0, %v8422_v3  ;;  %v8427_v52 = vld [vmem:[#allocation37_spill] sm:$0xff] }
 0xd40   : > { %v3051_v45 = vsub.f32 %v8396_v49, %v3048_v7  ;;  %v3044_v43 = vpop.permute.xlu1 %3043  ;;  %v8428_v7 = vld [vmem:[#allocation41_spill] sm:$0xff] }
 0xd41   : > { %v3047_v8 = vsel %vm1257_vm13, %v3044_v43, 0.0  ;;  %v1718_v9 = vsub.f32 %v4107_v5, %v8423_v11  ;;  %v4562_v43 = vld [vmem:[%s4917_s26 + $0x40] sm:$0xff]  ;;  %v8431_v30 = vld [vmem:[#allocation69_spill] sm:$0xff]  ;;  %v8438_v11 = vld [vmem:[#allocation39_spill] sm:$0xff] }
 0xd42   : > { %v3050_v37 = vmax.f32 %v7362_v6, %v3047_v8  ;;  %v3054_v31 = vmul.f32 %v3051_v45, %v8419_v39  ;;  %v3249_v6 = vsel %vm1255_vm14, %v7218_v15, 0.0  ;;  %v3924_v45 = vsel %vm1255_vm14, %v7227_v54, 0.0 }
 0xd43   : > { %v7458_v42 = vmax.f32 %v7014_v44, %v3249_v6  ;;  %v3923_v44 = vsel %vm1255_vm14, %v7225_v10, 0.0  ;;  %v3151_v10 = vmul.f32 %v3148_v1, %v7334_v50  ;;  %v3146_v8 = vmul.f32 %v4562_v43, %v7231_v35  ;;  %v8436_v1 = vld [vmem:[#allocation26_spill] sm:$0xff] }
 0xd44   : > { %v3053_v20 = vsub.f32 %v8397_v28, %v3050_v37  ;;  %3057 = vmax.xlane.f32.xlu0 %v3054_v31  ;;  %v7480_v61 = vmax.f32 %v7083_v46, %v3923_v44  ;;  %v3696_v46 = vsel %vm1255_vm14, %v7212_v21, 0.0  ;;  %v7542_v39 = vmax.f32 %v7077_v26, %v3924_v45 }
 0xd45   : > { %v7501_v50 = vmax.f32 %v7051_v38, %v3696_v46  ;;  %v3149_v31 = vadd.f32 %v3146_v8, %v7329_v24 }
 0xd46   : > { %v3056_v25 = vmul.f32 %v3053_v20, %v8420_v62  ;;  %v8429_v20 = vld [vmem:[#allocation56_spill] sm:$0xff] }
 0xd48   : > { %3061 = vmax.xlane.f32.xlu0 %v3056_v25  ;;  %v8430_v25 = vld [vmem:[#allocation77_spill] sm:$0xff] }
 0xd49   : > { %v2496_v6 = vmul.f32 %v8431_v30, %v8430_v25  ;;  %v8448_v25 = vld [vmem:[#allocation49_spill] sm:$0xff] }
 0xd4b   : > { %v2499_v44 = vsel %vm2454_vm9, %v2496_v6, -1.0  ;;  %v8449_v6 = vld [vmem:[#allocation118_spill] sm:$0xff] }
 0xd5e   : > { %3700 = vrot.lane.b32.xlu0 %v7450_v41, %s4778_s29 }
 0xd62   : > { %v3042_v34 = vpop.permute.xlu0 %3041  ;;  %3255 = vrot.lane.b32.xlu0 %v7458_v42, %s4778_s29 }
 0xd63   : > { %v3046_v29 = vsel %vm1257_vm13, %v3042_v34, 0.0  ;;  %v8432_v34 = vld [vmem:[#allocation66_spill] sm:$0xff] }
 0xd64   : > { %v3049_v15 = vmax.f32 %v7379_v55, %v3046_v29  ;;  %v3695_v55 = vsel %vm1255_vm14, %v7195_v33, 0.0  ;;  %v8433_v29 = vld [vmem:[#allocation45_spill] sm:$0xff] }
 0xd65   : > { %v7492_v13 = vmax.f32 %v7037_v40, %v3695_v55  ;;  %v3250_v40 = vsel %vm1255_vm14, %v7216_v58, 0.0  ;;  %v3922_v58 = vsel %vm1255_vm14, %v7223_v53, 0.0  ;;  %v4117_v53 = vadd.f32 -1.0, %v8428_v7  ;;  %v8437_v55 = vld [vmem:[#allocation42_spill] sm:$0xff] }
 0xd66   : > { %v3052_v14 = vsub.f32 %v6037_v57, %v3049_v15  ;;  %3259 = vrot.lane.b32.xlu0 %v7468_v18, %s4778_s29  ;;  %v7511_v38 = vmax.f32 %v7058_v51, %v3250_v40  ;;  %v7528_v51 = vmax.f32 %v7065_v17, %v3922_v58  ;;  %v4539_v17 = vpop.eup %4538  ;;  %v2466_v24 = vmul.f32 %v8433_v29, %v8432_v34  ;;  %v8439_v40 = vld [vmem:[#allocation73_spill] sm:$0xff]  ;;  %v8443_v58 = vld [vmem:[#allocation50_spill] sm:$0xff]  ;;  %v8450_v34 = vld [vmem:[#allocation48_spill] sm:$0xff] }
 0xd67   : > { %v2397_v62 = vsub.f32 %v4117_v53, %v8429_v20  ;;  %v7553_v22 = vsel %vm3128_vm10, %v4539_v17, 0.0  ;;  %v8445_v17 = vld [vmem:[#allocation78_spill] sm:$0xff]  ;;  %v8446_v20 = vld [vmem:[#allocation44_spill] sm:$0xff]  ;;  %v4109_v29 = vadd.f32 -1.0, %v8450_v34 }
 0xd68   : > { %v3055_v56 = vmul.f32 %v3052_v14, %v8421_v23  ;;  %v3152_v15 = vmul.f32 %v3149_v31, %v7553_v22  ;;  %v1950_v14 = vsub.f32 %v4107_v5, %v8435_v36  ;;  %v4116_v23 = vadd.f32 -1.0, %v8436_v1  ;;  %v8441_v5 = vld [vmem:[#allocation65_spill] sm:$0xff] }
 0xd6a   : > { %3059 = vmax.xlane.f32.xlu1 %v3055_v56  ;;  %3930 = vrot.lane.b32.xlu0 %v7480_v61, %s4778_s29  ;;  %v2396_v46 = vsub.f32 %v4116_v23, %v8437_v55 }
 0xd6e   : > { %3158 = vrot.lane.b32.xlu0 %v3151_v10, %s4774_s16 }
 0xd7b   : > { %3702 = vrot.lane.b32.xlu1 %v7492_v13, %s4778_s29 }
 0xd7f   : > { %3704 = vrot.lane.b32.xlu1 %v7501_v50, %s4778_s29  ;;  %v1707_v33 = vpop.xlane.xlu1 %1706 }
 0xd80   : > { %v1721_v21 = vmax.f32 %v1707_v33, %v1718_v9  ;;  %v4108_v9 = vadd.f32 -1.0, %v8438_v11  ;;  %v8440_v33 = vld [vmem:[#allocation68_spill] sm:$0xff] }
 0xd82   : > { %1725 = vst.msk [vmem:[%s4924_s11] sm:$0xff] %vm1724_vm2, %v1721_v21  ;;  %v2495_v21 = vmul.f32 %v8440_v33, %v8439_v40  ;;  %v1951_v30 = vsub.f32 %v4108_v9, %v8448_v25  ;;  %v8459_v33 = vld [vmem:[#allocation61_spill] sm:$0xff] }
 0xd83   : > { %1792 = vst.msk [vmem:[%s4924_s11] sm:$0xff] %vm1791_vm3, %v1788_v16  ;;  %3257 = vrot.lane.b32.xlu1 %v7511_v38, %s4778_s29  ;;  %v2613_v63 = vpop.xlane.xlu1 %2612  ;;  %v2465_v16 = vmul.f32 %v8442_v27, %v8441_v5 }
 0xd84   : > { %1817 = vst.msk [vmem:[%s4924_s11] sm:$0xff] %vm1816_vm6, %v8426_v47  ;;  %v1719_v47 = vsub.f32 %v4108_v9, %v8443_v58  ;;  %v2498_v43 = vsel %vm2453_vm4, %v2495_v21, -1.0  ;;  %v8458_v9 = vld [vmem:[#allocation76_spill] sm:$0xff]  ;;  %v8460_v21 = vld [vmem:[#allocation63_spill] sm:$0xff]  ;;  %v8462_v58 = vld [vmem:[#allocation58_spill] sm:$0xff] }
 0xd85   : > { %1827 = vst.msk [vmem:[%s4924_s11] sm:$0xff] %vm1826_vm5, %v8427_v52  ;;  %v8444_v52 = vld [vmem:[#allocation117_spill] sm:$0xff] }
 0xd86   : > { %v2624_v7 = vsub.f32 %v4116_v23, %v8444_v52  ;;  %v8454_v23 = vld [vmem:[#allocation57_spill] sm:$0xff]  ;;  %v8463_v52 = vld [vmem:[#allocation80_spill] sm:$0xff] }
 0xd87   : > { %3928 = vrot.lane.b32.xlu1 %v7528_v51, %s4778_s29  ;;  %v1941_v37 = vpop.xlane.xlu1 %1940 }
 0xd88   : > { %v2627_v8 = vmax.f32 %v2613_v63, %v2624_v7  ;;  %v8464_v7 = vld [vmem:[#allocation71_spill] sm:$0xff] }
 0xd8b   : > { %3932 = vrot.lane.b32.xlu1 %v7542_v39, %s4778_s29  ;;  %v2387_v54 = vpop.xlane.xlu1 %2386  ;;  %s4618_s29 = sshll.u32 %s4780_s1, 4  ;;  %s4619_s29 = int_to_ptr.vmem [resolvable:$false] %s4618_s29 }
 0xd8c   : > { %v2400_v26 = vmax.f32 %v2387_v54, %v2397_v62  ;;  %v8447_v62 = vld [vmem:[#allocation43_spill] sm:$0xff] }
 0xd8d   : > { %v1789_v54 = vmul.f32 %v8447_v62, %v8446_v20 }
 0xd8e   : > { %2403 = vst.msk [vmem:[%s4924_s11 + $0x20] sm:$0xff] %vm1724_vm2, %v2400_v26  ;;  %v2625_v26 = vsub.f32 %v4117_v53, %v8449_v6  ;;  %v8453_v53 = vld [vmem:[#allocation60_spill] sm:$0xff]  ;;  %v3168_v6 = vmul.f32 %v7239_v12, %v7346_v32 }
 0xd8f   : > { %2469 = vst.msk [vmem:[%s4924_s11 + $0x20] sm:$0xff] %vm1791_vm3, %v2466_v24  ;;  %3160 = vrot.lane.b32.xlu1 %v3152_v15, %s4774_s16  ;;  %v1954_v24 = vmax.f32 %v1941_v37, %v1951_v30  ;;  %v8451_v15 = vld [vmem:[#allocation75_spill] sm:$0xff]  ;;  %v1720_v36 = vsub.f32 %v4109_v29, %v8453_v53  ;;  %v8455_v37 = vld [vmem:[#allocation52_spill] sm:$0xff] }
 0xd90   : > { %2493 = vst.msk [vmem:[%s4924_s11 + $0x20] sm:$0xff] %vm1816_vm6, %v8434_v48  ;;  %v8452_v48 = vld [vmem:[#allocation51_spill] sm:$0xff]  ;;  %v8470_v12 = vld [vmem:[#allocation124_spill] sm:$0xff] }
 0xd91   : > { %2502 = vst.msk [vmem:[%s4924_s11 + $0x20] sm:$0xff] %vm1826_vm5, %v2499_v44  ;;  %v3140_v32 = vmul.f32 %v8470_v12, %v7231_v35 }
 0xd9c   : > { %v1939_v56 = vpop.xlane.xlu0 %1938 }
 0xd9d   : > { %v1953_v10 = vmax.f32 %v1939_v56, %v1950_v14  ;;  %v1790_v56 = vmul.f32 %v8455_v37, %v8454_v23  ;;  %v8471_v23 = vld [vmem:[#allocation122_spill] sm:$0xff] }
 0xd9e   : > { %v7692_v37 = vadd.f32 -1.0, %v8471_v23 }
 0xd9f   : > { %1957 = vst.msk [vmem:[%s4924_s11] sm:$0xff] %vm1956_vm12, %v1953_v10  ;;  %v8456_v10 = vld [vmem:[#allocation62_spill] sm:$0xff] }
 0xda0   : > { %v2385_v3 = vpop.xlane.xlu0 %2384  ;;  %v1952_v55 = vsub.f32 %v4109_v29, %v8456_v10 }
 0xda1   : > { %v2399_v0 = vmax.f32 %v2385_v3, %v2396_v46  ;;  %v8457_v46 = vld [vmem:[#allocation55_spill] sm:$0xff] }
 0xda2   : > { %v4118_v3 = vadd.f32 -1.0, %v8457_v46 }
 0xda3   : > { %2402 = vst.msk [vmem:[%s4924_s11 + $0x18] sm:$0xff] %vm1724_vm2, %v2399_v0 }
 0xda4   : > { %2468 = vst.msk [vmem:[%s4924_s11 + $0x18] sm:$0xff] %vm1791_vm3, %v2465_v16  ;;  %v1709_v45 = vpop.xlane.xlu0 %1708  ;;  %v2398_v0 = vsub.f32 %v4118_v3, %v8460_v21  ;;  %v8461_v16 = vld [vmem:[#allocation67_spill] sm:$0xff] }
 0xda5   : > { %2492 = vst.msk [vmem:[%s4924_s11 + $0x18] sm:$0xff] %vm1816_vm6, %v8445_v17  ;;  %v1722_v31 = vmax.f32 %v1709_v45, %v1719_v47  ;;  %v2467_v47 = vmul.f32 %v8462_v58, %v8461_v16  ;;  %v8465_v45 = vld [vmem:[#allocation119_spill] sm:$0xff] }
 0xda6   : > { %2501 = vst.msk [vmem:[%s4924_s11 + $0x18] sm:$0xff] %vm1826_vm5, %v2498_v43  ;;  %v2626_v43 = vsub.f32 %v4118_v3, %v8465_v45  ;;  %v8473_v3 = vld [vmem:[#allocation125_spill] sm:$0xff] }
 0xda7   : > { %2630 = vst.msk [vmem:[%s4924_s11 + $0x18] sm:$0xff] %vm1956_vm12, %v2627_v8 }
 0xda8   : > { %1726 = vst.msk [vmem:[%s4924_s11 + $0x8] sm:$0xff] %vm1724_vm2, %v1722_v31  ;;  %v2615_v63 = vpop.xlane.xlu0 %2614  ;;  %v8466_v31 = vld [vmem:[#allocation120_spill] sm:$0xff] }
 0xda9   : > { %1793 = vst.msk [vmem:[%s4924_s11 + $0x8] sm:$0xff] %vm1791_vm3, %v1789_v54  ;;  %v2628_v44 = vmax.f32 %v2615_v63, %v2625_v26  ;;  %v7648_v20 = vadd.f32 -1.0, %v8466_v31  ;;  %v8467_v54 = vld [vmem:[#allocation121_spill] sm:$0xff]  ;;  %v8468_v63 = vld [vmem:[#allocation123_spill] sm:$0xff] }
 0xdaa   : > { %1818 = vst.msk [vmem:[%s4924_s11 + $0x8] sm:$0xff] %vm1816_vm6, %v8451_v15  ;;  %v7653_v25 = vadd.f32 -1.0, %v8467_v54  ;;  %v3138_v34 = vmul.f32 %v8468_v63, %v7191_v4  ;;  %v8469_v15 = vld [vmem:[#allocation33_spill] sm:$0xff] }
 0xdab   : > { %1828 = vst.msk [vmem:[%s4924_s11 + $0x8] sm:$0xff] %vm1826_vm5, %v8452_v48  ;;  %v3069_v62 = vsub.f32 %v7648_v20, %v7175_v60  ;;  %v8479_v54 = vld [vmem:[#allocation89_spill] sm:$0xff] }
 0xdac   : > { %1958 = vst.msk [vmem:[%s4924_s11 + $0x8] sm:$0xff] %vm1956_vm12, %v1954_v24  ;;  %2631 = vst.msk [vmem:[%s4924_s11 + $0x20] sm:$0xff] %vm1956_vm12, %v2628_v44  ;;  %v1711_v14 = vpop.xlane.xlu0 %1710  ;;  %v3071_v29 = vsub.f32 %v7653_v25, %v7183_v19  ;;  %v3171_v24 = vsel %vm3126_vm0, %v3168_v6, -1.0  ;;  %v8481_v6 = vld [vmem:[#allocation81_spill] sm:$0xff] }
 0xdad   : > { %v1723_v1 = vmax.f32 %v1711_v14, %v1720_v36 }
 0xdaf   : > { %1727 = vst.msk [vmem:[%s4924_s11 + $0x10] sm:$0xff] %vm1724_vm2, %v1723_v1 }
 0xdb0   : > { %1794 = vst.msk [vmem:[%s4924_s11 + $0x10] sm:$0xff] %vm1791_vm3, %v1790_v56  ;;  %v1943_v11 = vpop.xlane.xlu0 %1942 }
 0xdb1   : > { %1819 = vst.msk [vmem:[%s4924_s11 + $0x10] sm:$0xff] %vm1816_vm6, %v8458_v9  ;;  %v1955_v40 = vmax.f32 %v1943_v11, %v1952_v55  ;;  %v3139_v11 = vmul.f32 %v8473_v3, %v7229_v2 }
 0xdb2   : > { %1829 = vst.msk [vmem:[%s4924_s11 + $0x10] sm:$0xff] %vm1826_vm5, %v8459_v33 }
 0xdb3   : > { %1959 = vst.msk [vmem:[%s4924_s11 + $0x10] sm:$0xff] %vm1956_vm12, %v1955_v40  ;;  %v8474_v40 = vld [vmem:[#allocation106_spill] sm:$0xff] }
 0xdb4   : > { %v2389_v5 = vpop.xlane.xlu0 %2388  ;;  %v3172_v33 = vsel %vm3127_vm1, %v8474_v40, -1.0 }
 0xdb5   : > { %v2401_v27 = vmax.f32 %v2389_v5, %v2398_v0 }
 0xdb7   : > { %2404 = vst.msk [vmem:[%s4924_s11 + $0x28] sm:$0xff] %vm1724_vm2, %v2401_v27 }
 0xdb8   : > { %2470 = vst.msk [vmem:[%s4924_s11 + $0x28] sm:$0xff] %vm1791_vm3, %v2467_v47  ;;  %v8475_v47 = vld [vmem:[#allocation109_spill] sm:$0xff] }
 0xdb9   : > { %2494 = vst.msk [vmem:[%s4924_s11 + $0x28] sm:$0xff] %vm1816_vm6, %v8463_v52  ;;  %v3170_v52 = vmul.f32 %v7553_v22, %v8475_v47  ;;  %v8478_v22 = vld [vmem:[#allocation82_spill] sm:$0xff] }
 0xdba   : > { %2503 = vst.msk [vmem:[%s4924_s11 + $0x28] sm:$0xff] %vm1826_vm5, %v8464_v7 }
 0xdbb   : > { %v3173_v7 = vsel %vm3128_vm10, %v3170_v52, -1.0 }
 0xdc6   : > { %v2617_v8 = vpop.xlane.xlu1 %2616 }
 0xdc7   : > { %v2629_v17 = vmax.f32 %v2617_v8, %v2626_v43 }
 0xdc9   : > { %2632 = vst.msk [vmem:[%s4924_s11 + $0x28] sm:$0xff] %vm1956_vm12, %v2629_v17  ;;  %v8476_v17 = vld [vmem:[#allocation100_spill] sm:$0xff] }
 0xdd1   : > { %v3058_v30 = vpop.xlane.xlu0 %3057 }
 0xdd2   : > { %v3072_v26 = vmax.f32 %v3058_v30, %v3069_v62  ;;  %v8477_v62 = vld [vmem:[#allocation87_spill] sm:$0xff]  ;;  %v8480_v30 = vld [vmem:[#allocation102_spill] sm:$0xff] }
 0xdd3   : > { %vm3542_vm4 = vcmp.gt.f32.partialorder %v8478_v22, %v8477_v62  ;;  %vm3769_vm9 = vcmp.gt.f32.partialorder %v8481_v6, %v8480_v30 }
 0xdd4   : > { %3075 = vst.msk [vmem:[%s4924_s11 + $0x30] sm:$0xff] %vm1724_vm2, %v3072_v26  ;;  %v3545_v35 = vsel %vm3542_vm4, %v8479_v54, 0.0  ;;  %v8482_v26 = vld [vmem:[#allocation84_spill] sm:$0xff] }
 0xdd5   : > { %3141 = vst.msk [vmem:[%s4924_s11 + $0x30] sm:$0xff] %vm1791_vm3, %v3138_v34  ;;  %v3062_v60 = vpop.xlane.xlu0 %3061  ;;  %v7733_v63 = vsel %vm3769_vm9, %v8482_v26, 0.0  ;;  %v8483_v34 = vld [vmem:[#allocation105_spill] sm:$0xff] }
 0xdd6   : > { %3165 = vst.msk [vmem:[%s4924_s11 + $0x30] sm:$0xff] %vm1816_vm6, %v8469_v15  ;;  %v3074_v44 = vmax.f32 %v3062_v60, %v3071_v29  ;;  %v8484_v29 = vld [vmem:[#allocation83_spill] sm:$0xff] }
 0xdd7   : > { %3174 = vst.msk [vmem:[%s4924_s11 + $0x30] sm:$0xff] %vm1826_vm5, %v3171_v24  ;;  %vm3771_vm14 = vcmp.gt.f32.partialorder %v8484_v29, %v8483_v34 }
 0xdd8   : > { %3077 = vst.msk [vmem:[%s4924_s11 + $0x40] sm:$0xff] %vm1724_vm2, %v3074_v44 }
 0xdd9   : > { %v7676_v19 = vpop.permute.xlu0 %3700  ;;  %3143 = vst.msk [vmem:[%s4924_s11 + $0x40] sm:$0xff] %vm1791_vm3, %v3140_v32 }
 0xddd   : > { %v3256_v48 = vpop.permute.xlu0 %3255 }
 0xdde   : > { %v3261_v4 = vsel %vm1256_vm15, %v3256_v48, 0.0 }
 0xddf   : > { %v3264_v53 = vmax.f32 %v7458_v42, %v3261_v4  ;;  %v8472_v42 = vld [vmem:[#allocation99_spill] sm:$0xff] }
 0xde0   : > { %v3070_v10 = vsub.f32 %v7692_v37, %v8472_v42 }
 0xde1   : > { %3267 = vrot.lane.b32.xlu0 %v3264_v53, %s4779_s9  ;;  %v3260_v36 = vpop.permute.xlu0 %3259 }
 0xde2   : > { %v3263_v14 = vsel %vm1256_vm15, %v3260_v36, 0.0 }
 0xde3   : > { %v7687_v1 = vmax.f32 %v7468_v18, %v3263_v14  ;;  %v8487_v14 = vld [vmem:[#allocation15_spill] sm:$0xff] }
 0xde4   : > { %vm3541_vm0 = vcmp.gt.f32.partialorder %v8481_v6, %v8487_v14 }
 0xde5   : > { %3271 = vrot.lane.b32.xlu0 %v7687_v1, %s4779_s9  ;;  %v7694_v56 = vpop.permute.xlu0 %3930  ;;  %v3544_v23 = vsel %vm3541_vm0, %v8482_v26, 0.0 }
 0xde9   : > { %v3159_v18 = vpop.permute.xlu0 %3158 }
 0xdf7   : > { %v3060_v55 = vpop.xlane.xlu1 %3059 }
 0xdf8   : > { %v3073_v46 = vmax.f32 %v3060_v55, %v3070_v10  ;;  %v8489_v10 = vld [vmem:[#allocation112_spill] sm:$0xff]  ;;  %v3706_v55 = vsel %vm1256_vm15, %v7676_v19, 0.0 }
 0xdf9   : > { %vm3770_vm10 = vcmp.gt.f32.partialorder %v8478_v22, %v8489_v10  ;;  %v7777_v3 = vmax.f32 %v7450_v41, %v3706_v55  ;;  %v3553_v41 = vmul.f32 %v3544_v23, %v8481_v6  ;;  %v8501_v10 = vld [vmem:[#allocation96_spill] sm:$0xff] }
 0xdfa   : > { %3076 = vst.msk [vmem:[%s4924_s11 + $0x38] sm:$0xff] %vm1724_vm2, %v3073_v46  ;;  %v3554_v46 = vmul.f32 %v3545_v35, %v8478_v22 }
 0xdfb   : > { %3142 = vst.msk [vmem:[%s4924_s11 + $0x38] sm:$0xff] %vm1791_vm3, %v3139_v11  ;;  %v3703_v9 = vpop.permute.xlu1 %3702  ;;  %v3935_v11 = vsel %vm1256_vm15, %v7694_v56, 0.0 }
 0xdfc   : > { %3166 = vst.msk [vmem:[%s4924_s11 + $0x38] sm:$0xff] %vm1816_vm6, %v3159_v18  ;;  %v3707_v24 = vsel %vm1256_vm15, %v3703_v9, 0.0  ;;  %v7785_v18 = vmax.f32 %v7480_v61, %v3935_v11 }
 0xdfd   : > { %3175 = vst.msk [vmem:[%s4924_s11 + $0x38] sm:$0xff] %vm1826_vm5, %v3172_v33  ;;  %v7745_v15 = vmax.f32 %v7492_v13, %v3707_v24  ;;  %v8490_v33 = vld [vmem:[#allocation23_spill] sm:$0xff] }
 0xdff   : > { %v3705_v21 = vpop.permute.xlu1 %3704 }
 0xe00   : > { %v3708_v44 = vsel %vm1256_vm15, %v3705_v21, 0.0  ;;  %v8491_v21 = vld [vmem:[#allocation59_spill] sm:$0xff] }
 0xe01   : > { %v7752_v32 = vmax.f32 %v7501_v50, %v3708_v44  ;;  %v8488_v50 = vld [vmem:[#allocation92_spill] sm:$0xff]  ;;  %v3781_v44 = vmul.f32 %v7733_v63, %v8481_v6 }
 0xe02   : > { %vm3543_vm1 = vcmp.gt.f32.partialorder %v8484_v29, %v8488_v50  ;;  %v8500_v50 = vld [vmem:[#allocation101_spill] sm:$0xff] }
 0xe03   : > { %v3258_v0 = vpop.permute.xlu1 %3257 }
 0xe04   : > { %v3262_v5 = vsel %vm1256_vm15, %v3258_v0, 0.0 }
 0xe05   : > { %v3265_v27 = vmax.f32 %v7511_v38, %v3262_v5  ;;  %v8492_v5 = vld [vmem:[#allocation91_spill] sm:$0xff] }
 0xe07   : > { %3269 = vrot.lane.b32.xlu1 %v3265_v27, %s4779_s9  ;;  %v3929_v16 = vpop.permute.xlu1 %3928 }
 0xe08   : > { %v3934_v61 = vsel %vm1256_vm15, %v3929_v16, 0.0  ;;  %v8494_v16 = vld [vmem:[#allocation24_spill] sm:$0xff] }
 0xe09   : > { %v7805_v0 = vmax.f32 %v7528_v51, %v3934_v61 }
 0xe0b   : > { %v3933_v58 = vpop.permute.xlu1 %3932 }
 0xe0c   : > { %v3936_v9 = vsel %vm1256_vm15, %v3933_v58, 0.0  ;;  %v8493_v58 = vld [vmem:[#allocation54_spill] sm:$0xff] }
 0xe0d   : > { %v7792_v19 = vmax.f32 %v7542_v39, %v3936_v9  ;;  %v3509_v39 = vmul.f32 %v8491_v21, %v8490_v33  ;;  %v3508_v47 = vmul.f32 %v8493_v58, %v8490_v33  ;;  %v8504_v9 = vld [vmem:[#allocation104_spill] sm:$0xff] }
 0xe0f   : > { %v3161_v2 = vpop.permute.xlu1 %3160  ;;  %v7813_v52 = vsub.f32 %v8494_v16, %v3509_v39 }
 0xe10   : > { %3167 = vst.msk [vmem:[%s4924_s11 + $0x40] sm:$0xff] %vm1816_vm6, %v3161_v2  ;;  %v7816_v2 = vsub.f32 %v8494_v16, %v3508_v47 }
 0xe11   : > { %3176 = vst.msk [vmem:[%s4924_s11 + $0x40] sm:$0xff] %vm1826_vm5, %v3173_v7  ;;  %v8495_v7 = vld [vmem:[#allocation86_spill] sm:$0xff]  ;;  %4540 = vrcp.f32 %v7813_v52 }
 0xe12   : > { %v3510_v51 = vmul.f32 %v8495_v7, %v8490_v33  ;;  %4542 = vrcp.f32 %v7816_v2 }
 0xe53   : > { %v3268_v45 = vpop.permute.xlu0 %3267 }
 0xe54   : > { %v3273_v43 = vsel %vm1257_vm13, %v3268_v45, 0.0  ;;  %v8496_v45 = vld [vmem:[#allocation90_spill] sm:$0xff] }
 0xe55   : > { %v3276_v38 = vmax.f32 %v3264_v53, %v3273_v43  ;;  %v8486_v53 = vld [vmem:[#allocation107_spill] sm:$0xff]  ;;  %v7824_v43 = vsub.f32 %v8494_v16, %v3510_v51  ;;  %v8506_v51 = vld [vmem:[#allocation88_spill] sm:$0xff] }
 0xe57   : > { %v3279_v8 = vsub.f32 %v8396_v49, %v3276_v38  ;;  %v8485_v49 = vld [vmem:[#allocation94_spill] sm:$0xff]  ;;  %4544 = vrcp.f32 %v7824_v43  ;;  %v3272_v55 = vpop.permute.xlu0 %3271 }
 0xe58   : > { %v7739_v60 = vsel %vm3771_vm14, %v8485_v49, 0.0  ;;  %v3546_v42 = vsel %vm3543_vm1, %v8485_v49, 0.0  ;;  %v8497_v38 = vld [vmem:[#allocation98_spill] sm:$0xff] }
 0xe59   : > { %v3282_v31 = vmul.f32 %v3279_v8, %v8476_v17  ;;  %v3555_v56 = vmul.f32 %v3546_v42, %v8484_v29  ;;  %v4541_v17 = vpop.eup %4540  ;;  %v3564_v6 = vmul.f32 %v3546_v42, %v8501_v10 }
 0xe5a   : > { %v4543_v62 = vpop.eup %4542 }
 0xe5b   : > { %3285 = vmax.xlane.f32.xlu1 %v3282_v31 }
 0xe5f   : > { %3549 = vadd.xlane.f32.xlu1 %v3545_v35 }
 0xe61   : > { %v4545_v30 = vpop.eup %4544 }
 0xe63   : > { %3775 = vadd.xlane.f32.xlu1 %v7733_v63 }
 0xe67   : > { %3779 = vadd.xlane.f32.xlu1 %v7739_v60 }
 0xe78   : > { %3714 = vrot.lane.b32.xlu1 %v7745_v15, %s4779_s9 }
 0xe79   : > { %v3270_v12 = vpop.permute.xlu1 %3269 }
 0xe7a   : > { %v3274_v48 = vsel %vm1257_vm13, %v3270_v12, 0.0 }
 0xe7b   : > { %v3277_v4 = vmax.f32 %v3265_v27, %v3274_v48  ;;  %v3563_v27 = vmul.f32 %v3545_v35, %v8492_v5 }
 0xe7c   : > { %3716 = vrot.lane.b32.xlu1 %v7752_v32, %s4779_s9 }
 0xe7d   : > { %v3280_v13 = vsub.f32 %v6037_v57, %v3277_v4  ;;  %v7769_v57 = vsel %vm3770_vm10, %v8479_v54, 0.0  ;;  %v3783_v4 = vmul.f32 %v7739_v60, %v8484_v29 }
 0xe7e   : > { %v3782_v40 = vmul.f32 %v7769_v57, %v8478_v22  ;;  %v3791_v29 = vmul.f32 %v7769_v57, %v8492_v5 }
 0xe7f   : > { %v3283_v36 = vmul.f32 %v3280_v13, %v8486_v53  ;;  %v8498_v13 = vld [vmem:[#allocation93_spill] sm:$0xff] }
 0xe81   : > { %3287 = vmax.xlane.f32.xlu0 %v3283_v36  ;;  %v8499_v36 = vld [vmem:[#allocation85_spill] sm:$0xff] }
 0xe82   : > { %v3562_v14 = vmul.f32 %v3544_v23, %v8499_v36 }
 0xe85   : > { %3547 = vadd.xlane.f32.xlu0 %v3544_v23 }
 0xe89   : > { %3551 = vadd.xlane.f32.xlu0 %v3546_v42  ;;  %v8505_v42 = vld [vmem:[#allocation116_spill] sm:$0xff] }
 0xe8d   : > { %3777 = vadd.xlane.f32.xlu0 %v7769_v57 }
 0xea0   : > { %3558 = vadd.xlane.f32.xlu1 %v3554_v46  ;;  %v8503_v46 = vld [vmem:[#allocation95_spill] sm:$0xff] }
 0xea3   : > { %3712 = vrot.lane.b32.xlu0 %v7777_v3, %s4779_s9 }
 0xeb1   : > { %3942 = vrot.lane.b32.xlu1 %v7785_v18, %s4779_s9 }
 0xeb5   : > { %3944 = vrot.lane.b32.xlu1 %v7792_v19, %s4779_s9 }
 0xec2   : > { %3556 = vadd.xlane.f32.xlu0 %v3553_v41 }
 0xec6   : > { %3560 = vadd.xlane.f32.xlu0 %v3555_v56 }
 0xed9   : > { %3786 = vadd.xlane.f32.xlu1 %v3782_v40 }
 0xedc   : > { %3940 = vrot.lane.b32.xlu0 %v7805_v0, %s4779_s9  ;;  %s4620_s9 = scalar_lea.vmem %s4619_s29, 3072 }
 0xedd   : > { %3567 = vadd.xlane.f32.xlu1 %v3563_v27 }
 0xee1   : > { %3736 = vmax.xlane.f32.xlu1 %v8496_v45 }
 0xee5   : > { %3740 = vmax.xlane.f32.xlu1 %v8497_v38  ;;  %v8507_v38 = vld [vmem:[#allocation97_spill] sm:$0xff] }
 0xee8   : > { %v7827_v8 = vpop.xlane.xlu1 %3285 }
 0xeec   : > { %v7830_v31 = vpop.xlane.xlu1 %3549 }
 0xeed   : > { %v3584_v22 = vmul.f32 %v4541_v17, %v7830_v31  ;;  %vm3572_vm15 = vcmp.gt.f32.partialorder %v7830_v31, 0.0 }
 0xeef   : > { %3587 = vst.msk [vmem:[%s4924_s11 + $0x50] sm:$0xff] %vm1545_vm11, %v3584_v22  ;;  %v8508_v22 = vld [vmem:[#allocation108_spill] sm:$0xff] }
 0xef0   : > { %v7833_v54 = vpop.xlane.xlu1 %3775 }
 0xef1   : > { %v7838_v35 = vmul.f32 %v4543_v62, %v7833_v54  ;;  %vm3799_vm9 = vcmp.gt.f32.partialorder %v7833_v54, 0.0 }
 0xef4   : > { %v7840_v26 = vpop.xlane.xlu1 %3779 }
 0xef5   : > { %v7843_v34 = vmul.f32 %v4545_v30, %v7840_v26  ;;  %vm3801_vm14 = vcmp.gt.f32.partialorder %v7840_v26, 0.0 }
 0xef8   : > { %v3715_v49 = vpop.permute.xlu1 %3714 }
 0xef9   : > { %v3719_v24 = vsel %vm1257_vm13, %v3715_v49, 0.0 }
 0xefa   : > { %v3722_v12 = vmax.f32 %v7745_v15, %v3719_v24  ;;  %v8502_v15 = vld [vmem:[#allocation111_spill] sm:$0xff]  ;;  %v3792_v24 = vmul.f32 %v7739_v60, %v8501_v10 }
 0xefb   : > { %3784 = vadd.xlane.f32.xlu0 %v3781_v44 }
 0xefc   : > { %v3725_v48 = vsub.f32 %v8492_v5, %v3722_v12  ;;  %v3717_v57 = vpop.permute.xlu1 %3716 }
 0xefd   : > { %v3720_v21 = vsel %vm1257_vm13, %v3717_v57, 0.0 }
 0xefe   : > { %v3728_v53 = vmul.f32 %v3725_v48, %v8498_v13  ;;  %v3723_v58 = vmax.f32 %v7752_v32, %v3720_v21  ;;  %v3275_v32 = vsel %vm1257_vm13, %v3272_v55, 0.0  ;;  %v8510_v13 = vld [vmem:[#allocation110_spill] sm:$0xff] }
 0xeff   : > { %3788 = vadd.xlane.f32.xlu0 %v3783_v4  ;;  %v3278_v49 = vmax.f32 %v7687_v1, %v3275_v32 }
 0xf00   : > { %3732 = vmax.xlane.f32.xlu1 %v3728_v53  ;;  %v3726_v7 = vsub.f32 %v8501_v10, %v3723_v58  ;;  %v8513_v58 = vld [vmem:[#allocation115_spill] sm:$0xff] }
 0xf01   : > { %v3281_v12 = vsub.f32 %v8397_v28, %v3278_v49 }
 0xf03   : > { %3565 = vadd.xlane.f32.xlu0 %v3562_v14  ;;  %v3284_v53 = vmul.f32 %v3281_v12, %v8510_v13  ;;  %v8511_v14 = vld [vmem:[#allocation113_spill] sm:$0xff] }
 0xf04   : > { %3291 = vmax.xlane.f32.xlu1 %v8500_v50  ;;  %v4563_v50 = vld [vmem:[%s4917_s26 + $0x48] sm:$0xff] }
 0xf07   : > { %3569 = vadd.xlane.f32.xlu0 %v3564_v6 }
 0xf08   : > { %3295 = vmax.xlane.f32.xlu1 %v8502_v15 }
 0xf0b   : > { %3738 = vmax.xlane.f32.xlu0 %v8503_v46 }
 0xf0c   : > { %3795 = vadd.xlane.f32.xlu1 %v3791_v29 }
 0xf0e   : > { %v7861_v11 = vpop.xlane.xlu0 %3287 }
 0xf10   : > { %3964 = vmax.xlane.f32.xlu1 %v8504_v9 }
 0xf12   : > { %v7864_v23 = vpop.xlane.xlu0 %3547 }
 0xf13   : > { %v3583_v41 = vmul.f32 %v4543_v62, %v7864_v23  ;;  %4546 = vrcp.f32 %v7864_v23  ;;  %v3589_v6 = vmul.f32 %v4563_v50, %v7864_v23 }
 0xf14   : > { %3968 = vmax.xlane.f32.xlu1 %v8505_v42  ;;  %4548 = vrcp.f32 %v7830_v31 }
 0xf15   : > { %3586 = vst.msk [vmem:[%s4924_s11 + $0x48] sm:$0xff] %vm1545_vm11, %v3583_v41 }
 0xf16   : > { %v7870_v56 = vpop.xlane.xlu0 %3551 }
 0xf17   : > { %v3585_v61 = vmul.f32 %v4545_v30, %v7870_v56  ;;  %v3790_v30 = vmul.f32 %v7733_v63, %v8499_v36  ;;  %v8509_v63 = vld [vmem:[#allocation114_spill] sm:$0xff]  ;;  %4550 = vrcp.f32 %v7870_v56 }
 0xf19   : > { %3588 = vst.msk [vmem:[%s4924_s11 + $0x58] sm:$0xff] %vm1545_vm11, %v3585_v61  ;;  %vm3571_vm11 = vcmp.gt.f32.partialorder %v7864_v23, 0.0 }
 0xf1a   : > { %v7873_v40 = vpop.xlane.xlu0 %3777 }
 0xf1b   : > { %v7878_v33 = vmul.f32 %v4541_v17, %v7873_v40  ;;  %v3729_v17 = vmul.f32 %v3726_v7, %v8507_v38  ;;  %4552 = vrcp.f32 %v7873_v40  ;;  %vm3800_vm4 = vcmp.gt.f32.partialorder %v7873_v40, 0.0 }
 0xf1c   : > { %4554 = vrcp.f32 %v7833_v54 }
 0xf1d   : > { %v4547_v15 = vpop.eup %4546  ;;  %4556 = vrcp.f32 %v7840_v26 }
 0xf1e   : > { %v3713_v39 = vpop.permute.xlu0 %3712 }
 0xf1f   : > { %v3718_v27 = vsel %vm1257_vm13, %v3713_v39, 0.0  ;;  %v8512_v39 = vld [vmem:[#allocation103_spill] sm:$0xff] }
 0xf20   : > { %v3721_v47 = vmax.f32 %v7777_v3, %v3718_v27 }
 0xf22   : > { %v3724_v16 = vsub.f32 %v8499_v36, %v3721_v47 }
 0xf24   : > { %v3727_v45 = vmul.f32 %v3724_v16, %v8506_v51  ;;  %v4549_v16 = vpop.eup %4548 }
 0xf26   : > { %3730 = vmax.xlane.f32.xlu0 %v3727_v45  ;;  %v4565_v45 = vld [vmem:[%s4917_s26 + $0x58] sm:$0xff] }
 0xf27   : > { %v3591_v38 = vmul.f32 %v4565_v45, %v7870_v56 }
 0xf2a   : > { %3734 = vmax.xlane.f32.xlu0 %v3729_v17  ;;  %v4551_v17 = vpop.eup %4550 }
 0xf2b   : > { %v4553_v49 = vpop.eup %4552 }
 0xf2d   : > { %v3559_v62 = vpop.xlane.xlu1 %3558 }
 0xf2e   : > { %3293 = vmax.xlane.f32.xlu0 %v8508_v22 }
 0xf31   : > { %v3943_v3 = vpop.permute.xlu1 %3942 }
 0xf32   : > { %3793 = vadd.xlane.f32.xlu0 %v3790_v30  ;;  %v3947_v44 = vsel %vm1257_vm13, %v3943_v3, 0.0 }
 0xf33   : > { %v3950_v48 = vmax.f32 %v7785_v18, %v3947_v44 }
 0xf35   : > { %v3953_v4 = vsub.f32 %v8492_v5, %v3950_v48  ;;  %v3945_v55 = vpop.permute.xlu1 %3944  ;;  %v7912_v5 = vsel %vm3571_vm11, %v4547_v15, 0.0  ;;  %v3819_v15 = vmul.f32 %v4565_v45, %v7840_v26 }
 0xf36   : > { %3797 = vadd.xlane.f32.xlu0 %v3792_v24  ;;  %v3948_v29 = vsel %vm1257_vm13, %v3945_v55, 0.0 }
 0xf37   : > { %v3956_v1 = vmul.f32 %v3953_v4, %v8511_v14  ;;  %v3951_v42 = vmax.f32 %v7792_v19, %v3948_v29  ;;  %v3581_v19 = vsel %vm3572_vm15, %v4549_v16, 0.0  ;;  %v3817_v4 = vmul.f32 %v4563_v50, %v7833_v54 }
 0xf39   : > { %v3954_v21 = vsub.f32 %v8501_v10, %v3951_v42  ;;  %v4564_v10 = vld [vmem:[%s4917_s26 + $0x50] sm:$0xff]  ;;  %s4334_s26 = smul.u32 12, %s4694_s20 }
 0xf3a   : > { %3966 = vmax.xlane.f32.xlu0 %v8509_v63  ;;  %v3590_v7 = vmul.f32 %v4564_v10, %v7830_v31  ;;  %v3818_v32 = vmul.f32 %v4564_v10, %v7873_v40  ;;  %v4555_v63 = vpop.eup %4554 }
 0xf3b   : > { %v3957_v59 = vmul.f32 %v3954_v21, %v8513_v58  ;;  %v4135_v21 = vadd.f32 -1.0, %v7813_v52 }
 0xf3c   : > { %v3593_v51 = vadd.f32 %v3590_v7, %v3559_v62  ;;  %v7947_v62 = vsel %vm3800_vm4, %v4553_v49, 0.0 }
 0xf3e   : > { %3289 = vmax.xlane.f32.xlu0 %v3284_v53  ;;  %v3596_v30 = vmul.f32 %v3593_v51, %v3581_v19 }
 0xf42   : > { %3960 = vmax.xlane.f32.xlu0 %v3956_v1  ;;  %v7957_v1 = vsel %vm3799_vm9, %v4555_v63, 0.0 }
 0xf4f   : > { %v3557_v60 = vpop.xlane.xlu0 %3556 }
 0xf50   : > { %v3592_v28 = vadd.f32 %v3589_v6, %v3557_v60  ;;  %v4557_v60 = vpop.eup %4556 }
 0xf52   : > { %v3595_v46 = vmul.f32 %v3592_v28, %v7912_v5 }
 0xf53   : > { %v3561_v18 = vpop.xlane.xlu0 %3560 }
 0xf54   : > { %v3594_v22 = vadd.f32 %v3591_v38, %v3561_v18  ;;  %v7965_v18 = vsel %vm3801_vm14, %v4557_v60, 0.0 }
 0xf57   : > { %v3941_v9 = vpop.permute.xlu0 %3940 }
 0xf58   : > { %v3946_v41 = vsel %vm1257_vm13, %v3941_v9, 0.0  ;;  %3601 = vrot.lane.b32.xlu0 %v3595_v46, %s4774_s16  ;;  %vm3573_vm13 = vcmp.gt.f32.partialorder %v7870_v56, 0.0 }
 0xf59   : > { %v3949_v61 = vmax.f32 %v7805_v0, %v3946_v41  ;;  %v3582_v3 = vsel %vm3573_vm13, %v4551_v17, 0.0 }
 0xf5a   : > { %v3597_v24 = vmul.f32 %v3594_v22, %v3582_v3  ;;  %v4134_v22 = vadd.f32 -1.0, %v7816_v2 }
 0xf5b   : > { %v3952_v57 = vsub.f32 %v8499_v36, %v3949_v61 }
 0xf5d   : > { %v3955_v27 = vmul.f32 %v3952_v57, %v8512_v39 }
 0xf5f   : > { %3958 = vmax.xlane.f32.xlu1 %v3955_v27 }
 0xf63   : > { %3962 = vmax.xlane.f32.xlu1 %v3957_v59  ;;  %v7975_v59 = vadd.f32 -1.0, %v7824_v43 }
 0xf66   : > { %v3787_v47 = vpop.xlane.xlu1 %3786 }
 0xf67   : > { %v3821_v44 = vadd.f32 %v3818_v32, %v3787_v47 }
 0xf69   : > { %v3824_v12 = vmul.f32 %v3821_v44, %v7947_v62 }
 0xf6a   : > { %v3568_v0 = vpop.xlane.xlu1 %3567 }
 0xf6b   : > { %v7931_v36 = vmul.f32 %v3581_v19, %v3568_v0 }
 0xf6e   : > { %v3737_v48 = vpop.xlane.xlu1 %3736 }
 0xf72   : > { %v3741_v53 = vpop.xlane.xlu1 %3740 }
 0xf73   : > { %v3744_v16 = vsub.f32 %v7975_v59, %v3741_v53 }
 0xf74   : > { %3603 = vrot.lane.b32.xlu1 %v3596_v30, %s4774_s16  ;;  %v3742_v30 = vsub.f32 %v4134_v22, %v3737_v48 }
 0xf78   : > { %3605 = vrot.lane.b32.xlu1 %v3597_v24, %s4774_s16 }
 0xf7c   : > { %3831 = vrot.lane.b32.xlu1 %v3824_v12, %s4774_s16  ;;  %v3617_v12 = vsel %vm3572_vm15, %v7931_v36, -1.0 }
 0xf88   : > { %v3785_v13 = vpop.xlane.xlu0 %3784 }
 0xf89   : > { %v3820_v14 = vadd.f32 %v3817_v4, %v3785_v13 }
 0xf8b   : > { %v3823_v6 = vmul.f32 %v3820_v14, %v7957_v1 }
 0xf8c   : > { %v3789_v28 = vpop.xlane.xlu0 %3788 }
 0xf8d   : > { %v3822_v55 = vadd.f32 %v3819_v15, %v3789_v28  ;;  %3829 = vrot.lane.b32.xlu0 %v3823_v6, %s4774_s16  ;;  %v3733_v50 = vpop.xlane.xlu1 %3732 }
 0xf8f   : > { %v3825_v29 = vmul.f32 %v3822_v55, %v7965_v18 }
 0xf90   : > { %v3566_v46 = vpop.xlane.xlu0 %3565 }
 0xf91   : > { %3833 = vrot.lane.b32.xlu0 %v3825_v29, %s4774_s16  ;;  %v3292_v9 = vpop.xlane.xlu1 %3291  ;;  %s4335_s16 = smul.u32 72, %s4698_s21  ;;  %s3995_s21 = sshll.u32 %s4924_s11, 4  ;;  %s8044_s21 = int_to_ptr.vmem [resolvable:$true] %s3995_s21 }
 0xf92   : > { %v3297_v41 = vsub.f32 %v7648_v20, %v3292_v9  ;;  %s4614_s25 = scalar_lea.vmem %s8044_s21, 1536  ;;  %p4621_p3 = scmp.lt.s32.totalorder %s8044_s21, %s4619_s29 }
 0xf93   : > { %s3992_s20 = sadd.s32 %s4335_s16, %s4334_s26  ;;  %p4615_p13 = scmp.ne.s32.totalorder %s8044_s21, %s4614_s25 }
 0xf94   : > { %v3300_v42 = vmax.f32 %v7827_v8, %v3297_v41  ;;  %v3570_v61 = vpop.xlane.xlu0 %3569  ;;  %s4137_s0 = sshll.u32 %s3992_s20, 7  ;;  %p4622_p4 = scmp.lt.s32.totalorder %s4620_s9, %s4614_s25 }
 0xf95   : > { %v3615_v57 = vmul.f32 %v3582_v3, %v3570_v61  ;;  %v3296_v43 = vpop.xlane.xlu1 %3295  ;;  %s8053_s15 = scalar_lea.hbm %s8118_s7, %s4137_s0  ;;  %p4616_p1 = pnand %p4615_p13, %p4885_p9 }
 0xf96   : > { %3303 = vst.msk [vmem:[%s4924_s11 + $0x30] sm:$0xff] %vm1956_vm12, %v3300_v42  ;;  %v3299_v45 = vsub.f32 %v7653_v25, %v3296_v43  ;;  %p4623_p5 = por %p4622_p4, %p4621_p3 }
 0xf97   : > { %v3618_v48 = vsel %vm3573_vm13, %v3615_v57, -1.0  ;;  %p4617_p2 = pneg %p4616_p1 }
 0xf98   : > { %v3739_v39 = vpop.xlane.xlu0 %3738 }
 0xf99   : > { %v3743_v27 = vsub.f32 %v4135_v21, %v3739_v39  ;;  %v3796_v25 = vpop.xlane.xlu1 %3795  ;;  %p4624_p6 = pnand %p4623_p5, %p4617_p2 }
 0xf9a   : > { %v3842_v63 = vmul.f32 %v7947_v62, %v3796_v25 }
 0xf9b   : > { %v3746_v58 = vmax.f32 %v3733_v50, %v3743_v27 }
 0xf9c   : > { %v3845_v36 = vsel %vm3800_vm4, %v3842_v63, -1.0 }
 0xf9d   : > { %v3965_v2 = vpop.xlane.xlu1 %3964 }
 0xf9e   : > { %v3970_v4 = vsub.f32 %v4134_v22, %v3965_v2 }
 0xfa1   : > { %v3969_v23 = vpop.xlane.xlu1 %3968 }
 0xfa2   : > { %v3972_v14 = vsub.f32 %v7975_v59, %v3969_v23 }
 0xfb3   : > { %v3731_v47 = vpop.xlane.xlu0 %3730 }
 0xfb4   : > { %v3745_v49 = vmax.f32 %v3731_v47, %v3742_v30 }
 0xfb7   : > { %v3735_v20 = vpop.xlane.xlu0 %3734 }
 0xfb8   : > { %v3747_v19 = vmax.f32 %v3735_v20, %v3744_v16 }
 0xfbb   : > { %v3294_v8 = vpop.xlane.xlu0 %3293 }
 0xfbc   : > { %v3298_v0 = vsub.f32 %v7692_v37, %v3294_v8 }
 0xfbe   : > { %v3301_v10 = vmax.f32 %v7861_v11, %v3298_v0  ;;  %v3613_v11 = vmul.f32 %v7912_v5, %v3566_v46 }
 0xfbf   : > { %v3794_v52 = vpop.xlane.xlu0 %3793 }
 0xfc0   : > { %3304 = vst.msk [vmem:[%s4924_s11 + $0x38] sm:$0xff] %vm1956_vm12, %v3301_v10  ;;  %v3616_v3 = vsel %vm3571_vm11, %v3613_v11, -1.0 }
 0xfc3   : > { %v3798_v7 = vpop.xlane.xlu0 %3797 }
 0xfc7   : > { %v3967_v51 = vpop.xlane.xlu0 %3966 }
 0xfc8   : > { %v3971_v31 = vsub.f32 %v4135_v21, %v3967_v51 }
 0xfcb   : > { %v3290_v38 = vpop.xlane.xlu0 %3289 }
 0xfcc   : > { %v3302_v17 = vmax.f32 %v3290_v38, %v3299_v45 }
 0xfce   : > { %3305 = vst.msk [vmem:[%s4924_s11 + $0x40] sm:$0xff] %vm1956_vm12, %v3302_v17 }
 0xfcf   : > { %v3961_v37 = vpop.xlane.xlu0 %3960 }
 0xfd0   : > { %v3974_v62 = vmax.f32 %v3961_v37, %v3971_v31 }
 0xfd3   : > { %v3602_v32 = vpop.permute.xlu0 %3601 }
 0xfd4   : > { %3610 = vst.msk [vmem:[%s4924_s11 + $0x48] sm:$0xff] %vm1570_vm7, %v3602_v32 }
 0xfd5   : > { %3619 = vst.msk [vmem:[%s4924_s11 + $0x48] sm:$0xff] %vm1580_vm8, %v3616_v3 }
 0xfd6   : > { %3748 = vst.msk [vmem:[%s4924_s11 + $0x48] sm:$0xff] %vm1724_vm2, %v3745_v49 }
 0xfd7   : > { %3814 = vst.msk [vmem:[%s4924_s11 + $0x48] sm:$0xff] %vm1791_vm3, %v7838_v35 }
 0xfec   : > { %v3959_v5 = vpop.xlane.xlu1 %3958 }
 0xfed   : > { %v3973_v40 = vmax.f32 %v3959_v5, %v3970_v4 }
 0xff0   : > { %v3963_v24 = vpop.xlane.xlu1 %3962 }
 0xff1   : > { %v3975_v60 = vmax.f32 %v3963_v24, %v3972_v14 }
 0xff4   : > { %v3604_v44 = vpop.permute.xlu1 %3603 }
 0xff5   : > { %3611 = vst.msk [vmem:[%s4924_s11 + $0x50] sm:$0xff] %vm1570_vm7, %v3604_v44 }
 0xff6   : > { %3620 = vst.msk [vmem:[%s4924_s11 + $0x50] sm:$0xff] %vm1580_vm8, %v3617_v12 }
 0xff7   : > { %3749 = vst.msk [vmem:[%s4924_s11 + $0x50] sm:$0xff] %vm1724_vm2, %v3746_v58 }
 0xff8   : > { %v3606_v35 = vpop.permute.xlu1 %3605  ;;  %3815 = vst.msk [vmem:[%s4924_s11 + $0x50] sm:$0xff] %vm1791_vm3, %v7878_v33  ;;  %v3841_v33 = vmul.f32 %v7957_v1, %v3794_v52 }
 0xff9   : > { %3612 = vst.msk [vmem:[%s4924_s11 + $0x58] sm:$0xff] %vm1570_vm7, %v3606_v35 }
 0xffa   : > { %3621 = vst.msk [vmem:[%s4924_s11 + $0x58] sm:$0xff] %vm1580_vm8, %v3618_v48  ;;  %v3844_v53 = vsel %vm3799_vm9, %v3841_v33, -1.0 }
 0xffb   : > { %3750 = vst.msk [vmem:[%s4924_s11 + $0x58] sm:$0xff] %vm1724_vm2, %v3747_v19 }
 0xffc   : > { %v3832_v56 = vpop.permute.xlu1 %3831  ;;  %3816 = vst.msk [vmem:[%s4924_s11 + $0x58] sm:$0xff] %vm1791_vm3, %v7843_v34  ;;  %v3843_v34 = vmul.f32 %v7965_v18, %v3798_v7 }
 0xffd   : > { %3839 = vst.msk [vmem:[%s4924_s11 + $0x50] sm:$0xff] %vm1816_vm6, %v3832_v56 }
 0xffe   : > { %3848 = vst.msk [vmem:[%s4924_s11 + $0x50] sm:$0xff] %vm1826_vm5, %v3845_v36  ;;  %v3846_v54 = vsel %vm3801_vm14, %v3843_v34, -1.0 }
 0xfff   : > { %3977 = vst.msk [vmem:[%s4924_s11 + $0x50] sm:$0xff] %vm1956_vm12, %v3974_v62  ;;  %v3830_v13 = vpop.permute.xlu0 %3829 }
0x1000   : > { %3838 = vst.msk [vmem:[%s4924_s11 + $0x48] sm:$0xff] %vm1816_vm6, %v3830_v13 }
0x1001   : > { %3847 = vst.msk [vmem:[%s4924_s11 + $0x48] sm:$0xff] %vm1826_vm5, %v3844_v53 }
0x1002   : > { %3976 = vst.msk [vmem:[%s4924_s11 + $0x48] sm:$0xff] %vm1956_vm12, %v3973_v40 }
0x1003   : > { %v3834_v1 = vpop.permute.xlu0 %3833 }
0x1004   : > { %3840 = vst.msk [vmem:[%s4924_s11 + $0x58] sm:$0xff] %vm1816_vm6, %v3834_v1 }
0x1005   : > { %3849 = vst.msk [vmem:[%s4924_s11 + $0x58] sm:$0xff] %vm1826_vm5, %v3846_v54 }
0x1006   : > { %3978 = vst.msk [vmem:[%s4924_s11 + $0x58] sm:$0xff] %vm1956_vm12, %v3975_v60 }
0x1007   : > { %4627 = shalt.err (!%p4624_p6)
}
0x1008   : > { %s4628_s11 = scalar_lea.hbm %s8053_s15, 1536  ;;  %s4632_s20 = scalar_lea.hbm %s8118_s7, 18432 }
0x1009   : > { %p4629_p7 = scmp.ne.s32.totalorder %s8053_s15, %s4628_s11  ;;  %p4633_p11 = scmp.lt.u32.totalorder %s8053_s15, %s8118_s7 }
0x100a   : > { %p4634_p12 = scmp.lt.u32.totalorder %s4632_s20, %s4628_s11  ;;  %p4636_p1 = scmp.lt.u32.totalorder %s4628_s11, %s8053_s15 }
0x100b   : > { %p4630_p8 = pnand %p4629_p7, %p4885_p9 }
0x100c   : > { %p4635_p13 = por %p4634_p12, %p4633_p11 }
0x100d   : > { %p4631_p10 = pneg %p4630_p8 }
0x100e   : > { %p4637_p2 = por %p4636_p1, %p4635_p13 }
0x1010   : > { %p4638_p3 = pnand %p4637_p2, %p4631_p10 }
0x1012   : > { %4641 = shalt.err (!%p4638_p3)
}
0x1013   : > { %s4781_s14 = smov 128  }
0x1014   : > { %4336 = dma.vmem_to_hbm [thread:$0]  (%p4885_p9), %s8044_s21, 1536, %s8053_s15, %s8061_s2, %s4781_s14, %s4781_s14, %s4776_s12  }
0x1015 PF: > { %p4342_p4 = scmp.ge.s32.totalorder %s4710_s24, 2  ;;  %s4010_s17 = sand.u32 1, %s4682_s3  }
0x1016   : > { %s4011_s25 = scalar_lea.sflag [#allocation9], %s4010_s17 }
0x1017   : > { %p4339_p5 = pnand %p4342_p4, %p4894_p0 }
0x1019   : > { %4677 = dma.done.wait (!%p4339_p5), %s4011_s25, 1536  }
0x101a   : > { %4679 = vsyncadd (!%p4339_p5), %s4011_s25, 4294965760  ;;  %s38_s24 = sadd.s32 1, %s4710_s24   ;;  %s8515_s3 = smov %s4686_s18 }
0x101b   : > { %p35_p6 = scmp.ge.s32.totalorder %s38_s24, 14   ;;  %s8516_s18 = smov %s4690_s19 }
0x101c   : > { %s8517_s19 = smov %s4903_s10  ;;  %s8518_s20 = smov %s4702_s22 }
0x101d   : > { %s8519_s21 = smov %s4706_s23  ;;  %s8520_s22 = smov %s8523_s27 }
0x101e   : > { %s8521_s23 = smov %s8527_s28  ;;  %37 = sbr.rel (!%p35_p6) target bundleno = 51 (0x33), region = 94 }
0x1025   :  { %4016 = vsyncpa [#allocation9], 1 }
0x1026   :  { %4018 = vsyncpa [#allocation9 + $0x1], 1 }

</bundles_post_ra>
